<compile_context>
chip_gen: v7x
topology: tpu7x:2x2x1
jax: 0.10.0
libtpu: 0.0.40
codegen_flags: <defaults>
</compile_context>

<pallas_src>
import functools

import jax
import jax.numpy as jnp
from jax import lax
from jax.experimental import pallas as pl
from jax.experimental.pallas import tpu as pltpu

HIDDEN_CHANNEL = 128


# ----------------------------------------------------------------------------
# Fused kernel: conv3x3(+ReLU) + fused gamma/beta conv3x3 + IN apply + modulate
# ----------------------------------------------------------------------------
def _spade_kernel(H, W, Cn, Cl, th,
                  x_ref, mtile_ref, stats_ref, w1_ref, b1_ref, w2_ref, b2_ref,
                  o_ref):
    """One (batch, row-tile) grid step; all intermediates stay in VMEM."""
    Ch = HIDDEN_CHANNEL
    C2 = 2 * Cn
    t = pl.program_id(1)
    row0 = t * th                       # first image row of this output tile

    # ---- mlp_shared: 3x3 conv (label -> 128) + ReLU, on the VPU -------------
    # Cl is tiny, so an MXU dot would use <3% of the contraction depth and
    # need a huge (.., 3*128) intermediate; 9*Cl broadcast FMAs avoid both.
    # actv is produced for the th output rows plus a 1-row halo each side
    # (needed by the gamma/beta conv); out-of-image halo rows are zeroed
    # later, post-dot, on narrow data.
    m = mtile_ref[0, 0, :, :, :].astype(jnp.float32)           # (th+4, W+2, Cl)
    w1 = w1_ref[:, :]                                          # (9*Cl, Ch) f32
    acc1 = jnp.zeros((th + 2, W, Ch), jnp.float32)
    for dy in range(3):
        for dx in range(3):
            mt = m[dy:dy + th + 2, dx:dx + W, :]               # (th+2, W, Cl)
            for ci in range(Cl):
                acc1 = acc1 + mt[:, :, ci:ci + 1] * w1[(dy * 3 + dx) * Cl + ci]
    actv = jnp.maximum(acc1 + b1_ref[0, :], 0.0).astype(jnp.bfloat16)

    # ---- mlp_gamma|mlp_beta: ONE bf16 MXU dot, all 9 taps folded into cols --
    tdot = jnp.dot(actv.reshape(((th + 2) * W, Ch)), w2_ref[:, :],
                   preferred_element_type=jnp.float32)         # ((th+2)*W, 9*C2)
    tdot = tdot.reshape((th + 2, W, 9 * C2))

    # Zero contributions from actv rows outside the image (== the conv's zero
    # padding along H).  Only the two halo rows can be invalid, so this only
    # touches 2*W*9*C2 narrow elements, never the 128-wide activations.
    keep_top = jnp.where(row0 > 0, 1.0, 0.0)
    keep_bot = jnp.where(row0 + th < H, 1.0, 0.0)
    tdot = jnp.concatenate([tdot[0:1] * keep_top,
                            tdot[1:th + 1],
                            tdot[th + 1:th + 2] * keep_bot], axis=0)
    # Zero padding along W, applied to the narrow post-dot result.
    zcol = jnp.zeros((th + 2, 1, 9 * C2), jnp.float32)
    tpad = jnp.concatenate([zcol, tdot, zcol], axis=1)         # (th+2, W+2, 9*C2)

    acc2 = jnp.zeros((th, W, C2), jnp.float32)
    for dy in range(3):
        for dx in range(3):
            k9 = dy * 3 + dx
            acc2 = acc2 + tpad[dy:dy + th, dx:dx + W, k9 * C2:(k9 + 1) * C2]
    gb = acc2 + b2_ref[0, :]                                   # (th, W, 2*Cn)
    gamma = gb[:, :, :Cn]
    beta = gb[:, :, Cn:]

    # ---- param-free InstanceNorm apply + SPADE modulation --------------------
    xt = x_ref[0, :, :, :].astype(jnp.float32)                 # (th, W, Cn)
    mean = stats_ref[0, 0, :]
    rstd = stats_ref[0, 1, :]
    normalized = (xt - mean) * rstd
    # TODO(synk): lane-dense (th, W*Cn) output layout for tiny Cn (skipped).
    o_ref[0, :, :, :] = (normalized * (1.0 + gamma) + beta).astype(o_ref.dtype)


def _pick_row_tile(H):
    # Bound the per-tile VMEM working set (v5e scoped default 16 MiB, v7x has
    # only 64 MiB physical) while keeping >1 tile so both v7x TensorCores get
    # work even at B == 1.
    for cand in (16, 8):
        if H % cand == 0 and H > cand:
            return cand
    return H


def spade_fused(x, mtiles, stats, w1s, b1, w2s, b2, *, th):
    """x: (B,H,W,Cn) NHWC.  mtiles: (B, n_t, th+4, W+2, Cl) overlapping windows
    of the resized + zero-padded label map.  stats: (B, 2, Cn) = [mean, rstd].

    w1s: (9*Cl, Ch) f32      b1: (1, Ch) f32
    w2s: (Ch, 9*2*Cn) bf16   b2: (1, 2*Cn) f32   (gamma|beta fused along Cout)
    """
    B, H, W, Cn = x.shape
    n_t = mtiles.shape[1]
    Cl = mtiles.shape[-1]
    Ch = HIDDEN_CHANNEL
    C2 = 2 * Cn

    kernel = functools.partial(_spade_kernel, H, W, Cn, Cl, th)
    return pl.pallas_call(
        kernel,
        out_shape=jax.ShapeDtypeStruct((B, H, W, Cn), x.dtype),
        grid=(B, n_t),
        in_specs=[
            pl.BlockSpec((1, th, W, Cn), lambda b, t: (b, t, 0, 0)),
            pl.BlockSpec((1, 1, th + 4, W + 2, Cl), lambda b, t: (b, t, 0, 0, 0)),
            pl.BlockSpec((1, 2, Cn), lambda b, t: (b, 0, 0)),
            pl.BlockSpec((9 * Cl, Ch), lambda b, t: (0, 0)),
            pl.BlockSpec((1, Ch), lambda b, t: (0, 0)),
            pl.BlockSpec((Ch, 9 * C2), lambda b, t: (0, 0)),
            pl.BlockSpec((1, C2), lambda b, t: (0, 0)),
        ],
        out_specs=pl.BlockSpec((1, th, W, Cn), lambda b, t: (b, t, 0, 0)),
        compiler_params=pltpu.CompilerParams(
            dimension_semantics=("parallel", "parallel"),
            vmem_limit_bytes=48 * 1024 * 1024),
    )(x, mtiles, stats, w1s, b1, w2s, b2)


# ----------------------------------------------------------------------------
# Wrapper glue (plain JAX, tiny Cn/Cl-channel tensors only)
# ----------------------------------------------------------------------------
def nearest_resize_nhwc(m, out_h, out_w):
    """Matches F.interpolate(mode='nearest'): src = floor(dst * in / out)."""
    B, Hm, Wm, C = m.shape
    ih = (jnp.arange(out_h) * Hm) // out_h
    iw = (jnp.arange(out_w) * Wm) // out_w
    return m[:, ih][:, :, iw]


def init_spade_params(key, norm_channel, label_channel, hidden_channel=HIDDEN_CHANNEL):
    k = jax.random.split(key, 6)
    s = 0.1
    return {
        "w_shared": s * jax.random.normal(k[0], (3, 3, label_channel, hidden_channel), jnp.float32),
        "b_shared": s * jax.random.normal(k[1], (hidden_channel,), jnp.float32),
        "w_gamma":  s * jax.random.normal(k[2], (3, 3, hidden_channel, norm_channel), jnp.float32),
        "b_gamma":  s * jax.random.normal(k[3], (norm_channel,), jnp.float32),
        "w_beta":   s * jax.random.normal(k[4], (3, 3, hidden_channel, norm_channel), jnp.float32),
        "b_beta":   s * jax.random.normal(k[5], (norm_channel,), jnp.float32),
    }


@jax.jit
def spade_layer(params, x_nchw, modulation_nchw):
    # PyTorch NCHW -> NHWC so channels land on TPU lanes for the convs.
    x = jnp.transpose(x_nchw, (0, 2, 3, 1))
    m = jnp.transpose(modulation_nchw, (0, 2, 3, 1))
    B, H, W, Cn = x.shape
    Cl = m.shape[-1]
    Ch = HIDDEN_CHANNEL
    C2 = 2 * Cn

    th = _pick_row_tile(H)
    n_t = H // th

    # Separate two-pass InstanceNorm statistics (f32) over the small Cn-channel
    # input: keeps the row tiles independent (megacore-parallel) and avoids the
    # E[x^2]-mean^2 cancellation concern.
    xf = x.astype(jnp.float32)
    mean = jnp.mean(xf, axis=(1, 2))                                  # (B, Cn)
    var = jnp.mean(jnp.square(xf - mean[:, None, None, :]), axis=(1, 2))
    rstd = lax.rsqrt(var + 1e-5)
    stats = jnp.stack([mean, rstd], axis=1)                           # (B, 2, Cn)

    # Nearest resize + zero halo (2 rows / 1 col for the fused conv chain),
    # then overlapping per-tile row windows -- only the tiny Cl-channel label
    # map is touched here; the 128-channel activations never leave VMEM.
    m_resized = nearest_resize_nhwc(m, H, W)
    mpad = jnp.pad(m_resized, ((0, 0), (2, 2), (1, 1), (0, 0)))       # (B,H+4,W+2,Cl)
    win = (jnp.arange(n_t) * th)[:, None] + jnp.arange(th + 4)[None, :]
    mtiles = mpad[:, win]                                             # (B,n_t,th+4,W+2,Cl)

    # Weight slabs.
    w1s = params["w_shared"].reshape(9 * Cl, Ch).astype(jnp.float32)  # VPU path: f32
    b1 = params["b_shared"].reshape(1, Ch).astype(jnp.float32)
    w_gb = jnp.concatenate([params["w_gamma"], params["w_beta"]], axis=-1)  # (3,3,Ch,2Cn)
    w2s = jnp.transpose(w_gb, (2, 0, 1, 3)).reshape(Ch, 9 * C2).astype(jnp.bfloat16)
    b2 = jnp.concatenate([params["b_gamma"], params["b_beta"]]).reshape(1, C2).astype(jnp.float32)

    out = spade_fused(x, mtiles, stats, w1s, b1, w2s, b2, th=th)
    return jnp.transpose(out, (0, 3, 1, 2))                           # back to NCHW


# ----------------------------------------------------------------------------
# Pure-JAX reference (correctness check only)
# ----------------------------------------------------------------------------
def spade_layer_ref(params, x_nchw, modulation_nchw):
    x = jnp.transpose(x_nchw, (0, 2, 3, 1))
    m = jnp.transpose(modulation_nchw, (0, 2, 3, 1))
    B, H, W, C = x.shape

    mean = jnp.mean(x, axis=(1, 2), keepdims=True)
    var = jnp.mean((x - mean) ** 2, axis=(1, 2), keepdims=True)
    normalized = (x - mean) / jnp.sqrt(var + 1e-5)

    m_resized = nearest_resize_nhwc(m, H, W)

    def conv(inp, w, b):
        y = lax.conv_general_dilated(
            inp, w, window_strides=(1, 1), padding="SAME",
            dimension_numbers=("NHWC", "HWIO", "NHWC"),
            precision=lax.Precision.HIGHEST)
        return y + b.reshape(1, 1, 1, -1)

    actv = jnp.maximum(conv(m_resized, params["w_shared"], params["b_shared"]), 0.0)
    gamma = conv(actv, params["w_gamma"], params["b_gamma"])
    beta = conv(actv, params["w_beta"], params["b_beta"])
    out = normalized * (1 + gamma) + beta
    return jnp.transpose(out, (0, 3, 1, 2))


# ----------------------------------------------------------------------------
if __name__ == "__main__":
    norm_channel = 4
    label_channel = 3
    B, H, W = 2, 16, 16
    Hm, Wm = 8, 8   # modulation map is smaller -> exercises nearest interpolation

    key = jax.random.PRNGKey(0)
    kx, km, kp = jax.random.split(key, 3)
    x = jax.random.normal(kx, (B, norm_channel, H, W), jnp.float32)              # NCHW
    modulation = jax.random.normal(km, (B, label_channel, Hm, Wm), jnp.float32)  # NCHW
    params = init_spade_params(kp, norm_channel, label_channel)

    out = jax.block_until_ready(spade_layer(params, x, modulation))
    ref = spade_layer_ref(params, x, modulation)

    assert out.shape == (B, norm_channel, H, W)
    # bf16 actv / gamma-beta weight operands (f32 MXU accumulation): ~1e-2-level
    # agreement with the f32 reference is expected.
    assert jnp.allclose(out, ref, rtol=2e-2, atol=2e-2), "mismatch vs pure-JAX reference"

    print("KERNEL_OK")
</pallas_src>

<mosaic_0001>
module attributes {stable_mosaic.version = 11 : i64} {
  func.func @_spade_kernel(%arg0: i32, %arg1: i32, %arg2: memref<1x8x16x4xf32, #tpu.memory_space<vmem>>, %arg3: memref<1x1x12x18x3xf32, #tpu.memory_space<vmem>>, %arg4: memref<1x2x4xf32, #tpu.memory_space<vmem>>, %arg5: memref<27x128xf32, #tpu.memory_space<vmem>>, %arg6: memref<1x128xf32, #tpu.memory_space<vmem>>, %arg7: memref<128x72xbf16, #tpu.memory_space<vmem>>, %arg8: memref<1x8xf32, #tpu.memory_space<vmem>>, %arg9: memref<1x8x16x4xf32, #tpu.memory_space<vmem>>) attributes {dimension_semantics = [#tpu.dimension_semantics<parallel>, #tpu.dimension_semantics<parallel>], iteration_bounds = array<i64: 2, 2>, scalar_prefetch = 0 : i64, scratch_operands = 0 : i64, tpu.core_type = #tpu.core_type<tc>, window_params = [{transform_indices = @transform_0, window_bounds = array<i64: 1, 8, 16, 4>}, {transform_indices = @transform_1, window_bounds = array<i64: 1, 1, 12, 18, 3>}, {transform_indices = @transform_2, window_bounds = array<i64: 1, 2, 4>}, {pipeline_mode = #tpu.pipeline_mode<synchronous>, transform_indices = @transform_3, window_bounds = array<i64: 27, 128>}, {pipeline_mode = #tpu.pipeline_mode<synchronous>, transform_indices = @transform_4, window_bounds = array<i64: 1, 128>}, {pipeline_mode = #tpu.pipeline_mode<synchronous>, transform_indices = @transform_5, window_bounds = array<i64: 128, 72>}, {pipeline_mode = #tpu.pipeline_mode<synchronous>, transform_indices = @transform_6, window_bounds = array<i64: 1, 8>}, {transform_indices = @transform_7, window_bounds = array<i64: 1, 8, 16, 4>}]} {
    %c8_i32 = arith.constant 8 : i32
    %0 = arith.muli %arg1, %c8_i32 : i32
    %c0 = arith.constant 0 : index
    %c0_0 = arith.constant 0 : index
    %c0_1 = arith.constant 0 : index
    %c0_2 = arith.constant 0 : index
    %c0_3 = arith.constant 0 : index
    %1 = vector.load %arg3[%c0, %c0_0, %c0_1, %c0_2, %c0_3] : memref<1x1x12x18x3xf32, #tpu.memory_space<vmem>>, vector<1x1x12x18x3xf32>
    %2 = vector.shape_cast %1 : vector<1x1x12x18x3xf32> to vector<12x18x3xf32>
    %c0_4 = arith.constant 0 : index
    %c0_5 = arith.constant 0 : index
    %3 = vector.load %arg5[%c0_4, %c0_5] : memref<27x128xf32, #tpu.memory_space<vmem>>, vector<27x128xf32>
    %cst = arith.constant 0.000000e+00 : f32
    %4 = vector.broadcast %cst : f32 to vector<10x16x128xf32>
    %5 = vector.extract_strided_slice %2 {offsets = [0, 0, 0], sizes = [10, 16, 3], strides = [1, 1, 1]} : vector<12x18x3xf32> to vector<10x16x3xf32>
    %6 = vector.extract_strided_slice %5 {offsets = [0, 0, 0], sizes = [10, 16, 1], strides = [1, 1, 1]} : vector<10x16x3xf32> to vector<10x16x1xf32>
    %7 = vector.extract_strided_slice %3 {offsets = [0, 0], sizes = [1, 128], strides = [1, 1]} : vector<27x128xf32> to vector<1x128xf32>
    %8 = vector.shape_cast %7 : vector<1x128xf32> to vector<128xf32>
    %9 = vector.shape_cast %8 : vector<128xf32> to vector<1x1x128xf32>
    %10 = vector.broadcast %6 : vector<10x16x1xf32> to vector<10x16x128xf32>
    %11 = vector.broadcast %9 : vector<1x1x128xf32> to vector<10x16x128xf32>
    %12 = arith.mulf %10, %11 : vector<10x16x128xf32>
    %13 = arith.addf %4, %12 : vector<10x16x128xf32>
    %14 = vector.extract_strided_slice %5 {offsets = [0, 0, 1], sizes = [10, 16, 1], strides = [1, 1, 1]} : vector<10x16x3xf32> to vector<10x16x1xf32>
    %15 = vector.extract_strided_slice %3 {offsets = [1, 0], sizes = [1, 128], strides = [1, 1]} : vector<27x128xf32> to vector<1x128xf32>
    %16 = vector.shape_cast %15 : vector<1x128xf32> to vector<128xf32>
    %17 = vector.shape_cast %16 : vector<128xf32> to vector<1x1x128xf32>
    %18 = vector.broadcast %14 : vector<10x16x1xf32> to vector<10x16x128xf32>
    %19 = vector.broadcast %17 : vector<1x1x128xf32> to vector<10x16x128xf32>
    %20 = arith.mulf %18, %19 : vector<10x16x128xf32>
    %21 = arith.addf %13, %20 : vector<10x16x128xf32>
    %22 = vector.extract_strided_slice %5 {offsets = [0, 0, 2], sizes = [10, 16, 1], strides = [1, 1, 1]} : vector<10x16x3xf32> to vector<10x16x1xf32>
    %23 = vector.extract_strided_slice %3 {offsets = [2, 0], sizes = [1, 128], strides = [1, 1]} : vector<27x128xf32> to vector<1x128xf32>
    %24 = vector.shape_cast %23 : vector<1x128xf32> to vector<128xf32>
    %25 = vector.shape_cast %24 : vector<128xf32> to vector<1x1x128xf32>
    %26 = vector.broadcast %22 : vector<10x16x1xf32> to vector<10x16x128xf32>
    %27 = vector.broadcast %25 : vector<1x1x128xf32> to vector<10x16x128xf32>
    %28 = arith.mulf %26, %27 : vector<10x16x128xf32>
    %29 = arith.addf %21, %28 : vector<10x16x128xf32>
    %30 = vector.extract_strided_slice %2 {offsets = [0, 1, 0], sizes = [10, 16, 3], strides = [1, 1, 1]} : vector<12x18x3xf32> to vector<10x16x3xf32>
    %31 = vector.extract_strided_slice %30 {offsets = [0, 0, 0], sizes = [10, 16, 1], strides = [1, 1, 1]} : vector<10x16x3xf32> to vector<10x16x1xf32>
    %32 = vector.extract_strided_slice %3 {offsets = [3, 0], sizes = [1, 128], strides = [1, 1]} : vector<27x128xf32> to vector<1x128xf32>
    %33 = vector.shape_cast %32 : vector<1x128xf32> to vector<128xf32>
    %34 = vector.shape_cast %33 : vector<128xf32> to vector<1x1x128xf32>
    %35 = vector.broadcast %31 : vector<10x16x1xf32> to vector<10x16x128xf32>
    %36 = vector.broadcast %34 : vector<1x1x128xf32> to vector<10x16x128xf32>
    %37 = arith.mulf %35, %36 : vector<10x16x128xf32>
    %38 = arith.addf %29, %37 : vector<10x16x128xf32>
    %39 = vector.extract_strided_slice %30 {offsets = [0, 0, 1], sizes = [10, 16, 1], strides = [1, 1, 1]} : vector<10x16x3xf32> to vector<10x16x1xf32>
    %40 = vector.extract_strided_slice %3 {offsets = [4, 0], sizes = [1, 128], strides = [1, 1]} : vector<27x128xf32> to vector<1x128xf32>
    %41 = vector.shape_cast %40 : vector<1x128xf32> to vector<128xf32>
    %42 = vector.shape_cast %41 : vector<128xf32> to vector<1x1x128xf32>
    %43 = vector.broadcast %39 : vector<10x16x1xf32> to vector<10x16x128xf32>
    %44 = vector.broadcast %42 : vector<1x1x128xf32> to vector<10x16x128xf32>
    %45 = arith.mulf %43, %44 : vector<10x16x128xf32>
    %46 = arith.addf %38, %45 : vector<10x16x128xf32>
    %47 = vector.extract_strided_slice %30 {offsets = [0, 0, 2], sizes = [10, 16, 1], strides = [1, 1, 1]} : vector<10x16x3xf32> to vector<10x16x1xf32>
    %48 = vector.extract_strided_slice %3 {offsets = [5, 0], sizes = [1, 128], strides = [1, 1]} : vector<27x128xf32> to vector<1x128xf32>
    %49 = vector.shape_cast %48 : vector<1x128xf32> to vector<128xf32>
    %50 = vector.shape_cast %49 : vector<128xf32> to vector<1x1x128xf32>
    %51 = vector.broadcast %47 : vector<10x16x1xf32> to vector<10x16x128xf32>
    %52 = vector.broadcast %50 : vector<1x1x128xf32> to vector<10x16x128xf32>
    %53 = arith.mulf %51, %52 : vector<10x16x128xf32>
    %54 = arith.addf %46, %53 : vector<10x16x128xf32>
    %55 = vector.extract_strided_slice %2 {offsets = [0, 2, 0], sizes = [10, 16, 3], strides = [1, 1, 1]} : vector<12x18x3xf32> to vector<10x16x3xf32>
    %56 = vector.extract_strided_slice %55 {offsets = [0, 0, 0], sizes = [10, 16, 1], strides = [1, 1, 1]} : vector<10x16x3xf32> to vector<10x16x1xf32>
    %57 = vector.extract_strided_slice %3 {offsets = [6, 0], sizes = [1, 128], strides = [1, 1]} : vector<27x128xf32> to vector<1x128xf32>
    %58 = vector.shape_cast %57 : vector<1x128xf32> to vector<128xf32>
    %59 = vector.shape_cast %58 : vector<128xf32> to vector<1x1x128xf32>
    %60 = vector.broadcast %56 : vector<10x16x1xf32> to vector<10x16x128xf32>
    %61 = vector.broadcast %59 : vector<1x1x128xf32> to vector<10x16x128xf32>
    %62 = arith.mulf %60, %61 : vector<10x16x128xf32>
    %63 = arith.addf %54, %62 : vector<10x16x128xf32>
    %64 = vector.extract_strided_slice %55 {offsets = [0, 0, 1], sizes = [10, 16, 1], strides = [1, 1, 1]} : vector<10x16x3xf32> to vector<10x16x1xf32>
    %65 = vector.extract_strided_slice %3 {offsets = [7, 0], sizes = [1, 128], strides = [1, 1]} : vector<27x128xf32> to vector<1x128xf32>
    %66 = vector.shape_cast %65 : vector<1x128xf32> to vector<128xf32>
    %67 = vector.shape_cast %66 : vector<128xf32> to vector<1x1x128xf32>
    %68 = vector.broadcast %64 : vector<10x16x1xf32> to vector<10x16x128xf32>
    %69 = vector.broadcast %67 : vector<1x1x128xf32> to vector<10x16x128xf32>
    %70 = arith.mulf %68, %69 : vector<10x16x128xf32>
    %71 = arith.addf %63, %70 : vector<10x16x128xf32>
    %72 = vector.extract_strided_slice %55 {offsets = [0, 0, 2], sizes = [10, 16, 1], strides = [1, 1, 1]} : vector<10x16x3xf32> to vector<10x16x1xf32>
    %73 = vector.extract_strided_slice %3 {offsets = [8, 0], sizes = [1, 128], strides = [1, 1]} : vector<27x128xf32> to vector<1x128xf32>
    %74 = vector.shape_cast %73 : vector<1x128xf32> to vector<128xf32>
    %75 = vector.shape_cast %74 : vector<128xf32> to vector<1x1x128xf32>
    %76 = vector.broadcast %72 : vector<10x16x1xf32> to vector<10x16x128xf32>
    %77 = vector.broadcast %75 : vector<1x1x128xf32> to vector<10x16x128xf32>
    %78 = arith.mulf %76, %77 : vector<10x16x128xf32>
    %79 = arith.addf %71, %78 : vector<10x16x128xf32>
    %80 = vector.extract_strided_slice %2 {offsets = [1, 0, 0], sizes = [10, 16, 3], strides = [1, 1, 1]} : vector<12x18x3xf32> to vector<10x16x3xf32>
    %81 = vector.extract_strided_slice %80 {offsets = [0, 0, 0], sizes = [10, 16, 1], strides = [1, 1, 1]} : vector<10x16x3xf32> to vector<10x16x1xf32>
    %82 = vector.extract_strided_slice %3 {offsets = [9, 0], sizes = [1, 128], strides = [1, 1]} : vector<27x128xf32> to vector<1x128xf32>
    %83 = vector.shape_cast %82 : vector<1x128xf32> to vector<128xf32>
    %84 = vector.shape_cast %83 : vector<128xf32> to vector<1x1x128xf32>
    %85 = vector.broadcast %81 : vector<10x16x1xf32> to vector<10x16x128xf32>
    %86 = vector.broadcast %84 : vector<1x1x128xf32> to vector<10x16x128xf32>
    %87 = arith.mulf %85, %86 : vector<10x16x128xf32>
    %88 = arith.addf %79, %87 : vector<10x16x128xf32>
    %89 = vector.extract_strided_slice %80 {offsets = [0, 0, 1], sizes = [10, 16, 1], strides = [1, 1, 1]} : vector<10x16x3xf32> to vector<10x16x1xf32>
    %90 = vector.extract_strided_slice %3 {offsets = [10, 0], sizes = [1, 128], strides = [1, 1]} : vector<27x128xf32> to vector<1x128xf32>
    %91 = vector.shape_cast %90 : vector<1x128xf32> to vector<128xf32>
    %92 = vector.shape_cast %91 : vector<128xf32> to vector<1x1x128xf32>
    %93 = vector.broadcast %89 : vector<10x16x1xf32> to vector<10x16x128xf32>
    %94 = vector.broadcast %92 : vector<1x1x128xf32> to vector<10x16x128xf32>
    %95 = arith.mulf %93, %94 : vector<10x16x128xf32>
    %96 = arith.addf %88, %95 : vector<10x16x128xf32>
    %97 = vector.extract_strided_slice %80 {offsets = [0, 0, 2], sizes = [10, 16, 1], strides = [1, 1, 1]} : vector<10x16x3xf32> to vector<10x16x1xf32>
    %98 = vector.extract_strided_slice %3 {offsets = [11, 0], sizes = [1, 128], strides = [1, 1]} : vector<27x128xf32> to vector<1x128xf32>
    %99 = vector.shape_cast %98 : vector<1x128xf32> to vector<128xf32>
    %100 = vector.shape_cast %99 : vector<128xf32> to vector<1x1x128xf32>
    %101 = vector.broadcast %97 : vector<10x16x1xf32> to vector<10x16x128xf32>
    %102 = vector.broadcast %100 : vector<1x1x128xf32> to vector<10x16x128xf32>
    %103 = arith.mulf %101, %102 : vector<10x16x128xf32>
    %104 = arith.addf %96, %103 : vector<10x16x128xf32>
    %105 = vector.extract_strided_slice %2 {offsets = [1, 1, 0], sizes = [10, 16, 3], strides = [1, 1, 1]} : vector<12x18x3xf32> to vector<10x16x3xf32>
    %106 = vector.extract_strided_slice %105 {offsets = [0, 0, 0], sizes = [10, 16, 1], strides = [1, 1, 1]} : vector<10x16x3xf32> to vector<10x16x1xf32>
    %107 = vector.extract_strided_slice %3 {offsets = [12, 0], sizes = [1, 128], strides = [1, 1]} : vector<27x128xf32> to vector<1x128xf32>
    %108 = vector.shape_cast %107 : vector<1x128xf32> to vector<128xf32>
    %109 = vector.shape_cast %108 : vector<128xf32> to vector<1x1x128xf32>
    %110 = vector.broadcast %106 : vector<10x16x1xf32> to vector<10x16x128xf32>
    %111 = vector.broadcast %109 : vector<1x1x128xf32> to vector<10x16x128xf32>
    %112 = arith.mulf %110, %111 : vector<10x16x128xf32>
    %113 = arith.addf %104, %112 : vector<10x16x128xf32>
    %114 = vector.extract_strided_slice %105 {offsets = [0, 0, 1], sizes = [10, 16, 1], strides = [1, 1, 1]} : vector<10x16x3xf32> to vector<10x16x1xf32>
    %115 = vector.extract_strided_slice %3 {offsets = [13, 0], sizes = [1, 128], strides = [1, 1]} : vector<27x128xf32> to vector<1x128xf32>
    %116 = vector.shape_cast %115 : vector<1x128xf32> to vector<128xf32>
    %117 = vector.shape_cast %116 : vector<128xf32> to vector<1x1x128xf32>
    %118 = vector.broadcast %114 : vector<10x16x1xf32> to vector<10x16x128xf32>
    %119 = vector.broadcast %117 : vector<1x1x128xf32> to vector<10x16x128xf32>
    %120 = arith.mulf %118, %119 : vector<10x16x128xf32>
    %121 = arith.addf %113, %120 : vector<10x16x128xf32>
    %122 = vector.extract_strided_slice %105 {offsets = [0, 0, 2], sizes = [10, 16, 1], strides = [1, 1, 1]} : vector<10x16x3xf32> to vector<10x16x1xf32>
    %123 = vector.extract_strided_slice %3 {offsets = [14, 0], sizes = [1, 128], strides = [1, 1]} : vector<27x128xf32> to vector<1x128xf32>
    %124 = vector.shape_cast %123 : vector<1x128xf32> to vector<128xf32>
    %125 = vector.shape_cast %124 : vector<128xf32> to vector<1x1x128xf32>
    %126 = vector.broadcast %122 : vector<10x16x1xf32> to vector<10x16x128xf32>
    %127 = vector.broadcast %125 : vector<1x1x128xf32> to vector<10x16x128xf32>
    %128 = arith.mulf %126, %127 : vector<10x16x128xf32>
    %129 = arith.addf %121, %128 : vector<10x16x128xf32>
    %130 = vector.extract_strided_slice %2 {offsets = [1, 2, 0], sizes = [10, 16, 3], strides = [1, 1, 1]} : vector<12x18x3xf32> to vector<10x16x3xf32>
    %131 = vector.extract_strided_slice %130 {offsets = [0, 0, 0], sizes = [10, 16, 1], strides = [1, 1, 1]} : vector<10x16x3xf32> to vector<10x16x1xf32>
    %132 = vector.extract_strided_slice %3 {offsets = [15, 0], sizes = [1, 128], strides = [1, 1]} : vector<27x128xf32> to vector<1x128xf32>
    %133 = vector.shape_cast %132 : vector<1x128xf32> to vector<128xf32>
    %134 = vector.shape_cast %133 : vector<128xf32> to vector<1x1x128xf32>
    %135 = vector.broadcast %131 : vector<10x16x1xf32> to vector<10x16x128xf32>
    %136 = vector.broadcast %134 : vector<1x1x128xf32> to vector<10x16x128xf32>
    %137 = arith.mulf %135, %136 : vector<10x16x128xf32>
    %138 = arith.addf %129, %137 : vector<10x16x128xf32>
    %139 = vector.extract_strided_slice %130 {offsets = [0, 0, 1], sizes = [10, 16, 1], strides = [1, 1, 1]} : vector<10x16x3xf32> to vector<10x16x1xf32>
    %140 = vector.extract_strided_slice %3 {offsets = [16, 0], sizes = [1, 128], strides = [1, 1]} : vector<27x128xf32> to vector<1x128xf32>
    %141 = vector.shape_cast %140 : vector<1x128xf32> to vector<128xf32>
    %142 = vector.shape_cast %141 : vector<128xf32> to vector<1x1x128xf32>
    %143 = vector.broadcast %139 : vector<10x16x1xf32> to vector<10x16x128xf32>
    %144 = vector.broadcast %142 : vector<1x1x128xf32> to vector<10x16x128xf32>
    %145 = arith.mulf %143, %144 : vector<10x16x128xf32>
    %146 = arith.addf %138, %145 : vector<10x16x128xf32>
    %147 = vector.extract_strided_slice %130 {offsets = [0, 0, 2], sizes = [10, 16, 1], strides = [1, 1, 1]} : vector<10x16x3xf32> to vector<10x16x1xf32>
    %148 = vector.extract_strided_slice %3 {offsets = [17, 0], sizes = [1, 128], strides = [1, 1]} : vector<27x128xf32> to vector<1x128xf32>
    %149 = vector.shape_cast %148 : vector<1x128xf32> to vector<128xf32>
    %150 = vector.shape_cast %149 : vector<128xf32> to vector<1x1x128xf32>
    %151 = vector.broadcast %147 : vector<10x16x1xf32> to vector<10x16x128xf32>
    %152 = vector.broadcast %150 : vector<1x1x128xf32> to vector<10x16x128xf32>
    %153 = arith.mulf %151, %152 : vector<10x16x128xf32>
    %154 = arith.addf %146, %153 : vector<10x16x128xf32>
    %155 = vector.extract_strided_slice %2 {offsets = [2, 0, 0], sizes = [10, 16, 3], strides = [1, 1, 1]} : vector<12x18x3xf32> to vector<10x16x3xf32>
    %156 = vector.extract_strided_slice %155 {offsets = [0, 0, 0], sizes = [10, 16, 1], strides = [1, 1, 1]} : vector<10x16x3xf32> to vector<10x16x1xf32>
    %157 = vector.extract_strided_slice %3 {offsets = [18, 0], sizes = [1, 128], strides = [1, 1]} : vector<27x128xf32> to vector<1x128xf32>
    %158 = vector.shape_cast %157 : vector<1x128xf32> to vector<128xf32>
    %159 = vector.shape_cast %158 : vector<128xf32> to vector<1x1x128xf32>
    %160 = vector.broadcast %156 : vector<10x16x1xf32> to vector<10x16x128xf32>
    %161 = vector.broadcast %159 : vector<1x1x128xf32> to vector<10x16x128xf32>
    %162 = arith.mulf %160, %161 : vector<10x16x128xf32>
    %163 = arith.addf %154, %162 : vector<10x16x128xf32>
    %164 = vector.extract_strided_slice %155 {offsets = [0, 0, 1], sizes = [10, 16, 1], strides = [1, 1, 1]} : vector<10x16x3xf32> to vector<10x16x1xf32>
    %165 = vector.extract_strided_slice %3 {offsets = [19, 0], sizes = [1, 128], strides = [1, 1]} : vector<27x128xf32> to vector<1x128xf32>
    %166 = vector.shape_cast %165 : vector<1x128xf32> to vector<128xf32>
    %167 = vector.shape_cast %166 : vector<128xf32> to vector<1x1x128xf32>
    %168 = vector.broadcast %164 : vector<10x16x1xf32> to vector<10x16x128xf32>
    %169 = vector.broadcast %167 : vector<1x1x128xf32> to vector<10x16x128xf32>
    %170 = arith.mulf %168, %169 : vector<10x16x128xf32>
    %171 = arith.addf %163, %170 : vector<10x16x128xf32>
    %172 = vector.extract_strided_slice %155 {offsets = [0, 0, 2], sizes = [10, 16, 1], strides = [1, 1, 1]} : vector<10x16x3xf32> to vector<10x16x1xf32>
    %173 = vector.extract_strided_slice %3 {offsets = [20, 0], sizes = [1, 128], strides = [1, 1]} : vector<27x128xf32> to vector<1x128xf32>
    %174 = vector.shape_cast %173 : vector<1x128xf32> to vector<128xf32>
    %175 = vector.shape_cast %174 : vector<128xf32> to vector<1x1x128xf32>
    %176 = vector.broadcast %172 : vector<10x16x1xf32> to vector<10x16x128xf32>
    %177 = vector.broadcast %175 : vector<1x1x128xf32> to vector<10x16x128xf32>
    %178 = arith.mulf %176, %177 : vector<10x16x128xf32>
    %179 = arith.addf %171, %178 : vector<10x16x128xf32>
    %180 = vector.extract_strided_slice %2 {offsets = [2, 1, 0], sizes = [10, 16, 3], strides = [1, 1, 1]} : vector<12x18x3xf32> to vector<10x16x3xf32>
    %181 = vector.extract_strided_slice %180 {offsets = [0, 0, 0], sizes = [10, 16, 1], strides = [1, 1, 1]} : vector<10x16x3xf32> to vector<10x16x1xf32>
    %182 = vector.extract_strided_slice %3 {offsets = [21, 0], sizes = [1, 128], strides = [1, 1]} : vector<27x128xf32> to vector<1x128xf32>
    %183 = vector.shape_cast %182 : vector<1x128xf32> to vector<128xf32>
    %184 = vector.shape_cast %183 : vector<128xf32> to vector<1x1x128xf32>
    %185 = vector.broadcast %181 : vector<10x16x1xf32> to vector<10x16x128xf32>
    %186 = vector.broadcast %184 : vector<1x1x128xf32> to vector<10x16x128xf32>
    %187 = arith.mulf %185, %186 : vector<10x16x128xf32>
    %188 = arith.addf %179, %187 : vector<10x16x128xf32>
    %189 = vector.extract_strided_slice %180 {offsets = [0, 0, 1], sizes = [10, 16, 1], strides = [1, 1, 1]} : vector<10x16x3xf32> to vector<10x16x1xf32>
    %190 = vector.extract_strided_slice %3 {offsets = [22, 0], sizes = [1, 128], strides = [1, 1]} : vector<27x128xf32> to vector<1x128xf32>
    %191 = vector.shape_cast %190 : vector<1x128xf32> to vector<128xf32>
    %192 = vector.shape_cast %191 : vector<128xf32> to vector<1x1x128xf32>
    %193 = vector.broadcast %189 : vector<10x16x1xf32> to vector<10x16x128xf32>
    %194 = vector.broadcast %192 : vector<1x1x128xf32> to vector<10x16x128xf32>
    %195 = arith.mulf %193, %194 : vector<10x16x128xf32>
    %196 = arith.addf %188, %195 : vector<10x16x128xf32>
    %197 = vector.extract_strided_slice %180 {offsets = [0, 0, 2], sizes = [10, 16, 1], strides = [1, 1, 1]} : vector<10x16x3xf32> to vector<10x16x1xf32>
    %198 = vector.extract_strided_slice %3 {offsets = [23, 0], sizes = [1, 128], strides = [1, 1]} : vector<27x128xf32> to vector<1x128xf32>
    %199 = vector.shape_cast %198 : vector<1x128xf32> to vector<128xf32>
    %200 = vector.shape_cast %199 : vector<128xf32> to vector<1x1x128xf32>
    %201 = vector.broadcast %197 : vector<10x16x1xf32> to vector<10x16x128xf32>
    %202 = vector.broadcast %200 : vector<1x1x128xf32> to vector<10x16x128xf32>
    %203 = arith.mulf %201, %202 : vector<10x16x128xf32>
    %204 = arith.addf %196, %203 : vector<10x16x128xf32>
    %205 = vector.extract_strided_slice %2 {offsets = [2, 2, 0], sizes = [10, 16, 3], strides = [1, 1, 1]} : vector<12x18x3xf32> to vector<10x16x3xf32>
    %206 = vector.extract_strided_slice %205 {offsets = [0, 0, 0], sizes = [10, 16, 1], strides = [1, 1, 1]} : vector<10x16x3xf32> to vector<10x16x1xf32>
    %207 = vector.extract_strided_slice %3 {offsets = [24, 0], sizes = [1, 128], strides = [1, 1]} : vector<27x128xf32> to vector<1x128xf32>
    %208 = vector.shape_cast %207 : vector<1x128xf32> to vector<128xf32>
    %209 = vector.shape_cast %208 : vector<128xf32> to vector<1x1x128xf32>
    %210 = vector.broadcast %206 : vector<10x16x1xf32> to vector<10x16x128xf32>
    %211 = vector.broadcast %209 : vector<1x1x128xf32> to vector<10x16x128xf32>
    %212 = arith.mulf %210, %211 : vector<10x16x128xf32>
    %213 = arith.addf %204, %212 : vector<10x16x128xf32>
    %214 = vector.extract_strided_slice %205 {offsets = [0, 0, 1], sizes = [10, 16, 1], strides = [1, 1, 1]} : vector<10x16x3xf32> to vector<10x16x1xf32>
    %215 = vector.extract_strided_slice %3 {offsets = [25, 0], sizes = [1, 128], strides = [1, 1]} : vector<27x128xf32> to vector<1x128xf32>
    %216 = vector.shape_cast %215 : vector<1x128xf32> to vector<128xf32>
    %217 = vector.shape_cast %216 : vector<128xf32> to vector<1x1x128xf32>
    %218 = vector.broadcast %214 : vector<10x16x1xf32> to vector<10x16x128xf32>
    %219 = vector.broadcast %217 : vector<1x1x128xf32> to vector<10x16x128xf32>
    %220 = arith.mulf %218, %219 : vector<10x16x128xf32>
    %221 = arith.addf %213, %220 : vector<10x16x128xf32>
    %222 = vector.extract_strided_slice %205 {offsets = [0, 0, 2], sizes = [10, 16, 1], strides = [1, 1, 1]} : vector<10x16x3xf32> to vector<10x16x1xf32>
    %223 = vector.extract_strided_slice %3 {offsets = [26, 0], sizes = [1, 128], strides = [1, 1]} : vector<27x128xf32> to vector<1x128xf32>
    %224 = vector.shape_cast %223 : vector<1x128xf32> to vector<128xf32>
    %225 = vector.shape_cast %224 : vector<128xf32> to vector<1x1x128xf32>
    %226 = vector.broadcast %222 : vector<10x16x1xf32> to vector<10x16x128xf32>
    %227 = vector.broadcast %225 : vector<1x1x128xf32> to vector<10x16x128xf32>
    %228 = arith.mulf %226, %227 : vector<10x16x128xf32>
    %229 = arith.addf %221, %228 : vector<10x16x128xf32>
    %c0_6 = arith.constant 0 : index
    %c0_7 = arith.constant 0 : index
    %230 = vector.load %arg6[%c0_6, %c0_7] : memref<1x128xf32, #tpu.memory_space<vmem>>, vector<1x128xf32>
    %231 = vector.shape_cast %230 : vector<1x128xf32> to vector<128xf32>
    %232 = vector.shape_cast %231 : vector<128xf32> to vector<1x1x128xf32>
    %233 = vector.broadcast %232 : vector<1x1x128xf32> to vector<10x16x128xf32>
    %234 = arith.addf %229, %233 : vector<10x16x128xf32>
    %cst_8 = arith.constant 0.000000e+00 : f32
    %235 = vector.broadcast %cst_8 : f32 to vector<10x16x128xf32>
    %236 = arith.maximumf %234, %235 : vector<10x16x128xf32>
    %237 = arith.truncf %236 : vector<10x16x128xf32> to vector<10x16x128xbf16>
    %238 = vector.shape_cast %237 : vector<10x16x128xbf16> to vector<160x128xbf16>
    %c0_9 = arith.constant 0 : index
    %c0_10 = arith.constant 0 : index
    %239 = vector.load %arg7[%c0_9, %c0_10] : memref<128x72xbf16, #tpu.memory_space<vmem>>, vector<128x72xbf16>
    %cst_11 = arith.constant dense<0.000000e+00> : vector<160x72xf32>
    %240 = tpu.matmul %238, %239, %cst_11 {dimension_numbers = #tpu.dot_dimension_numbers<[1], [0], [0], [1], [0, 0, 1, 1], [], []>} : vector<160x128xbf16>, vector<128x72xbf16>, vector<160x72xf32> -> vector<160x72xf32>
    %241 = vector.shape_cast %240 : vector<160x72xf32> to vector<10x16x72xf32>
    %c0_i32 = arith.constant 0 : i32
    %242 = arith.cmpi sgt, %0, %c0_i32 : i32
    %cst_12 = arith.constant 1.000000e+00 : f32
    %cst_13 = arith.constant 0.000000e+00 : f32
    %243 = arith.select %242, %cst_12, %cst_13 : f32
    %c8_i32_14 = arith.constant 8 : i32
    %244 = arith.addi %0, %c8_i32_14 : i32
    %c16_i32 = arith.constant 16 : i32
    %245 = arith.cmpi slt, %244, %c16_i32 : i32
    %cst_15 = arith.constant 1.000000e+00 : f32
    %cst_16 = arith.constant 0.000000e+00 : f32
    %246 = arith.select %245, %cst_15, %cst_16 : f32
    %247 = vector.extract_strided_slice %241 {offsets = [0, 0, 0], sizes = [1, 16, 72], strides = [1, 1, 1]} : vector<10x16x72xf32> to vector<1x16x72xf32>
    %248 = vector.broadcast %243 : f32 to vector<1x16x72xf32>
    %249 = arith.mulf %247, %248 : vector<1x16x72xf32>
    %250 = vector.extract_strided_slice %241 {offsets = [1, 0, 0], sizes = [8, 16, 72], strides = [1, 1, 1]} : vector<10x16x72xf32> to vector<8x16x72xf32>
    %251 = vector.extract_strided_slice %241 {offsets = [9, 0, 0], sizes = [1, 16, 72], strides = [1, 1, 1]} : vector<10x16x72xf32> to vector<1x16x72xf32>
    %252 = vector.broadcast %246 : f32 to vector<1x16x72xf32>
    %253 = arith.mulf %251, %252 : vector<1x16x72xf32>
    %254 = tpu.concatenate %249, %250, %253 in 0 : vector<1x16x72xf32>, vector<8x16x72xf32>, vector<1x16x72xf32> -> vector<10x16x72xf32>
    %cst_17 = arith.constant 0.000000e+00 : f32
    %255 = vector.broadcast %cst_17 : f32 to vector<10x1x72xf32>
    %256 = tpu.concatenate %255, %254, %255 in 1 : vector<10x1x72xf32>, vector<10x16x72xf32>, vector<10x1x72xf32> -> vector<10x18x72xf32>
    %cst_18 = arith.constant 0.000000e+00 : f32
    %257 = vector.broadcast %cst_18 : f32 to vector<8x16x8xf32>
    %258 = vector.extract_strided_slice %256 {offsets = [0, 0, 0], sizes = [8, 16, 8], strides = [1, 1, 1]} : vector<10x18x72xf32> to vector<8x16x8xf32>
    %259 = arith.addf %257, %258 : vector<8x16x8xf32>
    %260 = vector.extract_strided_slice %256 {offsets = [0, 1, 8], sizes = [8, 16, 8], strides = [1, 1, 1]} : vector<10x18x72xf32> to vector<8x16x8xf32>
    %261 = arith.addf %259, %260 : vector<8x16x8xf32>
    %262 = vector.extract_strided_slice %256 {offsets = [0, 2, 16], sizes = [8, 16, 8], strides = [1, 1, 1]} : vector<10x18x72xf32> to vector<8x16x8xf32>
    %263 = arith.addf %261, %262 : vector<8x16x8xf32>
    %264 = vector.extract_strided_slice %256 {offsets = [1, 0, 24], sizes = [8, 16, 8], strides = [1, 1, 1]} : vector<10x18x72xf32> to vector<8x16x8xf32>
    %265 = arith.addf %263, %264 : vector<8x16x8xf32>
    %266 = vector.extract_strided_slice %256 {offsets = [1, 1, 32], sizes = [8, 16, 8], strides = [1, 1, 1]} : vector<10x18x72xf32> to vector<8x16x8xf32>
    %267 = arith.addf %265, %266 : vector<8x16x8xf32>
    %268 = vector.extract_strided_slice %256 {offsets = [1, 2, 40], sizes = [8, 16, 8], strides = [1, 1, 1]} : vector<10x18x72xf32> to vector<8x16x8xf32>
    %269 = arith.addf %267, %268 : vector<8x16x8xf32>
    %270 = vector.extract_strided_slice %256 {offsets = [2, 0, 48], sizes = [8, 16, 8], strides = [1, 1, 1]} : vector<10x18x72xf32> to vector<8x16x8xf32>
    %271 = arith.addf %269, %270 : vector<8x16x8xf32>
    %272 = vector.extract_strided_slice %256 {offsets = [2, 1, 56], sizes = [8, 16, 8], strides = [1, 1, 1]} : vector<10x18x72xf32> to vector<8x16x8xf32>
    %273 = arith.addf %271, %272 : vector<8x16x8xf32>
    %274 = vector.extract_strided_slice %256 {offsets = [2, 2, 64], sizes = [8, 16, 8], strides = [1, 1, 1]} : vector<10x18x72xf32> to vector<8x16x8xf32>
    %275 = arith.addf %273, %274 : vector<8x16x8xf32>
    %c0_19 = arith.constant 0 : index
    %c0_20 = arith.constant 0 : index
    %276 = vector.load %arg8[%c0_19, %c0_20] : memref<1x8xf32, #tpu.memory_space<vmem>>, vector<1x8xf32>
    %277 = vector.shape_cast %276 : vector<1x8xf32> to vector<8xf32>
    %278 = vector.shape_cast %277 : vector<8xf32> to vector<1x1x8xf32>
    %279 = vector.broadcast %278 : vector<1x1x8xf32> to vector<8x16x8xf32>
    %280 = arith.addf %275, %279 : vector<8x16x8xf32>
    %281 = vector.extract_strided_slice %280 {offsets = [0, 0, 0], sizes = [8, 16, 4], strides = [1, 1, 1]} : vector<8x16x8xf32> to vector<8x16x4xf32>
    %282 = vector.extract_strided_slice %280 {offsets = [0, 0, 4], sizes = [8, 16, 4], strides = [1, 1, 1]} : vector<8x16x8xf32> to vector<8x16x4xf32>
    %c0_21 = arith.constant 0 : index
    %c0_22 = arith.constant 0 : index
    %c0_23 = arith.constant 0 : index
    %c0_24 = arith.constant 0 : index
    %283 = vector.load %arg2[%c0_21, %c0_22, %c0_23, %c0_24] : memref<1x8x16x4xf32, #tpu.memory_space<vmem>>, vector<1x8x16x4xf32>
    %284 = vector.shape_cast %283 : vector<1x8x16x4xf32> to vector<8x16x4xf32>
    %c0_25 = arith.constant 0 : index
    %c0_26 = arith.constant 0 : index
    %c0_27 = arith.constant 0 : index
    %285 = vector.load %arg4[%c0_25, %c0_26, %c0_27] : memref<1x2x4xf32, #tpu.memory_space<vmem>>, vector<1x1x4xf32>
    %286 = vector.shape_cast %285 : vector<1x1x4xf32> to vector<4xf32>
    %c0_28 = arith.constant 0 : index
    %c1 = arith.constant 1 : index
    %c0_29 = arith.constant 0 : index
    %287 = vector.load %arg4[%c0_28, %c1, %c0_29] : memref<1x2x4xf32, #tpu.memory_space<vmem>>, vector<1x1x4xf32>
    %288 = vector.shape_cast %287 : vector<1x1x4xf32> to vector<4xf32>
    %289 = vector.shape_cast %286 : vector<4xf32> to vector<1x1x4xf32>
    %290 = vector.broadcast %289 : vector<1x1x4xf32> to vector<8x16x4xf32>
    %291 = arith.subf %284, %290 : vector<8x16x4xf32>
    %292 = vector.shape_cast %288 : vector<4xf32> to vector<1x1x4xf32>
    %293 = vector.broadcast %292 : vector<1x1x4xf32> to vector<8x16x4xf32>
    %294 = arith.mulf %291, %293 : vector<8x16x4xf32>
    %cst_30 = arith.constant 1.000000e+00 : f32
    %295 = vector.broadcast %cst_30 : f32 to vector<8x16x4xf32>
    %296 = arith.addf %295, %281 : vector<8x16x4xf32>
    %297 = arith.mulf %294, %296 : vector<8x16x4xf32>
    %298 = arith.addf %297, %282 : vector<8x16x4xf32>
    %c0_31 = arith.constant 0 : index
    %c0_32 = arith.constant 0 : index
    %c0_33 = arith.constant 0 : index
    %c0_34 = arith.constant 0 : index
    %299 = vector.load %arg9[%c0_31, %c0_32, %c0_33, %c0_34] : memref<1x8x16x4xf32, #tpu.memory_space<vmem>>, vector<1x8x16x4xf32>
    %300 = vector.shape_cast %299 : vector<1x8x16x4xf32> to vector<8x16x4xf32>
    %301 = vector.shape_cast %298 : vector<8x16x4xf32> to vector<1x8x16x4xf32>
    tpu.vector_store %arg9[%c0_31, %c0_32, %c0_33, %c0_34], %301 {strides = array<i32>} : memref<1x8x16x4xf32, #tpu.memory_space<vmem>>, vector<1x8x16x4xf32>,
    return
  }
  func.func @transform_0(%arg0: i32, %arg1: i32) -> (i32, i32, i32, i32) {
    %c0_i32 = arith.constant 0 : i32
    %c0_i32_0 = arith.constant 0 : i32
    %c0_i32_1 = arith.constant 0 : i32
    return %arg0, %arg1, %c0_i32, %c0_i32_0 : i32, i32, i32, i32
  }
  func.func @transform_1(%arg0: i32, %arg1: i32) -> (i32, i32, i32, i32, i32) {
    %c0_i32 = arith.constant 0 : i32
    %c0_i32_0 = arith.constant 0 : i32
    %c0_i32_1 = arith.constant 0 : i32
    %c0_i32_2 = arith.constant 0 : i32
    return %arg0, %arg1, %c0_i32, %c0_i32_0, %c0_i32_1 : i32, i32, i32, i32, i32
  }
  func.func @transform_2(%arg0: i32, %arg1: i32) -> (i32, i32, i32) {
    %c0_i32 = arith.constant 0 : i32
    %c0_i32_0 = arith.constant 0 : i32
    %c0_i32_1 = arith.constant 0 : i32
    return %arg0, %c0_i32, %c0_i32_0 : i32, i32, i32
  }
  func.func @transform_3(%arg0: i32, %arg1: i32) -> (i32, i32) {
    %c0_i32 = arith.constant 0 : i32
    %c0_i32_0 = arith.constant 0 : i32
    %c0_i32_1 = arith.constant 0 : i32
    return %c0_i32, %c0_i32_0 : i32, i32
  }
  func.func @transform_4(%arg0: i32, %arg1: i32) -> (i32, i32) {
    %c0_i32 = arith.constant 0 : i32
    %c0_i32_0 = arith.constant 0 : i32
    %c0_i32_1 = arith.constant 0 : i32
    return %c0_i32, %c0_i32_0 : i32, i32
  }
  func.func @transform_5(%arg0: i32, %arg1: i32) -> (i32, i32) {
    %c0_i32 = arith.constant 0 : i32
    %c0_i32_0 = arith.constant 0 : i32
    %c0_i32_1 = arith.constant 0 : i32
    return %c0_i32, %c0_i32_0 : i32, i32
  }
  func.func @transform_6(%arg0: i32, %arg1: i32) -> (i32, i32) {
    %c0_i32 = arith.constant 0 : i32
    %c0_i32_0 = arith.constant 0 : i32
    %c0_i32_1 = arith.constant 0 : i32
    return %c0_i32, %c0_i32_0 : i32, i32
  }
  func.func @transform_7(%arg0: i32, %arg1: i32) -> (i32, i32, i32, i32) {
    %c0_i32 = arith.constant 0 : i32
    %c0_i32_0 = arith.constant 0 : i32
    %c0_i32_1 = arith.constant 0 : i32
    return %arg0, %arg1, %c0_i32, %c0_i32_0 : i32, i32, i32, i32
  }
}

</mosaic_0001>

<bundles_post_ra>
// kernel: spade_layer.1
= control target key start
LH: loop header
LB: loop body
LE: loop exit
PB: predicated region body
PF: predicated region fallthrough
CT: control target
= control target key end

     0   :  { %s5677_s24 = smov 0   ;;  %s5679_s25 = smov 0   ;;  %s10940_s0 = inlined_call_operand.vmem [shape: f32[2,16,16,4], index: 0, kind: input, shape index: {}]   ;;  %s10941_s1 = inlined_call_operand.vmem [shape: f32[2,2,12,18,3], index: 1, kind: input, shape index: {}]   ;;  %s10942_s2 = inlined_call_operand.vmem [shape: f32[2,2,4], index: 2, kind: input, shape index: {}]   ;;  %s10943_s3 = inlined_call_operand.vmem [shape: f32[27,128], index: 3, kind: input, shape index: {}]   ;;  %s10944_s4 = inlined_call_operand.vmem [shape: f32[1,128], index: 4, kind: input, shape index: {}]   ;;  %s10945_s5 = inlined_call_operand.vmem [shape: bf16[128,72], index: 5, kind: input, shape index: {}]   ;;  %s10946_s6 = inlined_call_operand.vmem [shape: f32[1,8], index: 6, kind: input, shape index: {}]   ;;  %s10947_s7 = inlined_call_operand.vmem [shape: f32[2,16,16,4], index: 7, kind: output, shape index: {}]  }
   0x1   :  { %s5681_s26 = smov 0   ;;  %s5683_s27 = smov 0  }
   0x2   :  { %s5685_s28 = smov 0  }
   0x3 LB: > { %s26_s29 = sadd.s32 1, %s5615_s26  ;;  %s29_s30 = sadd.s32 1, %s5619_s27  ;;  %s5623_s28 = sphi %s5685_s28, %s17_s28   ;;  %s5619_s27 = sphi %s5683_s27, %s12547_s27   ;;  %s5615_s26 = sphi %s5681_s26, %s12546_s26   ;;  %s5611_s25 = sphi %s5679_s25, %s12545_s25   ;;  %s5607_s24 = sphi %s5677_s24, %s12544_s24  }
   0x4   : > { %p27_p0 = scmp.ge.s32.totalorder %s26_s29, 2  ;;  %p5392_p1 = scmp.ge.s32.totalorder %s5623_s28, 1 }
   0x5   : > { %p284_p2 = scmp.lt.s32.totalorder %s5623_s28, 5 }
   0x6   : > { %s12549_s29 = smov (%p27_p0, %s26_s29), 0  ;;  %s12551_s30 = smov (!%p27_p0, %s29_s30), %s5619_s27 }
   0x7   : > { %p285_p3 = pnand %p5392_p1, %p284_p2  ;;  %p31_p4 = scmp.ge.s32.totalorder %s12551_s30, 2 }
   0x9   : > { %s12553_s30 = smov (%p31_p4, %s12551_s30), 0  ;;  %288 = sbr.rel (%p285_p3) target bundleno = 1461 (0x5b5), region = 48 }
  0x10   : > { %p340_p5 = scmp.lt.s32.totalorder %s5611_s25, 1  ;;  %p352_p6 = scmp.lt.s32.totalorder %s5607_s24, 1  ;;  %v10952_v0 = vmov 1   ;;  %v10948_v1 = vmov 0   ;;  %v10950_v27 = vmov 2   ;;  %v516_v31 = vlaneseq  ;;  %v412_v36 = vld [vmem:[%s10943_s3] sm:$0xff] }
  0x11   : > { %5543 = vset.pattern.permute.xlu0 %v10952_v0  ;;  %5542 = vset.pattern.permute.xlu1 %v10948_v1  ;;  %v413_v39 = vld [vmem:[%s10943_s3 + $0x8] sm:$0xff]  ;;  %v415_v48 = vld [vmem:[%s10943_s3 + $0x18] sm:$0x7]  ;;  %v5896_v54 = vld [vmem:[%s10943_s3 + $0x10] sm:$0xff]  ;;  %vm922_vm0 = vcmask 1046528   ;;  %vm1465_vm1 = vcmask 1045504  }
  0x12   : > { %s12555_s25 = smov (!%p340_p5, %s5611_s25), 1  ;;  %v517_v32 = vshrl.u32 %v516_v31, 7  ;;  %s9921_s14 = sshll.u32 %s5607_s24, 3  ;;  %vm4319_vm2 = vcmask 1040384   ;;  %vm5239_vm3 = vcmask 31744  }
  0x13   : > { %s353_s8 = scalar_select %p352_p6, %s5607_s24, 1 }
  0x14   : > { %s5489_s9 = smul.u32 72, %s12555_s25  ;;  %v518_v33 = vsub.s32 0, %v517_v32  ;;  %v642_v37 = vsub.s32 1, %v517_v32  ;;  %v5860_v38 = vsub.s32 3, %v517_v32  ;;  %v5866_v40 = vsub.s32 4, %v517_v32  ;;  %p4288_p7 = scmp.gt.s32.totalorder %s9921_s14, 0 }
  0x15   : > { %s5488_s10 = smul.u32 36, %s353_s8  ;;  %v1403_v41 = vsub.s32 6, %v517_v32  ;;  %v5868_v42 = vsub.s32 7, %v517_v32  ;;  %v1249_v49 = vsub.s32 5, %v517_v32  ;;  %v766_v50 = vsub.s32 2, %v517_v32  ;;  %s5628_s24 = smov 104  }
  0x16   : > { %11336 = vst [vmem:[#allocation6_spill] sm:$0xff] %v5860_v38  ;;  %11337 = vst [vmem:[#allocation7_spill] sm:$0xff] %v5866_v40  ;;  %v5871_v43 = vrot.slane %v412_v36, %v518_v33  ;;  %v5878_v46 = vrot.slane %v412_v36, %v5860_v38  ;;  %v5880_v47 = vrot.slane %v413_v39, %v642_v37  ;;  %s5629_s16 = smov 80   ;;  %s4290_s17 = sadd.s32 8, %s9921_s14 }
  0x17   : > { %s356_s11 = sadd.s32 %s5489_s9, %s5488_s10  ;;  %v5885_v51 = vrot.slane %v412_v36, %v1403_v41  ;;  %v5888_v52 = vrot.slane %v413_v39, %v5866_v40  ;;  %v5891_v53 = vrot.slane %v413_v39, %v5868_v42  ;;  %v5898_v55 = vrot.slane %v412_v36, %v642_v37  ;;  %p10038_p8 = scmp.lt.s32.totalorder %s4290_s17, 16 }
  0x18   : > { %s5397_s12 = sshll.u32 %s356_s11, 3  ;;  %11338 = vst [vmem:[#allocation8_spill] sm:$0xff] %v5871_v43  ;;  %11339 = vst [vmem:[#allocation9_spill] sm:$0xff] %v5878_v46  ;;  %v5902_v56 = vrot.slane %v412_v36, %v5866_v40  ;;  %v5904_v57 = vrot.slane %v412_v36, %v1249_v49  ;;  %v5907_v58 = vrot.slane %v412_v36, %v5868_v42  ;;  %s5630_s19 = smov 120  }
  0x19   : > { %s5719_s15 = scalar_lea.vmem %s10941_s1, %s5397_s12  ;;  %11340 = vst [vmem:[#allocation10_spill] sm:$0xff] %v5880_v47  ;;  %11341 = vst [vmem:[#allocation11_spill] sm:$0xff] %v5885_v51  ;;  %v5910_v59 = vrot.slane %v5896_v54, %v642_v37  ;;  %v5913_v60 = vrot.slane %v415_v48, %v642_v37  ;;  %v5915_v61 = vrot.slane %v413_v39, %v1249_v49  ;;  %s5631_s21 = smov 112  }
  0x1a   : > { %v5722_v2 = vld [vmem:[%s5719_s15 + $0x18] sm:$0xff]  ;;  %v5725_v3 = vld [vmem:[%s5719_s15] sm:$0xff]  ;;  %v5740_v6 = vld [vmem:[%s5719_s15 + $0x50] sm:$0xff]  ;;  %11342 = vst [vmem:[#allocation12_spill] sm:$0xff] %v5888_v52  ;;  %v5918_v62 = vrot.slane %v5896_v54, %v518_v33  ;;  %s4292_s20 = scalar_select %p10038_p8, 1.0, 0.0 }
  0x1b   : > { %428 = vperm.xlu1 %5542, %v5722_v2   ;;  %561 = vperm.xlu0 %5543, %v5725_v3   ;;  %v5730_v4 = vld [vmem:[%s5719_s15 + $0x20] sm:$0xff]  ;;  %v5735_v5 = vld [vmem:[%s5719_s15 + $0x38] sm:$0xff]  ;;  %v5745_v7 = vld [vmem:[%s5719_s15 + $0x68] sm:$0xff]  ;;  %11343 = vst [vmem:[#allocation13_spill] sm:$0xff] %v5891_v53  ;;  %s5632_s22 = smov 96   ;;  %s5633_s23 = smov 88  }
  0x1c   : > { %v5750_v8 = vld [vmem:[%s5719_s15 + $0x80] sm:$0xff]  ;;  %v5755_v9 = vld [vmem:[%s5719_s15 + $0x98] sm:$0xff]  ;;  %v5760_v10 = vld [vmem:[%s5719_s15 + $0xb0] sm:$0xff]  ;;  %11344 = vst [vmem:[#allocation14_spill] sm:$0xff] %v5898_v55  ;;  %s5634_s8 = smov 72   ;;  %s5635_s9 = smov 64  }
  0x1d   : > { %v5765_v11 = vld [vmem:[%s5719_s15 + $0xc8] sm:$0xff]  ;;  %v5770_v12 = vld [vmem:[%s5719_s15 + $0xe0] sm:$0xff]  ;;  %v5781_v15 = vld [vmem:[%s5719_s15 + $0x58] sm:$0x3]  ;;  %11345 = vst [vmem:[#allocation15_spill] sm:$0xff] %v5902_v56  ;;  %s5636_s12 = smov 124  }
  0x1e   : > { %11332 = vst [vmem:[#allocation2_spill] sm:$0xff] %v5765_v11  ;;  %11333 = vst [vmem:[#allocation3_spill] sm:$0xff] %v5770_v12  ;;  %v5775_v13 = vld [vmem:[%s5719_s15 + $0x28] sm:$0x3]  ;;  %v5786_v16 = vld [vmem:[%s5719_s15 + $0xa0] sm:$0x3] }
  0x1f   : > { %433 = vperm.xlu1 %5542, %v5730_v4   ;;  %573 = vperm.xlu0 %5543, %v5730_v4   ;;  %v377_v14 = vld [vmem:[%s5719_s15 + $0x8] sm:$0xff]  ;;  %v382_v17 = vld [vmem:[%s5719_s15 + $0x30] sm:$0xff]  ;;  %v5799_v21 = vld [vmem:[%s5719_s15 + $0x60] sm:$0xff]  ;;  %11346 = vst [vmem:[#allocation16_spill] sm:$0xff] %v5904_v57  ;;  %p342_p9 = scmp.lt.s32.totalorder %s9921_s14, 15  ;;  %s5398_s17 = sshll.u32 %s12555_s25, 1 }
  0x20   : > { %v5791_v18 = vld [vmem:[%s5719_s15 + $0x70] sm:$0x3]  ;;  %v385_v19 = vld [vmem:[%s5719_s15 + $0x48] sm:$0xff]  ;;  %v5804_v22 = vld [vmem:[%s5719_s15 + $0x78] sm:$0xff]  ;;  %11347 = vst [vmem:[#allocation17_spill] sm:$0xff] %v5907_v58 }
  0x21   : > { %v5796_v20 = vld [vmem:[%s5719_s15 + $0x88] sm:$0x3]  ;;  %v5810_v23 = vld [vmem:[%s5719_s15 + $0x90] sm:$0xff]  ;;  %v5818_v25 = vld [vmem:[%s5719_s15 + $0xc0] sm:$0xff]  ;;  %11348 = vst [vmem:[#allocation18_spill] sm:$0xff] %v5910_v59  ;;  %s12557_s14 = smov (!%p342_p9, %s9921_s14), 15 }
  0x22   : > { %v5814_v24 = vld [vmem:[%s5719_s15 + $0xa8] sm:$0xff]  ;;  %v5822_v26 = vld [vmem:[%s5719_s15 + $0xd8] sm:$0xff]  ;;  %v378_v28 = vld [vmem:[%s5719_s15 + $0x10] sm:$0x3]  ;;  %11349 = vst [vmem:[#allocation19_spill] sm:$0xff] %v5913_v60  ;;  %s5394_s13 = sshll.u32 %s12557_s14, 1 }
  0x23   : > { %443 = vperm.xlu1 %5542, %v5735_v5   ;;  %581 = vperm.xlu0 %5543, %v5735_v5   ;;  %11334 = vst [vmem:[#allocation4_spill] sm:$0xff] %v5822_v26  ;;  %v5840_v29 = vld [vmem:[%s5719_s15 + $0x40] sm:$0x3]  ;;  %v5847_v30 = vld [vmem:[%s5719_s15 + $0xe8] sm:$0x3]  ;;  %11350 = vst [vmem:[#allocation20_spill] sm:$0xff] %v5915_v61 }
  0x24   : > { %11335 = vst [vmem:[#allocation5_spill] sm:$0xff] %v5847_v30  ;;  %11351 = vst [vmem:[#allocation21_spill] sm:$0xff] %v5918_v62 }
  0x27   : > { %453 = vperm.xlu1 %5542, %v5740_v6   ;;  %589 = vperm.xlu0 %5543, %v5740_v6  }
  0x2b   : > { %463 = vperm.xlu1 %5542, %v5745_v7   ;;  %597 = vperm.xlu0 %5543, %v5745_v7  }
  0x2f   : > { %473 = vperm.xlu1 %5542, %v5750_v8   ;;  %605 = vperm.xlu0 %5543, %v5750_v8  }
  0x33   : > { %483 = vperm.xlu1 %5542, %v5755_v9   ;;  %613 = vperm.xlu0 %5543, %v5755_v9  }
  0x37   : > { %493 = vperm.xlu1 %5542, %v5760_v10   ;;  %621 = vperm.xlu0 %5543, %v5760_v10  }
  0x3b   : > { %503 = vperm.xlu1 %5542, %v5765_v11   ;;  %629 = vperm.xlu0 %5543, %v5765_v11   ;;  %v6265_v11 = vrot.slane %v5896_v54, %v5868_v42 }
  0x3d   : > { %11431 = vst [vmem:[#allocation94_spill] sm:$0xff] %v6265_v11 }
  0x3f   : > { %513 = vperm.xlu1 %5542, %v5770_v12   ;;  %637 = vperm.xlu0 %5543, %v5770_v12  }
  0x43   : > { %5544 = vset.pattern.permute.xlu1 %v10952_v0  ;;  %1018 = vperm.xlu0 %5543, %v5775_v13  }
  0x44   : > { %565 = vperm.xlu1 %5544, %v377_v14  }
  0x47   : > { %1026 = vperm.xlu0 %5543, %v5781_v15  }
  0x48   : > { %569 = vperm.xlu1 %5544, %v5722_v2  }
  0x4b   : > { %1038 = vperm.xlu0 %5543, %v5786_v16  }
  0x4c   : > { %577 = vperm.xlu1 %5544, %v382_v17  }
  0x4f   : > { %1030 = vperm.xlu0 %5543, %v5791_v18  }
  0x50   : > { %585 = vperm.xlu1 %5544, %v385_v19  }
  0x53   : > { %1034 = vperm.xlu0 %5543, %v5796_v20  }
  0x54   : > { %593 = vperm.xlu1 %5544, %v5799_v21  }
  0x57   : > { %5555 = vset.pattern.permute.xlu0 %v10948_v1 }
  0x58   : > { %601 = vperm.xlu1 %5544, %v5804_v22   ;;  %418 = vperm.xlu0 %5555, %v5725_v3  }
  0x5c   : > { %609 = vperm.xlu1 %5544, %v5810_v23   ;;  %423 = vperm.xlu0 %5555, %v377_v14  }
  0x60   : > { %617 = vperm.xlu1 %5544, %v5814_v24   ;;  %438 = vperm.xlu0 %5555, %v382_v17  }
  0x64   : > { %625 = vperm.xlu1 %5544, %v5818_v25   ;;  %448 = vperm.xlu0 %5555, %v385_v19  }
  0x68   : > { %633 = vperm.xlu1 %5544, %v5822_v26   ;;  %458 = vperm.xlu0 %5555, %v5799_v21  }
  0x6c   : > { %5545 = vset.pattern.permute.xlu1 %v10950_v27  ;;  %468 = vperm.xlu0 %5555, %v5804_v22  }
  0x6d   : > { %685 = vperm.xlu1 %5545, %v5725_v3   ;;  %v5924_v3 = vrot.slane %v415_v48, %v518_v33 }
  0x6f   : > { %11354 = vst [vmem:[#allocation24_spill] sm:$0xff] %v5924_v3 }
  0x70   : > { %478 = vperm.xlu0 %5555, %v5810_v23  }
  0x71   : > { %693 = vperm.xlu1 %5545, %v5722_v2  }
  0x74   : > { %488 = vperm.xlu0 %5555, %v5814_v24  }
  0x75   : > { %697 = vperm.xlu1 %5545, %v5730_v4   ;;  %v5927_v4 = vrot.slane %v5896_v54, %v1403_v41 }
  0x77   : > { %11355 = vst [vmem:[#allocation25_spill] sm:$0xff] %v5927_v4 }
  0x78   : > { %498 = vperm.xlu0 %5555, %v5818_v25  }
  0x79   : > { %705 = vperm.xlu1 %5545, %v5735_v5   ;;  %v5929_v5 = vrot.slane %v413_v39, %v766_v50 }
  0x7b   : > { %11356 = vst [vmem:[#allocation26_spill] sm:$0xff] %v5929_v5 }
  0x7c   : > { %508 = vperm.xlu0 %5555, %v5822_v26  }
  0x7d   : > { %713 = vperm.xlu1 %5545, %v5740_v6   ;;  %v5932_v6 = vrot.slane %v5896_v54, %v1249_v49 }
  0x7f   : > { %11357 = vst [vmem:[#allocation27_spill] sm:$0xff] %v5932_v6 }
  0x80   : > { %810 = vperm.xlu0 %5555, %v378_v28  }
  0x81   : > { %721 = vperm.xlu1 %5545, %v5745_v7   ;;  %v5935_v7 = vrot.slane %v5896_v54, %v766_v50 }
  0x83   : > { %11358 = vst [vmem:[#allocation28_spill] sm:$0xff] %v5935_v7 }
  0x84   : > { %820 = vperm.xlu0 %5555, %v5840_v29  }
  0x85   : > { %729 = vperm.xlu1 %5545, %v5750_v8   ;;  %v5938_v8 = vrot.slane %v413_v39, %v518_v33 }
  0x87   : > { %11359 = vst [vmem:[#allocation29_spill] sm:$0xff] %v5938_v8 }
  0x88   : > { %840 = vperm.xlu0 %5555, %v5786_v16  }
  0x89   : > { %737 = vperm.xlu1 %5545, %v5755_v9   ;;  %v5940_v9 = vrot.slane %v412_v36, %v766_v50 }
  0x8b   : > { %11360 = vst [vmem:[#allocation30_spill] sm:$0xff] %v5940_v9  ;;  %v6139_v9 = vld [vmem:[%s5719_s15 + $0xb8] sm:$0x3] }
  0x8c   : > { %855 = vperm.xlu0 %5555, %v5847_v30  }
  0x8d   : > { %745 = vperm.xlu1 %5545, %v5760_v10   ;;  %v5942_v10 = vrot.slane %v415_v48, %v766_v50 }
  0x8f   : > { %11361 = vst [vmem:[#allocation31_spill] sm:$0xff] %v5942_v10  ;;  %v11372_v10 = vmov 1  }
  0x90   : > { %5558 = vset.pattern.permute.xlu0 %v10950_v27 }
  0x91   : > { %5546 = vset.pattern.permute.xlu1 %v10948_v1  ;;  %689 = vperm.xlu0 %5558, %v377_v14  }
  0x92   : > { %815 = vperm.xlu1 %5546, %v5775_v13  }
  0x95   : > { %701 = vperm.xlu0 %5558, %v382_v17  }
  0x96   : > { %5547 = vset.pattern.permute.xlu1 %v10952_v0 }
  0x97   : > { %1014 = vperm.xlu1 %5547, %v378_v28  }
  0x99   : > { %709 = vperm.xlu0 %5558, %v385_v19   ;;  %v5956_v19 = vrot.slane %v413_v39, %v1403_v41 }
  0x9a   : > { %v429_v34 = vpop.permute.xlu1 %428  ;;  %v5855_v35 = vpop.permute.xlu0 %561 }
  0x9b   : > { %5548 = vset.pattern.permute.xlu1 %v10950_v27  ;;  %v5948_v14 = vmul.f32 %v5871_v43, %v429_v34  ;;  %11364 = vst [vmem:[#allocation34_spill] sm:$0xff] %v5956_v19  ;;  %v2501_v31 = vmul.f32 %v5891_v53, %v429_v34  ;;  %v5967_v36 = vmul.f32 %v5880_v47, %v429_v34 }
  0x9c   : > { %1208 = vperm.xlu1 %5548, %v378_v28   ;;  %v2031_v28 = vmul.f32 %v5888_v52, %v429_v34  ;;  %v5975_v37 = vmul.f32 %v5907_v58, %v5855_v35  ;;  %v5995_v50 = vmul.f32 %v5898_v55, %v5855_v35 }
  0x9d   : > { %717 = vperm.xlu0 %5558, %v5799_v21   ;;  %v865_v21 = vmul.f32 %v5878_v46, %v429_v34  ;;  %11367 = vst [vmem:[#allocation37_spill] sm:$0xff] %v5967_v36  ;;  %v2561_v3 = vrot.slane %v2501_v31, 2 }
  0x9e   : > { %v5873_v44 = vpop.permute.xlu1 %433  ;;  %v5875_v45 = vpop.permute.xlu0 %573  ;;  %11371 = vst [vmem:[#allocation41_spill] sm:$0xff] %v5995_v50  ;;  %v2091_v36 = vrot.slane %v2031_v28, 1 }
  0x9f   : > { %v5952_v17 = vmul.f32 %v5885_v51, %v5873_v44  ;;  %v523_v41 = vmul.f32 %v5871_v43, %v5873_v44  ;;  %v5985_v48 = vmul.f32 %v5888_v52, %v5873_v44  ;;  %v647_v49 = vmul.f32 %v5898_v55, %v5875_v45 }
  0xa0   : > { %1212 = vperm.xlu1 %5548, %v5775_v13   ;;  %v5945_v13 = vrot.slane %v413_v39, %v5860_v38  ;;  %v5979_v39 = vmul.f32 %v5878_v46, %v5873_v44  ;;  %v6000_v27 = vmul.f32 %v5902_v56, %v5875_v45  ;;  %v6004_v0 = vmul.f32 %v5907_v58, %v5875_v45 }
  0xa1   : > { %725 = vperm.xlu0 %5558, %v5804_v22   ;;  %11363 = vst [vmem:[#allocation33_spill] sm:$0xff] %v5952_v17  ;;  %v1408_v22 = vmul.f32 %v5885_v51, %v429_v34  ;;  %11369 = vst [vmem:[#allocation39_spill] sm:$0xff] %v5985_v48  ;;  %v5989_v34 = vmul.f32 %v5891_v53, %v5873_v44  ;;  %v928_v40 = vrot.slane %v865_v21, 1  ;;  %v11376_v31 = vrot.slane %v5952_v17, 2 }
  0xa2   : > { %v5920_v63 = vpop.permute.xlu1 %443  ;;  %v5922_v2 = vpop.permute.xlu0 %581  ;;  %11362 = vst [vmem:[#allocation32_spill] sm:$0xff] %v5945_v13  ;;  %11368 = vst [vmem:[#allocation38_spill] sm:$0xff] %v5979_v39  ;;  %v6018_v19 = vmul.f32 %v5915_v61, %v5875_v45  ;;  %v6026_v28 = vmul.f32 %v5918_v62, %v5875_v45  ;;  %v11387_v8 = vrot.slane %v5985_v48, 1  ;;  %v11391_v50 = vrot.slane %v5979_v39, 1 }
  0xa3   : > { %11352 = vst [vmem:[#allocation22_spill] sm:$0xff] %v5920_v63  ;;  %11353 = vst [vmem:[#allocation23_spill] sm:$0xff] %v5922_v2  ;;  %v1471_v38 = vrot.slane %v1408_v22, 2  ;;  %v6022_v22 = vadd.f32 %v647_v49, %v523_v41  ;;  %v525_v21 = vmul.f32 %v5871_v43, %v5920_v63  ;;  %v11379_v49 = vmov 2  }
  0xa4   : > { %5549 = vset.pattern.permute.xlu1 %v10948_v1  ;;  %11370 = vst [vmem:[#allocation40_spill] sm:$0xff] %v5989_v34  ;;  %v649_v17 = vmul.f32 %v5898_v55, %v5922_v2  ;;  %v6055_v59 = vmul.f32 %v5888_v52, %v5920_v63  ;;  %v6074_v57 = vsel %vm922_vm0, %v2091_v36, %v11387_v8  ;;  %v11389_v6 = vrot.slane %v5989_v34, 2 }
  0xa5   : > { %825 = vperm.xlu1 %5549, %v5781_v15   ;;  %733 = vperm.xlu0 %5558, %v5810_v23   ;;  %v5971_v23 = vmul.f32 %v5902_v56, %v5855_v35  ;;  %11375 = vst [vmem:[#allocation44_spill] sm:$0xff] %v6022_v22  ;;  %v6031_v13 = vsel %vm1465_vm1, %v1471_v38, %v11376_v31  ;;  %11388 = vst [vmem:[#allocation54_spill] sm:$0xff] %v6074_v57 }
  0xa6   : > { %v5962_v32 = vpop.permute.xlu1 %453  ;;  %v5964_v33 = vpop.permute.xlu0 %589  ;;  %11377 = vst [vmem:[#allocation45_spill] sm:$0xff] %v6031_v13  ;;  %v6047_v38 = vmul.f32 %v5878_v46, %v5920_v63  ;;  %v6051_v31 = vmul.f32 %v5885_v51, %v5920_v63  ;;  %11383 = vst [vmem:[#allocation50_spill] sm:$0xff] %v6055_v59  ;;  %v6085_v12 = vsel %vm922_vm0, %v928_v40, %v11391_v50 }
  0xa7   : > { %11365 = vst [vmem:[#allocation35_spill] sm:$0xff] %v5962_v32  ;;  %11366 = vst [vmem:[#allocation36_spill] sm:$0xff] %v5964_v33  ;;  %v6065_v22 = vmul.f32 %v5907_v58, %v5964_v33  ;;  %v6069_v13 = vmul.f32 %v5915_v61, %v5964_v33  ;;  %v6090_v48 = vmul.f32 %v5918_v62, %v5964_v33 }
  0xa8   : > { %11381 = vst [vmem:[#allocation48_spill] sm:$0xff] %v6047_v38  ;;  %11382 = vst [vmem:[#allocation49_spill] sm:$0xff] %v6051_v31  ;;  %v6094_v8 = vmul.f32 %v5891_v53, %v5920_v63  ;;  %v6108_v36 = vadd.f32 %v649_v17, %v525_v21  ;;  %v6157_v34 = vmul.f32 %v5880_v47, %v5920_v63 }
  0xa9   : > { %5550 = vset.pattern.permute.xlu1 %v11372_v10  ;;  %741 = vperm.xlu0 %5558, %v5814_v24   ;;  %11385 = vst [vmem:[#allocation52_spill] sm:$0xff] %v6065_v22  ;;  %11386 = vst [vmem:[#allocation53_spill] sm:$0xff] %v6069_v13  ;;  %v6161_v50 = vmul.f32 %v5935_v7, %v5920_v63  ;;  %v6169_v39 = vmul.f32 %v5891_v53, %v5962_v32 }
  0xaa   : > { %v6008_v35 = vpop.permute.xlu1 %463  ;;  %1022 = vperm.xlu1 %5550, %v5840_v29   ;;  %v6011_v1 = vpop.permute.xlu0 %597  ;;  %11392 = vst [vmem:[#allocation56_spill] sm:$0xff] %v6085_v12  ;;  %11393 = vst [vmem:[#allocation57_spill] sm:$0xff] %v6090_v48  ;;  %v6216_v12 = vmul.f32 %v5880_v47, %v5962_v32 }
  0xab   : > { %11373 = vst [vmem:[#allocation42_spill] sm:$0xff] %v6008_v35  ;;  %11374 = vst [vmem:[#allocation43_spill] sm:$0xff] %v6011_v1  ;;  %v6123_v17 = vmul.f32 %v5907_v58, %v6011_v1  ;;  %v6127_v21 = vmul.f32 %v5915_v61, %v6011_v1 }
  0xac   : > { %11394 = vst [vmem:[#allocation58_spill] sm:$0xff] %v6094_v8  ;;  %11399 = vst [vmem:[#allocation63_spill] sm:$0xff] %v6108_v36  ;;  %v11413_v36 = vmov 0  }
  0xad   : > { %1224 = vperm.xlu0 %5558, %v5791_v18   ;;  %11401 = vst [vmem:[#allocation65_spill] sm:$0xff] %v6123_v17  ;;  %11402 = vst [vmem:[#allocation66_spill] sm:$0xff] %v6127_v21 }
  0xae   : > { %v6038_v41 = vpop.permute.xlu1 %473  ;;  %5551 = vset.pattern.permute.xlu1 %v11379_v49  ;;  %v6041_v24 = vpop.permute.xlu0 %605  ;;  %11409 = vst [vmem:[#allocation73_spill] sm:$0xff] %v6157_v34  ;;  %11410 = vst [vmem:[#allocation74_spill] sm:$0xff] %v6161_v50  ;;  %v527_v50 = vmul.f32 %v5871_v43, %v5962_v32 }
  0xaf   : > { %11378 = vst [vmem:[#allocation46_spill] sm:$0xff] %v6038_v41  ;;  %11380 = vst [vmem:[#allocation47_spill] sm:$0xff] %v6041_v24  ;;  %1216 = vperm.xlu1 %5551, %v5840_v29   ;;  %v6061_v41 = vmul.f32 %v5902_v56, %v5964_v33  ;;  %v6079_v29 = vsel %vm1465_vm1, %v2561_v3, %v11389_v6  ;;  %v6098_v3 = vmul.f32 %v5880_v47, %v5873_v44 }
  0xb0   : > { %11390 = vst [vmem:[#allocation55_spill] sm:$0xff] %v6079_v29  ;;  %v6102_v6 = vmul.f32 %v5929_v5, %v5875_v45  ;;  %v6135_v29 = vmul.f32 %v5878_v46, %v5962_v32  ;;  %v6145_v45 = vmul.f32 %v5885_v51, %v5962_v32  ;;  %v6149_v44 = vmul.f32 %v5888_v52, %v5962_v32 }
  0xb1   : > { %11384 = vst [vmem:[#allocation51_spill] sm:$0xff] %v6061_v41  ;;  %749 = vperm.xlu0 %5558, %v5818_v25   ;;  %11395 = vst [vmem:[#allocation59_spill] sm:$0xff] %v6098_v3  ;;  %v6119_v3 = vmul.f32 %v5902_v56, %v6011_v1  ;;  %v6178_v34 = vmul.f32 %v5902_v56, %v6041_v24  ;;  %v6182_v63 = vmul.f32 %v5907_v58, %v6041_v24 }
  0xb2   : > { %11396 = vst [vmem:[#allocation60_spill] sm:$0xff] %v6102_v6  ;;  %v6104_v40 = vpop.permute.xlu1 %483  ;;  %v6106_v25 = vpop.permute.xlu0 %613  ;;  %11404 = vst [vmem:[#allocation68_spill] sm:$0xff] %v6135_v29  ;;  %v6165_v6 = vmul.f32 %v5929_v5, %v5922_v2  ;;  %v6194_v31 = vmul.f32 %v5915_v61, %v6041_v24  ;;  %v6198_v38 = vmul.f32 %v5918_v62, %v6041_v24 }
  0xb3   : > { %11397 = vst [vmem:[#allocation61_spill] sm:$0xff] %v6104_v40  ;;  %11398 = vst [vmem:[#allocation62_spill] sm:$0xff] %v6106_v25  ;;  %1220 = vperm.xlu1 %5551, %v5781_v15   ;;  %v6131_v15 = vmul.f32 %v5918_v62, %v6011_v1  ;;  %v651_v29 = vmul.f32 %v5898_v55, %v5964_v33  ;;  %v6224_v24 = vmul.f32 %v5907_v58, %v6106_v25 }
  0xb4   : > { %11400 = vst [vmem:[#allocation64_spill] sm:$0xff] %v6119_v3  ;;  %11405 = vst [vmem:[#allocation69_spill] sm:$0xff] %v6145_v45  ;;  %v6246_v59 = vmul.f32 %v5885_v51, %v6104_v40  ;;  %v6252_v45 = vmul.f32 %v5888_v52, %v6104_v40  ;;  %v6256_v26 = vmul.f32 %v5891_v53, %v6104_v40 }
  0xb5   : > { %11403 = vst [vmem:[#allocation67_spill] sm:$0xff] %v6131_v15  ;;  %1244 = vperm.xlu0 %5558, %v5847_v30   ;;  %11406 = vst [vmem:[#allocation70_spill] sm:$0xff] %v6149_v44  ;;  %v6212_v30 = vmul.f32 %v5902_v56, %v5922_v2  ;;  %v6234_v2 = vmul.f32 %v5915_v61, %v6106_v25  ;;  %v6242_v44 = vmul.f32 %v5878_v46, %v6104_v40 }
  0xb6   : > { %v6151_v1 = vpop.permute.xlu1 %493  ;;  %v6153_v57 = vpop.permute.xlu0 %621  ;;  %11411 = vst [vmem:[#allocation75_spill] sm:$0xff] %v6165_v6  ;;  %11412 = vst [vmem:[#allocation76_spill] sm:$0xff] %v6169_v39  ;;  %v6220_v6 = vmul.f32 %v5902_v56, %v6106_v25  ;;  %v6229_v39 = vld [vmem:[%s5719_s15 + $0xf0] sm:$0xff]  ;;  %v6267_v33 = vadd.f32 %v651_v29, %v527_v50 }
  0xb7   : > { %11407 = vst [vmem:[#allocation71_spill] sm:$0xff] %v6151_v1  ;;  %11408 = vst [vmem:[#allocation72_spill] sm:$0xff] %v6153_v57  ;;  %5552 = vset.pattern.permute.xlu1 %v11413_v36  ;;  %v6173_v1 = vld [vmem:[%s5719_s15 + $0xd0] sm:$0x3] }
  0xb8   : > { %11414 = vst [vmem:[#allocation77_spill] sm:$0xff] %v6178_v34  ;;  %11415 = vst [vmem:[#allocation78_spill] sm:$0xff] %v6182_v63  ;;  %845 = vperm.xlu1 %5552, %v6139_v9  }
  0xb9   : > { %5561 = vset.pattern.permute.xlu0 %v11372_v10  ;;  %11416 = vst [vmem:[#allocation79_spill] sm:$0xff] %v6194_v31  ;;  %11417 = vst [vmem:[#allocation80_spill] sm:$0xff] %v6198_v38  ;;  %v6272_v38 = vmul.f32 %v5935_v7, %v5962_v32  ;;  %v6276_v31 = vmul.f32 %v5871_v43, %v6104_v40 }
  0xba   : > { %v6202_v8 = vpop.permute.xlu1 %503  ;;  %1046 = vperm.xlu0 %5561, %v6173_v1   ;;  %v6205_v57 = vpop.permute.xlu0 %629  ;;  %11420 = vst [vmem:[#allocation83_spill] sm:$0xff] %v6212_v30  ;;  %11421 = vst [vmem:[#allocation84_spill] sm:$0xff] %v6216_v12  ;;  %v6238_v12 = vmul.f32 %v5918_v62, %v6106_v25 }
  0xbb   : > { %11418 = vst [vmem:[#allocation81_spill] sm:$0xff] %v6202_v8  ;;  %11419 = vst [vmem:[#allocation82_spill] sm:$0xff] %v6205_v57  ;;  %v6291_v32 = vmul.f32 %v5871_v43, %v6202_v8 }
  0xbc   : > { %11422 = vst [vmem:[#allocation85_spill] sm:$0xff] %v6220_v6  ;;  %11423 = vst [vmem:[#allocation86_spill] sm:$0xff] %v6224_v24  ;;  %830 = vperm.xlu1 %5552, %v5791_v18  }
  0xbd   : > { %11424 = vst [vmem:[#allocation87_spill] sm:$0xff] %v6238_v12  ;;  %11425 = vst [vmem:[#allocation88_spill] sm:$0xff] %v6242_v44  ;;  %v11449_v44 = vrot.slane %v6018_v19, 1 }
  0xbe   : > { %11426 = vst [vmem:[#allocation89_spill] sm:$0xff] %v6246_v59  ;;  %11427 = vst [vmem:[#allocation90_spill] sm:$0xff] %v6252_v45  ;;  %v6258_v63 = vpop.permute.xlu1 %513  ;;  %v6260_v34 = vpop.permute.xlu0 %637  ;;  %1919 = vperm.xlu0 %5561, %v6229_v39   ;;  %v11447_v59 = vrot.slane %v6004_v0, 2 }
  0xbf   : > { %11428 = vst [vmem:[#allocation91_spill] sm:$0xff] %v6256_v26  ;;  %11429 = vst [vmem:[#allocation92_spill] sm:$0xff] %v6258_v63  ;;  %v6302_v50 = vmul.f32 %v5878_v46, %v6258_v63  ;;  %v6306_v18 = vmul.f32 %v5885_v51, %v6258_v63  ;;  %v6310_v29 = vmul.f32 %v5888_v52, %v6258_v63  ;;  %v6338_v26 = vld [vmem:[%s5719_s15 + $0x100] sm:$0x3] }
  0xc0   : > { %11430 = vst [vmem:[#allocation93_spill] sm:$0xff] %v6260_v34  ;;  %11432 = vst [vmem:[#allocation95_spill] sm:$0xff] %v6267_v33  ;;  %v6280_v34 = vmul.f32 %v5898_v55, %v6106_v25  ;;  %835 = vperm.xlu1 %5552, %v5796_v20   ;;  %v6295_v25 = vmul.f32 %v5898_v55, %v6205_v57  ;;  %v6314_v42 = vmul.f32 %v5891_v53, %v6258_v63 }
  0xc1   : > { %11433 = vst [vmem:[#allocation96_spill] sm:$0xff] %v6272_v38  ;;  %11434 = vst [vmem:[#allocation97_spill] sm:$0xff] %v6276_v31  ;;  %v6330_v63 = vmul.f32 %v5880_v47, %v6008_v35  ;;  %v6334_v57 = vmul.f32 %v5935_v7, %v6008_v35  ;;  %v11445_v7 = vrot.slane %v6000_v27, 1 }
  0xc2   : > { %11435 = vst [vmem:[#allocation98_spill] sm:$0xff] %v6280_v34  ;;  %11436 = vst [vmem:[#allocation99_spill] sm:$0xff] %v6291_v32  ;;  %v1019_v40 = vpop.permute.xlu0 %1018  ;;  %5565 = vset.pattern.permute.xlu0 %v11379_v49 }
  0xc3   : > { %11437 = vst [vmem:[#allocation100_spill] sm:$0xff] %v6295_v25  ;;  %11438 = vst [vmem:[#allocation101_spill] sm:$0xff] %v6306_v18  ;;  %v1062_v15 = vmul.f32 %v5902_v56, %v1019_v40  ;;  %v1565_v54 = vmul.f32 %v5907_v58, %v1019_v40  ;;  %v2191_v25 = vmul.f32 %v5915_v61, %v1019_v40  ;;  %v566_v8 = vpop.permute.xlu1 %565  ;;  %1971 = vperm.xlu0 %5565, %v6229_v39  }
  0xc4   : > { %11439 = vst [vmem:[#allocation102_spill] sm:$0xff] %v6310_v29  ;;  %11440 = vst [vmem:[#allocation103_spill] sm:$0xff] %v6314_v42  ;;  %v2657_v32 = vmul.f32 %v5918_v62, %v1019_v40  ;;  %v6322_v34 = vmul.f32 %v5902_v56, %v566_v8  ;;  %v6325_v31 = vmul.f32 %v5907_v58, %v566_v8  ;;  %5553 = vset.pattern.permute.xlu1 %v11372_v10 }
  0xc5   : > { %11443 = vst [vmem:[#allocation106_spill] sm:$0xff] %v6330_v63  ;;  %11444 = vst [vmem:[#allocation107_spill] sm:$0xff] %v6334_v57  ;;  %v1125_v40 = vrot.slane %v1062_v15, 1  ;;  %v1628_v38 = vrot.slane %v1565_v54, 2  ;;  %v2252_v11 = vrot.slane %v2191_v25, 1  ;;  %1042 = vperm.xlu1 %5553, %v6139_v9   ;;  %v11451_v25 = vrot.slane %v6026_v28, 2 }
  0xc6   : > { %11441 = vst [vmem:[#allocation104_spill] sm:$0xff] %v6322_v34  ;;  %11442 = vst [vmem:[#allocation105_spill] sm:$0xff] %v6325_v31  ;;  %v2718_v30 = vrot.slane %v2657_v32, 2  ;;  %v1027_v33 = vpop.permute.xlu0 %1026  ;;  %v6350_v32 = vmul.f32 %v5898_v55, %v566_v8  ;;  %v11457_v29 = vrot.slane %v6325_v31, 2 }
  0xc7   : > { %v6347_v15 = vsel %vm922_vm0, %v11445_v7, %v1125_v40  ;;  %v570_v45 = vpop.permute.xlu1 %569  ;;  %2340 = vperm.xlu0 %5565, %v6338_v26   ;;  %v6358_v63 = vsel %vm1465_vm1, %v11447_v59, %v1628_v38  ;;  %v6363_v7 = vsel %vm922_vm0, %v11449_v44, %v2252_v11  ;;  %v1068_v8 = vmul.f32 %v5902_v56, %v1027_v33  ;;  %v6379_v11 = vld [vmem:[%s5719_s15 + $0x110] sm:$0xff] }
  0xc8   : > { %11446 = vst [vmem:[#allocation108_spill] sm:$0xff] %v6347_v15  ;;  %11448 = vst [vmem:[#allocation109_spill] sm:$0xff] %v6358_v63  ;;  %v1571_v40 = vmul.f32 %v5907_v58, %v1027_v33  ;;  %v6370_v54 = vsel %vm1465_vm1, %v11451_v25, %v2718_v30  ;;  %v2197_v35 = vmul.f32 %v5915_v61, %v1027_v33  ;;  %v11454_v25 = vrot.slane %v6322_v34, 1 }
  0xc9   : > { %11450 = vst [vmem:[#allocation110_spill] sm:$0xff] %v6363_v7  ;;  %11452 = vst [vmem:[#allocation111_spill] sm:$0xff] %v6370_v54  ;;  %v2663_v57 = vmul.f32 %v5918_v62, %v1027_v33  ;;  %v6375_v59 = vmul.f32 %v5927_v4, %v1027_v33  ;;  %5554 = vset.pattern.permute.xlu1 %v11379_v49  ;;  %v1135_v38 = vrot.slane %v1068_v8, 1  ;;  %v11455_v54 = vrot.slane %v5971_v23, 1 }
  0xca   : > { %v1638_v44 = vrot.slane %v1571_v40, 2  ;;  %v646_v7 = vmul.f32 %v5898_v55, %v570_v45  ;;  %v1060_v63 = vmul.f32 %v5902_v56, %v570_v45  ;;  %1232 = vperm.xlu1 %5554, %v5786_v16   ;;  %v1039_v30 = vpop.permute.xlu0 %1038  ;;  %v2262_v42 = vrot.slane %v2197_v35, 1 }
  0xcb   : > { %11453 = vst [vmem:[#allocation112_spill] sm:$0xff] %v6375_v59  ;;  %v6389_v15 = vsel %vm922_vm0, %v11455_v54, %v11454_v25  ;;  %v2728_v18 = vrot.slane %v2663_v57, 2  ;;  %v1563_v8 = vmul.f32 %v5907_v58, %v570_v45  ;;  %v6392_v40 = vpop.permute.xlu1 %577  ;;  %5569 = vset.pattern.permute.xlu0 %v11413_v36  ;;  %v11458_v16 = vrot.slane %v5975_v37, 2 }
  0xcc   : > { %11456 = vst [vmem:[#allocation113_spill] sm:$0xff] %v6392_v40  ;;  %v11460_v23 = vrot.slane %v6061_v41, 1  ;;  %v6409_v35 = vmul.f32 %v5913_v60, %v1027_v33  ;;  %2966 = vperm.xlu0 %5569, %v6379_v11   ;;  %v11463_v25 = vrot.slane %v6065_v22, 2  ;;  %v6418_v37 = vadd.f32 %v646_v7, %v5948_v14  ;;  %v6421_v41 = vld [vmem:[%s5719_s15 + $0x118] sm:$0x3] }
  0xcd   : > { %v6400_v34 = vsel %vm1465_vm1, %v11458_v16, %v11457_v29  ;;  %v1122_v29 = vrot.slane %v1060_v63, 1  ;;  %v1625_v16 = vrot.slane %v1563_v8, 2  ;;  %v2189_v33 = vmul.f32 %v5915_v61, %v570_v45 }
  0xce   : > { %11459 = vst [vmem:[#allocation114_spill] sm:$0xff] %v6400_v34  ;;  %v6405_v54 = vsel %vm922_vm0, %v11460_v23, %v1135_v38  ;;  %11462 = vst [vmem:[#allocation116_spill] sm:$0xff] %v6409_v35  ;;  %v6415_v31 = vsel %vm1465_vm1, %v11463_v25, %v1638_v44  ;;  %v11465_v38 = vrot.slane %v6069_v13, 1  ;;  %v2655_v57 = vmul.f32 %v5918_v62, %v570_v45  ;;  %v1031_v44 = vpop.permute.xlu0 %1030 }
  0xcf   : > { %11461 = vst [vmem:[#allocation115_spill] sm:$0xff] %v6405_v54  ;;  %11464 = vst [vmem:[#allocation117_spill] sm:$0xff] %v6415_v31  ;;  %v1077_v35 = vmul.f32 %v5902_v56, %v1039_v30  ;;  %1236 = vperm.xlu1 %5554, %v6139_v9   ;;  %v11467_v14 = vrot.slane %v6090_v48, 2  ;;  %v1580_v7 = vmul.f32 %v5907_v58, %v1039_v30  ;;  %v6440_v25 = vpop.permute.xlu1 %585  ;;  %v11471_v9 = vrot.slane %v6000_v27, 1 }
  0xd0   : > { %v6426_v23 = vsel %vm922_vm0, %v11465_v38, %v2262_v42  ;;  %v2206_v8 = vmul.f32 %v5915_v61, %v1039_v30  ;;  %v2672_v42 = vmul.f32 %v5918_v62, %v1039_v30  ;;  %11469 = vst [vmem:[#allocation120_spill] sm:$0xff] %v6440_v25  ;;  %v2249_v38 = vrot.slane %v2189_v33, 1  ;;  %3119 = vperm.xlu0 %5569, %v6421_v41  }
  0xd1   : > { %11466 = vst [vmem:[#allocation118_spill] sm:$0xff] %v6426_v23  ;;  %v6435_v63 = vsel %vm1465_vm1, %v11467_v14, %v2728_v18  ;;  %v2715_v59 = vrot.slane %v2655_v57, 2  ;;  %v1150_v31 = vrot.slane %v1077_v35, 1  ;;  %v6443_v23 = vmul.f32 %v5927_v4, %v1039_v30 }
  0xd2   : > { %11468 = vst [vmem:[#allocation119_spill] sm:$0xff] %v6435_v63  ;;  %v6449_v18 = vsel %vm922_vm0, %v1122_v29, %v11471_v9  ;;  %v11472_v14 = vrot.slane %v6004_v0, 2  ;;  %v6457_v63 = vmul.f32 %v5929_v5, %v570_v45  ;;  %v1653_v57 = vrot.slane %v1580_v7, 2  ;;  %v1035_v0 = vpop.permute.xlu0 %1034 }
  0xd3   : > { %11470 = vst [vmem:[#allocation121_spill] sm:$0xff] %v6443_v23  ;;  %v11474_v35 = vrot.slane %v6018_v19, 1  ;;  %v2277_v13 = vrot.slane %v2206_v8, 1  ;;  %v2743_v22 = vrot.slane %v2672_v42, 2  ;;  %v6465_v27 = vmul.f32 %v5913_v60, %v1039_v30  ;;  %1228 = vperm.xlu1 %5554, %v5796_v20   ;;  %v6484_v42 = vpop.permute.xlu1 %593 }
  0xd4   : > { %v6454_v48 = vsel %vm1465_vm1, %v1625_v16, %v11472_v14  ;;  %11473 = vst [vmem:[#allocation122_spill] sm:$0xff] %v6457_v63  ;;  %v11477_v29 = vrot.slane %v6026_v28, 2  ;;  %v11479_v45 = vrot.slane %v6220_v6, 1  ;;  %v11481_v7 = vrot.slane %v6224_v24, 2  ;;  %11483 = vst [vmem:[#allocation128_spill] sm:$0xff] %v6484_v42  ;;  %5572 = vset.pattern.permute.xlu0 %v11379_v49 }
  0xd5   : > { %v6462_v33 = vsel %vm922_vm0, %v2249_v38, %v11474_v35  ;;  %11476 = vst [vmem:[#allocation124_spill] sm:$0xff] %v6465_v27  ;;  %v6488_v20 = vmul.f32 %v5902_v56, %v6392_v40  ;;  %v6492_v28 = vmul.f32 %v5907_v58, %v6392_v40  ;;  %v1071_v38 = vmul.f32 %v5902_v56, %v1031_v44 }
  0xd6   : > { %11475 = vst [vmem:[#allocation123_spill] sm:$0xff] %v6462_v33  ;;  %v6471_v16 = vsel %vm1465_vm1, %v2715_v59, %v11477_v29  ;;  %v6476_v19 = vsel %vm922_vm0, %v11479_v45, %v1150_v31  ;;  %v6481_v8 = vsel %vm1465_vm1, %v11481_v7, %v1653_v57  ;;  %v6496_v31 = vmul.f32 %v5915_v61, %v6392_v40 }
  0xd7   : > { %11478 = vst [vmem:[#allocation125_spill] sm:$0xff] %v6471_v16  ;;  %11480 = vst [vmem:[#allocation126_spill] sm:$0xff] %v6476_v19  ;;  %v6500_v59 = vmul.f32 %v5918_v62, %v6392_v40  ;;  %v1574_v9 = vmul.f32 %v5907_v58, %v1031_v44  ;;  %v2200_v14 = vmul.f32 %v5915_v61, %v1031_v44  ;;  %3070 = vperm.xlu0 %5572, %v6379_v11   ;;  %v6524_v24 = vpop.permute.xlu1 %601 }
  0xd8   : > { %11482 = vst [vmem:[#allocation127_spill] sm:$0xff] %v6481_v8  ;;  %11484 = vst [vmem:[#allocation129_spill] sm:$0xff] %v6488_v20  ;;  %v2666_v57 = vmul.f32 %v5918_v62, %v1031_v44  ;;  %v11488_v35 = vrot.slane %v6234_v2, 1  ;;  %v11490_v45 = vrot.slane %v6238_v12, 2  ;;  %v6520_v30 = vmul.f32 %v5898_v55, %v6392_v40  ;;  %5556 = vset.pattern.permute.xlu1 %v11413_v36 }
  0xd9   : > { %11485 = vst [vmem:[#allocation130_spill] sm:$0xff] %v6492_v28  ;;  %11486 = vst [vmem:[#allocation131_spill] sm:$0xff] %v6496_v31  ;;  %v1140_v23 = vrot.slane %v1071_v38, 1  ;;  %v1643_v16 = vrot.slane %v1574_v9, 2  ;;  %v2267_v8 = vrot.slane %v2200_v14, 1  ;;  %850 = vperm.xlu1 %5556, %v6173_v1   ;;  %v6533_v27 = vmul.f32 %v5927_v4, %v1031_v44 }
  0xda   : > { %11487 = vst [vmem:[#allocation132_spill] sm:$0xff] %v6500_v59  ;;  %v6511_v29 = vsel %vm922_vm0, %v11488_v35, %v2277_v13  ;;  %v6516_v7 = vsel %vm1465_vm1, %v11490_v45, %v2743_v22  ;;  %v2733_v19 = vrot.slane %v2666_v57, 2  ;;  %11492 = vst [vmem:[#allocation135_spill] sm:$0xff] %v6524_v24  ;;  %v6527_v13 = vpop.permute.xlu0 %418  ;;  %v11494_v38 = vrot.slane %v6119_v3, 1 }
  0xdb   : > { %11489 = vst [vmem:[#allocation133_spill] sm:$0xff] %v6511_v29  ;;  %11491 = vst [vmem:[#allocation134_spill] sm:$0xff] %v6516_v7  ;;  %v6541_v14 = vmul.f32 %v5913_v60, %v1031_v44  ;;  %v6545_v57 = vmul.f32 %v5898_v55, %v6440_v25  ;;  %v6549_v35 = vmul.f32 %v5902_v56, %v6440_v25  ;;  %v11498_v45 = vrot.slane %v6123_v17, 2  ;;  %v11502_v44 = vld [vmem:[#allocation67_spill] sm:$0xff] }
  0xdc   : > { %11493 = vst [vmem:[#allocation136_spill] sm:$0xff] %v6533_v27  ;;  %v6538_v9 = vsel %vm922_vm0, %v11494_v38, %v1140_v23  ;;  %v11500_v7 = vrot.slane %v6127_v21, 1  ;;  %v11503_v38 = vrot.slane %v11502_v44, 2  ;;  %v6572_v59 = vmul.f32 %v5915_v61, %v6440_v25 }
  0xdd   : > { %11495 = vst [vmem:[#allocation137_spill] sm:$0xff] %v6538_v9  ;;  %11496 = vst [vmem:[#allocation138_spill] sm:$0xff] %v6541_v14  ;;  %v6554_v22 = vsel %vm1465_vm1, %v11498_v45, %v1643_v16  ;;  %v6568_v14 = vmul.f32 %v5907_v58, %v6440_v25  ;;  %v6576_v16 = vmul.f32 %v5918_v62, %v6440_v25  ;;  %v6580_v45 = vpop.permute.xlu1 %609  ;;  %5557 = vset.pattern.permute.xlu1 %v11379_v49 }
  0xde   : > { %11497 = vst [vmem:[#allocation139_spill] sm:$0xff] %v6549_v35  ;;  %11499 = vst [vmem:[#allocation140_spill] sm:$0xff] %v6554_v22  ;;  %v6559_v23 = vsel %vm922_vm0, %v11500_v7, %v2267_v8  ;;  %v6564_v12 = vsel %vm1465_vm1, %v11503_v38, %v2733_v19  ;;  %v1074_v8 = vmul.f32 %v5902_v56, %v1035_v0  ;;  %v6583_v19 = vpop.permute.xlu0 %423 }
  0xdf   : > { %11501 = vst [vmem:[#allocation141_spill] sm:$0xff] %v6559_v23  ;;  %11504 = vst [vmem:[#allocation142_spill] sm:$0xff] %v6564_v12  ;;  %v1577_v7 = vmul.f32 %v5907_v58, %v1035_v0  ;;  %v2203_v44 = vmul.f32 %v5915_v61, %v1035_v0  ;;  %v2669_v29 = vmul.f32 %v5918_v62, %v1035_v0  ;;  %v11510_v12 = vld [vmem:[#allocation2_spill] sm:$0xff] }
  0xe0   : > { %11505 = vst [vmem:[#allocation143_spill] sm:$0xff] %v6568_v14  ;;  %11506 = vst [vmem:[#allocation144_spill] sm:$0xff] %v6572_v59  ;;  %v6589_v6 = vmul.f32 %v5927_v4, %v1035_v0  ;;  %753 = vperm.xlu1 %5557, %v11510_v12   ;;  %v6595_v23 = vmul.f32 %v5929_v5, %v6440_v25  ;;  %v1145_v21 = vrot.slane %v1074_v8, 1 }
  0xe1   : > { %11507 = vst [vmem:[#allocation145_spill] sm:$0xff] %v6576_v16  ;;  %11508 = vst [vmem:[#allocation146_spill] sm:$0xff] %v6580_v45  ;;  %v1648_v9 = vrot.slane %v1577_v7, 2  ;;  %v2272_v27 = vrot.slane %v2203_v44, 1  ;;  %v2738_v3 = vrot.slane %v2669_v29, 2  ;;  %v6602_v12 = vmul.f32 %v5913_v60, %v1035_v0  ;;  %v6608_v25 = vpop.permute.xlu1 %617  ;;  %v11516_v7 = vld [vmem:[#allocation77_spill] sm:$0xff] }
  0xe2   : > { %11509 = vst [vmem:[#allocation147_spill] sm:$0xff] %v6589_v6  ;;  %11511 = vst [vmem:[#allocation2_spill] sm:$0xff] %v6595_v23  ;;  %v6606_v22 = vmul.f32 %v5902_v56, %v6484_v42  ;;  %v6610_v8 = vpop.permute.xlu0 %438  ;;  %v11517_v17 = vrot.slane %v11516_v7, 1  ;;  %v11519_v29 = vld [vmem:[#allocation78_spill] sm:$0xff]  ;;  %v6624_v0 = vmul.f32 %v5898_v55, %v6484_v42  ;;  %v6628_v38 = vmul.f32 %v5907_v58, %v6484_v42  ;;  %v11524_v6 = vld [vmem:[#allocation79_spill] sm:$0xff] }
  0xe3   : > { %11512 = vst [vmem:[#allocation148_spill] sm:$0xff] %v6602_v12  ;;  %11514 = vst [vmem:[#allocation150_spill] sm:$0xff] %v6608_v25  ;;  %v11520_v54 = vrot.slane %v11519_v29, 2  ;;  %v11523_v12 = vld [vmem:[#allocation4_spill] sm:$0xff]  ;;  %v11525_v16 = vrot.slane %v11524_v6, 1  ;;  %v6652_v6 = vmul.f32 %v5929_v5, %v6484_v42  ;;  %v6688_v7 = vmul.f32 %v5878_v46, %v6527_v13  ;;  %v11540_v60 = vld [vmem:[#allocation3_spill] sm:$0xff] }
  0xe4   : > { %11513 = vst [vmem:[#allocation149_spill] sm:$0xff] %v6606_v22  ;;  %11515 = vst [vmem:[#allocation151_spill] sm:$0xff] %v6610_v8  ;;  %v6615_v44 = vsel %vm922_vm0, %v11517_v17, %v1145_v21  ;;  %757 = vperm.xlu1 %5557, %v11523_v12   ;;  %v11527_v21 = vld [vmem:[#allocation80_spill] sm:$0xff]  ;;  %v6669_v12 = vmul.f32 %v5915_v61, %v6524_v24  ;;  %v6711_v22 = vmul.f32 %v5898_v55, %v6580_v45 }
  0xe5   : > { %11518 = vst [vmem:[#allocation152_spill] sm:$0xff] %v6615_v44  ;;  %v6620_v31 = vsel %vm1465_vm1, %v11520_v54, %v1648_v9  ;;  %11522 = vst [vmem:[#allocation154_spill] sm:$0xff] %v6628_v38  ;;  %v6634_v17 = vsel %vm922_vm0, %v11525_v16, %v2272_v27  ;;  %v11528_v29 = vrot.slane %v11527_v21, 2  ;;  %v6643_v9 = vmul.f32 %v5915_v61, %v6484_v42  ;;  %v11543_v38 = vld [vmem:[#allocation41_spill] sm:$0xff] }
  0xe6   : > { %11521 = vst [vmem:[#allocation153_spill] sm:$0xff] %v6620_v31  ;;  %11526 = vst [vmem:[#allocation4_spill] sm:$0xff] %v6634_v17  ;;  %v6647_v31 = vmul.f32 %v5918_v62, %v6484_v42  ;;  %v6656_v27 = vmul.f32 %v5902_v56, %v6524_v24  ;;  %v6673_v21 = vmul.f32 %v5918_v62, %v6524_v24  ;;  %v6675_v42 = vpop.permute.xlu1 %625 }
  0xe7   : > { %v6639_v54 = vsel %vm1465_vm1, %v11528_v29, %v2738_v3  ;;  %11530 = vst [vmem:[#allocation156_spill] sm:$0xff] %v6643_v9  ;;  %11532 = vst [vmem:[#allocation158_spill] sm:$0xff] %v6652_v6  ;;  %v6660_v3 = vmul.f32 %v5907_v58, %v6524_v24  ;;  %v6665_v29 = vmul.f32 %v5898_v55, %v6524_v24 }
  0xe8   : > { %11529 = vst [vmem:[#allocation155_spill] sm:$0xff] %v6639_v54  ;;  %11531 = vst [vmem:[#allocation157_spill] sm:$0xff] %v6647_v31  ;;  %v6677_v54 = vpop.permute.xlu0 %448  ;;  %v6682_v16 = vmul.f32 %v5929_v5, %v6524_v24  ;;  %v520_v44 = vmul.f32 %v5871_v43, %v6527_v13  ;;  %761 = vperm.xlu1 %5557, %v11540_v60   ;;  %v1405_v17 = vmul.f32 %v5885_v51, %v6527_v13 }
  0xe9   : > { %11533 = vst [vmem:[#allocation159_spill] sm:$0xff] %v6656_v27  ;;  %11534 = vst [vmem:[#allocation160_spill] sm:$0xff] %v6660_v3  ;;  %v6700_v9 = vmul.f32 %v5902_v56, %v6580_v45  ;;  %v6704_v60 = vmul.f32 %v5907_v58, %v6580_v45  ;;  %v2204_v13 = vmul.f32 %v5915_v61, %v6580_v45 }
  0xea   : > { %11535 = vst [vmem:[#allocation161_spill] sm:$0xff] %v6669_v12  ;;  %11536 = vst [vmem:[#allocation162_spill] sm:$0xff] %v6673_v21  ;;  %v6707_v31 = vadd.f32 %v11543_v38, %v520_v44  ;;  %v6719_v24 = vpop.permute.xlu1 %633  ;;  %v1466_v12 = vrot.slane %v1405_v17, 2  ;;  %v521_v38 = vmul.f32 %v5871_v43, %v6583_v19  ;;  %v6728_v44 = vmul.f32 %v5878_v46, %v6583_v19  ;;  %v11548_v17 = vld [vmem:[#allocation5_spill] sm:$0xff] }
  0xeb   : > { %11537 = vst [vmem:[#allocation163_spill] sm:$0xff] %v6675_v42  ;;  %11538 = vst [vmem:[#allocation164_spill] sm:$0xff] %v6677_v54  ;;  %v6734_v27 = vmul.f32 %v5929_v5, %v6580_v45  ;;  %v2274_v59 = vrot.slane %v2204_v13, 1  ;;  %v6738_v21 = vmul.f32 %v5885_v51, %v6583_v19  ;;  %v6745_v23 = vmul.f32 %v5902_v56, %v6608_v25 }
  0xec   : > { %11539 = vst [vmem:[#allocation165_spill] sm:$0xff] %v6682_v16  ;;  %11541 = vst [vmem:[#allocation3_spill] sm:$0xff] %v6700_v9  ;;  %v6717_v16 = vmul.f32 %v5918_v62, %v6580_v45  ;;  %v6721_v6 = vpop.permute.xlu0 %458  ;;  %5559 = vset.pattern.permute.xlu1 %v11372_v10  ;;  %v6749_v3 = vmul.f32 %v5907_v58, %v6608_v25  ;;  %v6752_v13 = vadd.f32 %v6350_v32, %v521_v38 }
  0xed   : > { %11542 = vst [vmem:[#allocation166_spill] sm:$0xff] %v6704_v60  ;;  %11545 = vst [vmem:[#allocation167_spill] sm:$0xff] %v6719_v24  ;;  %1050 = vperm.xlu1 %5559, %v11548_v17   ;;  %v6757_v17 = vmul.f32 %v5898_v55, %v6608_v25  ;;  %v6761_v35 = vmul.f32 %v5915_v61, %v6608_v25  ;;  %v6773_v38 = vmul.f32 %v5929_v5, %v6608_v25 }
  0xee   : > { %11544 = vst [vmem:[#allocation41_spill] sm:$0xff] %v6717_v16  ;;  %11546 = vst [vmem:[#allocation168_spill] sm:$0xff] %v6721_v6  ;;  %v11553_v16 = vrot.slane %v6234_v2, 1  ;;  %v524_v19 = vmul.f32 %v5871_v43, %v6610_v8  ;;  %v6783_v2 = vmul.f32 %v5878_v46, %v6610_v8  ;;  %v6797_v60 = vmul.f32 %v5918_v62, %v6608_v25 }
  0xef   : > { %11547 = vst [vmem:[#allocation169_spill] sm:$0xff] %v6734_v27  ;;  %11549 = vst [vmem:[#allocation5_spill] sm:$0xff] %v6745_v23  ;;  %v6777_v27 = vpop.permute.xlu1 %685  ;;  %v6801_v9 = vmul.f32 %v5888_v52, %v6610_v8  ;;  %v6838_v28 = vmul.f32 %v5918_v62, %v6675_v42  ;;  %v526_v23 = vmul.f32 %v5871_v43, %v6677_v54 }
  0xf0   : > { %11550 = vst [vmem:[#allocation170_spill] sm:$0xff] %v6749_v3  ;;  %11551 = vst [vmem:[#allocation171_spill] sm:$0xff] %v6761_v35  ;;  %v6763_v14 = vpop.permute.xlu0 %468  ;;  %v6768_v45 = vsel %vm922_vm0, %v2274_v59, %v11553_v16  ;;  %v6787_v59 = vmul.f32 %v5885_v51, %v6610_v8  ;;  %v11556_v16 = vrot.slane %v6738_v21, 2  ;;  %v6810_v3 = vadd.f32 %v6520_v30, %v524_v19 }
  0xf1   : > { %11552 = vst [vmem:[#allocation172_spill] sm:$0xff] %v6763_v14  ;;  %11554 = vst [vmem:[#allocation173_spill] sm:$0xff] %v6768_v45  ;;  %5560 = vset.pattern.permute.xlu1 %v11379_v49  ;;  %v6805_v45 = vmul.f32 %v5891_v53, %v6610_v8  ;;  %v6830_v30 = vmul.f32 %v5915_v61, %v6675_v42  ;;  %v6845_v4 = vmul.f32 %v5929_v5, %v6675_v42 }
  0xf2   : > { %11555 = vst [vmem:[#allocation174_spill] sm:$0xff] %v6773_v38  ;;  %v6793_v32 = vsel %vm1465_vm1, %v1466_v12, %v11556_v16  ;;  %11557 = vst [vmem:[#allocation175_spill] sm:$0xff] %v6797_v60  ;;  %1240 = vperm.xlu1 %5560, %v6173_v1   ;;  %v6814_v12 = vmul.f32 %v5902_v56, %v6675_v42  ;;  %v6818_v16 = vmul.f32 %v5907_v58, %v6675_v42  ;;  %v11600_v58 = vld [vmem:[#allocation18_spill] sm:$0xff] }
  0xf3   : > { %11558 = vst [vmem:[#allocation176_spill] sm:$0xff] %v6810_v3  ;;  %v6826_v1 = vmul.f32 %v5898_v55, %v6675_v42  ;;  %11562 = vst [vmem:[#allocation180_spill] sm:$0xff] %v6830_v30  ;;  %v6832_v19 = vpop.permute.xlu1 %693  ;;  %v6849_v20 = vmul.f32 %v5878_v46, %v6677_v54  ;;  %v6853_v35 = vmul.f32 %v5885_v51, %v6677_v54  ;;  %v6882_v30 = vld [vmem:[%s5719_s15 + $0xf8] sm:$0xff] }
  0xf4   : > { %11559 = vst [vmem:[#allocation177_spill] sm:$0xff] %v6814_v12  ;;  %11560 = vst [vmem:[#allocation178_spill] sm:$0xff] %v6818_v16  ;;  %v6820_v25 = vpop.permute.xlu0 %478  ;;  %v6860_v60 = vmul.f32 %v5888_v52, %v6677_v54  ;;  %v6864_v42 = vmul.f32 %v5891_v53, %v6677_v54  ;;  %v6871_v33 = vadd.f32 %v6545_v57, %v526_v23 }
  0xf5   : > { %11561 = vst [vmem:[#allocation179_spill] sm:$0xff] %v6820_v25  ;;  %11563 = vst [vmem:[#allocation181_spill] sm:$0xff] %v6838_v28  ;;  %v6875_v62 = vmul.f32 %v5880_v47, %v6677_v54  ;;  %v6879_v38 = vmul.f32 %v5902_v56, %v6719_v24  ;;  %v6888_v12 = vmul.f32 %v5898_v55, %v6719_v24 }
  0xf6   : > { %11564 = vst [vmem:[#allocation182_spill] sm:$0xff] %v6845_v4  ;;  %11565 = vst [vmem:[#allocation183_spill] sm:$0xff] %v6849_v20  ;;  %5562 = vset.pattern.permute.xlu1 %v11413_v36  ;;  %v6892_v57 = vmul.f32 %v5915_v61, %v6719_v24  ;;  %v528_v54 = vmul.f32 %v5871_v43, %v6721_v6  ;;  %v6901_v16 = vmul.f32 %v5878_v46, %v6721_v6 }
  0xf7   : > { %11566 = vst [vmem:[#allocation184_spill] sm:$0xff] %v6853_v35  ;;  %11567 = vst [vmem:[#allocation185_spill] sm:$0xff] %v6860_v60  ;;  %1866 = vperm.xlu1 %5562, %v6229_v39   ;;  %v6894_v23 = vpop.permute.xlu1 %697  ;;  %v6905_v39 = vmul.f32 %v5885_v51, %v6721_v6  ;;  %v6914_v28 = vmul.f32 %v5888_v52, %v6721_v6  ;;  %v6918_v61 = vmul.f32 %v5891_v53, %v6721_v6 }
  0xf8   : > { %11568 = vst [vmem:[#allocation186_spill] sm:$0xff] %v6864_v42  ;;  %v6867_v4 = vpop.permute.xlu0 %488  ;;  %11570 = vst [vmem:[#allocation188_spill] sm:$0xff] %v6871_v33  ;;  %v6932_v42 = vadd.f32 %v6624_v0, %v528_v54  ;;  %v6938_v63 = vmul.f32 %v5878_v46, %v6763_v14  ;;  %v6943_v35 = vmul.f32 %v5885_v51, %v6763_v14  ;;  %v5575_v54 = vld [vmem:[%s10945_s5] sm:$0xff]   ;;  %v11591_v33 = vrot.slane %v6688_v7, 1 }
  0xf9   : > { %11569 = vst [vmem:[#allocation187_spill] sm:$0xff] %v6867_v4  ;;  %11571 = vst [vmem:[#allocation189_spill] sm:$0xff] %v6875_v62  ;;  %v6910_v62 = vmul.f32 %v5929_v5, %v6719_v24  ;;  %v6927_v24 = vmul.f32 %v5880_v47, %v6721_v6  ;;  %v6951_v0 = vmul.f32 %v5891_v53, %v6763_v14  ;;  %5436 = vmatprep.subr.bf16.mxu0 %v5575_v54 }
  0xfa   : > { %11572 = vst [vmem:[#allocation190_spill] sm:$0xff] %v6879_v38  ;;  %11573 = vst [vmem:[#allocation191_spill] sm:$0xff] %v6892_v57  ;;  %v6947_v57 = vmul.f32 %v5888_v52, %v6763_v14  ;;  %v6962_v20 = vmul.f32 %v5880_v47, %v6763_v14  ;;  %v11588_v38 = vld [vmem:[#allocation30_spill] sm:$0xff]  ;;  %v6989_v7 = vmul.f32 %v5878_v46, %v6820_v25  ;;  %5437 = vmatpush3.bf16.msra.mxu0 %v5575_v54 }
  0xfb   : > { %11574 = vst [vmem:[#allocation192_spill] sm:$0xff] %v6901_v16  ;;  %11575 = vst [vmem:[#allocation193_spill] sm:$0xff] %v6905_v39  ;;  %1871 = vperm.xlu1 %5562, %v6882_v30   ;;  %v768_v6 = vmul.f32 %v11588_v38, %v6777_v27  ;;  %v11590_v16 = vrot.slane %v6728_v44, 1  ;;  %v532_v39 = vmul.f32 %v5871_v43, %v6820_v25  ;;  %5472 = vmatprep.subr.bf16.mxu1 %v5575_v54 }
  0xfc   : > { %11576 = vst [vmem:[#allocation194_spill] sm:$0xff] %v6910_v62  ;;  %11577 = vst [vmem:[#allocation195_spill] sm:$0xff] %v6914_v28  ;;  %v6921_v60 = vpop.permute.xlu0 %498  ;;  %v530_v62 = vmul.f32 %v5871_v43, %v6763_v14  ;;  %v6966_v28 = vpop.permute.xlu1 %705  ;;  %v11593_v14 = vld [vmem:[#allocation29_spill] sm:$0xff]  ;;  %v7008_v56 = vmul.f32 %v5880_v47, %v6820_v25  ;;  %5480 = vmatpush3.bf16.msra.mxu1 %v5575_v54  ;;  %v7064_v34 = vmul.f32 %v5880_v47, %v6867_v4 }
  0xfd   : > { %11578 = vst [vmem:[#allocation196_spill] sm:$0xff] %v6918_v61  ;;  %11579 = vst [vmem:[#allocation197_spill] sm:$0xff] %v6921_v60 }
  0xfe   : > { %11580 = vst [vmem:[#allocation198_spill] sm:$0xff] %v6927_v24  ;;  %11581 = vst [vmem:[#allocation199_spill] sm:$0xff] %v6932_v42  ;;  %v6958_v55 = vadd.f32 %v6665_v29, %v530_v62  ;;  %v925_v62 = vsel %vm922_vm0, %v11591_v33, %v11590_v16  ;;  %v11592_v29 = vld [vmem:[#allocation16_spill] sm:$0xff]  ;;  %v788_v24 = vadd.f32 %v768_v6, %v6707_v31 }
  0xff   : > { %11582 = vst [vmem:[#allocation200_spill] sm:$0xff] %v6938_v63  ;;  %11583 = vst [vmem:[#allocation201_spill] sm:$0xff] %v6943_v35  ;;  %5563 = vset.pattern.permute.xlu1 %v11372_v10  ;;  %v6977_v61 = vmul.f32 %v11592_v29, %v6777_v27  ;;  %v6993_v33 = vmul.f32 %v5885_v51, %v6820_v25  ;;  %v7002_v31 = vmul.f32 %v5888_v52, %v6820_v25  ;;  %v11601_v35 = vld [vmem:[#allocation32_spill] sm:$0xff] }
 0x100   : > { %11584 = vst [vmem:[#allocation202_spill] sm:$0xff] %v6947_v57  ;;  %11585 = vst [vmem:[#allocation203_spill] sm:$0xff] %v6951_v0  ;;  %1923 = vperm.xlu1 %5563, %v6882_v30   ;;  %v6995_v16 = vpop.permute.xlu0 %508  ;;  %v7015_v6 = vmul.f32 %v5891_v53, %v6820_v25  ;;  %v770_v63 = vmul.f32 %v11588_v38, %v6832_v19  ;;  %v7030_v42 = vpop.permute.xlu1 %713  ;;  %v7040_v0 = vmul.f32 %v11600_v58, %v6832_v19 }
 0x101   : > { %11586 = vst [vmem:[#allocation204_spill] sm:$0xff] %v6958_v55  ;;  %11587 = vst [vmem:[#allocation205_spill] sm:$0xff] %v6962_v20  ;;  %v6981_v20 = vmul.f32 %v11593_v14, %v6777_v27  ;;  %v993_v55 = vadd.f32 %v925_v62, %v788_v24  ;;  %v7011_v27 = vadd.f32 %v6711_v22, %v532_v39  ;;  %v11598_v39 = vld [vmem:[#allocation34_spill] sm:$0xff] }
 0x102   : > { %11589 = vst [vmem:[#allocation30_spill] sm:$0xff] %v6966_v28  ;;  %11595 = vst [vmem:[#allocation29_spill] sm:$0xff] %v6995_v16  ;;  %v1254_v24 = vmul.f32 %v11592_v29, %v6832_v19  ;;  %v1717_v22 = vmul.f32 %v11593_v14, %v6832_v19  ;;  %v7028_v54 = vmul.f32 %v11598_v39, %v6832_v19 }
 0x103   : > { %11594 = vst [vmem:[#allocation16_spill] sm:$0xff] %v6981_v20  ;;  %11596 = vst [vmem:[#allocation206_spill] sm:$0xff] %v7008_v56  ;;  %v7034_v25 = vadd.f32 %v6389_v15, %v993_v55  ;;  %v790_v62 = vadd.f32 %v770_v63, %v6418_v37  ;;  %v7051_v55 = vmul.f32 %v5878_v46, %v6867_v4  ;;  %v11604_v37 = vld [vmem:[#allocation56_spill] sm:$0xff] }
 0x104   : > { %11597 = vst [vmem:[#allocation207_spill] sm:$0xff] %v7011_v27  ;;  %5564 = vset.pattern.permute.xlu1 %v11413_v36  ;;  %11599 = vst [vmem:[#allocation34_spill] sm:$0xff] %v7030_v42  ;;  %v7045_v27 = vmul.f32 %v11601_v35, %v6832_v19  ;;  %v534_v42 = vmul.f32 %v5871_v43, %v6867_v4  ;;  %v7053_v15 = vpop.permute.xlu0 %810  ;;  %v1316_v56 = vrot.slane %v1254_v24, 1  ;;  %v1779_v3 = vrot.slane %v1717_v22, 2 }
 0x105   : > { %2024 = vperm.xlu1 %5564, %v6338_v26   ;;  %11603 = vst [vmem:[#allocation208_spill] sm:$0xff] %v7051_v55  ;;  %v995_v63 = vadd.f32 %v11604_v37, %v790_v62  ;;  %v7058_v57 = vmul.f32 %v5885_v51, %v6867_v4  ;;  %v2407_v19 = vrot.slane %v7028_v54, 1  ;;  %11606 = vst [vmem:[#allocation209_spill] sm:$0xff] %v7064_v34 }
 0x106   : > { %11602 = vst [vmem:[#allocation32_spill] sm:$0xff] %v7045_v27  ;;  %v2869_v27 = vrot.slane %v7040_v0, 2  ;;  %v7068_v20 = vmul.f32 %v5888_v52, %v6867_v4  ;;  %v7073_v62 = vadd.f32 %v6757_v17, %v534_v42  ;;  %v7078_v0 = vmul.f32 %v5891_v53, %v6867_v4  ;;  %v7094_v17 = vpop.permute.xlu1 %721 }
 0x107   : > { %11605 = vst [vmem:[#allocation56_spill] sm:$0xff] %v7058_v57  ;;  %v1189_v24 = vadd.f32 %v6449_v18, %v995_v63  ;;  %v7084_v37 = vmul.f32 %v5929_v5, %v6392_v40  ;;  %v7088_v18 = vmul.f32 %v11592_v29, %v6894_v23  ;;  %v7092_v42 = vmul.f32 %v11593_v14, %v6894_v23 }
 0x108   : > { %11607 = vst [vmem:[#allocation210_spill] sm:$0xff] %v7068_v20  ;;  %11608 = vst [vmem:[#allocation211_spill] sm:$0xff] %v7073_v62  ;;  %v7102_v54 = vmul.f32 %v11588_v38, %v6894_v23  ;;  %v7106_v22 = vmul.f32 %v11598_v39, %v6894_v23  ;;  %v7110_v4 = vmul.f32 %v11600_v58, %v6894_v23  ;;  %v7120_v20 = vpop.permute.xlu0 %820 }
 0x109   : > { %5566 = vset.pattern.permute.xlu1 %v11379_v49  ;;  %11609 = vst [vmem:[#allocation212_spill] sm:$0xff] %v7078_v0  ;;  %11610 = vst [vmem:[#allocation213_spill] sm:$0xff] %v7094_v17  ;;  %v536_v57 = vmul.f32 %v5871_v43, %v6921_v60  ;;  %v7118_v63 = vmul.f32 %v5878_v46, %v6921_v60  ;;  %v1880_v5 = vmul.f32 %v5880_v47, %v6610_v8 }
 0x10a   : > { %1975 = vperm.xlu1 %5566, %v6882_v30   ;;  %v5576_v30 = vld [vmem:[%s10945_s5 + $0x8] sm:$0xff]   ;;  %11612 = vst [vmem:[#allocation215_spill] sm:$0xff] %v7120_v20  ;;  %v7127_v40 = vmul.f32 %v11601_v35, %v6894_v23  ;;  %v11614_v17 = vrot.slane %v7088_v18, 1  ;;  %v7137_v55 = vmul.f32 %v5885_v51, %v6921_v60  ;;  %v7141_v23 = vmul.f32 %v5880_v47, %v6921_v60 }
 0x10b   : > { %11611 = vst [vmem:[#allocation214_spill] sm:$0xff] %v7118_v63  ;;  %5438 = vmatprep.subr.bf16.mxu0 %v5576_v30  ;;  %5473 = vmatprep.subr.bf16.mxu1 %v5576_v30  ;;  %v11617_v0 = vrot.slane %v7092_v42, 2  ;;  %v7153_v58 = vmul.f32 %v5888_v52, %v6921_v60  ;;  %v11624_v63 = vrot.slane %v7110_v4, 2 }
 0x10c   : > { %11613 = vst [vmem:[#allocation216_spill] sm:$0xff] %v7127_v40  ;;  %5439 = vmatpush3.bf16.msra.mxu0 %v5576_v30  ;;  %v1318_v62 = vsel %vm922_vm0, %v1316_v56, %v11614_v17  ;;  %11615 = vst [vmem:[#allocation217_spill] sm:$0xff] %v7137_v55  ;;  %5481 = vmatpush3.bf16.msra.mxu1 %v5576_v30  ;;  %v7148_v56 = vadd.f32 %v6826_v1, %v536_v57  ;;  %v7168_v1 = vld [vmem:[%s5719_s15 + $0x108] sm:$0xff]  ;;  %v11622_v57 = vld [vmem:[#allocation45_spill] sm:$0xff]  ;;  %v11646_v55 = vrot.slane %v6805_v45, 2 }
 0x10d   : > { %11616 = vst [vmem:[#allocation218_spill] sm:$0xff] %v7141_v23  ;;  %v1383_v34 = vadd.f32 %v1318_v62, %v1189_v24  ;;  %v1781_v8 = vsel %vm1465_vm1, %v1779_v3, %v11617_v0  ;;  %11619 = vst [vmem:[#allocation220_spill] sm:$0xff] %v7153_v58  ;;  %v7157_v23 = vmul.f32 %v5891_v53, %v6921_v60  ;;  %v7165_v3 = vpop.permute.xlu1 %729  ;;  %v11623_v0 = vrot.slane %v7106_v22, 1  ;;  %s4289_s15 = scalar_select %p4288_p7, 1.0, 0.0 }
 0x10e   : > { %5567 = vset.pattern.permute.xlu1 %v11372_v10  ;;  %11618 = vst [vmem:[#allocation219_spill] sm:$0xff] %v7148_v56  ;;  %v7163_v24 = vmul.f32 %v5878_v46, %v6995_v16  ;;  %11621 = vst [vmem:[#allocation222_spill] sm:$0xff] %v7165_v3  ;;  %v7178_v17 = vmul.f32 %v5888_v52, %v6995_v16  ;;  %v864_v60 = vmul.f32 %v5878_v46, %v7053_v15 }
 0x10f   : > { %2182 = vperm.xlu1 %5567, %v6338_v26   ;;  %11620 = vst [vmem:[#allocation221_spill] sm:$0xff] %v7157_v23  ;;  %v538_v26 = vmul.f32 %v5871_v43, %v6995_v16  ;;  %v1538_v62 = vadd.f32 %v11622_v57, %v1383_v34  ;;  %v7174_v30 = vsel %vm922_vm0, %v2407_v19, %v11623_v0  ;;  %v841_v57 = vpop.permute.xlu0 %840  ;;  %v11652_v45 = vrot.slane %v6989_v7, 1 }
 0x110   : > { %v7185_v3 = vsel %vm1465_vm1, %v2869_v27, %v11624_v63  ;;  %v7191_v19 = vmul.f32 %v5880_v47, %v6995_v16  ;;  %v926_v40 = vrot.slane %v864_v60, 1  ;;  %v1407_v27 = vmul.f32 %v5885_v51, %v7053_v15 }
 0x111   : > { %11625 = vst [vmem:[#allocation45_spill] sm:$0xff] %v7185_v3  ;;  %v1692_v0 = vadd.f32 %v6454_v48, %v1538_v62  ;;  %v7200_v63 = vadd.f32 %v6888_v12, %v538_v26  ;;  %v968_v34 = vrot.slane %v7163_v24, 1  ;;  %v2131_v43 = vrot.slane %v7178_v17, 1  ;;  %v11628_v62 = vld [vmem:[#allocation48_spill] sm:$0xff]  ;;  %v11636_v17 = vld [vmem:[#allocation50_spill] sm:$0xff] }
 0x112   : > { %11626 = vst [vmem:[#allocation223_spill] sm:$0xff] %v7191_v19  ;;  %v1469_v48 = vrot.slane %v1407_v27, 2  ;;  %v11629_v56 = vrot.slane %v11628_v62, 1  ;;  %v11630_v60 = vrot.slane %v6783_v2, 1  ;;  %v11632_v19 = vld [vmem:[#allocation49_spill] sm:$0xff]  ;;  %v11634_v12 = vrot.slane %v6787_v59, 2  ;;  %v7233_v59 = vpop.permute.xlu1 %737 }
 0x113   : > { %5568 = vset.pattern.permute.xlu1 %v11413_v36  ;;  %11627 = vst [vmem:[#allocation224_spill] sm:$0xff] %v7200_v63  ;;  %v773_v36 = vmul.f32 %v11588_v38, %v6966_v28  ;;  %v1846_v16 = vadd.f32 %v1781_v8, %v1692_v0  ;;  %v11633_v23 = vrot.slane %v11632_v19, 2  ;;  %v11637_v24 = vrot.slane %v11636_v17, 1  ;;  %11640 = vst [vmem:[#allocation225_spill] sm:$0xff] %v7233_v59  ;;  %v11649_v59 = vld [vmem:[#allocation63_spill] sm:$0xff] }
 0x114   : > { %2961 = vperm.xlu1 %5568, %v7168_v1   ;;  %v7211_v15 = vsel %vm922_vm0, %v11630_v60, %v11629_v56  ;;  %v11638_v63 = vrot.slane %v6801_v9, 1  ;;  %v870_v2 = vmul.f32 %v5878_v46, %v7120_v20  ;;  %v1413_v56 = vmul.f32 %v5885_v51, %v7120_v20 }
 0x115   : > { %11631 = vst [vmem:[#allocation48_spill] sm:$0xff] %v7211_v15  ;;  %v7218_v26 = vsel %vm1465_vm1, %v11634_v12, %v11633_v23  ;;  %v2036_v0 = vmul.f32 %v5888_v52, %v7120_v20  ;;  %v1900_v23 = vadd.f32 %v1880_v5, %v1846_v16  ;;  %v11641_v27 = vrot.slane %v6728_v44, 1 }
 0x116   : > { %11635 = vst [vmem:[#allocation49_spill] sm:$0xff] %v7218_v26  ;;  %v7225_v8 = vsel %vm922_vm0, %v11638_v63, %v11637_v24  ;;  %v2506_v9 = vmul.f32 %v5891_v53, %v7120_v20  ;;  %v11642_v63 = vld [vmem:[#allocation27_spill] sm:$0xff]  ;;  %v11644_v24 = vld [vmem:[#allocation58_spill] sm:$0xff]  ;;  %v936_v44 = vrot.slane %v870_v2, 1  ;;  %v1479_v16 = vrot.slane %v1413_v56, 2 }
 0x117   : > { %11639 = vst [vmem:[#allocation50_spill] sm:$0xff] %v7225_v8  ;;  %v7238_v60 = vsel %vm922_vm0, %v11641_v27, %v926_v40  ;;  %v7244_v12 = vmul.f32 %v11642_v63, %v7120_v20  ;;  %v11645_v58 = vrot.slane %v11644_v24, 2  ;;  %v2099_v40 = vrot.slane %v2036_v0, 1  ;;  %v856_v27 = vpop.permute.xlu0 %855  ;;  %v11650_v8 = vld [vmem:[#allocation88_spill] sm:$0xff] }
 0x118   : > { %5570 = vset.pattern.permute.xlu1 %v11372_v10  ;;  %v11648_v3 = vrot.slane %v6738_v21, 2  ;;  %v793_v47 = vadd.f32 %v773_v36, %v11649_v59  ;;  %v2569_v26 = vrot.slane %v2506_v9, 2  ;;  %v11651_v15 = vrot.slane %v11650_v8, 1  ;;  %v11660_v59 = vld [vmem:[#allocation90_spill] sm:$0xff] }
 0x119   : > { %11643 = vst [vmem:[#allocation226_spill] sm:$0xff] %v7244_v12  ;;  %v7252_v5 = vsel %vm1465_vm1, %v11646_v55, %v11645_v58  ;;  %3014 = vperm.xlu1 %5570, %v7168_v1   ;;  %v7269_v55 = vadd.f32 %v7084_v37, %v1900_v23  ;;  %v11653_v2 = vrot.slane %v11628_v62, 1  ;;  %v11656_v36 = vrot.slane %v6993_v33, 2 }
 0x11a   : > { %11647 = vst [vmem:[#allocation58_spill] sm:$0xff] %v7252_v5  ;;  %v7258_v20 = vsel %vm1465_vm1, %v11648_v3, %v1469_v48  ;;  %v7266_v58 = vsel %vm922_vm0, %v11652_v45, %v11651_v15  ;;  %v11654_v48 = vld [vmem:[#allocation89_spill] sm:$0xff]  ;;  %v11658_v7 = vrot.slane %v11632_v19, 2  ;;  %v11659_v37 = vrot.slane %v11636_v17, 1 }
 0x11b   : > { %v937_v21 = vsel %vm922_vm0, %v11653_v2, %v936_v44  ;;  %v11655_v56 = vrot.slane %v11654_v48, 2  ;;  %v11661_v23 = vrot.slane %v11660_v59, 1  ;;  %v11662_v9 = vrot.slane %v7002_v31, 1 }
 0x11c   : > { %v7285_v15 = vsel %vm1465_vm1, %v11658_v7, %v1479_v16  ;;  %v7290_v62 = vsel %vm922_vm0, %v11659_v37, %v2099_v40  ;;  %v882_v33 = vmul.f32 %v5878_v46, %v841_v57  ;;  %v1425_v45 = vmul.f32 %v5885_v51, %v841_v57  ;;  %v7306_v40 = vpop.permute.xlu1 %745  ;;  %v11667_v7 = vld [vmem:[#allocation24_spill] sm:$0xff] }
 0x11d   : > { %v7280_v0 = vsel %vm1465_vm1, %v11656_v36, %v11655_v56  ;;  %v7297_v44 = vsel %vm922_vm0, %v11662_v9, %v11661_v23  ;;  %v2048_v19 = vmul.f32 %v5888_v52, %v841_v57  ;;  %v2518_v16 = vmul.f32 %v5891_v53, %v841_v57  ;;  %11665 = vst [vmem:[#allocation90_spill] sm:$0xff] %v7306_v40  ;;  %v11669_v23 = vld [vmem:[#allocation91_spill] sm:$0xff] }
 0x11e   : > { %11657 = vst [vmem:[#allocation63_spill] sm:$0xff] %v7280_v0  ;;  %11663 = vst [vmem:[#allocation88_spill] sm:$0xff] %v7297_v44  ;;  %v7304_v17 = vmul.f32 %v11642_v63, %v841_v57  ;;  %3018 = vperm.xlu1 %5570, %v6379_v11   ;;  %v7309_v2 = vadd.f32 %v937_v21, %v793_v47  ;;  %v11666_v31 = vrot.slane %v11644_v24, 2  ;;  %v956_v36 = vrot.slane %v882_v33, 1  ;;  %v11675_v24 = vld [vmem:[#allocation102_spill] sm:$0xff]  ;;  %v5577_v33 = vld [vmem:[%s10945_s5 + $0x10] sm:$0xff]  }
 0x11f   : > { %v7317_v37 = vmul.f32 %v11667_v7, %v841_v57  ;;  %v11670_v9 = vrot.slane %v11669_v23, 2  ;;  %v11671_v3 = vrot.slane %v7015_v6, 2  ;;  %v1499_v5 = vrot.slane %v1425_v45, 2  ;;  %v690_v57 = vpop.permute.xlu0 %689  ;;  %5440 = vmatprep.subr.bf16.mxu0 %v5577_v33  ;;  %5474 = vmatprep.subr.bf16.mxu1 %v5577_v33 }
 0x120   : > { %11664 = vst [vmem:[#allocation89_spill] sm:$0xff] %v7304_v17  ;;  %v7314_v56 = vsel %vm1465_vm1, %v11666_v31, %v2569_v26  ;;  %v11673_v47 = vrot.slane %v6302_v50, 1  ;;  %v11676_v26 = vrot.slane %v11675_v24, 1  ;;  %v2119_v6 = vrot.slane %v2048_v19, 1  ;;  %5441 = vmatpush3.bf16.msra.mxu0 %v5577_v33  ;;  %5482 = vmatpush3.bf16.msra.mxu1 %v5577_v33 }
 0x121   : > { %11668 = vst [vmem:[#allocation24_spill] sm:$0xff] %v7317_v37  ;;  %v7324_v44 = vsel %vm1465_vm1, %v11671_v3, %v11670_v9  ;;  %v2589_v31 = vrot.slane %v2518_v16, 2  ;;  %v891_v3 = vmul.f32 %v5878_v46, %v856_v27  ;;  %v1434_v45 = vmul.f32 %v5885_v51, %v856_v27 }
 0x122   : > { %11672 = vst [vmem:[#allocation91_spill] sm:$0xff] %v7324_v44  ;;  %v7329_v11 = vsel %vm922_vm0, %v968_v34, %v11673_v47  ;;  %v7334_v21 = vsel %vm922_vm0, %v2131_v43, %v11676_v26  ;;  %v11678_v9 = vrot.slane %v11650_v8, 1  ;;  %v2057_v26 = vmul.f32 %v5888_v52, %v856_v27  ;;  %5571 = vset.pattern.permute.xlu1 %v11379_v49 }
 0x123   : > { %11674 = vst [vmem:[#allocation227_spill] sm:$0xff] %v7329_v11  ;;  %11677 = vst [vmem:[#allocation102_spill] sm:$0xff] %v7334_v21  ;;  %v971_v44 = vrot.slane %v891_v3, 1  ;;  %v1514_v19 = vrot.slane %v1434_v45, 2  ;;  %v2527_v16 = vmul.f32 %v5891_v53, %v856_v27  ;;  %v7352_v21 = vmul.f32 %v11642_v63, %v856_v27  ;;  %3066 = vperm.xlu1 %5571, %v7168_v1   ;;  %v816_v3 = vpop.permute.xlu1 %815  ;;  %v11690_v11 = vld [vmem:[#allocation101_spill] sm:$0xff] }
 0x124   : > { %v7344_v34 = vsel %vm922_vm0, %v11678_v9, %v956_v36  ;;  %v11681_v8 = vrot.slane %v11654_v48, 2  ;;  %v2134_v9 = vrot.slane %v2057_v26, 1  ;;  %v769_v43 = vmul.f32 %v11588_v38, %v690_v57 }
 0x125   : > { %11679 = vst [vmem:[#allocation228_spill] sm:$0xff] %v7344_v34  ;;  %11680 = vst [vmem:[#allocation229_spill] sm:$0xff] %v7352_v21  ;;  %v7362_v47 = vmul.f32 %v11592_v29, %v690_v57  ;;  %v11683_v45 = vrot.slane %v11660_v59, 1  ;;  %v11685_v1 = vrot.slane %v11669_v23, 2  ;;  %v7375_v26 = vmul.f32 %v11667_v7, %v856_v27  ;;  %v5578_v27 = vld [vmem:[%s10945_s5 + $0x18] sm:$0xff]  }
 0x126   : > { %v7358_v36 = vsel %vm1465_vm1, %v11681_v8, %v1499_v5  ;;  %v2604_v5 = vrot.slane %v2527_v16, 2  ;;  %v11688_v8 = vrot.slane %v6302_v50, 1  ;;  %v11691_v59 = vrot.slane %v11690_v11, 2  ;;  %5442 = vmatprep.subr.bf16.mxu0 %v5578_v27  ;;  %5475 = vmatprep.subr.bf16.mxu1 %v5578_v27 }
 0x127   : > { %11682 = vst [vmem:[#allocation230_spill] sm:$0xff] %v7358_v36  ;;  %v7367_v37 = vsel %vm922_vm0, %v11683_v45, %v2119_v6  ;;  %v7372_v48 = vsel %vm1465_vm1, %v11685_v1, %v2589_v31  ;;  %11687 = vst [vmem:[#allocation233_spill] sm:$0xff] %v7375_v26  ;;  %v11171_v31 = vrot.slane %v7362_v47, 1  ;;  %v7389_v45 = vpop.permute.xlu0 %701  ;;  %v11694_v50 = vrot.slane %v11675_v24, 1  ;;  %5573 = vset.pattern.permute.xlu1 %v11372_v10  ;;  %v11696_v1 = vld [vmem:[#allocation103_spill] sm:$0xff] }
 0x128   : > { %11684 = vst [vmem:[#allocation231_spill] sm:$0xff] %v7367_v37  ;;  %11686 = vst [vmem:[#allocation232_spill] sm:$0xff] %v7372_v48  ;;  %v7380_v17 = vsel %vm922_vm0, %v11688_v8, %v971_v44  ;;  %v7385_v6 = vsel %vm1465_vm1, %v11691_v59, %v1514_v19  ;;  %v789_v33 = vadd.f32 %v769_v43, %v6752_v13  ;;  %v11697_v8 = vrot.slane %v11696_v1, 2 }
 0x129   : > { %11689 = vst [vmem:[#allocation234_spill] sm:$0xff] %v7380_v17  ;;  %11692 = vst [vmem:[#allocation235_spill] sm:$0xff] %v7385_v6  ;;  %v7397_v44 = vsel %vm922_vm0, %v11694_v50, %v2134_v9  ;;  %v7401_v19 = vmul.f32 %v11593_v14, %v690_v57  ;;  %v867_v16 = vmul.f32 %v5878_v46, %v816_v3  ;;  %v11699_v24 = vrot.slane %v6977_v61, 1 }
 0x12a   : > { %11693 = vst [vmem:[#allocation236_spill] sm:$0xff] %v7389_v45  ;;  %11695 = vst [vmem:[#allocation237_spill] sm:$0xff] %v7397_v44  ;;  %v7408_v59 = vsel %vm1465_vm1, %v11697_v8, %v2604_v5  ;;  %v1410_v13 = vmul.f32 %v5885_v51, %v816_v3  ;;  %v2033_v57 = vmul.f32 %v5888_v52, %v816_v3  ;;  %3277 = vperm.xlu1 %5573, %v6421_v41   ;;  %v11700_v8 = vld [vmem:[#allocation44_spill] sm:$0xff] }
 0x12b   : > { %11698 = vst [vmem:[#allocation238_spill] sm:$0xff] %v7408_v59  ;;  %v1313_v9 = vsel %vm922_vm0, %v11699_v24, %v11171_v31  ;;  %v931_v50 = vrot.slane %v867_v16, 1  ;;  %v2503_v5 = vmul.f32 %v5891_v53, %v816_v3  ;;  %v791_v61 = vadd.f32 %v7102_v54, %v11700_v8  ;;  %5443 = vmatpush3.bf16.msra.mxu0 %v5578_v27  ;;  %v1015_v54 = vpop.permute.xlu1 %1014  ;;  %v11710_v59 = vld [vmem:[#allocation39_spill] sm:$0xff] }
 0x12c   : > { %v1381_v43 = vadd.f32 %v1313_v9, %v7034_v25  ;;  %v1474_v23 = vrot.slane %v1410_v13, 2  ;;  %v2094_v24 = vrot.slane %v2033_v57, 1  ;;  %v772_v31 = vmul.f32 %v11588_v38, %v7389_v45  ;;  %5483 = vmatpush3.bf16.msra.mxu1 %v5578_v27  ;;  %v11701_v9 = vld [vmem:[#allocation38_spill] sm:$0xff]  ;;  %v11704_v57 = vld [vmem:[#allocation16_spill] sm:$0xff] }
 0x12d   : > { %v994_v21 = vadd.f32 %v7238_v60, %v789_v33  ;;  %v11702_v16 = vrot.slane %v11701_v9, 1  ;;  %v7432_v10 = vmul.f32 %v11592_v29, %v7389_v45  ;;  %v11703_v13 = vrot.slane %v7401_v19, 2  ;;  %v11706_v60 = vld [vmem:[#allocation33_spill] sm:$0xff]  ;;  %v11709_v9 = vld [vmem:[#allocation114_spill] sm:$0xff] }
 0x12e   : > { %v1536_v25 = vadd.f32 %v6793_v32, %v1381_v43  ;;  %v11705_v8 = vrot.slane %v11704_v57, 2  ;;  %v11707_v33 = vrot.slane %v11706_v60, 2  ;;  %v2564_v43 = vrot.slane %v2503_v5, 2  ;;  %5574 = vset.pattern.permute.xlu1 %v11379_v49  ;;  %v5579_v49 = vld [vmem:[%s10945_s5 + $0x20] sm:$0xff]   ;;  %v11715_v5 = vld [vmem:[#allocation15_spill] sm:$0xff] }
 0x12f   : > { %v932_v3 = vsel %vm922_vm0, %v11702_v16, %v931_v50  ;;  %v7446_v50 = vpop.permute.xlu0 %709  ;;  %v11711_v44 = vrot.slane %v11710_v59, 1  ;;  %3435 = vperm.xlu1 %5574, %v6421_v41   ;;  %5444 = vmatprep.subr.bf16.mxu0 %v5579_v49  ;;  %v1209_v37 = vpop.permute.xlu1 %1208  ;;  %v11732_v0 = vrot.slane %v7362_v47, 1 }
 0x130   : > { %v1776_v48 = vsel %vm1465_vm1, %v11705_v8, %v11703_v13  ;;  %v7439_v27 = vadd.f32 %v932_v3, %v791_v61  ;;  %v7444_v32 = vsel %vm1465_vm1, %v11707_v33, %v1474_v23  ;;  %11708 = vst [vmem:[#allocation44_spill] sm:$0xff] %v7446_v50  ;;  %v1690_v16 = vadd.f32 %v11709_v9, %v1536_v25  ;;  %v11712_v13 = vld [vmem:[#allocation176_spill] sm:$0xff]  ;;  %v11716_v8 = vld [vmem:[#allocation17_spill] sm:$0xff] }
 0x131   : > { %v7453_v57 = vsel %vm922_vm0, %v11711_v44, %v2094_v24  ;;  %v7456_v61 = vadd.f32 %v772_v31, %v11712_v13  ;;  %v7460_v3 = vmul.f32 %v11593_v14, %v7389_v45  ;;  %v1984_v23 = vmul.f32 %v11601_v35, %v7389_v45  ;;  %v11713_v31 = vld [vmem:[#allocation18_spill] sm:$0xff]  ;;  %5476 = vmatprep.subr.bf16.mxu1 %v5579_v49  ;;  %v11717_v9 = vld [vmem:[#allocation40_spill] sm:$0xff] }
 0x132   : > { %v7470_v44 = vmul.f32 %v11598_v39, %v7389_v45  ;;  %v7474_v59 = vmul.f32 %v11713_v31, %v7389_v45  ;;  %v1059_v24 = vmul.f32 %v11715_v5, %v1015_v54  ;;  %v1844_v41 = vadd.f32 %v1776_v48, %v1690_v16  ;;  %5445 = vmatpush3.bf16.msra.mxu0 %v5579_v49  ;;  %v11719_v48 = vld [vmem:[#allocation37_spill] sm:$0xff] }
 0x133   : > { %v1562_v60 = vmul.f32 %v11716_v8, %v1015_v54  ;;  %v774_v33 = vmul.f32 %v11588_v38, %v7446_v50  ;;  %v11718_v13 = vrot.slane %v11717_v9, 2  ;;  %5484 = vmatpush3.bf16.msra.mxu1 %v5579_v49  ;;  %v7490_v54 = vadd.f32 %v1984_v23, %v7269_v55  ;;  %v7505_v55 = vpop.permute.xlu0 %717  ;;  %v11724_v23 = vld [vmem:[#allocation122_spill] sm:$0xff]  ;;  %v11727_v9 = vld [vmem:[#allocation105_spill] sm:$0xff]  ;;  %v1213_v36 = vpop.permute.xlu1 %1212 }
 0x134   : > { %11714 = vst [vmem:[#allocation38_spill] sm:$0xff] %v7474_v59  ;;  %v1120_v17 = vrot.slane %v1059_v24, 1  ;;  %v1898_v16 = vadd.f32 %v11719_v48, %v1844_v41  ;;  %v7499_v24 = vmul.f32 %v11592_v29, %v7446_v50  ;;  %v7503_v49 = vmul.f32 %v11593_v14, %v7446_v50  ;;  %11723 = vst [vmem:[#allocation33_spill] sm:$0xff] %v7505_v55 }
 0x135   : > { %v7484_v1 = vsel %vm1465_vm1, %v11718_v13, %v2564_v43  ;;  %v1623_v26 = vrot.slane %v1562_v60, 2  ;;  %v11720_v43 = vld [vmem:[#allocation104_spill] sm:$0xff]  ;;  %v11728_v25 = vrot.slane %v11727_v9, 2  ;;  %v7524_v59 = vmul.f32 %v11713_v31, %v7446_v50 }
 0x136   : > { %v11721_v13 = vrot.slane %v11720_v43, 1  ;;  %11722 = vst [vmem:[#allocation16_spill] sm:$0xff] %v7503_v49  ;;  %v1950_v41 = vadd.f32 %v11724_v23, %v1898_v16  ;;  %v11725_v60 = vld [vmem:[#allocation188_spill] sm:$0xff]  ;;  %v7513_v43 = vmul.f32 %v11601_v35, %v7446_v50  ;;  %v776_v12 = vmul.f32 %v11588_v38, %v7505_v55 }
 0x137   : > { %v7509_v48 = vadd.f32 %v774_v33, %v11725_v60  ;;  %v1624_v11 = vsel %vm1465_vm1, %v11728_v25, %v1623_v26  ;;  %11729 = vst [vmem:[#allocation39_spill] sm:$0xff] %v7524_v59  ;;  %v1253_v33 = vmul.f32 %v11592_v29, %v1209_v37  ;;  %v11730_v16 = vld [vmem:[#allocation32_spill] sm:$0xff]  ;;  %v1716_v60 = vmul.f32 %v11593_v14, %v1209_v37  ;;  %v7561_v26 = vpop.permute.xlu0 %725 }
 0x138   : > { %v1121_v6 = vsel %vm922_vm0, %v11721_v13, %v1120_v17  ;;  %v7517_v17 = vmul.f32 %v11598_v39, %v7446_v50  ;;  %v2002_v23 = vadd.f32 %v11730_v16, %v1950_v41  ;;  %v7539_v9 = vmul.f32 %v11593_v14, %v7505_v55  ;;  %v11731_v50 = vld [vmem:[#allocation54_spill] sm:$0xff]  ;;  %11737 = vst [vmem:[#allocation40_spill] sm:$0xff] %v7561_v26  ;;  %v11740_v59 = vld [vmem:[#allocation108_spill] sm:$0xff] }
 0x139   : > { %v1188_v13 = vadd.f32 %v1121_v6, %v994_v21  ;;  %v7533_v21 = vmul.f32 %v11592_v29, %v7505_v55  ;;  %v1314_v25 = vrot.slane %v1253_v33, 1  ;;  %v1777_v45 = vrot.slane %v1716_v60, 2  ;;  %v11733_v6 = vld [vmem:[#allocation199_spill] sm:$0xff]  ;;  %v11745_v49 = vld [vmem:[#allocation204_spill] sm:$0xff] }
 0x13a   : > { %11726 = vst [vmem:[#allocation114_spill] sm:$0xff] %v7517_v17  ;;  %v2161_v41 = vadd.f32 %v11731_v50, %v2002_v23  ;;  %v7548_v40 = vadd.f32 %v776_v12, %v11733_v6  ;;  %v7552_v33 = vmul.f32 %v11601_v35, %v7505_v55  ;;  %v7556_v50 = vmul.f32 %v11598_v39, %v7505_v55  ;;  %v11736_v23 = vld [vmem:[#allocation123_spill] sm:$0xff] }
 0x13b   : > { %v1315_v34 = vsel %vm922_vm0, %v11732_v0, %v1314_v25  ;;  %v11738_v12 = vrot.slane %v7401_v19, 2  ;;  %v7568_v6 = vmul.f32 %v11713_v31, %v7505_v55  ;;  %v7572_v25 = vmul.f32 %v11601_v35, %v6966_v28 }
 0x13c   : > { %11734 = vst [vmem:[#allocation176_spill] sm:$0xff] %v7548_v40  ;;  %11735 = vst [vmem:[#allocation18_spill] sm:$0xff] %v7552_v33  ;;  %v2319_v37 = vadd.f32 %v11736_v23, %v2161_v41  ;;  %v1382_v16 = vadd.f32 %v1315_v34, %v1188_v13  ;;  %v1256_v34 = vmul.f32 %v11592_v29, %v1213_v36 }
 0x13d   : > { %v1778_v0 = vsel %vm1465_vm1, %v11738_v12, %v1777_v45  ;;  %11739 = vst [vmem:[#allocation37_spill] sm:$0xff] %v7568_v6  ;;  %v1719_v23 = vmul.f32 %v11593_v14, %v1213_v36  ;;  %v2349_v19 = vmul.f32 %v11598_v39, %v1213_v36  ;;  %v2811_v47 = vmul.f32 %v11713_v31, %v1213_v36  ;;  %v11743_v36 = vld [vmem:[#allocation55_spill] sm:$0xff] }
 0x13e   : > { %v2477_v13 = vadd.f32 %v7174_v30, %v2319_v37  ;;  %v1537_v41 = vadd.f32 %v7258_v20, %v1382_v16  ;;  %v1319_v12 = vrot.slane %v1256_v34, 1  ;;  %v778_v60 = vmul.f32 %v11588_v38, %v7561_v26  ;;  %v11760_v20 = vld [vmem:[#allocation183_spill] sm:$0xff] }
 0x13f   : > { %v1190_v33 = vadd.f32 %v11740_v59, %v7439_v27  ;;  %v1782_v40 = vrot.slane %v1719_v23, 2  ;;  %v2410_v30 = vrot.slane %v2349_v19, 1  ;;  %v11741_v37 = vrot.slane %v7088_v18, 1  ;;  %v826_v59 = vpop.permute.xlu1 %825 }
 0x140   : > { %v1691_v55 = vadd.f32 %v1624_v11, %v1537_v41  ;;  %v2872_v17 = vrot.slane %v2811_v47, 2  ;;  %v7591_v34 = vmul.f32 %v11592_v29, %v7561_v26  ;;  %v7594_v45 = vadd.f32 %v11743_v36, %v2477_v13  ;;  %v11756_v36 = vld [vmem:[#allocation60_spill] sm:$0xff] }
 0x141   : > { %v1320_v16 = vsel %vm922_vm0, %v11741_v37, %v1319_v12  ;;  %v7597_v27 = vadd.f32 %v778_v60, %v11745_v49  ;;  %v11747_v23 = vrot.slane %v7092_v42, 2  ;;  %v11748_v19 = vrot.slane %v7106_v22, 1  ;;  %v5580_v49 = vld [vmem:[%s10945_s5 + $0x28] sm:$0xff]   ;;  %v11753_v60 = vld [vmem:[#allocation34_spill] sm:$0xff] }
 0x142   : > { %11742 = vst [vmem:[#allocation104_spill] sm:$0xff] %v7591_v34  ;;  %11744 = vst [vmem:[#allocation122_spill] sm:$0xff] %v7594_v45  ;;  %v1845_v11 = vadd.f32 %v1778_v0, %v1691_v55  ;;  %v1384_v41 = vadd.f32 %v1320_v16, %v1190_v33  ;;  %v7607_v12 = vmul.f32 %v11593_v14, %v7561_v26  ;;  %v11751_v33 = vld [vmem:[#allocation59_spill] sm:$0xff]  ;;  %v11754_v13 = vrot.slane %v7110_v4, 2  ;;  %v11772_v34 = vld [vmem:[#allocation185_spill] sm:$0xff] }
 0x143   : > { %11746 = vst [vmem:[#allocation188_spill] sm:$0xff] %v7597_v27  ;;  %v1783_v18 = vsel %vm1465_vm1, %v11747_v23, %v1782_v40  ;;  %v2411_v47 = vsel %vm922_vm0, %v11748_v19, %v2410_v30  ;;  %v7611_v55 = vmul.f32 %v11598_v39, %v7561_v26  ;;  %v7620_v22 = vmul.f32 %v11713_v31, %v7561_v26 }
 0x144   : > { %11749 = vst [vmem:[#allocation105_spill] sm:$0xff] %v7607_v12  ;;  %v1899_v42 = vadd.f32 %v11751_v33, %v1845_v11  ;;  %v1539_v40 = vadd.f32 %v7444_v32, %v1384_v41  ;;  %v775_v0 = vmul.f32 %v11588_v38, %v11753_v60  ;;  %v7627_v30 = vsel %vm1465_vm1, %v11754_v13, %v2872_v17  ;;  %v11757_v41 = vld [vmem:[#allocation109_spill] sm:$0xff]  ;;  %v11758_v33 = vld [vmem:[#allocation68_spill] sm:$0xff] }
 0x145   : > { %11750 = vst [vmem:[#allocation32_spill] sm:$0xff] %v7611_v55  ;;  %11752 = vst [vmem:[#allocation54_spill] sm:$0xff] %v7620_v22  ;;  %v7632_v16 = vmul.f32 %v11601_v35, %v7561_v26  ;;  %v873_v32 = vmul.f32 %v5878_v46, %v826_v59  ;;  %5446 = vmatprep.subr.bf16.mxu0 %v5580_v49  ;;  %5477 = vmatprep.subr.bf16.mxu1 %v5580_v49  ;;  %v11759_v13 = vrot.slane %v11758_v33, 1  ;;  %v7649_v55 = vpop.permute.xlu0 %733  ;;  %v11765_v17 = vld [vmem:[#allocation69_spill] sm:$0xff] }
 0x146   : > { %v1951_v11 = vadd.f32 %v11756_v36, %v1899_v42  ;;  %v1693_v23 = vadd.f32 %v11757_v41, %v1539_v40  ;;  %5447 = vmatpush3.bf16.msra.mxu0 %v5580_v49  ;;  %5485 = vmatpush3.bf16.msra.mxu1 %v5580_v49  ;;  %v11761_v37 = vrot.slane %v11760_v20, 1  ;;  %v1416_v45 = vmul.f32 %v5885_v51, %v826_v59  ;;  %v11762_v42 = vld [vmem:[#allocation216_spill] sm:$0xff]  ;;  %v11763_v41 = vld [vmem:[#allocation95_spill] sm:$0xff] }
 0x147   : > { %11755 = vst [vmem:[#allocation199_spill] sm:$0xff] %v7632_v16  ;;  %v941_v6 = vrot.slane %v873_v32, 1  ;;  %v795_v19 = vadd.f32 %v775_v0, %v11763_v41  ;;  %v2039_v4 = vmul.f32 %v5888_v52, %v826_v59  ;;  %11764 = vst [vmem:[#allocation123_spill] sm:$0xff] %v7649_v55  ;;  %v11766_v22 = vrot.slane %v11765_v17, 2  ;;  %v11767_v20 = vld [vmem:[#allocation184_spill] sm:$0xff]  ;;  %v11769_v0 = vld [vmem:[#allocation73_spill] sm:$0xff] }
 0x148   : > { %v940_v26 = vsel %vm922_vm0, %v11761_v37, %v11759_v13  ;;  %v2003_v36 = vadd.f32 %v11762_v42, %v1951_v11  ;;  %v1847_v40 = vadd.f32 %v1783_v18, %v1693_v23  ;;  %v11768_v12 = vrot.slane %v11767_v20, 2 }
 0x149   : > { %v7652_v49 = vadd.f32 %v940_v26, %v7509_v48  ;;  %v1484_v32 = vrot.slane %v1416_v45, 2  ;;  %v2509_v11 = vmul.f32 %v5891_v53, %v826_v59  ;;  %v942_v42 = vsel %vm922_vm0, %v11759_v13, %v941_v6  ;;  %v11770_v26 = vld [vmem:[#allocation70_spill] sm:$0xff]  ;;  %v11780_v6 = vld [vmem:[#allocation75_spill] sm:$0xff] }
 0x14a   : > { %v7659_v37 = vsel %vm1465_vm1, %v11768_v12, %v11766_v22  ;;  %v2162_v18 = vadd.f32 %v7453_v57, %v2003_v36  ;;  %v1901_v23 = vadd.f32 %v11769_v0, %v1847_v40  ;;  %v2104_v48 = vrot.slane %v2039_v4, 1  ;;  %v11774_v12 = vld [vmem:[#allocation76_spill] sm:$0xff]  ;;  %v11776_v22 = vld [vmem:[#allocation186_spill] sm:$0xff] }
 0x14b   : > { %v11771_v41 = vrot.slane %v11770_v26, 1  ;;  %v11773_v16 = vrot.slane %v11772_v34, 1  ;;  %v11775_v45 = vrot.slane %v11774_v12, 2  ;;  %v11777_v27 = vrot.slane %v11776_v22, 2  ;;  %v11781_v40 = vld [vmem:[#allocation110_spill] sm:$0xff]  ;;  %v11786_v22 = vld [vmem:[#allocation207_spill] sm:$0xff] }
 0x14c   : > { %v2574_v36 = vrot.slane %v2509_v11, 2  ;;  %v7682_v33 = vmul.f32 %v11642_v63, %v826_v59  ;;  %v1953_v4 = vadd.f32 %v11780_v6, %v1901_v23  ;;  %v2320_v0 = vadd.f32 %v11781_v40, %v2162_v18 }
 0x14d   : > { %v7672_v20 = vsel %vm922_vm0, %v11773_v16, %v11771_v41  ;;  %v7679_v57 = vsel %vm1465_vm1, %v11777_v27, %v11775_v45  ;;  %v7687_v34 = vmul.f32 %v11667_v7, %v826_v59  ;;  %v780_v16 = vmul.f32 %v11588_v38, %v7649_v55 }
 0x14e   : > { %11778 = vst [vmem:[#allocation108_spill] sm:$0xff] %v7679_v57  ;;  %11779 = vst [vmem:[#allocation55_spill] sm:$0xff] %v7682_v33  ;;  %v7691_v13 = vadd.f32 %v942_v42, %v795_v19  ;;  %v11783_v41 = vrot.slane %v11765_v17, 2  ;;  %v11784_v11 = vrot.slane %v11770_v26, 1  ;;  %v7705_v18 = vmul.f32 %v11592_v29, %v7649_v55  ;;  %v11800_v26 = vld [vmem:[#allocation211_spill] sm:$0xff] }
 0x14f   : > { %11782 = vst [vmem:[#allocation204_spill] sm:$0xff] %v7687_v34  ;;  %v2005_v59 = vadd.f32 %v7572_v25, %v1953_v4  ;;  %v2478_v23 = vadd.f32 %v2411_v47, %v2320_v0  ;;  %v800_v19 = vadd.f32 %v780_v16, %v11786_v22  ;;  %v7711_v17 = vmul.f32 %v11593_v14, %v7649_v55 }
 0x150   : > { %v7696_v27 = vsel %vm1465_vm1, %v11783_v41, %v1484_v32  ;;  %v7701_v45 = vsel %vm922_vm0, %v11784_v11, %v2104_v48  ;;  %11785 = vst [vmem:[#allocation59_spill] sm:$0xff] %v7705_v18  ;;  %v7713_v32 = vpop.permute.xlu0 %741  ;;  %v11789_v42 = vrot.slane %v11774_v12, 2  ;;  %v7723_v6 = vmul.f32 %v11598_v39, %v7649_v55  ;;  %v5581_v11 = vld [vmem:[%s10945_s5 + $0x30] sm:$0xff]  }
 0x151   : > { %11787 = vst [vmem:[#allocation60_spill] sm:$0xff] %v7711_v17  ;;  %11788 = vst [vmem:[#allocation109_spill] sm:$0xff] %v7713_v32  ;;  %v7727_v25 = vmul.f32 %v11713_v31, %v7649_v55  ;;  %v2632_v47 = vadd.f32 %v7484_v1, %v2478_v23  ;;  %v7734_v12 = vmul.f32 %v11601_v35, %v7649_v55  ;;  %v11796_v23 = vld [vmem:[#allocation111_spill] sm:$0xff]  ;;  %5448 = vmatprep.subr.bf16.mxu0 %v5581_v11 }
 0x152   : > { %v7718_v48 = vsel %vm1465_vm1, %v11789_v42, %v2574_v36  ;;  %11790 = vst [vmem:[#allocation68_spill] sm:$0xff] %v7723_v6  ;;  %v7736_v36 = vpop.permute.xlu1 %1022  ;;  %v2164_v0 = vadd.f32 %v7290_v62, %v2005_v59  ;;  %v7740_v16 = vadd.f32 %v7266_v58, %v800_v19  ;;  %v782_v41 = vmul.f32 %v11588_v38, %v7713_v32  ;;  %v11801_v59 = vld [vmem:[#allocation48_spill] sm:$0xff]  ;;  %v11812_v6 = vld [vmem:[#allocation74_spill] sm:$0xff] }
 0x153   : > { %11791 = vst [vmem:[#allocation183_spill] sm:$0xff] %v7727_v25  ;;  %11792 = vst [vmem:[#allocation216_spill] sm:$0xff] %v7734_v12  ;;  %v7746_v1 = vmul.f32 %v11592_v29, %v7713_v32  ;;  %v2786_v22 = vadd.f32 %v11796_v23, %v2632_v47  ;;  %v7755_v62 = vmul.f32 %v11593_v14, %v7713_v32  ;;  %5478 = vmatprep.subr.bf16.mxu1 %v5581_v11 }
 0x154   : > { %11793 = vst [vmem:[#allocation95_spill] sm:$0xff] %v7736_v36  ;;  %11794 = vst [vmem:[#allocation69_spill] sm:$0xff] %v7740_v16  ;;  %v7759_v58 = vmul.f32 %v11598_v39, %v7713_v32  ;;  %v7765_v4 = vmul.f32 %v11601_v35, %v7713_v32  ;;  %v1065_v47 = vmul.f32 %v11715_v5, %v7736_v36  ;;  %5449 = vmatpush3.bf16.msra.mxu0 %v5581_v11  ;;  %v11802_v32 = vld [vmem:[#allocation23_spill] sm:$0xff] }
 0x155   : > { %11795 = vst [vmem:[#allocation184_spill] sm:$0xff] %v7746_v1  ;;  %11797 = vst [vmem:[#allocation73_spill] sm:$0xff] %v7755_v62  ;;  %v2940_v23 = vadd.f32 %v7627_v30, %v2786_v22  ;;  %v7771_v42 = vadd.f32 %v782_v41, %v11800_v26  ;;  %v997_v55 = vadd.f32 %v11801_v59, %v7456_v61  ;;  %5486 = vmatpush3.bf16.msra.mxu1 %v5581_v11  ;;  %v11803_v26 = vld [vmem:[#allocation83_spill] sm:$0xff]  ;;  %v11805_v22 = vld [vmem:[#allocation129_spill] sm:$0xff] }
 0x156   : > { %11798 = vst [vmem:[#allocation70_spill] sm:$0xff] %v7759_v58  ;;  %11799 = vst [vmem:[#allocation185_spill] sm:$0xff] %v7765_v4  ;;  %v1130_v25 = vrot.slane %v1065_v47, 1  ;;  %v1567_v4 = vmul.f32 %v11716_v8, %v11802_v32  ;;  %v1568_v57 = vmul.f32 %v11716_v8, %v7736_v36  ;;  %v11804_v41 = vrot.slane %v11803_v26, 1  ;;  %v11807_v61 = vld [vmem:[#allocation20_spill] sm:$0xff]  ;;  %v11809_v30 = vld [vmem:[#allocation21_spill] sm:$0xff] }
 0x157   : > { %v11806_v40 = vrot.slane %v11805_v22, 1  ;;  %v2193_v11 = vmul.f32 %v11807_v61, %v11802_v32  ;;  %v2194_v59 = vmul.f32 %v11807_v61, %v7736_v36  ;;  %v7796_v58 = vmul.f32 %v11809_v30, %v11802_v32  ;;  %v11811_v22 = vld [vmem:[#allocation50_spill] sm:$0xff] }
 0x158   : > { %v11808_v47 = vmov %v11804_v41  ;;  %v1631_v33 = vrot.slane %v1567_v4, 2  ;;  %v1633_v12 = vrot.slane %v1568_v57, 2  ;;  %v2163_v62 = vadd.f32 %v11811_v22, %v7490_v54  ;;  %v11814_v57 = vld [vmem:[#allocation25_spill] sm:$0xff] }
 0x159   : > { %v1129_v34 = vsel %vm922_vm0, %v11806_v40, %v11804_v41  ;;  %v1131_v19 = vsel %vm922_vm0, %v11808_v47, %v1130_v25  ;;  %11810 = vst [vmem:[#allocation76_spill] sm:$0xff] %v7796_v58  ;;  %v2255_v40 = vrot.slane %v2193_v11, 1  ;;  %v2257_v41 = vrot.slane %v2194_v59, 1  ;;  %v11816_v47 = vld [vmem:[#allocation130_spill] sm:$0xff]  ;;  %v11818_v22 = vld [vmem:[#allocation213_spill] sm:$0xff] }
 0x15a   : > { %v2660_v1 = vmul.f32 %v11809_v30, %v7736_v36  ;;  %v7803_v17 = vadd.f32 %v11812_v6, %v2940_v23  ;;  %v1191_v26 = vadd.f32 %v1129_v34, %v997_v55  ;;  %v7806_v25 = vadd.f32 %v1131_v19, %v7309_v2  ;;  %v7822_v55 = vpop.permute.xlu0 %1224  ;;  %v11820_v2 = vld [vmem:[#allocation131_spill] sm:$0xff] }
 0x15b   : > { %v7810_v4 = vmul.f32 %v11814_v57, %v7736_v36  ;;  %v11817_v32 = vrot.slane %v11816_v47, 2  ;;  %v7818_v11 = vsel %vm1465_vm1, %v1631_v33, %v1633_v12  ;;  %v1264_v6 = vmul.f32 %v11592_v29, %v11818_v22  ;;  %11819 = vst [vmem:[#allocation110_spill] sm:$0xff] %v7822_v55 }
 0x15c   : > { %11813 = vst [vmem:[#allocation186_spill] sm:$0xff] %v7803_v17  ;;  %v2723_v59 = vrot.slane %v2660_v1, 2  ;;  %v11821_v34 = vrot.slane %v11820_v2, 1  ;;  %v2258_v23 = vsel %vm922_vm0, %v2255_v40, %v2257_v41  ;;  %v11211_v47 = vrot.slane %v7796_v58, 2 }
 0x15d   : > { %11815 = vst [vmem:[#allocation75_spill] sm:$0xff] %v7810_v4  ;;  %v7815_v54 = vsel %vm1465_vm1, %v11817_v32, %v1631_v33  ;;  %v1727_v32 = vmul.f32 %v11593_v14, %v11818_v22  ;;  %v2322_v33 = vadd.f32 %v2258_v23, %v2164_v0  ;;  %v2357_v1 = vmul.f32 %v11598_v39, %v11818_v22  ;;  %v5582_v0 = vld [vmem:[%s10945_s5 + $0x38] sm:$0xff]  }
 0x15e   : > { %v2256_v19 = vsel %vm922_vm0, %v11821_v34, %v2255_v40  ;;  %v7836_v17 = vmul.f32 %v11713_v31, %v11818_v22  ;;  %v1265_v2 = vmul.f32 %v11592_v29, %v7822_v55  ;;  %v1728_v40 = vmul.f32 %v11593_v14, %v7822_v55  ;;  %5450 = vmatprep.subr.bf16.mxu0 %v5582_v0 }
 0x15f   : > { %v2321_v36 = vadd.f32 %v2256_v19, %v2163_v62  ;;  %v2358_v41 = vmul.f32 %v11598_v39, %v7822_v55  ;;  %v7850_v62 = vsel %vm1465_vm1, %v11211_v47, %v2723_v59  ;;  %v1332_v34 = vrot.slane %v1264_v6, 1  ;;  %5479 = vmatprep.subr.bf16.mxu1 %v5582_v0  ;;  %v11824_v59 = vld [vmem:[#allocation94_spill] sm:$0xff]  ;;  %5451 = vmatpush3.bf16.msra.mxu0 %v5582_v0 }
 0x160   : > { %11822 = vst [vmem:[#allocation207_spill] sm:$0xff] %v7836_v17  ;;  %v1795_v19 = vrot.slane %v1727_v32, 2  ;;  %v2820_v23 = vmul.f32 %v11713_v31, %v7822_v55  ;;  %v2423_v12 = vrot.slane %v2357_v1, 1  ;;  %v1334_v4 = vrot.slane %v1265_v2, 1  ;;  %v7865_v32 = vpop.permute.xlu1 %1216  ;;  %5487 = vmatpush3.bf16.msra.mxu1 %v5582_v0 }
 0x161   : > { %v1797_v18 = vrot.slane %v1728_v40, 2  ;;  %v2425_v16 = vrot.slane %v2358_v41, 1  ;;  %v11823_v22 = vrot.slane %v7533_v21, 1  ;;  %v7861_v47 = vmul.f32 %v11824_v59, %v7822_v55  ;;  %11826 = vst [vmem:[#allocation211_spill] sm:$0xff] %v7865_v32 }
 0x162   : > { %v2887_v58 = vrot.slane %v2820_v23, 2  ;;  %v1258_v6 = vmul.f32 %v11592_v29, %v6966_v28  ;;  %v11827_v1 = vrot.slane %v7539_v9, 2  ;;  %v11829_v21 = vrot.slane %v7556_v50, 1 }
 0x163   : > { %v7857_v57 = vsel %vm922_vm0, %v11823_v22, %v1332_v34  ;;  %11825 = vst [vmem:[#allocation111_spill] sm:$0xff] %v7861_v47  ;;  %v1721_v41 = vmul.f32 %v11593_v14, %v6966_v28  ;;  %v7881_v23 = vsel %vm922_vm0, %v1332_v34, %v1334_v4  ;;  %v7884_v0 = vsel %vm1465_vm1, %v1795_v19, %v1797_v18 }
 0x164   : > { %v7870_v2 = vsel %vm1465_vm1, %v11827_v1, %v1795_v19  ;;  %v7875_v22 = vsel %vm922_vm0, %v11829_v21, %v2423_v12  ;;  %11831 = vst [vmem:[#allocation129_spill] sm:$0xff] %v7881_v23  ;;  %11832 = vst [vmem:[#allocation50_spill] sm:$0xff] %v7884_v0  ;;  %v1322_v9 = vrot.slane %v1258_v6, 1  ;;  %v2351_v1 = vmul.f32 %v11598_v39, %v6966_v28  ;;  %v11839_v19 = vld [vmem:[#allocation49_spill] sm:$0xff] }
 0x165   : > { %11828 = vst [vmem:[#allocation48_spill] sm:$0xff] %v7870_v2  ;;  %11830 = vst [vmem:[#allocation83_spill] sm:$0xff] %v7875_v22  ;;  %v7889_v50 = vsel %vm922_vm0, %v2423_v12, %v2425_v16  ;;  %v7893_v21 = vmul.f32 %v11713_v31, %v6966_v28  ;;  %v1259_v40 = vmul.f32 %v11592_v29, %v7865_v32  ;;  %v11835_v18 = vrot.slane %v7836_v17, 2  ;;  %v11838_v17 = vld [vmem:[#allocation26_spill] sm:$0xff] }
 0x166   : > { %11833 = vst [vmem:[#allocation74_spill] sm:$0xff] %v7889_v50  ;;  %v1722_v4 = vmul.f32 %v11593_v14, %v7865_v32  ;;  %v11836_v16 = vrot.slane %v7432_v10, 1  ;;  %v2352_v6 = vmul.f32 %v11598_v39, %v7865_v32  ;;  %v1785_v22 = vrot.slane %v1721_v41, 2  ;;  %v11837_v50 = vld [vmem:[#allocation36_spill] sm:$0xff] }
 0x167   : > { %11834 = vst [vmem:[#allocation130_spill] sm:$0xff] %v7893_v21  ;;  %v7902_v34 = vsel %vm1465_vm1, %v11835_v18, %v2887_v58  ;;  %v2413_v55 = vrot.slane %v2351_v1, 1  ;;  %v1324_v28 = vrot.slane %v1259_v40, 1  ;;  %v1935_v23 = vmul.f32 %v11838_v17, %v11837_v50  ;;  %v7920_v40 = vpop.permute.xlu0 %749 }
 0x168   : > { %v1323_v12 = vsel %vm922_vm0, %v11836_v16, %v1322_v9  ;;  %v2415_v58 = vrot.slane %v2352_v6, 1  ;;  %v2814_v18 = vmul.f32 %v11713_v31, %v7865_v32  ;;  %v11840_v47 = vrot.slane %v7460_v3, 2  ;;  %11841 = vst [vmem:[#allocation131_spill] sm:$0xff] %v7920_v40 }
 0x169   : > { %v1385_v0 = vadd.f32 %v1323_v12, %v1191_v26  ;;  %v1325_v10 = vsel %vm922_vm0, %v1322_v9, %v1324_v28  ;;  %v1787_v1 = vrot.slane %v1722_v4, 2  ;;  %v11842_v12 = vrot.slane %v7470_v44, 1 }
 0x16a   : > { %v1786_v41 = vsel %vm1465_vm1, %v11840_v47, %v1785_v22  ;;  %v1386_v26 = vadd.f32 %v1325_v10, %v7806_v25  ;;  %v2416_v2 = vsel %vm922_vm0, %v2413_v55, %v2415_v58  ;;  %v2877_v50 = vrot.slane %v2814_v18, 2  ;;  %v11851_v18 = vld [vmem:[#allocation189_spill] sm:$0xff] }
 0x16b   : > { %v1540_v16 = vadd.f32 %v11839_v19, %v1385_v0  ;;  %v2414_v6 = vsel %vm922_vm0, %v11842_v12, %v2413_v55  ;;  %v2480_v0 = vadd.f32 %v2416_v2, %v2322_v33  ;;  %v7932_v3 = vmul.f32 %v11824_v59, %v7865_v32 }
 0x16c   : > { %v7928_v9 = vadd.f32 %v2414_v6, %v2321_v36  ;;  %v1541_v47 = vadd.f32 %v7285_v15, %v1386_v26  ;;  %v784_v25 = vmul.f32 %v11588_v38, %v7920_v40  ;;  %v7939_v44 = vmul.f32 %v11592_v29, %v7920_v40  ;;  %v7974_v6 = vpop.permute.xlu1 %1220 }
 0x16d   : > { %v1694_v28 = vadd.f32 %v7815_v54, %v1540_v16  ;;  %11844 = vst [vmem:[#allocation49_spill] sm:$0xff] %v7932_v3  ;;  %v7943_v55 = vmul.f32 %v11593_v14, %v7920_v40  ;;  %v1788_v36 = vsel %vm1465_vm1, %v1785_v22, %v1787_v1  ;;  %v2634_v33 = vadd.f32 %v7314_v56, %v2480_v0 }
 0x16e   : > { %11843 = vst [vmem:[#allocation26_spill] sm:$0xff] %v7928_v9  ;;  %11845 = vst [vmem:[#allocation239_spill] sm:$0xff] %v7939_v44  ;;  %v11847_v2 = vrot.slane %v7893_v21, 2  ;;  %v1695_v4 = vadd.f32 %v7818_v11, %v1541_v47  ;;  %v7953_v19 = vmul.f32 %v11601_v35, %v7920_v40  ;;  %v7957_v58 = vmul.f32 %v11598_v39, %v7920_v40  ;;  %v11934_v9 = vld [vmem:[#allocation64_spill] sm:$0xff] }
 0x16f   : > { %11846 = vst [vmem:[#allocation240_spill] sm:$0xff] %v7943_v55  ;;  %v1848_v54 = vadd.f32 %v1786_v41, %v1694_v28  ;;  %v7961_v22 = vmul.f32 %v11713_v31, %v7920_v40  ;;  %v2788_v10 = vadd.f32 %v7850_v62, %v2634_v33  ;;  %v1724_v11 = vmul.f32 %v11593_v14, %v11753_v60  ;;  %v11852_v41 = vld [vmem:[#allocation219_spill] sm:$0xff]  ;;  %v11855_v28 = vld [vmem:[#allocation2_spill] sm:$0xff]  ;;  %v11856_v33 = vld [vmem:[#allocation84_spill] sm:$0xff] }
 0x170   : > { %v2878_v15 = vsel %vm1465_vm1, %v11847_v2, %v2877_v50  ;;  %11848 = vst [vmem:[#allocation241_spill] sm:$0xff] %v7953_v19  ;;  %11849 = vst [vmem:[#allocation242_spill] sm:$0xff] %v7957_v58  ;;  %v1261_v50 = vmul.f32 %v11592_v29, %v11753_v60  ;;  %v1849_v16 = vadd.f32 %v1788_v36, %v1695_v4  ;;  %v11857_v36 = vld [vmem:[#allocation51_spill] sm:$0xff]  ;;  %v11935_v19 = vrot.slane %v11934_v9, 1 }
 0x171   : > { %11850 = vst [vmem:[#allocation243_spill] sm:$0xff] %v7961_v22  ;;  %v1902_v56 = vadd.f32 %v11851_v18, %v1848_v54  ;;  %v7970_v1 = vadd.f32 %v784_v25, %v11852_v41  ;;  %11854 = vst [vmem:[#allocation219_spill] sm:$0xff] %v7974_v6  ;;  %v2942_v47 = vadd.f32 %v2878_v15, %v2788_v10  ;;  %v11858_v4 = vrot.slane %v11857_v36, 1  ;;  %v11859_v41 = vld [vmem:[#allocation139_spill] sm:$0xff] }
 0x172   : > { %v1903_v2 = vadd.f32 %v11856_v33, %v1849_v16  ;;  %v1327_v18 = vrot.slane %v1261_v50, 1  ;;  %v2354_v25 = vmul.f32 %v11598_v39, %v11753_v60  ;;  %v11860_v26 = vrot.slane %v11859_v41, 1  ;;  %v11861_v50 = vld [vmem:[#allocation96_spill] sm:$0xff]  ;;  %v11897_v55 = vld [vmem:[#allocation107_spill] sm:$0xff] }
 0x173   : > { %11853 = vst [vmem:[#allocation189_spill] sm:$0xff] %v7970_v1  ;;  %v1954_v0 = vadd.f32 %v11855_v28, %v1902_v56  ;;  %v1790_v40 = vrot.slane %v1724_v11, 2  ;;  %v1987_v15 = vmul.f32 %v11601_v35, %v11753_v60  ;;  %v1262_v10 = vmul.f32 %v11592_v29, %v7974_v6  ;;  %v11936_v1 = vld [vmem:[#allocation149_spill] sm:$0xff] }
 0x174   : > { %v1134_v12 = vsel %vm922_vm0, %v11860_v26, %v11858_v4  ;;  %v1955_v16 = vadd.f32 %v1935_v23, %v1903_v2  ;;  %v7993_v28 = vadd.f32 %v11861_v50, %v2942_v47  ;;  %v7997_v33 = vmul.f32 %v11713_v31, %v11753_v60  ;;  %v11865_v26 = vld [vmem:[#allocation115_spill] sm:$0xff]  ;;  %v11866_v2 = vld [vmem:[#allocation52_spill] sm:$0xff] }
 0x175   : > { %v1193_v56 = vadd.f32 %v1134_v12, %v7652_v49  ;;  %v11864_v36 = vrot.slane %v7499_v24, 1  ;;  %v1194_v4 = vadd.f32 %v11865_v26, %v7691_v13  ;;  %v1329_v41 = vrot.slane %v1262_v10, 1  ;;  %v11868_v50 = vld [vmem:[#allocation143_spill] sm:$0xff]  ;;  %v11870_v13 = vld [vmem:[#allocation16_spill] sm:$0xff] }
 0x176   : > { %11862 = vst [vmem:[#allocation2_spill] sm:$0xff] %v7993_v28  ;;  %11863 = vst [vmem:[#allocation84_spill] sm:$0xff] %v7997_v33  ;;  %v1725_v12 = vmul.f32 %v11593_v14, %v7974_v6  ;;  %v2418_v23 = vrot.slane %v2354_v25, 1  ;;  %v11867_v47 = vrot.slane %v11866_v2, 2  ;;  %v11869_v54 = vrot.slane %v11868_v50, 2 }
 0x177   : > { %v1328_v11 = vsel %vm922_vm0, %v11864_v36, %v1327_v18  ;;  %v2006_v22 = vadd.f32 %v7513_v43, %v1954_v0  ;;  %v2007_v24 = vadd.f32 %v1987_v15, %v1955_v16  ;;  %v1330_v36 = vsel %vm922_vm0, %v1327_v18, %v1329_v41  ;;  %v11874_v43 = vld [vmem:[#allocation144_spill] sm:$0xff] }
 0x178   : > { %v1387_v49 = vadd.f32 %v1328_v11, %v1193_v56  ;;  %v1637_v62 = vsel %vm1465_vm1, %v11869_v54, %v11867_v47  ;;  %v11871_v10 = vrot.slane %v11870_v13, 2  ;;  %v2355_v25 = vmul.f32 %v11598_v39, %v7974_v6  ;;  %v11872_v54 = vld [vmem:[#allocation53_spill] sm:$0xff] }
 0x179   : > { %v1388_v11 = vadd.f32 %v1330_v36, %v1194_v4  ;;  %v2165_v26 = vadd.f32 %v7672_v20, %v2006_v22  ;;  %v2166_v2 = vadd.f32 %v7701_v45, %v2007_v24  ;;  %v11873_v47 = vrot.slane %v11872_v54, 1  ;;  %v11876_v4 = vld [vmem:[#allocation118_spill] sm:$0xff]  ;;  %v8034_v45 = vpop.permute.xlu0 %1244 }
 0x17a   : > { %v1542_v58 = vadd.f32 %v7659_v37, %v1387_v49  ;;  %v1791_v56 = vsel %vm1465_vm1, %v11871_v10, %v1790_v40  ;;  %v11875_v0 = vrot.slane %v11874_v43, 1  ;;  %v1792_v37 = vrot.slane %v1725_v12, 2  ;;  %11878 = vst [vmem:[#allocation139_spill] sm:$0xff] %v8034_v45  ;;  %v11881_v10 = vld [vmem:[#allocation114_spill] sm:$0xff] }
 0x17b   : > { %v2420_v16 = vrot.slane %v2355_v25, 1  ;;  %v2817_v41 = vmul.f32 %v11713_v31, %v7974_v6  ;;  %v1543_v49 = vadd.f32 %v7696_v27, %v1388_v11  ;;  %v2324_v36 = vadd.f32 %v11876_v4, %v2166_v2  ;;  %v11880_v27 = vld [vmem:[#allocation117_spill] sm:$0xff] }
 0x17c   : > { %v2261_v18 = vsel %vm922_vm0, %v11875_v0, %v11873_v47  ;;  %v1696_v15 = vadd.f32 %v1637_v62, %v1542_v58  ;;  %v8032_v20 = vmul.f32 %v11824_v59, %v7974_v6  ;;  %v8039_v62 = vmul.f32 %v11592_v29, %v8034_v45  ;;  %v11885_v0 = vld [vmem:[#allocation198_spill] sm:$0xff] }
 0x17d   : > { %v2323_v50 = vadd.f32 %v2261_v18, %v2165_v26  ;;  %v2421_v24 = vsel %vm922_vm0, %v2418_v23, %v2420_v16  ;;  %v2882_v58 = vrot.slane %v2817_v41, 2  ;;  %v11221_v12 = vrot.slane %v7997_v33, 2 }
 0x17e   : > { %11877 = vst [vmem:[#allocation51_spill] sm:$0xff] %v8032_v20  ;;  %v1850_v22 = vadd.f32 %v1791_v56, %v1696_v15  ;;  %11879 = vst [vmem:[#allocation96_spill] sm:$0xff] %v8039_v62  ;;  %v1697_v13 = vadd.f32 %v11880_v27, %v1543_v49  ;;  %v11882_v25 = vrot.slane %v11881_v10, 1  ;;  %v2482_v26 = vadd.f32 %v2421_v24, %v2324_v36  ;;  %v846_v49 = vpop.permute.xlu1 %845  ;;  %v11890_v36 = vld [vmem:[#allocation71_spill] sm:$0xff] }
 0x17f   : > { %v1793_v2 = vsel %vm1465_vm1, %v1790_v40, %v1792_v37  ;;  %v8052_v47 = vmul.f32 %v11593_v14, %v8034_v45  ;;  %v8064_v37 = vmul.f32 %v11598_v39, %v8034_v45  ;;  %v8068_v16 = vmul.f32 %v11713_v31, %v8034_v45 }
 0x180   : > { %v2419_v11 = vsel %vm922_vm0, %v11882_v25, %v2418_v23  ;;  %v1851_v43 = vadd.f32 %v1793_v2, %v1697_v13  ;;  %v8055_v18 = vadd.f32 %v11885_v0, %v1850_v22  ;;  %v2636_v15 = vadd.f32 %v7718_v48, %v2482_v26  ;;  %v11889_v48 = vld [vmem:[#allocation119_spill] sm:$0xff]  ;;  %v11891_v22 = vld [vmem:[#allocation8_spill] sm:$0xff]  ;;  %v11893_v13 = vld [vmem:[#allocation106_spill] sm:$0xff] }
 0x181   : > { %v8047_v54 = vadd.f32 %v2419_v11, %v2323_v50  ;;  %11884 = vst [vmem:[#allocation52_spill] sm:$0xff] %v8052_v47  ;;  %v2883_v23 = vsel %vm1465_vm1, %v11221_v12, %v2882_v58  ;;  %11886 = vst [vmem:[#allocation143_spill] sm:$0xff] %v8064_v37  ;;  %v8072_v41 = vmul.f32 %v11824_v59, %v8034_v45  ;;  %v11892_v58 = vld [vmem:[#allocation90_spill] sm:$0xff]  ;;  %v11899_v37 = vld [vmem:[#allocation208_spill] sm:$0xff]  ;;  %v11937_v32 = vrot.slane %v11936_v1, 1 }
 0x182   : > { %11887 = vst [vmem:[#allocation16_spill] sm:$0xff] %v8068_v16  ;;  %v2790_v50 = vadd.f32 %v11889_v48, %v2636_v15  ;;  %v535_v24 = vmul.f32 %v11891_v22, %v11890_v36  ;;  %v783_v27 = vmul.f32 %v11588_v38, %v11892_v58  ;;  %v8081_v10 = vadd.f32 %v11893_v13, %v1851_v43  ;;  %v11895_v15 = vld [vmem:[#allocation72_spill] sm:$0xff]  ;;  %v11896_v48 = vld [vmem:[#allocation14_spill] sm:$0xff] }
 0x183   : > { %11883 = vst [vmem:[#allocation115_spill] sm:$0xff] %v8047_v54  ;;  %11888 = vst [vmem:[#allocation53_spill] sm:$0xff] %v8072_v41  ;;  %v884_v25 = vmul.f32 %v5878_v46, %v11890_v36  ;;  %v1427_v11 = vmul.f32 %v5885_v51, %v11890_v36  ;;  %v2050_v26 = vmul.f32 %v5888_v52, %v11890_v36  ;;  %v11900_v40 = vrot.slane %v11899_v37, 1  ;;  %v11901_v41 = vld [vmem:[#allocation56_spill] sm:$0xff] }
 0x184   : > { %v2944_v2 = vadd.f32 %v2883_v23, %v2790_v50  ;;  %v8091_v0 = vmul.f32 %v5891_v53, %v11890_v36  ;;  %v659_v4 = vmul.f32 %v11896_v48, %v11895_v15  ;;  %v885_v43 = vmul.f32 %v5878_v46, %v846_v49 }
 0x185   : > { %v1428_v56 = vmul.f32 %v5885_v51, %v846_v49  ;;  %v959_v45 = vrot.slane %v884_v25, 1  ;;  %v1502_v47 = vrot.slane %v1427_v11, 2  ;;  %v2122_v62 = vrot.slane %v2050_v26, 1 }
 0x186   : > { %11894 = vst [vmem:[#allocation144_spill] sm:$0xff] %v8091_v0  ;;  %v679_v23 = vadd.f32 %v659_v4, %v535_v24  ;;  %v961_v50 = vrot.slane %v885_v43, 1  ;;  %v8101_v44 = vadd.f32 %v11897_v55, %v2944_v2  ;;  %v2051_v54 = vmul.f32 %v5888_v52, %v846_v49 }
 0x187   : > { %v1504_v33 = vrot.slane %v1428_v56, 2  ;;  %v11235_v6 = vrot.slane %v8091_v0, 2  ;;  %v960_v12 = vsel %vm922_vm0, %v11900_v40, %v959_v45  ;;  %v11902_v16 = vrot.slane %v11901_v41, 2  ;;  %v11905_v40 = vld [vmem:[#allocation82_spill] sm:$0xff] }
 0x188   : > { %11898 = vst [vmem:[#allocation118_spill] sm:$0xff] %v8101_v44  ;;  %v803_v13 = vadd.f32 %v783_v27, %v679_v23  ;;  %v962_v4 = vsel %vm922_vm0, %v959_v45, %v961_v50  ;;  %v2124_v55 = vrot.slane %v2051_v54, 1  ;;  %v2521_v24 = vmul.f32 %v5891_v53, %v846_v49  ;;  %v8128_v27 = vpop.permute.xlu0 %1046  ;;  %v11907_v54 = vld [vmem:[#allocation210_spill] sm:$0xff] }
 0x189   : > { %v8111_v25 = vsel %vm1465_vm1, %v11902_v16, %v1502_v47  ;;  %v8116_v56 = vmul.f32 %v11642_v63, %v846_v49  ;;  %v8119_v11 = vadd.f32 %v960_v12, %v7771_v42  ;;  %v8122_v37 = vmul.f32 %v11667_v7, %v846_v49  ;;  %11906 = vst [vmem:[#allocation198_spill] sm:$0xff] %v8128_v27 }
 0x18a   : > { %v1082_v41 = vmul.f32 %v11715_v5, %v11905_v40  ;;  %v1585_v16 = vmul.f32 %v11716_v8, %v11905_v40  ;;  %v8131_v45 = vsel %vm1465_vm1, %v1502_v47, %v1504_v33  ;;  %v11908_v26 = vrot.slane %v11907_v54, 1 }
 0x18b   : > { %11903 = vst [vmem:[#allocation117_spill] sm:$0xff] %v8116_v56  ;;  %11904 = vst [vmem:[#allocation114_spill] sm:$0xff] %v8122_v37  ;;  %v2594_v42 = vrot.slane %v2521_v24, 2  ;;  %v2211_v12 = vmul.f32 %v11807_v61, %v11905_v40  ;;  %v8140_v49 = vadd.f32 %v962_v4, %v803_v13  ;;  %v8143_v43 = vsel %vm922_vm0, %v2122_v62, %v2124_v55 }
 0x18c   : > { %v8136_v2 = vsel %vm922_vm0, %v11908_v26, %v2122_v62  ;;  %v8148_v33 = vmul.f32 %v11809_v30, %v11905_v40  ;;  %v1158_v50 = vrot.slane %v1082_v41, 1  ;;  %v1083_v24 = vmul.f32 %v11715_v5, %v8128_v27  ;;  %v11912_v26 = vld [vmem:[#allocation177_spill] sm:$0xff] }
 0x18d   : > { %11909 = vst [vmem:[#allocation119_spill] sm:$0xff] %v8136_v2  ;;  %v1586_v54 = vmul.f32 %v11716_v8, %v8128_v27  ;;  %v8158_v62 = vsel %vm1465_vm1, %v11235_v6, %v2594_v42  ;;  %v1661_v13 = vrot.slane %v1585_v16, 2  ;;  %v2285_v4 = vrot.slane %v2211_v12, 1  ;;  %v11915_v2 = vld [vmem:[#allocation178_spill] sm:$0xff]  ;;  %v11918_v6 = vld [vmem:[#allocation25_spill] sm:$0xff] }
 0x18e   : > { %11910 = vst [vmem:[#allocation106_spill] sm:$0xff] %v8148_v33  ;;  %11911 = vst [vmem:[#allocation107_spill] sm:$0xff] %v8158_v62  ;;  %v2212_v55 = vmul.f32 %v11807_v61, %v8128_v27  ;;  %v11913_v23 = vrot.slane %v11912_v26, 1  ;;  %v1160_v47 = vrot.slane %v1083_v24, 1  ;;  %v2678_v56 = vmul.f32 %v11809_v30, %v8128_v27  ;;  %v11920_v26 = vld [vmem:[#allocation180_spill] sm:$0xff] }
 0x18f   : > { %v1663_v37 = vrot.slane %v1586_v54, 2  ;;  %v11916_v0 = vrot.slane %v11915_v2, 2  ;;  %v8177_v44 = vmul.f32 %v11918_v6, %v8128_v27  ;;  %v831_v2 = vpop.permute.xlu1 %830  ;;  %v11926_v27 = vld [vmem:[#allocation213_spill] sm:$0xff]  ;;  %v11973_v62 = vld [vmem:[#allocation188_spill] sm:$0xff] }
 0x190   : > { %v8165_v41 = vsel %vm922_vm0, %v11913_v23, %v1158_v50  ;;  %v2287_v12 = vrot.slane %v2212_v55, 1  ;;  %v11921_v23 = vrot.slane %v11920_v26, 1  ;;  %v2753_v54 = vrot.slane %v2678_v56, 2 }
 0x191   : > { %11914 = vst [vmem:[#allocation208_spill] sm:$0xff] %v8165_v41  ;;  %v8172_v42 = vsel %vm1465_vm1, %v11916_v0, %v1661_v13  ;;  %11919 = vst [vmem:[#allocation210_spill] sm:$0xff] %v8177_v44  ;;  %v11923_v41 = vld [vmem:[#allocation42_spill] sm:$0xff]  ;;  %v8189_v16 = vsel %vm922_vm0, %v1158_v50, %v1160_v47  ;;  %v8192_v55 = vsel %vm1465_vm1, %v1661_v13, %v1663_v37  ;;  %v11928_v13 = vld [vmem:[#allocation43_spill] sm:$0xff] }
 0x192   : > { %11917 = vst [vmem:[#allocation56_spill] sm:$0xff] %v8172_v42  ;;  %v8182_v24 = vsel %vm922_vm0, %v11921_v23, %v2285_v4  ;;  %v529_v20 = vmul.f32 %v11891_v22, %v11923_v41  ;;  %v875_v0 = vmul.f32 %v5878_v46, %v11923_v41  ;;  %11924 = vst [vmem:[#allocation178_spill] sm:$0xff] %v8189_v16 }
 0x193   : > { %11922 = vst [vmem:[#allocation177_spill] sm:$0xff] %v8182_v24  ;;  %11925 = vst [vmem:[#allocation25_spill] sm:$0xff] %v8192_v55  ;;  %v777_v26 = vmul.f32 %v11588_v38, %v11926_v27  ;;  %v1418_v23 = vmul.f32 %v5885_v51, %v11923_v41  ;;  %v8199_v56 = vsel %vm922_vm0, %v2285_v4, %v2287_v12  ;;  %v11929_v4 = vrot.slane %v8148_v33, 2 }
 0x194   : > { %11927 = vst [vmem:[#allocation180_spill] sm:$0xff] %v8199_v56  ;;  %v944_v24 = vrot.slane %v875_v0, 1  ;;  %v2041_v42 = vmul.f32 %v5888_v52, %v11923_v41  ;;  %v2511_v47 = vmul.f32 %v5891_v53, %v11923_v41  ;;  %v1989_v37 = vmul.f32 %v11601_v35, %v11926_v27  ;;  %v11931_v56 = vld [vmem:[#allocation192_spill] sm:$0xff] }
 0x195   : > { %v653_v55 = vmul.f32 %v11896_v48, %v11928_v13  ;;  %v876_v16 = vmul.f32 %v5878_v46, %v831_v2  ;;  %v8214_v12 = vsel %vm1465_vm1, %v11929_v4, %v2753_v54  ;;  %v1487_v0 = vrot.slane %v1418_v23, 2  ;;  %v11933_v27 = vld [vmem:[#allocation176_spill] sm:$0xff] }
 0x196   : > { %11930 = vst [vmem:[#allocation244_spill] sm:$0xff] %v8214_v12  ;;  %v11932_v28 = vrot.slane %v11931_v56, 1  ;;  %v1419_v50 = vmul.f32 %v5885_v51, %v831_v2  ;;  %v1139_v33 = vsel %vm922_vm0, %v11937_v32, %v11935_v19  ;;  %v2107_v3 = vrot.slane %v2041_v42, 1  ;;  %v11938_v56 = vld [vmem:[#allocation158_spill] sm:$0xff] }
 0x197   : > { %v673_v44 = vadd.f32 %v653_v55, %v529_v20  ;;  %v946_v60 = vrot.slane %v876_v16, 1  ;;  %v2577_v54 = vrot.slane %v2511_v47, 2  ;;  %v1937_v23 = vmul.f32 %v11838_v17, %v11928_v13  ;;  %v11941_v19 = vld [vmem:[#allocation18_spill] sm:$0xff]  ;;  %v11942_v13 = vld [vmem:[#allocation195_spill] sm:$0xff] }
 0x198   : > { %v945_v41 = vsel %vm922_vm0, %v11932_v28, %v944_v24  ;;  %v1956_v28 = vadd.f32 %v11938_v56, %v8055_v18  ;;  %v1489_v55 = vrot.slane %v1419_v50, 2  ;;  %v11943_v18 = vrot.slane %v11942_v13, 1 }
 0x199   : > { %v1001_v21 = vadd.f32 %v945_v41, %v11933_v27  ;;  %v797_v4 = vadd.f32 %v777_v26, %v673_v44  ;;  %v947_v20 = vsel %vm922_vm0, %v944_v24, %v946_v60  ;;  %v2042_v27 = vmul.f32 %v5888_v52, %v831_v2  ;;  %v11939_v41 = vld [vmem:[#allocation193_spill] sm:$0xff]  ;;  %v11946_v24 = vld [vmem:[#allocation154_spill] sm:$0xff] }
 0x19a   : > { %v11940_v9 = vrot.slane %v11939_v41, 2  ;;  %v1957_v32 = vadd.f32 %v1937_v23, %v8081_v10  ;;  %v2008_v42 = vadd.f32 %v11941_v19, %v1956_v28  ;;  %v2108_v44 = vsel %vm922_vm0, %v11943_v18, %v2107_v3  ;;  %v11948_v23 = vld [vmem:[#allocation137_spill] sm:$0xff] }
 0x19b   : > { %v1195_v16 = vadd.f32 %v1139_v33, %v1001_v21  ;;  %v1002_v47 = vadd.f32 %v947_v20, %v797_v4  ;;  %v2109_v60 = vrot.slane %v2042_v27, 1  ;;  %v11944_v21 = vld [vmem:[#allocation65_spill] sm:$0xff]  ;;  %v11947_v26 = vrot.slane %v11946_v24, 2 }
 0x19c   : > { %v1488_v1 = vsel %vm1465_vm1, %v11940_v9, %v1487_v0  ;;  %v11945_v33 = vrot.slane %v11944_v21, 2  ;;  %v2009_v41 = vadd.f32 %v1989_v37, %v1957_v32  ;;  %v2167_v50 = vadd.f32 %v2108_v44, %v2008_v42  ;;  %v11951_v19 = vld [vmem:[#allocation129_spill] sm:$0xff]  ;;  %v11952_v42 = vld [vmem:[#allocation66_spill] sm:$0xff]  ;;  %v11954_v44 = vld [vmem:[#allocation156_spill] sm:$0xff] }
 0x19d   : > { %v1389_v12 = vadd.f32 %v7857_v57, %v1195_v16  ;;  %v2512_v10 = vmul.f32 %v5891_v53, %v831_v2  ;;  %v1196_v28 = vadd.f32 %v11948_v23, %v1002_v47  ;;  %v2110_v57 = vsel %vm922_vm0, %v2107_v3, %v2109_v60  ;;  %v11956_v3 = vld [vmem:[#allocation196_spill] sm:$0xff]  ;;  %v836_v23 = vpop.permute.xlu1 %835 }
 0x19e   : > { %v1642_v56 = vsel %vm1465_vm1, %v11947_v26, %v11945_v33  ;;  %v8250_v13 = vmul.f32 %v11642_v63, %v831_v2  ;;  %v1490_v20 = vsel %vm1465_vm1, %v1487_v0, %v1489_v55  ;;  %v2168_v16 = vadd.f32 %v2110_v57, %v2009_v41  ;;  %v11960_v55 = vld [vmem:[#allocation141_spill] sm:$0xff]  ;;  %v11961_v33 = vld [vmem:[#allocation46_spill] sm:$0xff] }
 0x19f   : > { %v1544_v4 = vadd.f32 %v1488_v1, %v1389_v12  ;;  %v2579_v27 = vrot.slane %v2512_v10, 2  ;;  %v8254_v9 = vmul.f32 %v11667_v7, %v831_v2  ;;  %v1390_v37 = vadd.f32 %v11951_v19, %v1196_v28  ;;  %v11962_v28 = vld [vmem:[#allocation74_spill] sm:$0xff] }
 0x1a0   : > { %11949 = vst [vmem:[#allocation192_spill] sm:$0xff] %v8250_v13  ;;  %v11953_v18 = vrot.slane %v11952_v42, 1  ;;  %v11955_v47 = vrot.slane %v11954_v44, 1  ;;  %v11957_v1 = vrot.slane %v11956_v3, 2  ;;  %v2326_v21 = vadd.f32 %v11960_v55, %v2168_v16  ;;  %v11963_v57 = vld [vmem:[#allocation222_spill] sm:$0xff]  ;;  %v11967_v3 = vld [vmem:[#allocation47_spill] sm:$0xff] }
 0x1a1   : > { %11950 = vst [vmem:[#allocation176_spill] sm:$0xff] %v8254_v9  ;;  %v1698_v32 = vadd.f32 %v1642_v56, %v1544_v4  ;;  %v531_v24 = vmul.f32 %v11891_v22, %v11961_v33  ;;  %v1545_v26 = vadd.f32 %v1490_v20, %v1390_v37  ;;  %v2580_v56 = vsel %vm1465_vm1, %v2577_v54, %v2579_v27  ;;  %v11964_v20 = vld [vmem:[#allocation140_spill] sm:$0xff]  ;;  %v11966_v42 = vld [vmem:[#allocation10_spill] sm:$0xff]  ;;  %v11972_v9 = vld [vmem:[#allocation205_spill] sm:$0xff] }
 0x1a2   : > { %v2266_v12 = vsel %vm922_vm0, %v11955_v47, %v11953_v18  ;;  %v8265_v60 = vsel %vm1465_vm1, %v11957_v1, %v2577_v54  ;;  %v878_v41 = vmul.f32 %v5878_v46, %v11961_v33  ;;  %v1421_v10 = vmul.f32 %v5885_v51, %v11961_v33  ;;  %v11965_v54 = vld [vmem:[#allocation48_spill] sm:$0xff] }
 0x1a3   : > { %11958 = vst [vmem:[#allocation64_spill] sm:$0xff] %v8265_v60  ;;  %v8267_v0 = vadd.f32 %v2266_v12, %v2167_v50  ;;  %v2484_v50 = vadd.f32 %v11962_v28, %v2326_v21  ;;  %v779_v16 = vmul.f32 %v11588_v38, %v11963_v57  ;;  %v2044_v19 = vmul.f32 %v5888_v52, %v11961_v33  ;;  %v11968_v21 = vld [vmem:[#allocation50_spill] sm:$0xff] }
 0x1a4   : > { %v1699_v37 = vadd.f32 %v11964_v20, %v1545_v26  ;;  %v1852_v27 = vadd.f32 %v11965_v54, %v1698_v32  ;;  %v1887_v18 = vmul.f32 %v11966_v42, %v11961_v33  ;;  %v2514_v44 = vmul.f32 %v5891_v53, %v11961_v33  ;;  %v11969_v54 = vld [vmem:[#allocation142_spill] sm:$0xff] }
 0x1a5   : > { %11959 = vst [vmem:[#allocation149_spill] sm:$0xff] %v8267_v0  ;;  %v2638_v47 = vadd.f32 %v2580_v56, %v2484_v50  ;;  %v1991_v12 = vmul.f32 %v11601_v35, %v11963_v57  ;;  %v655_v1 = vmul.f32 %v11896_v48, %v11967_v3  ;;  %v879_v55 = vmul.f32 %v5878_v46, %v836_v23  ;;  %v11970_v56 = vld [vmem:[#allocation200_spill] sm:$0xff] }
 0x1a6   : > { %v1853_v28 = vadd.f32 %v11968_v21, %v1699_v37  ;;  %v949_v26 = vrot.slane %v878_v41, 1  ;;  %v1492_v20 = vrot.slane %v1421_v10, 2  ;;  %v1422_v32 = vmul.f32 %v5885_v51, %v836_v23  ;;  %v11974_v41 = vld [vmem:[#allocation201_spill] sm:$0xff] }
 0x1a7   : > { %v2792_v4 = vadd.f32 %v11969_v54, %v2638_v47  ;;  %v2112_v2 = vrot.slane %v2044_v19, 1  ;;  %v2582_v60 = vrot.slane %v2514_v44, 2  ;;  %v951_v33 = vrot.slane %v879_v55, 1  ;;  %v11977_v55 = vld [vmem:[#allocation165_spill] sm:$0xff]  ;;  %v11979_v54 = vld [vmem:[#allocation202_spill] sm:$0xff] }
 0x1a8   : > { %v11971_v50 = vrot.slane %v11970_v56, 1  ;;  %v1494_v22 = vrot.slane %v1422_v32, 2  ;;  %v1906_v48 = vadd.f32 %v11972_v9, %v1852_v27  ;;  %v1907_v13 = vadd.f32 %v1887_v18, %v1853_v28  ;;  %v1043_v27 = vpop.permute.xlu1 %1042  ;;  %v11978_v28 = vld [vmem:[#allocation199_spill] sm:$0xff] }
 0x1a9   : > { %v675_v46 = vadd.f32 %v655_v1, %v531_v24  ;;  %v11975_v10 = vrot.slane %v11974_v41, 2  ;;  %v1939_v19 = vmul.f32 %v11838_v17, %v11967_v3  ;;  %v8313_v44 = vadd.f32 %v7902_v34, %v2792_v4 }
 0x1aa   : > { %v950_v0 = vsel %vm922_vm0, %v11971_v50, %v949_v26  ;;  %v952_v47 = vsel %vm922_vm0, %v949_v26, %v951_v33  ;;  %v1958_v9 = vadd.f32 %v11977_v55, %v1906_v48  ;;  %v2045_v24 = vmul.f32 %v5888_v52, %v836_v23 }
 0x1ab   : > { %v8303_v37 = vadd.f32 %v950_v0, %v11973_v62  ;;  %v8308_v21 = vsel %vm1465_vm1, %v11975_v10, %v1492_v20  ;;  %11976 = vst [vmem:[#allocation158_spill] sm:$0xff] %v8313_v44  ;;  %v799_v62 = vadd.f32 %v779_v16, %v675_v46  ;;  %v8319_v0 = vsel %vm1465_vm1, %v1492_v20, %v1494_v22  ;;  %v11983_v20 = vld [vmem:[#allocation203_spill] sm:$0xff] }
 0x1ac   : > { %v1959_v18 = vadd.f32 %v1939_v19, %v1907_v13  ;;  %v2515_v1 = vmul.f32 %v5891_v53, %v836_v23  ;;  %v2010_v32 = vadd.f32 %v11978_v28, %v1958_v9  ;;  %v11980_v56 = vrot.slane %v11979_v54, 1  ;;  %v11987_v54 = vld [vmem:[#allocation5_spill] sm:$0xff] }
 0x1ad   : > { %v2114_v4 = vrot.slane %v2045_v24, 1  ;;  %v8327_v33 = vmul.f32 %v11642_v63, %v836_v23  ;;  %v8329_v48 = vadd.f32 %v952_v47, %v799_v62  ;;  %v8332_v46 = vmul.f32 %v11667_v7, %v836_v23  ;;  %v11989_v62 = vld [vmem:[#allocation170_spill] sm:$0xff] }
 0x1ae   : > { %v2113_v34 = vsel %vm922_vm0, %v11980_v56, %v2112_v2  ;;  %v1079_v22 = vmul.f32 %v11715_v5, %v11895_v15  ;;  %v1080_v13 = vmul.f32 %v11715_v5, %v1043_v27  ;;  %v2011_v16 = vadd.f32 %v1991_v12, %v1959_v18 }
 0x1af   : > { %11981 = vst [vmem:[#allocation193_spill] sm:$0xff] %v8327_v33  ;;  %11982 = vst [vmem:[#allocation18_spill] sm:$0xff] %v8332_v46  ;;  %v2115_v26 = vsel %vm922_vm0, %v2112_v2, %v2114_v4  ;;  %v11984_v50 = vrot.slane %v11983_v20, 2  ;;  %v2584_v10 = vrot.slane %v2515_v1, 2  ;;  %v8343_v19 = vadd.f32 %v2113_v34, %v2010_v32  ;;  %v12007_v33 = vld [vmem:[#allocation69_spill] sm:$0xff] }
 0x1b0   : > { %v1153_v23 = vrot.slane %v1079_v22, 1  ;;  %v1155_v55 = vrot.slane %v1080_v13, 1  ;;  %v1582_v9 = vmul.f32 %v11716_v8, %v11895_v15  ;;  %v1583_v24 = vmul.f32 %v11716_v8, %v1043_v27  ;;  %v12016_v8 = vld [vmem:[#allocation63_spill] sm:$0xff] }
 0x1b1   : > { %v8341_v41 = vsel %vm1465_vm1, %v11984_v50, %v2582_v60  ;;  %v2208_v2 = vmul.f32 %v11807_v61, %v11895_v15  ;;  %v2209_v12 = vmul.f32 %v11807_v61, %v1043_v27  ;;  %v8356_v1 = vmul.f32 %v11809_v30, %v11895_v15 }
 0x1b2   : > { %11985 = vst [vmem:[#allocation195_spill] sm:$0xff] %v8341_v41  ;;  %v1156_v18 = vsel %vm922_vm0, %v1153_v23, %v1155_v55  ;;  %v2675_v28 = vmul.f32 %v11809_v30, %v1043_v27  ;;  %v8359_v32 = vadd.f32 %v2115_v26, %v2011_v16  ;;  %v11988_v56 = vrot.slane %v11987_v54, 1 }
 0x1b3   : > { %11986 = vst [vmem:[#allocation65_spill] sm:$0xff] %v8356_v1  ;;  %v1656_v4 = vrot.slane %v1582_v9, 2  ;;  %v1658_v22 = vrot.slane %v1583_v24, 2  ;;  %v8365_v13 = vsel %vm1465_vm1, %v2582_v60, %v2584_v10  ;;  %v8371_v50 = vadd.f32 %v1156_v18, %v8140_v49  ;;  %v11994_v49 = vld [vmem:[#allocation225_spill] sm:$0xff] }
 0x1b4   : > { %v1154_v34 = vsel %vm922_vm0, %v11988_v56, %v1153_v23  ;;  %v2282_v55 = vrot.slane %v2209_v12, 1  ;;  %v11990_v47 = vrot.slane %v11989_v62, 2  ;;  %v2280_v26 = vrot.slane %v2208_v2, 1  ;;  %v8390_v62 = vpop.permute.xlu1 %1232 }
 0x1b5   : > { %v8368_v20 = vadd.f32 %v1154_v34, %v8119_v11  ;;  %v2748_v9 = vrot.slane %v2675_v28, 2  ;;  %v8380_v24 = vsel %vm1465_vm1, %v1656_v4, %v1658_v22  ;;  %v8383_v60 = vmul.f32 %v11918_v6, %v1043_v27  ;;  %v11992_v11 = vld [vmem:[#allocation19_spill] sm:$0xff]  ;;  %11995 = vst [vmem:[#allocation129_spill] sm:$0xff] %v8390_v62  ;;  %v12001_v22 = vld [vmem:[#allocation98_spill] sm:$0xff] }
 0x1b6   : > { %v8376_v16 = vsel %vm1465_vm1, %v11990_v47, %v1656_v4  ;;  %v8386_v10 = vmul.f32 %v11992_v11, %v1043_v27  ;;  %v781_v12 = vmul.f32 %v11588_v38, %v11994_v49  ;;  %v11996_v47 = vld [vmem:[#allocation171_spill] sm:$0xff]  ;;  %v8398_v28 = vsel %vm922_vm0, %v2280_v26, %v2282_v55  ;;  %v12000_v4 = vld [vmem:[#allocation97_spill] sm:$0xff] }
 0x1b7   : > { %11991 = vst [vmem:[#allocation154_spill] sm:$0xff] %v8383_v60  ;;  %v11997_v18 = vrot.slane %v11996_v47, 1  ;;  %v1270_v54 = vmul.f32 %v11592_v29, %v11994_v49  ;;  %v1733_v27 = vmul.f32 %v11593_v14, %v11994_v49  ;;  %v2363_v56 = vmul.f32 %v11598_v39, %v11994_v49  ;;  %v12004_v55 = vld [vmem:[#allocation3_spill] sm:$0xff] }
 0x1b8   : > { %11993 = vst [vmem:[#allocation137_spill] sm:$0xff] %v8386_v10  ;;  %v8408_v34 = vmul.f32 %v11713_v31, %v11994_v49  ;;  %v677_v47 = vadd.f32 %v12001_v22, %v12000_v4  ;;  %v1271_v3 = vmul.f32 %v11592_v29, %v8390_v62  ;;  %v1891_v22 = vmul.f32 %v11966_v42, %v11890_v36  ;;  %v12015_v36 = vld [vmem:[#allocation126_spill] sm:$0xff] }
 0x1b9   : > { %v8395_v2 = vsel %vm922_vm0, %v11997_v18, %v2280_v26  ;;  %v12002_v18 = vld [vmem:[#allocation85_spill] sm:$0xff]  ;;  %v12005_v26 = vrot.slane %v12004_v55, 1  ;;  %v1342_v46 = vrot.slane %v1270_v54, 1  ;;  %v1805_v4 = vrot.slane %v1733_v27, 2 }
 0x1ba   : > { %11998 = vst [vmem:[#allocation66_spill] sm:$0xff] %v8395_v2  ;;  %11999 = vst [vmem:[#allocation156_spill] sm:$0xff] %v8408_v34  ;;  %v12003_v23 = vrot.slane %v12002_v18, 1  ;;  %v12006_v2 = vrot.slane %v8356_v1, 2  ;;  %v801_v18 = vadd.f32 %v781_v12, %v677_v47  ;;  %v2433_v55 = vrot.slane %v2363_v56, 1  ;;  %v12011_v12 = vld [vmem:[#allocation86_spill] sm:$0xff] }
 0x1bb   : > { %v2364_v27 = vmul.f32 %v11598_v39, %v8390_v62  ;;  %v12012_v56 = vrot.slane %v12011_v12, 2  ;;  %v12013_v47 = vld [vmem:[#allocation166_spill] sm:$0xff]  ;;  %v2826_v60 = vmul.f32 %v11713_v31, %v8390_v62  ;;  %v1943_v12 = vmul.f32 %v11838_v17, %v11895_v15 }
 0x1bc   : > { %v1149_v10 = vsel %vm922_vm0, %v12005_v26, %v12003_v23  ;;  %v8420_v41 = vsel %vm1465_vm1, %v12006_v2, %v2748_v9  ;;  %v12008_v23 = vld [vmem:[#allocation59_spill] sm:$0xff]  ;;  %v1344_v9 = vrot.slane %v1271_v3, 1  ;;  %v1734_v2 = vmul.f32 %v11593_v14, %v8390_v62 }
 0x1bd   : > { %v1199_v44 = vadd.f32 %v1149_v10, %v12007_v33  ;;  %v12009_v26 = vrot.slane %v12008_v23, 1  ;;  %v12010_v10 = vld [vmem:[#allocation228_spill] sm:$0xff]  ;;  %v12014_v23 = vrot.slane %v12013_v47, 2 }
 0x1be   : > { %v1006_v54 = vadd.f32 %v12010_v10, %v801_v18  ;;  %v1345_v30 = vsel %vm922_vm0, %v1342_v46, %v1344_v9  ;;  %v1807_v3 = vrot.slane %v1734_v2, 2  ;;  %v2897_v2 = vrot.slane %v2826_v60, 2 }
 0x1bf   : > { %v1343_v1 = vsel %vm922_vm0, %v12009_v26, %v1342_v46  ;;  %v1652_v26 = vsel %vm1465_vm1, %v12014_v23, %v12012_v56  ;;  %v12018_v46 = vld [vmem:[#allocation60_spill] sm:$0xff]  ;;  %v1273_v56 = vmul.f32 %v11592_v29, %v11892_v58  ;;  %v8465_v23 = vpop.permute.xlu1 %1236 }
 0x1c0   : > { %v1393_v61 = vadd.f32 %v1343_v1, %v1199_v44  ;;  %v1200_v33 = vadd.f32 %v12015_v36, %v1006_v54  ;;  %v2435_v44 = vrot.slane %v2364_v27, 1  ;;  %v8449_v1 = vmul.f32 %v11824_v59, %v8390_v62  ;;  %v12020_v54 = vld [vmem:[#allocation68_spill] sm:$0xff]  ;;  %12023 = vst [vmem:[#allocation74_spill] sm:$0xff] %v8465_v23 }
 0x1c1   : > { %v12019_v9 = vrot.slane %v12018_v46, 2  ;;  %v1736_v27 = vmul.f32 %v11593_v14, %v11892_v58  ;;  %v1808_v46 = vsel %vm1465_vm1, %v1805_v4, %v1807_v3  ;;  %v1347_v15 = vrot.slane %v1273_v56, 1  ;;  %v12030_v3 = vld [vmem:[#allocation184_spill] sm:$0xff] }
 0x1c2   : > { %v1548_v18 = vadd.f32 %v12016_v8, %v1393_v61  ;;  %12017 = vst [vmem:[#allocation196_spill] sm:$0xff] %v8449_v1  ;;  %v1394_v47 = vadd.f32 %v1345_v30, %v1200_v33  ;;  %v12021_v8 = vrot.slane %v12020_v54, 1  ;;  %v12025_v30 = vld [vmem:[#allocation230_spill] sm:$0xff]  ;;  %v1737_v56 = vmul.f32 %v11593_v14, %v8465_v23 }
 0x1c3   : > { %v1806_v10 = vsel %vm1465_vm1, %v12019_v9, %v1805_v4  ;;  %v8469_v9 = vsel %vm922_vm0, %v2433_v55, %v2435_v44  ;;  %v8484_v4 = vmul.f32 %v11713_v31, %v11892_v58  ;;  %v12031_v44 = vrot.slane %v12030_v3, 1 }
 0x1c4   : > { %v1702_v36 = vadd.f32 %v1652_v26, %v1548_v18  ;;  %v8461_v61 = vsel %vm922_vm0, %v12021_v8, %v2433_v55  ;;  %12024 = vst [vmem:[#allocation222_spill] sm:$0xff] %v8469_v9  ;;  %v1549_v33 = vadd.f32 %v12025_v30, %v1394_v47  ;;  %v12026_v18 = vrot.slane %v8408_v34, 2  ;;  %v12033_v30 = vld [vmem:[#allocation81_spill] sm:$0xff] }
 0x1c5   : > { %12022 = vst [vmem:[#allocation141_spill] sm:$0xff] %v8461_v61  ;;  %v8480_v8 = vmul.f32 %v11598_v39, %v11892_v58  ;;  %12029 = vst [vmem:[#allocation10_spill] sm:$0xff] %v8484_v4  ;;  %v1274_v55 = vmul.f32 %v11592_v29, %v8465_v23  ;;  %v1995_v34 = vmul.f32 %v11601_v35, %v11892_v58  ;;  %v11267_v62 = vrot.slane %v8484_v4, 2  ;;  %v12051_v58 = vld [vmem:[#allocation78_spill] sm:$0xff] }
 0x1c6   : > { %v1856_v26 = vadd.f32 %v1806_v10, %v1702_v36  ;;  %v8476_v54 = vsel %vm1465_vm1, %v12026_v18, %v2897_v2  ;;  %v1348_v10 = vsel %vm922_vm0, %v12031_v44, %v1347_v15  ;;  %v12032_v2 = vld [vmem:[#allocation127_spill] sm:$0xff]  ;;  %v1810_v36 = vrot.slane %v1736_v27, 2 }
 0x1c7   : > { %12027 = vst [vmem:[#allocation140_spill] sm:$0xff] %v8476_v54  ;;  %12028 = vst [vmem:[#allocation48_spill] sm:$0xff] %v8480_v8  ;;  %v1703_v47 = vadd.f32 %v12032_v2, %v1549_v33  ;;  %v1893_v18 = vmul.f32 %v11966_v42, %v12033_v30  ;;  %v1395_v60 = vadd.f32 %v1348_v10, %v8368_v20  ;;  %v12034_v54 = vld [vmem:[#allocation209_spill] sm:$0xff]  ;;  %v11268_v3 = vrot.slane %v8480_v8, 1 }
 0x1c8   : > { %v1910_v61 = vadd.f32 %v12034_v54, %v1856_v26  ;;  %v1349_v9 = vrot.slane %v1274_v55, 1  ;;  %v12035_v33 = vld [vmem:[#allocation73_spill] sm:$0xff]  ;;  %v1812_v20 = vrot.slane %v1737_v56, 2  ;;  %v2367_v26 = vmul.f32 %v11598_v39, %v8465_v23  ;;  %v12038_v56 = vld [vmem:[#allocation174_spill] sm:$0xff] }
 0x1c9   : > { %v1857_v44 = vadd.f32 %v1808_v46, %v1703_v47  ;;  %v1550_v1 = vadd.f32 %v8111_v25, %v1395_v60  ;;  %v12036_v27 = vrot.slane %v12035_v33, 2  ;;  %v2829_v54 = vmul.f32 %v11713_v31, %v8465_v23 }
 0x1ca   : > { %v1350_v5 = vsel %vm922_vm0, %v1347_v15, %v1349_v9  ;;  %v8515_v25 = vmul.f32 %v11824_v59, %v8465_v23  ;;  %v2440_v60 = vrot.slane %v2367_v26, 1  ;;  %v1267_v15 = vmul.f32 %v11592_v29, %v11963_v57 }
 0x1cb   : > { %v1811_v2 = vsel %vm1465_vm1, %v12036_v27, %v1810_v36  ;;  %v1911_v10 = vadd.f32 %v1891_v22, %v1857_v44  ;;  %v1396_v46 = vadd.f32 %v1350_v5, %v8371_v50  ;;  %v1704_v55 = vadd.f32 %v8376_v16, %v1550_v1 }
 0x1cc   : > { %12037 = vst [vmem:[#allocation50_spill] sm:$0xff] %v8515_v25  ;;  %v2902_v47 = vrot.slane %v2829_v54, 2  ;;  %v1730_v9 = vmul.f32 %v11593_v14, %v11963_v57  ;;  %v8522_v33 = vadd.f32 %v12038_v56, %v1910_v61  ;;  %v1813_v16 = vsel %vm1465_vm1, %v1810_v36, %v1812_v20  ;;  %v8536_v61 = vpop.permute.xlu1 %1228  ;;  %v12040_v36 = vld [vmem:[#allocation218_spill] sm:$0xff]  ;;  %v12045_v56 = vld [vmem:[#allocation159_spill] sm:$0xff] }
 0x1cd   : > { %v1963_v22 = vadd.f32 %v1943_v12, %v1911_v10  ;;  %v1551_v5 = vadd.f32 %v8131_v45, %v1396_v46  ;;  %v1858_v50 = vadd.f32 %v1811_v2, %v1704_v55  ;;  %v1945_v1 = vmul.f32 %v11838_v17, %v11905_v40  ;;  %v12041_v10 = vld [vmem:[#allocation61_spill] sm:$0xff] }
 0x1ce   : > { %12039 = vst [vmem:[#allocation142_spill] sm:$0xff] %v8522_v33  ;;  %v2441_v44 = vsel %vm922_vm0, %v11268_v3, %v2440_v60  ;;  %v2903_v12 = vsel %vm1465_vm1, %v11267_v62, %v2902_v47  ;;  %v1337_v45 = vrot.slane %v1267_v15, 1  ;;  %v1800_v20 = vrot.slane %v1730_v9, 2  ;;  %v12043_v47 = vld [vmem:[#allocation77_spill] sm:$0xff] }
 0x1cf   : > { %v1705_v26 = vadd.f32 %v8380_v24, %v1551_v5  ;;  %v2015_v54 = vadd.f32 %v1995_v34, %v1963_v22  ;;  %v8539_v2 = vadd.f32 %v12040_v36, %v1858_v50  ;;  %v1889_v46 = vmul.f32 %v11966_v42, %v12041_v10  ;;  %v12047_v50 = vld [vmem:[#allocation28_spill] sm:$0xff] }
 0x1d0   : > { %v2360_v55 = vmul.f32 %v11598_v39, %v11963_v57  ;;  %v8548_v34 = vmul.f32 %v11713_v31, %v11963_v57  ;;  %v12044_v15 = vrot.slane %v12043_v47, 1  ;;  %v12046_v22 = vrot.slane %v12045_v56, 1  ;;  %v12048_v47 = vld [vmem:[#allocation152_spill] sm:$0xff] }
 0x1d1   : > { %v1859_v60 = vadd.f32 %v1813_v16, %v1705_v26  ;;  %v2174_v24 = vadd.f32 %v8143_v43, %v2015_v54  ;;  %v8557_v9 = vmul.f32 %v11601_v35, %v11994_v49  ;;  %v8561_v36 = vmul.f32 %v12047_v50, %v12041_v10 }
 0x1d2   : > { %12042 = vst [vmem:[#allocation200_spill] sm:$0xff] %v8548_v34  ;;  %v1144_v5 = vsel %vm922_vm0, %v12046_v22, %v12044_v15  ;;  %v1268_v16 = vmul.f32 %v11592_v29, %v8536_v61  ;;  %v2428_v54 = vrot.slane %v2360_v55, 1  ;;  %v1198_v56 = vadd.f32 %v12048_v47, %v8329_v48  ;;  %v12049_v15 = vld [vmem:[#allocation104_spill] sm:$0xff]  ;;  %v12055_v48 = vld [vmem:[#allocation105_spill] sm:$0xff] }
 0x1d3   : > { %v1197_v43 = vadd.f32 %v1144_v5, %v8303_v37  ;;  %v2332_v26 = vadd.f32 %v8398_v28, %v2174_v24  ;;  %v12050_v22 = vrot.slane %v12049_v15, 1  ;;  %v1913_v62 = vadd.f32 %v1893_v18, %v1859_v60  ;;  %v12053_v28 = vld [vmem:[#allocation160_spill] sm:$0xff] }
 0x1d4   : > { %v1339_v3 = vrot.slane %v1268_v16, 1  ;;  %v1731_v25 = vmul.f32 %v11593_v14, %v8536_v61  ;;  %v12052_v4 = vrot.slane %v12051_v58, 2  ;;  %v12054_v55 = vrot.slane %v12053_v28, 2  ;;  %v12061_v58 = vld [vmem:[#allocation107_spill] sm:$0xff] }
 0x1d5   : > { %v1338_v27 = vsel %vm922_vm0, %v12050_v22, %v1337_v45  ;;  %v2490_v37 = vadd.f32 %v2441_v44, %v2332_v26  ;;  %v12056_v47 = vrot.slane %v12055_v48, 2  ;;  %v12059_v44 = vld [vmem:[#allocation161_spill] sm:$0xff]  ;;  %v8594_v48 = vadd.f32 %v1945_v1, %v1913_v62  ;;  %v12064_v62 = vld [vmem:[#allocation32_spill] sm:$0xff] }
 0x1d6   : > { %v1391_v23 = vadd.f32 %v1338_v27, %v1197_v43  ;;  %v1647_v24 = vsel %vm1465_vm1, %v12054_v55, %v12052_v4  ;;  %v1340_v18 = vsel %vm922_vm0, %v1337_v45, %v1339_v3  ;;  %v1802_v60 = vrot.slane %v1731_v25, 2  ;;  %v12057_v43 = vld [vmem:[#allocation79_spill] sm:$0xff] }
 0x1d7   : > { %v1801_v15 = vsel %vm1465_vm1, %v12056_v47, %v1800_v20  ;;  %v12058_v16 = vrot.slane %v12057_v43, 1  ;;  %v12060_v26 = vrot.slane %v12059_v44, 1  ;;  %v2644_v5 = vadd.f32 %v12061_v58, %v2490_v37  ;;  %v12063_v37 = vld [vmem:[#allocation62_spill] sm:$0xff]  ;;  %v12068_v44 = vld [vmem:[#allocation153_spill] sm:$0xff] }
 0x1d8   : > { %v1546_v27 = vadd.f32 %v8308_v21, %v1391_v23  ;;  %v1392_v28 = vadd.f32 %v1340_v18, %v1198_v56  ;;  %v2361_v55 = vmul.f32 %v11598_v39, %v8536_v61  ;;  %v12062_v21 = vld [vmem:[#allocation4_spill] sm:$0xff]  ;;  %v2823_v25 = vmul.f32 %v11713_v31, %v8536_v61 }
 0x1d9   : > { %v2271_v22 = vsel %vm922_vm0, %v12060_v26, %v12058_v16  ;;  %v2328_v23 = vadd.f32 %v12062_v21, %v8359_v32  ;;  %v2798_v45 = vadd.f32 %v8420_v41, %v2644_v5  ;;  %v1941_v56 = vmul.f32 %v11838_v17, %v12063_v37  ;;  %v12067_v32 = vld [vmem:[#allocation125_spill] sm:$0xff] }
 0x1da   : > { %v2327_v4 = vadd.f32 %v2271_v22, %v8343_v19  ;;  %v1700_v3 = vadd.f32 %v1647_v24, %v1546_v27  ;;  %v1547_v47 = vadd.f32 %v8319_v0, %v1392_v28  ;;  %v2430_v19 = vrot.slane %v2361_v55, 1  ;;  %v12066_v27 = vld [vmem:[#allocation122_spill] sm:$0xff]  ;;  %v12072_v55 = vld [vmem:[#allocation45_spill] sm:$0xff] }
 0x1db   : > { %v1803_v18 = vsel %vm1465_vm1, %v1800_v20, %v1802_v60  ;;  %v12065_v1 = vrot.slane %v12064_v62, 1  ;;  %v2785_v16 = vadd.f32 %v12067_v32, %v12066_v27  ;;  %v2892_v0 = vrot.slane %v2823_v25, 2  ;;  %v12077_v27 = vld [vmem:[#allocation113_spill] sm:$0xff] }
 0x1dc   : > { %v1854_v43 = vadd.f32 %v1801_v15, %v1700_v3  ;;  %v1701_v26 = vadd.f32 %v12068_v44, %v1547_v47  ;;  %v2431_v41 = vsel %vm922_vm0, %v2428_v54, %v2430_v19  ;;  %v8614_v22 = vadd.f32 %v2903_v12, %v2798_v45  ;;  %v12071_v15 = vld [vmem:[#allocation151_spill] sm:$0xff] }
 0x1dd   : > { %v2429_v24 = vsel %vm922_vm0, %v12065_v1, %v2428_v54  ;;  %v2486_v58 = vadd.f32 %v2431_v41, %v2328_v23  ;;  %v8618_v20 = vmul.f32 %v11824_v59, %v8536_v61  ;;  %v2973_v60 = vmul.f32 %v12047_v50, %v12071_v15  ;;  %v5583_v54 = vld [vmem:[%s10943_s3 + $0x10] sm:$0xff]  ;;  %v12074_v12 = vld [vmem:[#allocation7_spill] sm:$0xff]  ;;  %v12075_v23 = vld [vmem:[#allocation206_spill] sm:$0xff] }
 0x1de   : > { %v8612_v5 = vadd.f32 %v2429_v24, %v2327_v4  ;;  %12070 = vst [vmem:[#allocation188_spill] sm:$0xff] %v8614_v22  ;;  %v1855_v28 = vadd.f32 %v1803_v18, %v1701_v26  ;;  %v2939_v3 = vadd.f32 %v12072_v55, %v2785_v16  ;;  %v12073_v4 = vld [vmem:[#allocation6_spill] sm:$0xff]  ;;  %v8630_v25 = vrot.slane %v5583_v54, %v12074_v12  ;;  %v12078_v16 = vld [vmem:[#allocation23_spill] sm:$0xff] }
 0x1df   : > { %v8627_v21 = vrot.slane %v5583_v54, %v12073_v4  ;;  %v1908_v45 = vadd.f32 %v12075_v23, %v1854_v43  ;;  %v2640_v47 = vadd.f32 %v8365_v13, %v2486_v58  ;;  %v3126_v19 = vmul.f32 %v11642_v63, %v12071_v15  ;;  %v12076_v18 = vld [vmem:[#allocation22_spill] sm:$0xff]  ;;  %v12079_v26 = vld [vmem:[#allocation155_spill] sm:$0xff]  ;;  %v12081_v58 = vld [vmem:[#allocation236_spill] sm:$0xff] }
 0x1e0   : > { %12069 = vst [vmem:[#allocation205_spill] sm:$0xff] %v8612_v5  ;;  %v3127_v62 = vmul.f32 %v11642_v63, %v12076_v18  ;;  %v1909_v1 = vadd.f32 %v1889_v46, %v1855_v28  ;;  %v2993_v24 = vadd.f32 %v2973_v60, %v2939_v3  ;;  %v12080_v43 = vrot.slane %v8548_v34, 2  ;;  %v12082_v54 = vld [vmem:[#allocation30_spill] sm:$0xff] }
 0x1e1   : > { %v3025_v32 = vmul.f32 %v8627_v21, %v12077_v27  ;;  %v3026_v44 = vmul.f32 %v8627_v21, %v12078_v16  ;;  %v2794_v41 = vadd.f32 %v12079_v26, %v2640_v47  ;;  %v3077_v55 = vmul.f32 %v8630_v25, %v12081_v58  ;;  %v12083_v28 = vld [vmem:[#allocation186_spill] sm:$0xff] }
 0x1e2   : > { %v2893_v13 = vsel %vm1465_vm1, %v12080_v43, %v2892_v0  ;;  %v3078_v4 = vmul.f32 %v8630_v25, %v12082_v54  ;;  %v1961_v46 = vadd.f32 %v1941_v56, %v1909_v1  ;;  %v3186_v12 = vrot.slane %v3126_v19, 1  ;;  %v12084_v1 = vld [vmem:[#allocation169_spill] sm:$0xff] }
 0x1e3   : > { %v3045_v60 = vadd.f32 %v3025_v32, %v2993_v24  ;;  %v3046_v3 = vadd.f32 %v3026_v44, %v12083_v28  ;;  %v3187_v22 = vrot.slane %v3127_v62, 1  ;;  %v3284_v47 = vmul.f32 %v11918_v6, %v12077_v27  ;;  %v12085_v32 = vld [vmem:[#allocation226_spill] sm:$0xff] }
 0x1e4   : > { %v3285_v0 = vmul.f32 %v11918_v6, %v12078_v16  ;;  %v2013_v26 = vadd.f32 %v8557_v9, %v1961_v46  ;;  %v3442_v56 = vmul.f32 %v11824_v59, %v12081_v58  ;;  %v1960_v24 = vadd.f32 %v12084_v1, %v1908_v45  ;;  %v12089_v1 = vld [vmem:[#allocation75_spill] sm:$0xff] }
 0x1e5   : > { %v3097_v43 = vadd.f32 %v3077_v55, %v3045_v60  ;;  %v3098_v40 = vadd.f32 %v3078_v4, %v3046_v3  ;;  %v3188_v19 = vsel %vm922_vm0, %v3186_v12, %v3187_v22  ;;  %v12086_v44 = vrot.slane %v12085_v32, 1  ;;  %v12087_v4 = vld [vmem:[#allocation49_spill] sm:$0xff]  ;;  %v12088_v60 = vld [vmem:[#allocation231_spill] sm:$0xff] }
 0x1e6   : > { %v3344_v28 = vrot.slane %v3284_v47, 1  ;;  %v2948_v23 = vadd.f32 %v2893_v13, %v2794_v41  ;;  %v3345_v10 = vrot.slane %v3285_v0, 1  ;;  %v3443_v9 = vmul.f32 %v11824_v59, %v12082_v54 }
 0x1e7   : > { %v3190_v62 = vsel %vm922_vm0, %v3187_v22, %v12086_v44  ;;  %v3256_v8 = vadd.f32 %v3188_v19, %v3097_v43  ;;  %v3502_v55 = vrot.slane %v3442_v56, 1  ;;  %v3505_v46 = vrot.slane %v12087_v4, 1  ;;  %v12091_v43 = vld [vmem:[#allocation215_spill] sm:$0xff] }
 0x1e8   : > { %v3257_v33 = vadd.f32 %v3190_v62, %v3098_v40  ;;  %v3596_v45 = vmul.f32 %v11667_v7, %v12071_v15  ;;  %v2172_v3 = vadd.f32 %v12088_v60, %v2013_v26  ;;  %v3346_v12 = vsel %vm922_vm0, %v3344_v28, %v3345_v10 }
 0x1e9   : > { %v12090_v22 = vrot.slane %v12089_v1, 1  ;;  %v3597_v40 = vmul.f32 %v11667_v7, %v12076_v18  ;;  %v3414_v13 = vadd.f32 %v3346_v12, %v3256_v8  ;;  %v3503_v0 = vrot.slane %v3443_v9, 1  ;;  %v12092_v18 = vld [vmem:[#allocation95_spill] sm:$0xff] }
 0x1ea   : > { %v3598_v56 = vmul.f32 %v11667_v7, %v12091_v43  ;;  %v3656_v19 = vrot.slane %v3596_v45, 2  ;;  %v3750_v15 = vmul.f32 %v11992_v11, %v12077_v27  ;;  %v3751_v26 = vmul.f32 %v11992_v11, %v12078_v16  ;;  %v12093_v12 = vld [vmem:[#allocation31_spill] sm:$0xff] }
 0x1eb   : > { %v3348_v41 = vsel %vm922_vm0, %v3345_v10, %v12090_v22  ;;  %v3657_v32 = vrot.slane %v3597_v40, 2  ;;  %v3504_v44 = vsel %vm922_vm0, %v3502_v55, %v3503_v0  ;;  %v3506_v10 = vsel %vm922_vm0, %v3503_v0, %v3505_v46  ;;  %v12094_v22 = vld [vmem:[#allocation211_spill] sm:$0xff]  ;;  %v12095_v0 = vld [vmem:[#allocation9_spill] sm:$0xff] }
 0x1ec   : > { %v3415_v47 = vadd.f32 %v3348_v41, %v3257_v33  ;;  %v3659_v62 = vrot.slane %v3598_v56, 2  ;;  %v3752_v8 = vmul.f32 %v11992_v11, %v12092_v18  ;;  %v3572_v33 = vadd.f32 %v3504_v44, %v3414_v13  ;;  %v8698_v56 = vpop.permute.xlu1 %850 }
 0x1ed   : > { %v3658_v9 = vsel %vm1465_vm1, %v3656_v19, %v3657_v32  ;;  %v3810_v4 = vrot.slane %v3750_v15, 2  ;;  %v3811_v60 = vrot.slane %v3751_v26, 2  ;;  %v3904_v16 = vmul.f32 %v12093_v12, %v12081_v58  ;;  %12096 = vst [vmem:[#allocation201_spill] sm:$0xff] %v8698_v56  ;;  %v12097_v26 = vld [vmem:[#allocation216_spill] sm:$0xff] }
 0x1ee   : > { %v3573_v28 = vadd.f32 %v3506_v10, %v3415_v47  ;;  %v3660_v45 = vsel %vm1465_vm1, %v3657_v32, %v3659_v62  ;;  %v3813_v27 = vrot.slane %v3752_v8, 2  ;;  %v3726_v1 = vadd.f32 %v3658_v9, %v3572_v33 }
 0x1ef   : > { %v3905_v46 = vmul.f32 %v12093_v12, %v12082_v54  ;;  %v3906_v41 = vmul.f32 %v12093_v12, %v12094_v22  ;;  %v3812_v40 = vsel %vm1465_vm1, %v3810_v4, %v3811_v60  ;;  %v3964_v47 = vrot.slane %v3904_v16, 2  ;;  %v8726_v16 = vld [vmem:[%s10944_s4] ss:$0 sm:$0xff] }
 0x1f0   : > { %v3727_v55 = vadd.f32 %v3660_v45, %v3573_v28  ;;  %v3814_v13 = vsel %vm1465_vm1, %v3811_v60, %v3813_v27  ;;  %v887_v43 = vmul.f32 %v12095_v0, %v12033_v30  ;;  %v3880_v19 = vadd.f32 %v3812_v40, %v3726_v1  ;;  %v12100_v60 = vld [vmem:[#allocation133_spill] sm:$0xff] }
 0x1f1   : > { %v3965_v32 = vrot.slane %v3905_v46, 2  ;;  %v3967_v15 = vrot.slane %v3906_v41, 2  ;;  %v8701_v44 = vadd.f32 %v12097_v26, %v1960_v24  ;;  %v1430_v54 = vmul.f32 %v5885_v51, %v12033_v30  ;;  %v12106_v26 = vld [vmem:[#allocation217_spill] sm:$0xff] }
 0x1f2   : > { %v3881_v58 = vadd.f32 %v3814_v13, %v3727_v55  ;;  %v2053_v10 = vmul.f32 %v5888_v52, %v12033_v30  ;;  %v8709_v62 = vmul.f32 %v5891_v53, %v12033_v30  ;;  %v888_v33 = vmul.f32 %v12095_v0, %v8698_v56 }
 0x1f3   : > { %12098 = vst [vmem:[#allocation165_spill] sm:$0xff] %v8701_v44  ;;  %v3966_v18 = vsel %vm1465_vm1, %v3964_v47, %v3965_v32  ;;  %v3968_v8 = vsel %vm1465_vm1, %v3965_v32, %v3967_v15  ;;  %v1431_v24 = vmul.f32 %v5885_v51, %v8698_v56  ;;  %v8718_v28 = vadd.f32 %v8561_v36, %v2948_v23  ;;  %v12102_v23 = vld [vmem:[#allocation214_spill] sm:$0xff]  ;;  %v12104_v47 = vld [vmem:[#allocation189_spill] sm:$0xff] }
 0x1f4   : > { %v4034_v9 = vadd.f32 %v3966_v18, %v3880_v19  ;;  %v4035_v4 = vadd.f32 %v3968_v8, %v3881_v58  ;;  %v964_v45 = vrot.slane %v887_v43, 1  ;;  %v8721_v27 = vadd.f32 %v12100_v60, %v2172_v3  ;;  %v12105_v43 = vld [vmem:[#allocation182_spill] sm:$0xff] }
 0x1f5   : > { %12099 = vst [vmem:[#allocation199_spill] sm:$0xff] %v8718_v28  ;;  %v1507_v1 = vrot.slane %v1430_v54, 2  ;;  %v966_v55 = vrot.slane %v888_v33, 1  ;;  %v1509_v46 = vrot.slane %v1431_v24, 2  ;;  %v2127_v36 = vrot.slane %v2053_v10, 1 }
 0x1f6   : > { %12101 = vst [vmem:[#allocation202_spill] sm:$0xff] %v8721_v27  ;;  %v4061_v22 = vadd.f32 %v8726_v16, %v4034_v9  ;;  %v4062_v41 = vadd.f32 %v8726_v16, %v4035_v4  ;;  %v12103_v40 = vrot.slane %v12102_v23, 1  ;;  %v11276_v3 = vrot.slane %v8709_v62, 2  ;;  %v12112_v23 = vld [vmem:[#allocation221_spill] sm:$0xff] }
 0x1f7   : > { %v1964_v19 = vadd.f32 %v12105_v43, %v8539_v2  ;;  %v2054_v58 = vmul.f32 %v5888_v52, %v8698_v56  ;;  %v12107_v54 = vrot.slane %v12106_v26, 2  ;;  %v8748_v18 = vmul.f32 %v5891_v53, %v8698_v56  ;;  %v12109_v2 = vld [vmem:[#allocation220_spill] sm:$0xff]  ;;  %v8814_v53 = vpop.permute.xlu1 %753 }
 0x1f8   : > { %v965_v13 = vsel %vm922_vm0, %v12103_v40, %v964_v45  ;;  %v4081_v32 = vmax.f32 %v4061_v22, 0.0  ;;  %v4082_v15 = vmax.f32 %v4062_v41, 0.0  ;;  %v8751_v8 = vsel %vm922_vm0, %v964_v45, %v966_v55  ;;  %v12111_v22 = vld [vmem:[#allocation241_spill] sm:$0xff]  ;;  %v12115_v45 = vld [vmem:[#allocation26_spill] sm:$0xff] }
 0x1f9   : > { %v8735_v0 = vadd.f32 %v965_v13, %v12104_v47  ;;  %v8744_v10 = vsel %vm1465_vm1, %v12107_v54, %v1507_v1  ;;  %v8754_v33 = vsel %vm1465_vm1, %v1507_v1, %v1509_v46  ;;  %v12110_v24 = vrot.slane %v12109_v2, 1  ;;  %v12116_v55 = vld [vmem:[#allocation58_spill] sm:$0xff] }
 0x1fa   : > { %12108 = vst [vmem:[#allocation203_spill] sm:$0xff] %v8754_v33  ;;  %v2129_v4 = vrot.slane %v2054_v58, 1  ;;  %v4101_v60 = vpack.c.bf16 %v4082_v15, %v4081_v32  ;;  %v2016_v41 = vadd.f32 %v12111_v22, %v1964_v19  ;;  %v12113_v40 = vrot.slane %v12112_v23, 2  ;;  %v12118_v19 = vld [vmem:[#allocation76_spill] sm:$0xff]  ;;  %v12122_v2 = vld [vmem:[#allocation130_spill] sm:$0xff] }
 0x1fb   : > { %v2128_v9 = vsel %vm922_vm0, %v12110_v24, %v2127_v36  ;;  %v2633_v47 = vadd.f32 %v12116_v55, %v12115_v45  ;;  %v2599_v46 = vrot.slane %v8748_v18, 2  ;;  %v8775_v43 = vmul.f32 %v11642_v63, %v8698_v56  ;;  %v12120_v32 = vld [vmem:[#allocation132_spill] sm:$0xff]  ;;  %v12124_v22 = vld [vmem:[#allocation38_spill] sm:$0xff] }
 0x1fc   : > { %v8765_v13 = vsel %vm1465_vm1, %v12113_v40, %v11276_v3  ;;  %v8770_v1 = vsel %vm922_vm0, %v2127_v36, %v2129_v4  ;;  %v12119_v58 = vrot.slane %v12118_v19, 2  ;;  %v12121_v15 = vrot.slane %v12120_v32, 2  ;;  %5452 = vmatprep.mubr.bf16.mxu0 %v4101_v60  ;;  %v12126_v4 = vld [vmem:[#allocation164_spill] sm:$0xff]  ;;  %v12130_v60 = vld [vmem:[#allocation34_spill] sm:$0xff] }
 0x1fd   : > { %12114 = vst [vmem:[#allocation5_spill] sm:$0xff] %v8765_v13  ;;  %12117 = vst [vmem:[#allocation170_spill] sm:$0xff] %v8775_v43  ;;  %v12123_v24 = vrot.slane %v12122_v2, 2  ;;  %v12125_v23 = vrot.slane %v12124_v22, 2  ;;  %v2975_v18 = vmul.f32 %v12047_v50, %v12126_v4  ;;  %v12127_v40 = vld [vmem:[#allocation120_spill] sm:$0xff]  ;;  %v12131_v2 = vld [vmem:[#allocation35_spill] sm:$0xff]  ;;  %v3446_v56 = vmul.f32 %v11824_v59, %v12130_v60 }
 0x1fe   : > { %v2722_v26 = vsel %vm1465_vm1, %v12121_v15, %v12119_v58  ;;  %v3027_v45 = vmul.f32 %v8627_v21, %v12127_v40  ;;  %v12128_v55 = vld [vmem:[#allocation36_spill] sm:$0xff]  ;;  %v3129_v15 = vmul.f32 %v11642_v63, %v12126_v4  ;;  %v3287_v22 = vmul.f32 %v11918_v6, %v12127_v40  ;;  %v12132_v3 = vld [vmem:[#allocation2_spill] sm:$0xff] }
 0x1ff   : > { %v2787_v54 = vadd.f32 %v2722_v26, %v2633_v47  ;;  %v2876_v36 = vsel %vm1465_vm1, %v12125_v23, %v12123_v24  ;;  %v3028_v19 = vmul.f32 %v8627_v21, %v12128_v55  ;;  %v12129_v32 = vld [vmem:[#allocation44_spill] sm:$0xff]  ;;  %v3080_v47 = vmul.f32 %v8630_v25, %v12130_v60 }
 0x200   : > { %v3079_v58 = vmul.f32 %v8630_v25, %v12129_v32  ;;  %v3130_v24 = vmul.f32 %v11642_v63, %v12131_v2  ;;  %v3288_v23 = vmul.f32 %v11918_v6, %v12128_v55  ;;  %v3191_v27 = vrot.slane %v3129_v15, 1  ;;  %v12133_v15 = vld [vmem:[#allocation55_spill] sm:$0xff] }
 0x201   : > { %v2941_v26 = vadd.f32 %v2876_v36, %v2787_v54  ;;  %v3048_v13 = vadd.f32 %v3028_v19, %v12132_v3  ;;  %v3445_v44 = vmul.f32 %v11824_v59, %v12129_v32  ;;  %v3349_v36 = vrot.slane %v3287_v22, 1 }
 0x202   : > { %v3192_v54 = vrot.slane %v3130_v24, 1  ;;  %v3350_v28 = vrot.slane %v3288_v23, 1  ;;  %v8810_v49 = vadd.f32 %v2128_v9, %v2016_v41  ;;  %v3508_v34 = vrot.slane %v3446_v56, 1  ;;  %v12135_v9 = vld [vmem:[#allocation112_spill] sm:$0xff] }
 0x203   : > { %v2995_v30 = vadd.f32 %v2975_v18, %v2941_v26  ;;  %v3100_v37 = vadd.f32 %v3080_v47, %v3048_v13  ;;  %v3599_v5 = vmul.f32 %v11667_v7, %v12126_v4  ;;  %v12134_v52 = vrot.slane %v12133_v15, 1  ;;  %v12137_v13 = vld [vmem:[#allocation51_spill] sm:$0xff] }
 0x204   : > { %v3193_v19 = vsel %vm922_vm0, %v3191_v27, %v3192_v54  ;;  %v3507_v18 = vrot.slane %v3445_v44, 1  ;;  %v3351_v24 = vsel %vm922_vm0, %v3349_v36, %v3350_v28  ;;  %v12136_v41 = vrot.slane %v12135_v9, 1 }
 0x205   : > { %v3047_v3 = vadd.f32 %v3027_v45, %v2995_v30  ;;  %v3195_v51 = vsel %vm922_vm0, %v3192_v54, %v12134_v52  ;;  %v12138_v47 = vrot.slane %v12137_v13, 1  ;;  %v3600_v30 = vmul.f32 %v11667_v7, %v12131_v2 }
 0x206   : > { %v3259_v26 = vadd.f32 %v3195_v51, %v3100_v37  ;;  %v3353_v56 = vsel %vm922_vm0, %v3350_v28, %v12136_v41  ;;  %v3661_v27 = vrot.slane %v3599_v5, 2  ;;  %v3753_v52 = vmul.f32 %v11992_v11, %v12127_v40  ;;  %v12139_v37 = vld [vmem:[#allocation116_spill] sm:$0xff] }
 0x207   : > { %v3511_v4 = vsel %vm922_vm0, %v3508_v34, %v12138_v47  ;;  %v3099_v22 = vadd.f32 %v3079_v58, %v3047_v3  ;;  %v3754_v51 = vmul.f32 %v11992_v11, %v12128_v55  ;;  %v3818_v45 = vrot.slane %v12139_v37, 2  ;;  %v12140_v3 = vld [vmem:[#allocation219_spill] sm:$0xff]  ;;  %v12144_v41 = vld [vmem:[#allocation204_spill] sm:$0xff] }
 0x208   : > { %v3417_v44 = vadd.f32 %v3353_v56, %v3259_v26  ;;  %v3907_v28 = vmul.f32 %v12093_v12, %v12129_v32  ;;  %v3662_v54 = vrot.slane %v3600_v30, 2  ;;  %v3815_v36 = vrot.slane %v3753_v52, 2  ;;  %v8840_v26 = vpop.permute.xlu1 %757 }
 0x209   : > { %v3258_v23 = vadd.f32 %v3193_v19, %v3099_v22  ;;  %v3908_v58 = vmul.f32 %v12093_v12, %v12130_v60  ;;  %v3816_v5 = vrot.slane %v3754_v51, 2  ;;  %v3909_v40 = vmul.f32 %v12093_v12, %v12140_v3  ;;  %12141 = vst [vmem:[#allocation19_spill] sm:$0xff] %v8840_v26  ;;  %v12154_v3 = vld [vmem:[#allocation145_spill] sm:$0xff] }
 0x20a   : > { %v3575_v2 = vadd.f32 %v3511_v4, %v3417_v44  ;;  %v3969_v15 = vrot.slane %v3907_v28, 2  ;;  %v12142_v55 = vrot.slane %v8709_v62, 2  ;;  %v12145_v56 = vrot.slane %v12144_v41, 2  ;;  %v12150_v28 = vld [vmem:[#allocation108_spill] sm:$0xff] }
 0x20b   : > { %v3416_v19 = vadd.f32 %v3351_v24, %v3258_v23  ;;  %v3509_v13 = vsel %vm922_vm0, %v3507_v18, %v3508_v34  ;;  %v3970_v4 = vrot.slane %v3908_v58, 2  ;;  %v3972_v22 = vrot.slane %v3909_v40, 2  ;;  %v12156_v41 = vld [vmem:[#allocation84_spill] sm:$0xff] }
 0x20c   : > { %v8845_v9 = vsel %vm1465_vm1, %v12142_v55, %v2599_v46  ;;  %v3665_v60 = vsel %vm1465_vm1, %v3662_v54, %v12145_v56  ;;  %v3663_v52 = vsel %vm1465_vm1, %v3661_v27, %v3662_v54  ;;  %v3819_v62 = vsel %vm1465_vm1, %v3816_v5, %v3818_v45  ;;  %v12149_v45 = vld [vmem:[#allocation115_spill] sm:$0xff] }
 0x20d   : > { %12143 = vst [vmem:[#allocation171_spill] sm:$0xff] %v8845_v9  ;;  %v3729_v47 = vadd.f32 %v3665_v60, %v3575_v2  ;;  %v3574_v30 = vadd.f32 %v3509_v13, %v3416_v19  ;;  %v8856_v46 = vmul.f32 %v11592_v29, %v8840_v26  ;;  %v3817_v24 = vsel %vm1465_vm1, %v3815_v36, %v3816_v5  ;;  %v12152_v2 = vld [vmem:[#allocation57_spill] sm:$0xff]  ;;  %v12158_v60 = vld [vmem:[#allocation39_spill] sm:$0xff] }
 0x20e   : > { %v3971_v51 = vsel %vm1465_vm1, %v3969_v15, %v3970_v4  ;;  %v8862_v34 = vmul.f32 %v11588_v38, %v8840_v26  ;;  %v3973_v37 = vsel %vm1465_vm1, %v3970_v4, %v3972_v22  ;;  %v8867_v27 = vmul.f32 %v11601_v35, %v8840_v26  ;;  %v12160_v4 = vld [vmem:[#allocation168_spill] sm:$0xff] }
 0x20f   : > { %12146 = vst [vmem:[#allocation97_spill] sm:$0xff] %v8856_v46  ;;  %v3883_v44 = vadd.f32 %v3819_v62, %v3729_v47  ;;  %v3728_v18 = vadd.f32 %v3663_v52, %v3574_v30  ;;  %v2635_v23 = vadd.f32 %v12150_v28, %v12149_v45  ;;  %v8874_v58 = vmul.f32 %v11598_v39, %v8840_v26  ;;  %v12161_v52 = vld [vmem:[#allocation128_spill] sm:$0xff]  ;;  %v12163_v45 = vld [vmem:[#allocation33_spill] sm:$0xff]  ;;  %v8895_v28 = vpop.permute.xlu1 %761 }
 0x210   : > { %12147 = vst [vmem:[#allocation98_spill] sm:$0xff] %v8862_v34  ;;  %12148 = vst [vmem:[#allocation85_spill] sm:$0xff] %v8867_v27  ;;  %v12153_v5 = vrot.slane %v12152_v2, 2  ;;  %v12155_v40 = vrot.slane %v12154_v3, 2  ;;  %v12157_v56 = vrot.slane %v12156_v41, 2  ;;  %v12159_v13 = vrot.slane %v12158_v60, 2 }
 0x211   : > { %v4037_v54 = vadd.f32 %v3973_v37, %v3883_v44  ;;  %12151 = vst [vmem:[#allocation3_spill] sm:$0xff] %v8874_v58  ;;  %v3882_v55 = vadd.f32 %v3817_v24, %v3728_v18  ;;  %v2977_v22 = vmul.f32 %v12047_v50, %v12160_v4  ;;  %v3029_v62 = vmul.f32 %v8627_v21, %v12161_v52  ;;  %v12162_v44 = vld [vmem:[#allocation43_spill] sm:$0xff]  ;;  %v12165_v2 = vld [vmem:[#allocation213_spill] sm:$0xff]  ;;  %v12167_v41 = vld [vmem:[#allocation42_spill] sm:$0xff] }
 0x212   : > { %v2727_v15 = vsel %vm1465_vm1, %v12155_v40, %v12153_v5  ;;  %v2881_v47 = vsel %vm1465_vm1, %v12159_v13, %v12157_v56  ;;  %v3030_v37 = vmul.f32 %v8627_v21, %v12162_v44  ;;  %v3081_v24 = vmul.f32 %v8630_v25, %v12163_v45  ;;  %12164 = vst [vmem:[#allocation69_spill] sm:$0xff] %v8895_v28  ;;  %v12166_v40 = vld [vmem:[#allocation118_spill] sm:$0xff] }
 0x213   : > { %v2789_v19 = vadd.f32 %v2727_v15, %v2635_v23  ;;  %v4064_v30 = vadd.f32 %v8726_v16, %v4037_v54  ;;  %v4036_v18 = vadd.f32 %v3971_v51, %v3882_v55  ;;  %v3082_v5 = vmul.f32 %v8630_v25, %v12165_v2 }
 0x214   : > { %v3132_v3 = vmul.f32 %v11642_v63, %v12160_v4  ;;  %v3050_v15 = vadd.f32 %v3030_v37, %v12166_v40  ;;  %v3133_v56 = vmul.f32 %v11642_v63, %v12167_v41  ;;  %v3290_v60 = vmul.f32 %v11918_v6, %v12161_v52 }
 0x215   : > { %v2943_v23 = vadd.f32 %v2881_v47, %v2789_v19  ;;  %v4084_v54 = vmax.f32 %v4064_v30, 0.0  ;;  %v4063_v51 = vadd.f32 %v8726_v16, %v4036_v18  ;;  %v3291_v19 = vmul.f32 %v11918_v6, %v12162_v44 }
 0x216   : > { %v3196_v13 = vrot.slane %v3132_v3, 1  ;;  %v8911_v47 = vmul.f32 %v11598_v39, %v8895_v28  ;;  %v3102_v30 = vadd.f32 %v3082_v5, %v3050_v15  ;;  %v3197_v32 = vrot.slane %v3133_v56, 1 }
 0x217   : > { %v2997_v55 = vadd.f32 %v2977_v22, %v2943_v23  ;;  %v3448_v37 = vmul.f32 %v11824_v59, %v12163_v45  ;;  %v4083_v40 = vmax.f32 %v4063_v51, 0.0  ;;  %v3354_v43 = vrot.slane %v3290_v60, 1  ;;  %v12169_v23 = vld [vmem:[#allocation192_spill] sm:$0xff] }
 0x218   : > { %12168 = vst [vmem:[#allocation59_spill] sm:$0xff] %v8911_v47  ;;  %v3449_v18 = vmul.f32 %v11824_v59, %v12165_v2  ;;  %v3198_v22 = vsel %vm922_vm0, %v3196_v13, %v3197_v32  ;;  %v12170_v3 = vrot.slane %v12169_v23, 1  ;;  %v3355_v34 = vrot.slane %v3291_v19, 1  ;;  %v12171_v51 = vld [vmem:[#allocation136_spill] sm:$0xff] }
 0x219   : > { %v3049_v36 = vadd.f32 %v3029_v62, %v2997_v55  ;;  %v3602_v5 = vmul.f32 %v11667_v7, %v12160_v4  ;;  %v4102_v15 = vpack.c.bf16 %v4084_v54, %v4083_v40  ;;  %v3512_v46 = vrot.slane %v3448_v37, 1  ;;  %v12173_v4 = vld [vmem:[#allocation111_spill] sm:$0xff]  ;;  %v12175_v37 = vld [vmem:[#allocation138_spill] sm:$0xff] }
 0x21a   : > { %v3200_v27 = vsel %vm922_vm0, %v3197_v32, %v12170_v3  ;;  %v12172_v62 = vrot.slane %v12171_v51, 1  ;;  %v3513_v55 = vrot.slane %v3449_v18, 1  ;;  %v3603_v13 = vmul.f32 %v11667_v7, %v12167_v41 }
 0x21b   : > { %v3101_v56 = vadd.f32 %v3081_v24, %v3049_v36  ;;  %v3261_v9 = vadd.f32 %v3200_v27, %v3102_v30  ;;  %v3666_v26 = vrot.slane %v3602_v5, 2  ;;  %5453 = vmatmul.mubr.bf16.vlgmr.msra.gmra.mrb[0].mxu0 %v4102_v15  ;;  %v3756_v19 = vmul.f32 %v11992_v11, %v12161_v52  ;;  %v12176_v5 = vld [vmem:[#allocation176_spill] sm:$0xff] }
 0x21c   : > { %v3358_v60 = vsel %vm922_vm0, %v3355_v34, %v12172_v62  ;;  %v3757_v36 = vmul.f32 %v11992_v11, %v12162_v44  ;;  %v3356_v27 = vsel %vm922_vm0, %v3354_v43, %v3355_v34  ;;  %v12174_v24 = vrot.slane %v12173_v4, 1 }
 0x21d   : > { %v3260_v23 = vadd.f32 %v3198_v22, %v3101_v56  ;;  %v3419_v32 = vadd.f32 %v3358_v60, %v3261_v9  ;;  %v3667_v30 = vrot.slane %v3603_v13, 2  ;;  %v3823_v40 = vrot.slane %v12175_v37, 2  ;;  %v12178_v13 = vld [vmem:[#allocation110_spill] sm:$0xff] }
 0x21e   : > { %v3516_v54 = vsel %vm922_vm0, %v3513_v55, %v12174_v24  ;;  %v3820_v3 = vrot.slane %v3756_v19, 2  ;;  %v3821_v22 = vrot.slane %v3757_v36, 2  ;;  %v3514_v9 = vsel %vm922_vm0, %v3512_v46, %v3513_v55  ;;  %v1051_v36 = vpop.permute.xlu1 %1050 }
 0x21f   : > { %v3418_v41 = vadd.f32 %v3356_v27, %v3260_v23  ;;  %v3577_v18 = vadd.f32 %v3516_v54, %v3419_v32  ;;  %v12177_v52 = vrot.slane %v12176_v5, 2  ;;  %v3910_v43 = vmul.f32 %v12093_v12, %v12163_v45  ;;  %v12179_v23 = vld [vmem:[#allocation92_spill] sm:$0xff]  ;;  %v12182_v54 = vld [vmem:[#allocation93_spill] sm:$0xff] }
 0x220   : > { %v3911_v34 = vmul.f32 %v12093_v12, %v12165_v2  ;;  %v3668_v56 = vsel %vm1465_vm1, %v3666_v26, %v3667_v30  ;;  %v3822_v62 = vsel %vm1465_vm1, %v3820_v3, %v3821_v22  ;;  %v3824_v60 = vsel %vm1465_vm1, %v3821_v22, %v3823_v40  ;;  %v12180_v32 = vld [vmem:[#allocation8_spill] sm:$0xff]  ;;  %v12184_v40 = vld [vmem:[#allocation15_spill] sm:$0xff] }
 0x221   : > { %v3670_v15 = vsel %vm1465_vm1, %v3667_v30, %v12177_v52  ;;  %v3576_v44 = vadd.f32 %v3514_v9, %v3418_v41  ;;  %v3912_v46 = vmul.f32 %v12093_v12, %v12178_v13  ;;  %v3974_v55 = vrot.slane %v3910_v43, 2  ;;  %v12183_v30 = vld [vmem:[#allocation14_spill] sm:$0xff] }
 0x222   : > { %v3731_v51 = vadd.f32 %v3670_v15, %v3577_v18  ;;  %v539_v19 = vmul.f32 %v12180_v32, %v12179_v23  ;;  %v3975_v4 = vrot.slane %v3911_v34, 2  ;;  %v787_v2 = vmul.f32 %v11588_v38, %v8895_v28  ;;  %v12186_v15 = vld [vmem:[#allocation17_spill] sm:$0xff] }
 0x223   : > { %v3730_v45 = vadd.f32 %v3668_v56, %v3576_v44  ;;  %v3977_v26 = vrot.slane %v3912_v46, 2  ;;  %v8956_v24 = vmul.f32 %v11592_v29, %v8895_v28  ;;  %v663_v37 = vmul.f32 %v12183_v30, %v12182_v54  ;;  %v12190_v30 = vld [vmem:[#allocation234_spill] sm:$0xff] }
 0x224   : > { %v3885_v27 = vadd.f32 %v3824_v60, %v3731_v51  ;;  %v8962_v41 = vmul.f32 %v12184_v40, %v12182_v54  ;;  %v3976_v22 = vsel %vm1465_vm1, %v3974_v55, %v3975_v4  ;;  %v1086_v9 = vmul.f32 %v12184_v40, %v1051_v36  ;;  %v12188_v55 = vld [vmem:[#allocation20_spill] sm:$0xff]  ;;  %v12191_v40 = vld [vmem:[#allocation21_spill] sm:$0xff] }
 0x225   : > { %12181 = vst [vmem:[#allocation228_spill] sm:$0xff] %v8956_v24  ;;  %v3884_v3 = vadd.f32 %v3822_v62, %v3730_v45  ;;  %v3978_v5 = vsel %vm1465_vm1, %v3975_v4, %v3977_v26  ;;  %v683_v52 = vadd.f32 %v663_v37, %v539_v19  ;;  %v8970_v43 = vmul.f32 %v12186_v15, %v12182_v54 }
 0x226   : > { %12185 = vst [vmem:[#allocation86_spill] sm:$0xff] %v8962_v41  ;;  %v1589_v34 = vmul.f32 %v12186_v15, %v1051_v36  ;;  %v4039_v56 = vadd.f32 %v3978_v5, %v3885_v27  ;;  %v11290_v51 = vrot.slane %v8962_v41, 1  ;;  %v1165_v60 = vrot.slane %v1086_v9, 1 }
 0x227   : > { %12187 = vst [vmem:[#allocation166_spill] sm:$0xff] %v8970_v43  ;;  %v4038_v44 = vadd.f32 %v3976_v22, %v3884_v3  ;;  %v11293_v62 = vrot.slane %v8956_v24, 1  ;;  %v807_v13 = vadd.f32 %v787_v2, %v683_v52  ;;  %v8977_v32 = vmul.f32 %v12188_v55, %v12182_v54 }
 0x228   : > { %v1668_v46 = vrot.slane %v1589_v34, 2  ;;  %v4066_v45 = vadd.f32 %v8726_v16, %v4039_v56  ;;  %v1166_v4 = vsel %vm922_vm0, %v11290_v51, %v1165_v60  ;;  %v2215_v27 = vmul.f32 %v12188_v55, %v1051_v36 }
 0x229   : > { %12189 = vst [vmem:[#allocation126_spill] sm:$0xff] %v8977_v32  ;;  %v4065_v19 = vadd.f32 %v8726_v16, %v4038_v44  ;;  %v1012_v37 = vadd.f32 %v12190_v30, %v807_v13  ;;  %v11291_v2 = vrot.slane %v8970_v43, 2  ;;  %v8990_v3 = vmul.f32 %v12191_v40, %v12182_v54  ;;  %v12193_v44 = vld [vmem:[#allocation96_spill] sm:$0xff] }
 0x22a   : > { %v4086_v9 = vmax.f32 %v4066_v45, 0.0  ;;  %v2292_v5 = vrot.slane %v2215_v27, 1  ;;  %v2681_v52 = vmul.f32 %v12191_v40, %v1051_v36  ;;  %v12194_v56 = vrot.slane %v12193_v44, 1  ;;  %v12197_v27 = vld [vmem:[#allocation149_spill] sm:$0xff] }
 0x22b   : > { %12192 = vst [vmem:[#allocation63_spill] sm:$0xff] %v8990_v3  ;;  %v4085_v22 = vmax.f32 %v4065_v19, 0.0  ;;  %v1206_v34 = vadd.f32 %v1166_v4, %v1012_v37  ;;  %v11292_v13 = vrot.slane %v8977_v32, 1  ;;  %v9000_v30 = vmul.f32 %v11918_v6, %v1051_v36  ;;  %v12198_v4 = vld [vmem:[#allocation83_spill] sm:$0xff] }
 0x22c   : > { %v1360_v60 = vsel %vm922_vm0, %v11293_v62, %v12194_v56  ;;  %v9005_v19 = vsel %vm1465_vm1, %v11291_v2, %v1668_v46  ;;  %v2758_v45 = vrot.slane %v2681_v52, 2  ;;  %v2483_v37 = vadd.f32 %v12198_v4, %v12197_v27  ;;  %v12203_v2 = vld [vmem:[#allocation67_spill] sm:$0xff]  ;;  %v12205_v27 = vld [vmem:[#allocation157_spill] sm:$0xff]  ;;  %v12207_v4 = vld [vmem:[#allocation46_spill] sm:$0xff] }
 0x22d   : > { %12195 = vst [vmem:[#allocation60_spill] sm:$0xff] %v9000_v30  ;;  %v4103_v51 = vpack.c.bf16 %v4086_v9, %v4085_v22  ;;  %12196 = vst [vmem:[#allocation68_spill] sm:$0xff] %v9005_v19  ;;  %v9009_v44 = vadd.f32 %v1360_v60, %v1206_v34  ;;  %v9014_v56 = vsel %vm922_vm0, %v11292_v13, %v2292_v5  ;;  %v11295_v18 = vrot.slane %v8990_v3, 2  ;;  %v12202_v9 = vld [vmem:[#allocation64_spill] sm:$0xff]  ;;  %v12211_v62 = vld [vmem:[#allocation37_spill] sm:$0xff] }
 0x22e   : > { %12200 = vst [vmem:[#allocation184_spill] sm:$0xff] %v9014_v56  ;;  %v9018_v22 = vmul.f32 %v11992_v11, %v1051_v36  ;;  %v2637_v52 = vadd.f32 %v12202_v9, %v2483_v37  ;;  %v12204_v26 = vrot.slane %v12203_v2, 2  ;;  %v12206_v34 = vrot.slane %v12205_v27, 2  ;;  %v12209_v36 = vld [vmem:[#allocation207_spill] sm:$0xff]  ;;  %v12213_v9 = vld [vmem:[#allocation172_spill] sm:$0xff] }
 0x22f   : > { %12199 = vst [vmem:[#allocation230_spill] sm:$0xff] %v9009_v44  ;;  %5456 = vmatprep.mubr.bf16.mxu0 %v4103_v51  ;;  %v2980_v5 = vmul.f32 %v12047_v50, %v12207_v4  ;;  %v9032_v13 = vsel %vm1465_vm1, %v11295_v18, %v2758_v45  ;;  %v12210_v51 = vrot.slane %v12209_v36, 2  ;;  %v12212_v46 = vrot.slane %v12211_v62, 2  ;;  %v12214_v27 = vld [vmem:[#allocation47_spill] sm:$0xff] }
 0x230   : > { %12201 = vst [vmem:[#allocation127_spill] sm:$0xff] %v9018_v22  ;;  %v2732_v60 = vsel %vm1465_vm1, %v12206_v34, %v12204_v26  ;;  %12208 = vst [vmem:[#allocation209_spill] sm:$0xff] %v9032_v13  ;;  %v2979_v2 = vmul.f32 %v12047_v50, %v12213_v9  ;;  %v3032_v26 = vmul.f32 %v8627_v21, %v12214_v27  ;;  %v12215_v22 = vld [vmem:[#allocation158_spill] sm:$0xff]  ;;  %v12216_v36 = vld [vmem:[#allocation135_spill] sm:$0xff] }
 0x231   : > { %v2886_v37 = vsel %vm1465_vm1, %v12212_v46, %v12210_v51  ;;  %v2791_v34 = vadd.f32 %v2732_v60, %v2637_v52  ;;  %v3000_v30 = vadd.f32 %v2980_v5, %v12215_v22  ;;  %v3135_v56 = vmul.f32 %v11642_v63, %v12213_v9  ;;  %v12217_v51 = vld [vmem:[#allocation40_spill] sm:$0xff] }
 0x232   : > { %v3136_v45 = vmul.f32 %v11642_v63, %v12207_v4  ;;  %v3293_v62 = vmul.f32 %v11918_v6, %v12216_v36  ;;  %v3294_v46 = vmul.f32 %v11918_v6, %v12214_v27  ;;  %v3451_v18 = vmul.f32 %v11824_v59, %v12217_v51 }
 0x233   : > { %v3452_v52 = vmul.f32 %v11824_v59, %v11963_v57  ;;  %v2945_v60 = vadd.f32 %v2886_v37, %v2791_v34  ;;  %v3052_v22 = vadd.f32 %v3032_v26, %v3000_v30  ;;  %v3084_v5 = vmul.f32 %v8630_v25, %v11963_v57  ;;  %v12218_v37 = vld [vmem:[#allocation193_spill] sm:$0xff]  ;;  %v12220_v34 = vld [vmem:[#allocation147_spill] sm:$0xff] }
 0x234   : > { %v3201_v13 = vrot.slane %v3135_v56, 1  ;;  %v3031_v19 = vmul.f32 %v8627_v21, %v12216_v36  ;;  %v3083_v44 = vmul.f32 %v8630_v25, %v12217_v51  ;;  %v3202_v63 = vrot.slane %v3136_v45, 1 }
 0x235   : > { %v3360_v3 = vrot.slane %v3294_v46, 1  ;;  %v2999_v32 = vadd.f32 %v2979_v2, %v2945_v60  ;;  %v3104_v43 = vadd.f32 %v3084_v5, %v3052_v22  ;;  %v3359_v41 = vrot.slane %v3293_v62, 1 }
 0x236   : > { %v3517_v58 = vrot.slane %v3451_v18, 1  ;;  %v3203_v47 = vsel %vm922_vm0, %v3201_v13, %v3202_v63  ;;  %v12219_v30 = vrot.slane %v12218_v37, 1  ;;  %v12221_v56 = vrot.slane %v12220_v34, 1 }
 0x237   : > { %v3518_v59 = vrot.slane %v3452_v52, 1  ;;  %v3051_v15 = vadd.f32 %v3031_v19, %v2999_v32  ;;  %v3605_v45 = vmul.f32 %v11667_v7, %v12213_v9  ;;  %v3606_v2 = vmul.f32 %v11667_v7, %v12207_v4  ;;  %v12223_v9 = vld [vmem:[#allocation148_spill] sm:$0xff] }
 0x238   : > { %v3205_v26 = vsel %vm922_vm0, %v3202_v63, %v12219_v30  ;;  %v3363_v24 = vsel %vm922_vm0, %v3360_v3, %v12221_v56  ;;  %v12222_v18 = vrot.slane %v8618_v20, 1  ;;  %v3759_v63 = vmul.f32 %v11992_v11, %v12216_v36  ;;  %v1920_v30 = vpop.permute.xlu0 %1919 }
 0x239   : > { %v3263_v33 = vadd.f32 %v3205_v26, %v3104_v43  ;;  %v3760_v62 = vmul.f32 %v11992_v11, %v12214_v27  ;;  %v3913_v32 = vmul.f32 %v12093_v12, %v12217_v51  ;;  %v3103_v43 = vadd.f32 %v3083_v44, %v3051_v15 }
 0x23a   : > { %v3521_v13 = vsel %vm922_vm0, %v3518_v59, %v12222_v18  ;;  %v3671_v46 = vrot.slane %v3605_v45, 2  ;;  %v3828_v52 = vrot.slane %v12223_v9, 2  ;;  %v3672_v60 = vrot.slane %v3606_v2, 2 }
 0x23b   : > { %v3421_v19 = vadd.f32 %v3363_v24, %v3263_v33  ;;  %v3825_v4 = vrot.slane %v3759_v63, 2  ;;  %v3914_v20 = vmul.f32 %v12093_v12, %v11963_v57  ;;  %v3915_v22 = vmul.f32 %v12093_v12, %v8536_v61  ;;  %v12224_v24 = vld [vmem:[#allocation18_spill] sm:$0xff] }
 0x23c   : > { %v3262_v36 = vadd.f32 %v3203_v47, %v3103_v43  ;;  %v3361_v5 = vsel %vm922_vm0, %v3359_v41, %v3360_v3  ;;  %v3826_v37 = vrot.slane %v3760_v62, 2  ;;  %v3519_v15 = vsel %vm922_vm0, %v3517_v58, %v3518_v59  ;;  %v12264_v62 = vld [vmem:[#allocation86_spill] sm:$0xff] }
 0x23d   : > { %v3579_v27 = vadd.f32 %v3521_v13, %v3421_v19  ;;  %v3673_v33 = vsel %vm1465_vm1, %v3671_v46, %v3672_v60  ;;  %v12225_v44 = vrot.slane %v12224_v24, 2  ;;  %v3979_v26 = vrot.slane %v3913_v32, 2  ;;  %v12230_v24 = vld [vmem:[#allocation100_spill] sm:$0xff] }
 0x23e   : > { %v3420_v34 = vadd.f32 %v3361_v5, %v3262_v36  ;;  %v3827_v56 = vsel %vm1465_vm1, %v3825_v4, %v3826_v37  ;;  %v3982_v61 = vrot.slane %v3915_v22, 2  ;;  %v3829_v47 = vsel %vm1465_vm1, %v3826_v37, %v3828_v52  ;;  %v9127_v37 = vpop.permute.xlu1 %1240 }
 0x23f   : > { %v3675_v51 = vsel %vm1465_vm1, %v3672_v60, %v12225_v44  ;;  %v3980_v41 = vrot.slane %v3914_v20, 2  ;;  %v9096_v3 = vmul.f32 %v12188_v55, %v1920_v30  ;;  %v9099_v59 = vmul.f32 %v12191_v40, %v1920_v30 }
 0x240   : > { %v3733_v57 = vadd.f32 %v3675_v51, %v3579_v27  ;;  %v3578_v58 = vadd.f32 %v3519_v15, %v3420_v34  ;;  %v9102_v2 = vmul.f32 %v11838_v17, %v1920_v30  ;;  %v9105_v18 = vmul.f32 %v11918_v6, %v1920_v30 }
 0x241   : > { %12226 = vst [vmem:[#allocation73_spill] sm:$0xff] %v9099_v59  ;;  %v3981_v13 = vsel %vm1465_vm1, %v3979_v26, %v3980_v41  ;;  %v3983_v63 = vsel %vm1465_vm1, %v3980_v41, %v3982_v61  ;;  %v9111_v32 = vmul.f32 %v8627_v21, %v1920_v30  ;;  %v1276_v9 = vmul.f32 %v11592_v29, %v8814_v53  ;;  %v12329_v59 = vld [vmem:[#allocation121_spill] sm:$0xff] }
 0x242   : > { %v3887_v45 = vadd.f32 %v3829_v47, %v3733_v57  ;;  %12227 = vst [vmem:[#allocation174_spill] sm:$0xff] %v9105_v18  ;;  %v3732_v43 = vadd.f32 %v3673_v33, %v3578_v58  ;;  %v9118_v60 = vmul.f32 %v11992_v11, %v1920_v30  ;;  %v785_v4 = vmul.f32 %v11588_v38, %v8814_v53  ;;  %v12229_v33 = vld [vmem:[#allocation99_spill] sm:$0xff]  ;;  %v12232_v57 = vld [vmem:[#allocation208_spill] sm:$0xff] }
 0x243   : > { %v1739_v20 = vmul.f32 %v11593_v14, %v8814_v53  ;;  %v1352_v5 = vrot.slane %v1276_v9, 1  ;;  %v2369_v27 = vmul.f32 %v11598_v39, %v8814_v53  ;;  %v9131_v15 = vmul.f32 %v11966_v42, %v12179_v23  ;;  %v12233_v58 = vld [vmem:[#allocation239_spill] sm:$0xff] }
 0x244   : > { %v4041_v19 = vadd.f32 %v3983_v63, %v3887_v45  ;;  %12228 = vst [vmem:[#allocation218_spill] sm:$0xff] %v9118_v60  ;;  %v3886_v22 = vadd.f32 %v3827_v56, %v3732_v43  ;;  %v1997_v30 = vmul.f32 %v11601_v35, %v8814_v53  ;;  %v9137_v38 = vmul.f32 %v11601_v35, %v8895_v28  ;;  %v12269_v18 = vld [vmem:[#allocation11_spill] sm:$0xff] }
 0x245   : > { %v681_v44 = vadd.f32 %v12230_v24, %v12229_v33  ;;  %v1815_v26 = vrot.slane %v1739_v20, 2  ;;  %v9143_v34 = vmul.f32 %v11713_v31, %v8814_v53  ;;  %v1203_v56 = vadd.f32 %v12232_v57, %v8735_v0 }
 0x246   : > { %v4068_v36 = vadd.f32 %v8726_v16, %v4041_v19  ;;  %v4040_v51 = vadd.f32 %v3981_v13, %v3886_v22  ;;  %v1277_v41 = vmul.f32 %v11592_v29, %v9127_v37  ;;  %v12234_v45 = vrot.slane %v12233_v58, 1  ;;  %v12239_v58 = vld [vmem:[#allocation242_spill] sm:$0xff] }
 0x247   : > { %12231 = vst [vmem:[#allocation77_spill] sm:$0xff] %v9143_v34  ;;  %v805_v47 = vadd.f32 %v785_v4, %v681_v44  ;;  %v2443_v13 = vrot.slane %v2369_v27, 1  ;;  %v1740_v9 = vmul.f32 %v11593_v14, %v9127_v37  ;;  %v9157_v20 = vmul.f32 %v12047_v50, %v12179_v23  ;;  %v12235_v27 = vld [vmem:[#allocation178_spill] sm:$0xff] }
 0x248   : > { %v4088_v61 = vmax.f32 %v4068_v36, 0.0  ;;  %v1353_v63 = vsel %vm922_vm0, %v12234_v45, %v1352_v5  ;;  %v4067_v43 = vadd.f32 %v8726_v16, %v4040_v51  ;;  %v1354_v4 = vrot.slane %v1277_v41, 1  ;;  %v12237_v41 = vld [vmem:[#allocation240_spill] sm:$0xff] }
 0x249   : > { %v1397_v19 = vadd.f32 %v1353_v63, %v1203_v56  ;;  %v1010_v0 = vadd.f32 %v8751_v8, %v805_v47  ;;  %v2017_v29 = vadd.f32 %v1997_v30, %v8594_v48  ;;  %v11307_v36 = vrot.slane %v9143_v34, 2  ;;  %v12236_v8 = vld [vmem:[#allocation56_spill] sm:$0xff]  ;;  %v12327_v34 = vld [vmem:[#allocation89_spill] sm:$0xff] }
 0x24a   : > { %v4087_v22 = vmax.f32 %v4067_v43, 0.0  ;;  %v1817_v16 = vrot.slane %v1740_v9, 2  ;;  %v1355_v44 = vsel %vm922_vm0, %v1352_v5, %v1354_v4  ;;  %v2370_v57 = vmul.f32 %v11598_v39, %v9127_v37 }
 0x24b   : > { %v1552_v33 = vadd.f32 %v8744_v10, %v1397_v19  ;;  %v1204_v24 = vadd.f32 %v12235_v27, %v1010_v0  ;;  %v2176_v51 = vadd.f32 %v8770_v1, %v2017_v29  ;;  %v12238_v48 = vrot.slane %v12237_v41, 2  ;;  %v12241_v1 = vld [vmem:[#allocation177_spill] sm:$0xff]  ;;  %v12242_v0 = vld [vmem:[#allocation180_spill] sm:$0xff] }
 0x24c   : > { %v4104_v56 = vpack.c.bf16 %v4088_v61, %v4087_v22  ;;  %v12240_v45 = vrot.slane %v12239_v58, 1  ;;  %v1947_v5 = vmul.f32 %v11838_v17, %v12182_v54  ;;  %v2333_v43 = vadd.f32 %v12241_v1, %v8810_v49  ;;  %v12243_v22 = vld [vmem:[#allocation203_spill] sm:$0xff]  ;;  %v12247_v41 = vld [vmem:[#allocation17_spill] sm:$0xff]  ;;  %v12250_v58 = vld [vmem:[#allocation94_spill] sm:$0xff] }
 0x24d   : > { %v1706_v47 = vadd.f32 %v12236_v8, %v1552_v33  ;;  %v1816_v30 = vsel %vm1465_vm1, %v12238_v48, %v1815_v26  ;;  %v1398_v63 = vadd.f32 %v1355_v44, %v1204_v24  ;;  %v2445_v19 = vrot.slane %v2370_v57, 1  ;;  %v12245_v44 = vld [vmem:[#allocation19_spill] sm:$0xff] }
 0x24e   : > { %v2444_v10 = vsel %vm922_vm0, %v12240_v45, %v2443_v13  ;;  %5457 = vmatmul.mubr.bf16.gmra.mrb[4].mxu0 %v4104_v56  ;;  %v1818_v61 = vsel %vm1465_vm1, %v1815_v26, %v1817_v16  ;;  %v2334_v4 = vadd.f32 %v12242_v0, %v2176_v51  ;;  %v2832_v29 = vmul.f32 %v11713_v31, %v9127_v37  ;;  %v12246_v56 = vld [vmem:[#allocation167_spill] sm:$0xff]  ;;  %v12248_v51 = vld [vmem:[#allocation25_spill] sm:$0xff]  ;;  %v12251_v45 = vld [vmem:[#allocation228_spill] sm:$0xff] }
 0x24f   : > { %v1860_v9 = vadd.f32 %v1816_v30, %v1706_v47  ;;  %v1553_v33 = vadd.f32 %v12243_v22, %v1398_v63  ;;  %v2446_v27 = vsel %vm922_vm0, %v2443_v13, %v2445_v19  ;;  %v9185_v24 = vadd.f32 %v2444_v10, %v2333_v43  ;;  %v12249_v48 = vld [vmem:[#allocation223_spill] sm:$0xff]  ;;  %v12253_v63 = vld [vmem:[#allocation97_spill] sm:$0xff] }
 0x250   : > { %v1741_v8 = vmul.f32 %v11593_v14, %v12245_v44  ;;  %v2492_v49 = vadd.f32 %v2446_v27, %v2334_v4  ;;  %v2907_v57 = vrot.slane %v2832_v29, 2  ;;  %v1587_v26 = vmul.f32 %v12247_v41, %v12246_v56  ;;  %v12255_v19 = vld [vmem:[#allocation171_spill] sm:$0xff]  ;;  %v12256_v27 = vld [vmem:[#allocation224_spill] sm:$0xff]  ;;  %v12257_v41 = vld [vmem:[#allocation98_spill] sm:$0xff] }
 0x251   : > { %12244 = vst [vmem:[#allocation159_spill] sm:$0xff] %v9185_v24  ;;  %v1742_v16 = vmul.f32 %v11593_v14, %v8895_v28  ;;  %v1707_v47 = vadd.f32 %v12248_v51, %v1553_v33  ;;  %v1914_v30 = vadd.f32 %v12249_v48, %v1860_v9  ;;  %v9197_v13 = vmul.f32 %v12250_v58, %v9127_v37  ;;  %v12258_v48 = vld [vmem:[#allocation244_spill] sm:$0xff] }
 0x252   : > { %v12252_v10 = vrot.slane %v12251_v45, 1  ;;  %v12254_v1 = vrot.slane %v12253_v63, 1  ;;  %v2646_v0 = vadd.f32 %v12255_v19, %v2492_v49  ;;  %v1819_v4 = vrot.slane %v1741_v8, 2 }
 0x253   : > { %v1820_v29 = vrot.slane %v1742_v16, 2  ;;  %v2679_v14 = vmul.f32 %v12191_v40, %v12246_v56  ;;  %v1861_v22 = vadd.f32 %v1818_v61, %v1707_v47  ;;  %v2833_v9 = vmul.f32 %v11713_v31, %v12245_v44  ;;  %v12259_v16 = vld [vmem:[#allocation59_spill] sm:$0xff]  ;;  %v12271_v56 = vld [vmem:[#allocation166_spill] sm:$0xff] }
 0x254   : > { %v1358_v43 = vsel %vm922_vm0, %v12254_v1, %v12252_v10  ;;  %v9211_v33 = vmul.f32 %v11713_v31, %v8895_v28  ;;  %v806_v51 = vadd.f32 %v12257_v41, %v12256_v27  ;;  %v2800_v45 = vadd.f32 %v12258_v48, %v2646_v0  ;;  %v12261_v61 = vld [vmem:[#allocation3_spill] sm:$0xff]  ;;  %v1867_v27 = vpop.permute.xlu1 %1866 }
 0x255   : > { %v2908_v8 = vsel %vm1465_vm1, %v11307_v36, %v2907_v57  ;;  %v1665_v49 = vrot.slane %v1587_v26, 2  ;;  %v12260_v10 = vrot.slane %v12259_v16, 1  ;;  %v12262_v47 = vrot.slane %v12261_v61, 1  ;;  %v12263_v41 = vld [vmem:[#allocation227_spill] sm:$0xff]  ;;  %v12266_v26 = vld [vmem:[#allocation190_spill] sm:$0xff]  ;;  %v12268_v61 = vld [vmem:[#allocation29_spill] sm:$0xff] }
 0x256   : > { %v1915_v1 = vadd.f32 %v9131_v15, %v1861_v22  ;;  %v1821_v19 = vsel %vm1465_vm1, %v1819_v4, %v1820_v29  ;;  %v2910_v52 = vrot.slane %v9211_v33, 2  ;;  %v1011_v0 = vadd.f32 %v12263_v41, %v806_v51  ;;  %v12270_v4 = vld [vmem:[#allocation194_spill] sm:$0xff]  ;;  %v12274_v41 = vld [vmem:[#allocation85_spill] sm:$0xff] }
 0x257   : > { %v2449_v63 = vsel %vm922_vm0, %v12262_v47, %v12260_v10  ;;  %v2954_v48 = vadd.f32 %v2908_v8, %v2800_v45  ;;  %v2755_v46 = vrot.slane %v2679_v14, 2  ;;  %v12265_v57 = vrot.slane %v12264_v62, 1  ;;  %v12273_v62 = vld [vmem:[#allocation12_spill] sm:$0xff] }
 0x258   : > { %v12267_v36 = vrot.slane %v12266_v26, 1  ;;  %v1432_v10 = vmul.f32 %v12269_v18, %v12268_v61  ;;  %v1967_v47 = vadd.f32 %v1947_v5, %v1915_v1  ;;  %v2909_v15 = vrot.slane %v2833_v9, 2  ;;  %v12275_v18 = vld [vmem:[#allocation13_spill] sm:$0xff]  ;;  %v12281_v1 = vld [vmem:[#allocation191_spill] sm:$0xff] }
 0x259   : > { %v1966_v44 = vadd.f32 %v12270_v4, %v1914_v30  ;;  %v12272_v23 = vrot.slane %v12271_v56, 2  ;;  %v1896_v14 = vmul.f32 %v11966_v42, %v1867_v27  ;;  %v2058_v45 = vmul.f32 %v12273_v62, %v1867_v27  ;;  %v12277_v30 = vld [vmem:[#allocation101_spill] sm:$0xff]  ;;  %v12284_v4 = vld [vmem:[#allocation63_spill] sm:$0xff] }
 0x25a   : > { %v1164_v60 = vsel %vm922_vm0, %v12267_v36, %v12265_v57  ;;  %v1511_v33 = vrot.slane %v1432_v10, 2  ;;  %v2911_v8 = vsel %vm1465_vm1, %v2909_v15, %v2910_v52  ;;  %v2525_v5 = vmul.f32 %v12275_v18, %v12268_v61  ;;  %v12283_v15 = vld [vmem:[#allocation102_spill] sm:$0xff] }
 0x25b   : > { %v1205_v22 = vadd.f32 %v1164_v60, %v1011_v0  ;;  %v1667_v51 = vsel %vm1465_vm1, %v1665_v49, %v12272_v23  ;;  %v2018_v57 = vadd.f32 %v12274_v41, %v1966_v44  ;;  %v9246_v60 = vadd.f32 %v9157_v20, %v2954_v48  ;;  %v12279_v23 = vld [vmem:[#allocation126_spill] sm:$0xff] }
 0x25c   : > { %v12278_v9 = vrot.slane %v12277_v30, 2  ;;  %v12280_v49 = vrot.slane %v12279_v23, 1  ;;  %v12282_v0 = vrot.slane %v12281_v1, 1  ;;  %v2019_v44 = vadd.f32 %v9137_v38, %v1967_v47  ;;  %v12286_v30 = vld [vmem:[#allocation27_spill] sm:$0xff]  ;;  %v1872_v23 = vpop.permute.xlu1 %1871  ;;  %v12288_v1 = vld [vmem:[#allocation230_spill] sm:$0xff] }
 0x25d   : > { %v1399_v36 = vadd.f32 %v1358_v43, %v1205_v22  ;;  %12276 = vst [vmem:[#allocation28_spill] sm:$0xff] %v9246_v60  ;;  %v9257_v43 = vmul.f32 %v12275_v18, %v1867_v27  ;;  %v2177_v22 = vadd.f32 %v12283_v15, %v2018_v57  ;;  %v2601_v20 = vrot.slane %v2525_v5, 2  ;;  %v12294_v15 = vld [vmem:[#allocation52_spill] sm:$0xff] }
 0x25e   : > { %v1513_v56 = vsel %vm1465_vm1, %v1511_v33, %v12278_v9  ;;  %v2291_v26 = vsel %vm922_vm0, %v12282_v0, %v12280_v49  ;;  %v2136_v48 = vrot.slane %v2058_v45, 1  ;;  %v12285_v41 = vrot.slane %v12284_v4, 2  ;;  %v12289_v49 = vld [vmem:[#allocation235_spill] sm:$0xff] }
 0x25f   : > { %v1554_v10 = vadd.f32 %v1513_v56, %v1399_v36  ;;  %v9265_v9 = vmul.f32 %v12286_v30, %v1867_v27  ;;  %v1555_v0 = vadd.f32 %v12289_v49, %v12288_v1  ;;  %v2335_v28 = vadd.f32 %v2291_v26, %v2177_v22  ;;  %v12290_v36 = vld [vmem:[#allocation103_spill] sm:$0xff] }
 0x260   : > { %v2757_v33 = vsel %vm1465_vm1, %v2755_v46, %v12285_v41  ;;  %v2989_v47 = vmul.f32 %v12047_v50, %v1867_v27  ;;  %v12291_v57 = vrot.slane %v12290_v36, 2  ;;  %v9275_v5 = vmul.f32 %v11667_v7, %v1867_v27  ;;  %v12293_v46 = vld [vmem:[#allocation68_spill] sm:$0xff] }
 0x261   : > { %12287 = vst [vmem:[#allocation152_spill] sm:$0xff] %v9265_v9  ;;  %v1708_v60 = vadd.f32 %v1667_v51, %v1554_v10  ;;  %v1709_v56 = vadd.f32 %v12293_v46, %v1555_v0  ;;  %v12295_v4 = vrot.slane %v12294_v15, 2  ;;  %v2493_v51 = vadd.f32 %v2449_v63, %v2335_v28  ;;  %v12296_v10 = vld [vmem:[#allocation237_spill] sm:$0xff]  ;;  %v9292_v28 = vpop.permute.xlu0 %1971  ;;  %v12314_v63 = vld [vmem:[#allocation162_spill] sm:$0xff] }
 0x262   : > { %v2603_v45 = vsel %vm1465_vm1, %v2601_v20, %v12291_v57  ;;  %12292 = vst [vmem:[#allocation104_spill] sm:$0xff] %v9275_v5  ;;  %v9282_v26 = vmul.f32 %v12273_v62, %v1872_v23  ;;  %v2178_v22 = vadd.f32 %v12296_v10, %v2019_v44  ;;  %v1897_v20 = vmul.f32 %v11966_v42, %v1872_v23  ;;  %v12302_v42 = vld [vmem:[#allocation16_spill] sm:$0xff] }
 0x263   : > { %v1823_v41 = vsel %vm1465_vm1, %v1820_v29, %v12295_v4  ;;  %v1862_v1 = vadd.f32 %v1821_v19, %v1708_v60  ;;  %v9288_v27 = vmul.f32 %v12275_v18, %v1872_v23  ;;  %v2647_v57 = vadd.f32 %v2603_v45, %v2493_v51  ;;  %v12297_v29 = vld [vmem:[#allocation184_spill] sm:$0xff]  ;;  %12298 = vst [vmem:[#allocation78_spill] sm:$0xff] %v9292_v28  ;;  %v12299_v60 = vld [vmem:[#allocation143_spill] sm:$0xff] }
 0x264   : > { %v1863_v36 = vadd.f32 %v1823_v41, %v1709_v56  ;;  %v11314_v46 = vrot.slane %v9282_v26, 1  ;;  %v2336_v19 = vadd.f32 %v12297_v29, %v2178_v22  ;;  %v12300_v44 = vrot.slane %v12299_v60, 1 }
 0x265   : > { %v1916_v0 = vadd.f32 %v1896_v14, %v1862_v1  ;;  %v12301_v15 = vrot.slane %v12259_v16, 1  ;;  %v12303_v4 = vrot.slane %v12302_v42, 2  ;;  %v9304_v14 = vmul.f32 %v12286_v30, %v1872_v23  ;;  %v12310_v42 = vld [vmem:[#allocation205_spill] sm:$0xff]  ;;  %v12322_v16 = vld [vmem:[#allocation62_spill] sm:$0xff] }
 0x266   : > { %v2801_v45 = vadd.f32 %v2757_v33, %v2647_v57  ;;  %v9307_v51 = vmul.f32 %v11667_v7, %v1872_v23  ;;  %v9310_v22 = vadd.f32 %v1897_v20, %v1863_v36  ;;  %v2000_v29 = vmul.f32 %v11601_v35, %v9292_v28  ;;  %v12318_v36 = vld [vmem:[#allocation54_spill] sm:$0xff] }
 0x267   : > { %v2451_v56 = vsel %vm922_vm0, %v12301_v15, %v12300_v44  ;;  %v2913_v41 = vsel %vm1465_vm1, %v2910_v52, %v12303_v4  ;;  %12304 = vst [vmem:[#allocation160_spill] sm:$0xff] %v9304_v14  ;;  %v1968_v10 = vadd.f32 %v9102_v2, %v1916_v0  ;;  %v9317_v52 = vmul.f32 %v11598_v39, %v9292_v28  ;;  %v12306_v44 = vld [vmem:[#allocation238_spill] sm:$0xff]  ;;  %v12308_v15 = vld [vmem:[#allocation209_spill] sm:$0xff]  ;;  %v12311_v4 = vld [vmem:[#allocation195_spill] sm:$0xff] }
 0x268   : > { %v2494_v1 = vadd.f32 %v2451_v56, %v2336_v19  ;;  %12305 = vst [vmem:[#allocation105_spill] sm:$0xff] %v9307_v51  ;;  %v2955_v60 = vadd.f32 %v2911_v8, %v2801_v45  ;;  %v2990_v57 = vmul.f32 %v12047_v50, %v1872_v23  ;;  %v2138_v2 = vsel %vm922_vm0, %v2136_v48, %v11314_v46  ;;  %v12316_v8 = vld [vmem:[#allocation200_spill] sm:$0xff] }
 0x269   : > { %v2020_v0 = vadd.f32 %v2000_v29, %v1968_v10  ;;  %v9328_v19 = vmul.f32 %v12250_v58, %v9292_v28  ;;  %v9334_v23 = vmul.f32 %v11713_v31, %v9292_v28  ;;  %v2639_v48 = vadd.f32 %v12311_v4, %v12310_v42  ;;  %v12312_v29 = vld [vmem:[#allocation80_spill] sm:$0xff]  ;;  %v12321_v4 = vld [vmem:[#allocation146_spill] sm:$0xff] }
 0x26a   : > { %v2648_v33 = vadd.f32 %v12306_v44, %v2494_v1  ;;  %v3009_v45 = vadd.f32 %v2989_v47, %v2955_v60  ;;  %v9342_v10 = vmul.f32 %v8630_v25, %v9292_v28  ;;  %v12313_v44 = vrot.slane %v12312_v29, 2  ;;  %v12320_v60 = vld [vmem:[#allocation179_spill] sm:$0xff] }
 0x26b   : > { %12307 = vst [vmem:[#allocation79_spill] sm:$0xff] %v9328_v19  ;;  %12309 = vst [vmem:[#allocation161_spill] sm:$0xff] %v9334_v23  ;;  %v9338_v1 = vadd.f32 %v2138_v2, %v2020_v0  ;;  %v12317_v38 = vrot.slane %v12316_v8, 2  ;;  %v12319_v42 = vrot.slane %v12318_v36, 2  ;;  %v2981_v2 = vmul.f32 %v12047_v50, %v12320_v60  ;;  %v12324_v36 = vld [vmem:[#allocation225_spill] sm:$0xff] }
 0x26c   : > { %v2802_v56 = vadd.f32 %v12308_v15, %v2648_v33  ;;  %v12315_v33 = vrot.slane %v12314_v63, 2  ;;  %v3033_v29 = vmul.f32 %v8627_v21, %v12321_v4  ;;  %v3034_v63 = vmul.f32 %v8627_v21, %v12322_v16 }
 0x26d   : > { %v2891_v47 = vsel %vm1465_vm1, %v12319_v42, %v12317_v38  ;;  %v3086_v38 = vmul.f32 %v8630_v25, %v12324_v36  ;;  %v3296_v46 = vmul.f32 %v11918_v6, %v12321_v4  ;;  %v3297_v28 = vmul.f32 %v11918_v6, %v12322_v16 }
 0x26e   : > { %v2737_v15 = vsel %vm1465_vm1, %v12315_v33, %v12313_v44  ;;  %v2956_v0 = vadd.f32 %v2913_v41, %v2802_v56  ;;  %v3138_v44 = vmul.f32 %v12286_v30, %v12320_v60  ;;  %v12323_v33 = vld [vmem:[#allocation123_spill] sm:$0xff]  ;;  %v3455_v51 = vmul.f32 %v12250_v58, %v12324_v36 }
 0x26f   : > { %v2793_v49 = vadd.f32 %v2737_v15, %v2639_v48  ;;  %v3085_v8 = vmul.f32 %v8630_v25, %v12323_v33  ;;  %v12325_v15 = vld [vmem:[#allocation61_spill] sm:$0xff]  ;;  %v12326_v41 = vld [vmem:[#allocation199_spill] sm:$0xff]  ;;  %v3364_v9 = vrot.slane %v3296_v46, 1  ;;  %v3365_v54 = vrot.slane %v3297_v28, 1 }
 0x270   : > { %v3139_v42 = vmul.f32 %v12286_v30, %v12325_v15  ;;  %v3054_v56 = vadd.f32 %v3034_v63, %v12326_v41  ;;  %v3206_v20 = vrot.slane %v3138_v44, 1  ;;  %v3608_v63 = vmul.f32 %v11667_v7, %v12320_v60 }
 0x271   : > { %v2947_v48 = vadd.f32 %v2891_v47, %v2793_v49  ;;  %v3454_v47 = vmul.f32 %v12250_v58, %v12323_v33  ;;  %v9380_v44 = vadd.f32 %v2990_v57, %v2956_v0  ;;  %v3061_v41 = vadd.f32 %v9111_v32, %v3009_v45 }
 0x272   : > { %v3207_v49 = vrot.slane %v3139_v42, 1  ;;  %v3106_v19 = vadd.f32 %v3086_v38, %v3054_v56  ;;  %v12330_v23 = vrot.slane %v12329_v59, 1  ;;  %v3523_v56 = vrot.slane %v3455_v51, 1  ;;  %v12331_v59 = vld [vmem:[#allocation196_spill] sm:$0xff] }
 0x273   : > { %v3001_v5 = vadd.f32 %v2981_v2, %v2947_v48  ;;  %v12328_v2 = vrot.slane %v12327_v34, 1  ;;  %v3522_v28 = vrot.slane %v3454_v47, 1  ;;  %v3609_v57 = vmul.f32 %v11667_v7, %v12325_v15  ;;  %v12333_v51 = vld [vmem:[#allocation124_spill] sm:$0xff] }
 0x274   : > { %v3208_v42 = vsel %vm922_vm0, %v3206_v20, %v3207_v49  ;;  %v3368_v46 = vsel %vm922_vm0, %v3365_v54, %v12330_v23  ;;  %v3762_v32 = vmul.f32 %v11992_v11, %v12321_v4  ;;  %v3366_v34 = vsel %vm922_vm0, %v3364_v9, %v3365_v54  ;;  %v12334_v15 = vld [vmem:[#allocation24_spill] sm:$0xff] }
 0x275   : > { %v3053_v61 = vadd.f32 %v3033_v29, %v3001_v5  ;;  %v3210_v48 = vsel %vm922_vm0, %v3207_v49, %v12328_v2  ;;  %v3676_v45 = vrot.slane %v3608_v63, 2  ;;  %v3763_v20 = vmul.f32 %v11992_v11, %v12322_v16  ;;  %v12336_v63 = vld [vmem:[#allocation129_spill] sm:$0xff] }
 0x276   : > { %v3265_v24 = vadd.f32 %v3210_v48, %v3106_v19  ;;  %v12332_v60 = vrot.slane %v12331_v59, 1  ;;  %v3833_v0 = vrot.slane %v12333_v51, 2  ;;  %v3916_v4 = vmul.f32 %v12093_v12, %v12323_v33 }
 0x277   : > { %v3105_v38 = vadd.f32 %v3085_v8, %v3053_v61  ;;  %v3677_v61 = vrot.slane %v3609_v57, 2  ;;  %v3831_v8 = vrot.slane %v3763_v20, 2  ;;  %v3917_v54 = vmul.f32 %v12093_v12, %v12324_v36 }
 0x278   : > { %v3423_v5 = vadd.f32 %v3368_v46, %v3265_v24  ;;  %v3526_v23 = vsel %vm922_vm0, %v3523_v56, %v12332_v60  ;;  %v1924_v24 = vpop.permute.xlu1 %1923  ;;  %v12335_v16 = vrot.slane %v12334_v15, 2  ;;  %v3830_v47 = vrot.slane %v3762_v32, 2 }
 0x279   : > { %v3264_v19 = vadd.f32 %v3208_v42, %v3105_v38  ;;  %v3918_v2 = vmul.f32 %v12093_v12, %v12336_v63  ;;  %v3524_v48 = vsel %vm922_vm0, %v3522_v28, %v3523_v56  ;;  %v3834_v46 = vsel %vm1465_vm1, %v3831_v8, %v3833_v0 }
 0x27a   : > { %v3581_v29 = vadd.f32 %v3526_v23, %v3423_v5  ;;  %v3680_v49 = vsel %vm1465_vm1, %v3677_v61, %v12335_v16  ;;  %v3984_v38 = vrot.slane %v3916_v4, 2  ;;  %v3985_v57 = vrot.slane %v3917_v54, 2 }
 0x27b   : > { %v3422_v9 = vadd.f32 %v3366_v34, %v3264_v19  ;;  %v3987_v5 = vrot.slane %v3918_v2, 2  ;;  %v1949_v36 = vmul.f32 %v11838_v17, %v1924_v24  ;;  %v9414_v34 = vadd.f32 %v9342_v10, %v3061_v41 }
 0x27c   : > { %v3735_v42 = vadd.f32 %v3680_v49, %v3581_v29  ;;  %v3678_v20 = vsel %vm1465_vm1, %v3676_v45, %v3677_v61  ;;  %v9418_v19 = vmul.f32 %v12188_v55, %v1924_v24  ;;  %v3832_v28 = vsel %vm1465_vm1, %v3830_v47, %v3831_v8  ;;  %v2025_v45 = vpop.permute.xlu1 %2024  ;;  %v9438_v8 = vld [vmem:[%s10944_s4] ss:$0 sm:$0xff] }
 0x27d   : > { %v3580_v33 = vadd.f32 %v3524_v48, %v3422_v9  ;;  %12337 = vst [vmem:[#allocation107_spill] sm:$0xff] %v9414_v34  ;;  %v3988_v56 = vsel %vm1465_vm1, %v3985_v57, %v3987_v5  ;;  %v9423_v60 = vmul.f32 %v12191_v40, %v1924_v24  ;;  %v3986_v23 = vsel %vm1465_vm1, %v3984_v38, %v3985_v57  ;;  %v12339_v47 = vld [vmem:[#allocation142_spill] sm:$0xff]  ;;  %v12342_v57 = vld [vmem:[#allocation119_spill] sm:$0xff] }
 0x27e   : > { %v3889_v32 = vadd.f32 %v3834_v46, %v3735_v42  ;;  %v9427_v10 = vadd.f32 %v1949_v36, %v9310_v22  ;;  %v3042_v41 = vmul.f32 %v8627_v21, %v1924_v24  ;;  %v9432_v0 = vmul.f32 %v11918_v6, %v1924_v24  ;;  %v12368_v34 = vld [vmem:[#allocation170_spill] sm:$0xff] }
 0x27f   : > { %v3734_v59 = vadd.f32 %v3678_v20, %v3580_v33  ;;  %v2060_v29 = vmul.f32 %v12273_v62, %v2025_v45  ;;  %v2530_v22 = vmul.f32 %v12275_v18, %v2025_v45  ;;  %v3152_v54 = vmul.f32 %v12286_v30, %v2025_v45  ;;  %v12340_v62 = vld [vmem:[#allocation185_spill] sm:$0xff] }
 0x280   : > { %v4043_v17 = vadd.f32 %v3988_v56, %v3889_v32  ;;  %v9444_v9 = vmul.f32 %v11667_v7, %v2025_v45  ;;  %v2014_v63 = vadd.f32 %v12340_v62, %v12339_v47  ;;  %v9450_v2 = vadd.f32 %v3042_v41, %v9380_v44  ;;  %v12344_v32 = vld [vmem:[#allocation48_spill] sm:$0xff]  ;;  %v12366_v44 = vld [vmem:[#allocation10_spill] sm:$0xff] }
 0x281   : > { %v3888_v61 = vadd.f32 %v3832_v28, %v3734_v59  ;;  %v2139_v49 = vrot.slane %v2060_v29, 1  ;;  %v9453_v48 = vmul.f32 %v11992_v11, %v1924_v24  ;;  %v2609_v42 = vrot.slane %v2530_v22, 2  ;;  %v12346_v24 = vld [vmem:[#allocation70_spill] sm:$0xff]  ;;  %v12356_v62 = vld [vmem:[#allocation212_spill] sm:$0xff] }
 0x282   : > { %v4070_v4 = vadd.f32 %v9438_v8, %v4043_v17  ;;  %12338 = vst [vmem:[#allocation4_spill] sm:$0xff] %v9444_v9  ;;  %v3229_v18 = vrot.slane %v3152_v54, 1  ;;  %v2173_v5 = vadd.f32 %v12342_v57, %v2014_v63  ;;  %v12343_v36 = vrot.slane %v9282_v26, 1  ;;  %v12351_v26 = vld [vmem:[#allocation66_spill] sm:$0xff]  ;;  %v12358_v57 = vld [vmem:[#allocation197_spill] sm:$0xff] }
 0x283   : > { %v4042_v15 = vadd.f32 %v3986_v23, %v3888_v61  ;;  %12341 = vst [vmem:[#allocation32_spill] sm:$0xff] %v9453_v48  ;;  %v12345_v59 = vrot.slane %v12344_v32, 1  ;;  %v12347_v28 = vrot.slane %v12346_v24, 1  ;;  %v12348_v23 = vld [vmem:[#allocation175_spill] sm:$0xff]  ;;  %v12349_v45 = vrot.slane %v9288_v27, 2  ;;  %v12360_v24 = vld [vmem:[#allocation65_spill] sm:$0xff] }
 0x284   : > { %v4090_v38 = vmax.f32 %v4070_v4, 0.0  ;;  %v9461_v20 = vsel %vm922_vm0, %v12343_v36, %v2139_v49  ;;  %v2745_v17 = vrot.slane %v12348_v23, 2  ;;  %v2331_v29 = vadd.f32 %v12351_v26, %v2173_v5  ;;  %v12352_v4 = vld [vmem:[#allocation109_spill] sm:$0xff]  ;;  %v12354_v49 = vld [vmem:[#allocation144_spill] sm:$0xff] }
 0x285   : > { %v4069_v46 = vadd.f32 %v9438_v8, %v4042_v15  ;;  %v2439_v56 = vsel %vm922_vm0, %v12347_v28, %v12345_v59  ;;  %v9473_v61 = vsel %vm1465_vm1, %v12349_v45, %v2609_v42  ;;  %v2827_v22 = vmul.f32 %v11713_v31, %v12352_v4  ;;  %v12359_v36 = vld [vmem:[#allocation81_spill] sm:$0xff] }
 0x286   : > { %12350 = vst [vmem:[#allocation122_spill] sm:$0xff] %v9473_v61  ;;  %v12353_v54 = vrot.slane %v9304_v14, 1  ;;  %v12355_v47 = vrot.slane %v12354_v49, 2  ;;  %v12357_v63 = vrot.slane %v12356_v62, 2  ;;  %v2985_v42 = vmul.f32 %v12047_v50, %v12358_v57 }
 0x287   : > { %v4089_v41 = vmax.f32 %v4069_v46, 0.0  ;;  %v2986_v5 = vmul.f32 %v12047_v50, %v12359_v36  ;;  %v2489_v59 = vadd.f32 %v2439_v56, %v2331_v29  ;;  %v12361_v28 = vrot.slane %v12360_v24, 2 }
 0x288   : > { %v9481_v15 = vsel %vm922_vm0, %v12353_v54, %v3229_v18  ;;  %v2593_v46 = vsel %vm1465_vm1, %v12357_v63, %v12355_v47  ;;  %v12362_v18 = vld [vmem:[#allocation82_spill] sm:$0xff]  ;;  %v2899_v26 = vrot.slane %v2827_v22, 2  ;;  %v12363_v54 = vld [vmem:[#allocation188_spill] sm:$0xff]  ;;  %v3144_v47 = vmul.f32 %v12286_v30, %v12358_v57  ;;  %v12365_v22 = vld [vmem:[#allocation131_spill] sm:$0xff] }
 0x289   : > { %v4105_v32 = vpack.c.bf16 %v4090_v38, %v4089_v41  ;;  %v2747_v23 = vsel %vm1465_vm1, %v2745_v17, %v12361_v28  ;;  %v3038_v45 = vmul.f32 %v8627_v21, %v12362_v18  ;;  %v3006_v49 = vadd.f32 %v2986_v5, %v12363_v54  ;;  %v12364_v38 = vld [vmem:[#allocation163_spill] sm:$0xff] }
 0x28a   : > { %v3145_v62 = vmul.f32 %v12286_v30, %v12359_v36  ;;  %v2643_v63 = vadd.f32 %v2593_v46, %v2489_v59  ;;  %v3037_v56 = vmul.f32 %v8627_v21, %v12364_v38  ;;  %v3302_v17 = vmul.f32 %v11918_v6, %v12364_v38 }
 0x28b   : > { %5460 = vmatprep.mubr.bf16.mxu0 %v4105_v32  ;;  %v3303_v41 = vmul.f32 %v11918_v6, %v12362_v18  ;;  %v3058_v29 = vadd.f32 %v3038_v45, %v3006_v49  ;;  %v3089_v5 = vmul.f32 %v8630_v25, %v12365_v22  ;;  %v3090_v24 = vmul.f32 %v8630_v25, %v8814_v53 }
 0x28c   : > { %v3216_v28 = vrot.slane %v3144_v47, 1  ;;  %v2797_v54 = vadd.f32 %v2747_v23, %v2643_v63  ;;  %v3217_v32 = vrot.slane %v3145_v62, 1  ;;  %v3460_v46 = vmul.f32 %v12250_v58, %v12365_v22 }
 0x28d   : > { %v3461_v59 = vmul.f32 %v12250_v58, %v8814_v53  ;;  %v12367_v16 = vrot.slane %v12366_v44, 2  ;;  %v3110_v45 = vadd.f32 %v3090_v24, %v3058_v29  ;;  %v3374_v49 = vrot.slane %v3302_v17, 1  ;;  %v12372_v29 = vld [vmem:[#allocation201_spill] sm:$0xff] }
 0x28e   : > { %v3375_v51 = vrot.slane %v3303_v41, 1  ;;  %v3218_v9 = vsel %vm922_vm0, %v3216_v28, %v3217_v32  ;;  %v12369_v47 = vrot.slane %v12368_v34, 1  ;;  %v3535_v14 = vrot.slane %v9197_v13, 1 }
 0x28f   : > { %v2901_v33 = vsel %vm1465_vm1, %v2899_v26, %v12367_v16  ;;  %v3533_v62 = vrot.slane %v3461_v59, 1  ;;  %v3614_v61 = vmul.f32 %v11667_v7, %v12358_v57  ;;  %v3615_v16 = vmul.f32 %v11667_v7, %v12359_v36  ;;  %v12370_v26 = vld [vmem:[#allocation210_spill] sm:$0xff] }
 0x290   : > { %v2951_v48 = vadd.f32 %v2901_v33, %v2797_v54  ;;  %v3220_v23 = vsel %vm922_vm0, %v3217_v32, %v12369_v47  ;;  %v12371_v17 = vrot.slane %v12370_v26, 1  ;;  %v3532_v41 = vrot.slane %v3460_v46, 1 }
 0x291   : > { %v3269_v63 = vadd.f32 %v3220_v23, %v3110_v45  ;;  %v3616_v34 = vmul.f32 %v11667_v7, %v12372_v29  ;;  %v3536_v28 = vsel %vm922_vm0, %v3533_v62, %v3535_v14  ;;  %v3687_v54 = vrot.slane %v3615_v16, 2  ;;  %v9543_v14 = vpop.permute.xlu1 %1975 }
 0x292   : > { %v3005_v44 = vadd.f32 %v2985_v42, %v2951_v48  ;;  %v3378_v33 = vsel %vm922_vm0, %v3375_v51, %v12371_v17  ;;  %v3768_v13 = vmul.f32 %v11992_v11, %v12364_v38  ;;  %v3769_v48 = vmul.f32 %v11992_v11, %v12362_v18  ;;  %v12373_v42 = vld [vmem:[#allocation198_spill] sm:$0xff]  ;;  %12374 = vst [vmem:[#allocation125_spill] sm:$0xff] %v9543_v14 }
 0x293   : > { %v3427_v24 = vadd.f32 %v3378_v33, %v3269_v63  ;;  %v3689_v32 = vrot.slane %v3616_v34, 2  ;;  %v3770_v36 = vmul.f32 %v11992_v11, %v12373_v42  ;;  %v3376_v46 = vsel %vm922_vm0, %v3374_v49, %v3375_v51 }
 0x294   : > { %v3057_v57 = vadd.f32 %v3037_v56, %v3005_v44  ;;  %v3686_v45 = vrot.slane %v3614_v61, 2  ;;  %v3922_v47 = vmul.f32 %v12093_v12, %v12365_v22  ;;  %v3841_v56 = vrot.slane %v3769_v48, 2 }
 0x295   : > { %v3585_v59 = vadd.f32 %v3536_v28, %v3427_v24  ;;  %v3690_v38 = vsel %vm1465_vm1, %v3687_v54, %v3689_v32  ;;  %v3843_v63 = vrot.slane %v3770_v36, 2  ;;  %v3840_v44 = vrot.slane %v3768_v13, 2  ;;  %v12376_v32 = vld [vmem:[#allocation88_spill] sm:$0xff] }
 0x296   : > { %v3109_v23 = vadd.f32 %v3089_v5, %v3057_v57  ;;  %v3923_v18 = vmul.f32 %v12093_v12, %v8814_v53  ;;  %v3924_v51 = vmul.f32 %v12093_v12, %v9127_v37  ;;  %v3534_v61 = vsel %vm922_vm0, %v3532_v41, %v3533_v62  ;;  %v12375_v57 = vld [vmem:[#allocation165_spill] sm:$0xff] }
 0x297   : > { %v3739_v16 = vadd.f32 %v3690_v38, %v3585_v59  ;;  %v3844_v22 = vsel %vm1465_vm1, %v3841_v56, %v3843_v63  ;;  %v2001_v5 = vmul.f32 %v11601_v35, %v9543_v14  ;;  %v9556_v29 = vmul.f32 %v11598_v39, %v9543_v14  ;;  %v12378_v59 = vld [vmem:[#allocation222_spill] sm:$0xff]  ;;  %v12379_v38 = vld [vmem:[#allocation173_spill] sm:$0xff]  ;;  %v12380_v63 = vld [vmem:[#allocation87_spill] sm:$0xff] }
 0x298   : > { %v3268_v49 = vadd.f32 %v3218_v9, %v3109_v23  ;;  %v3995_v17 = vrot.slane %v3923_v18, 2  ;;  %v3997_v33 = vrot.slane %v3924_v51, 2  ;;  %v3688_v53 = vsel %vm1465_vm1, %v3686_v45, %v3687_v54 }
 0x299   : > { %v3893_v26 = vadd.f32 %v3844_v22, %v3739_v16  ;;  %v3994_v24 = vrot.slane %v3922_v47, 2  ;;  %v3094_v37 = vmul.f32 %v8630_v25, %v9543_v14  ;;  %v3842_v9 = vsel %vm1465_vm1, %v3840_v44, %v3841_v56  ;;  %v12382_v44 = vld [vmem:[#allocation41_spill] sm:$0xff] }
 0x29a   : > { %v3426_v34 = vadd.f32 %v3376_v46, %v3268_v49  ;;  %v3998_v62 = vsel %vm1465_vm1, %v3995_v17, %v3997_v33  ;;  %v9564_v35 = vadd.f32 %v2001_v5, %v9427_v10  ;;  %v9568_v41 = vmul.f32 %v12250_v58, %v9543_v14  ;;  %v12377_v46 = vld [vmem:[#allocation202_spill] sm:$0xff] }
 0x29b   : > { %v4047_v13 = vadd.f32 %v3998_v62, %v3893_v26  ;;  %v9572_v54 = vmul.f32 %v11713_v31, %v9543_v14  ;;  %v2171_v48 = vadd.f32 %v12376_v32, %v12375_v57  ;;  %v3996_v42 = vsel %vm1465_vm1, %v3994_v24, %v3995_v17  ;;  %v12387_v26 = vld [vmem:[#allocation183_spill] sm:$0xff]  ;;  %v12392_v32 = vld [vmem:[#allocation150_spill] sm:$0xff] }
 0x29c   : > { %v3584_v28 = vadd.f32 %v3534_v61, %v3426_v34  ;;  %v9579_v10 = vadd.f32 %v3094_v37, %v9450_v2  ;;  %v2488_v45 = vadd.f32 %v12378_v59, %v12377_v46  ;;  %v12381_v16 = vrot.slane %v12380_v63, 2  ;;  %v12384_v61 = vld [vmem:[#allocation232_spill] sm:$0xff]  ;;  %v12389_v34 = vld [vmem:[#allocation187_spill] sm:$0xff]  ;;  %v12390_v37 = vld [vmem:[#allocation141_spill] sm:$0xff] }
 0x29d   : > { %v2329_v56 = vadd.f32 %v12379_v38, %v2171_v48  ;;  %v12383_v18 = vrot.slane %v12382_v44, 2  ;;  %v4074_v49 = vadd.f32 %v9438_v8, %v4047_v13  ;;  %v12385_v2 = vld [vmem:[#allocation156_spill] sm:$0xff]  ;;  %v12388_v17 = vrot.slane %v12387_v26, 2  ;;  %v12393_v48 = vld [vmem:[#allocation134_spill] sm:$0xff] }
 0x29e   : > { %v3738_v47 = vadd.f32 %v3688_v53, %v3584_v28  ;;  %v2642_v22 = vadd.f32 %v12384_v61, %v2488_v45  ;;  %v12386_v5 = vrot.slane %v12385_v2, 2  ;;  %v2983_v53 = vmul.f32 %v12047_v50, %v12389_v34  ;;  %v12391_v28 = vld [vmem:[#allocation71_spill] sm:$0xff]  ;;  %v12394_v59 = vld [vmem:[#allocation72_spill] sm:$0xff] }
 0x29f   : > { %v2742_v51 = vsel %vm1465_vm1, %v12383_v18, %v12381_v16  ;;  %v2487_v62 = vadd.f32 %v12390_v37, %v2329_v56  ;;  %v2984_v57 = vmul.f32 %v12047_v50, %v12391_v28  ;;  %v3035_v13 = vmul.f32 %v8627_v21, %v12392_v32  ;;  %v12396_v61 = vld [vmem:[#allocation140_spill] sm:$0xff] }
 0x2a0   : > { %v2896_v33 = vsel %vm1465_vm1, %v12388_v17, %v12386_v5  ;;  %v3892_v24 = vadd.f32 %v3842_v9, %v3738_v47  ;;  %v2796_v46 = vadd.f32 %v12393_v48, %v2642_v22  ;;  %v3036_v45 = vmul.f32 %v8627_v21, %v12394_v59  ;;  %v12395_v47 = vld [vmem:[#allocation91_spill] sm:$0xff] }
 0x2a1   : > { %v3141_v38 = vmul.f32 %v12286_v30, %v12389_v34  ;;  %v3142_v63 = vmul.f32 %v12286_v30, %v12391_v28  ;;  %v2641_v56 = vadd.f32 %v12395_v47, %v2487_v62  ;;  %v3299_v16 = vmul.f32 %v11918_v6, %v12392_v32  ;;  %v12397_v62 = vld [vmem:[#allocation90_spill] sm:$0xff] }
 0x2a2   : > { %v4046_v9 = vadd.f32 %v3996_v42, %v3892_v24  ;;  %v3300_v44 = vmul.f32 %v11918_v6, %v12394_v59  ;;  %v4094_v18 = vmax.f32 %v4074_v49, 0.0  ;;  %v2950_v22 = vadd.f32 %v12396_v61, %v2796_v46 }
 0x2a3   : > { %v3211_v2 = vrot.slane %v3141_v38, 1  ;;  %v3457_v5 = vmul.f32 %v12250_v58, %v12352_v4  ;;  %v2795_v17 = vadd.f32 %v2742_v51, %v2641_v56  ;;  %v3087_v42 = vmul.f32 %v8630_v25, %v12352_v4 }
 0x2a4   : > { %v4073_v26 = vadd.f32 %v9438_v8, %v4046_v9  ;;  %v3212_v24 = vrot.slane %v3142_v63, 1  ;;  %v3004_v37 = vadd.f32 %v2984_v57, %v2950_v22  ;;  %v3088_v48 = vmul.f32 %v8630_v25, %v12397_v62  ;;  %v12398_v9 = vld [vmem:[#allocation117_spill] sm:$0xff] }
 0x2a5   : > { %v3369_v47 = vrot.slane %v3299_v16, 1  ;;  %v3458_v49 = vmul.f32 %v12250_v58, %v12397_v62  ;;  %v2949_v38 = vadd.f32 %v2896_v33, %v2795_v17  ;;  %v3370_v23 = vrot.slane %v3300_v44, 1 }
 0x2a6   : > { %v4093_v46 = vmax.f32 %v4073_v26, 0.0  ;;  %v3213_v61 = vsel %vm922_vm0, %v3211_v2, %v3212_v24  ;;  %v3056_v36 = vadd.f32 %v3036_v45, %v3004_v37  ;;  %v12399_v51 = vrot.slane %v12398_v9, 1  ;;  %v12400_v45 = vld [vmem:[#allocation154_spill] sm:$0xff]  ;;  %v2183_v9 = vpop.permute.xlu1 %2182 }
 0x2a7   : > { %v3527_v14 = vrot.slane %v3457_v5, 1  ;;  %v3611_v57 = vmul.f32 %v11667_v7, %v12389_v34  ;;  %v3003_v22 = vadd.f32 %v2983_v53, %v2949_v38  ;;  %v3612_v16 = vmul.f32 %v11667_v7, %v12391_v28  ;;  %v12402_v28 = vld [vmem:[#allocation137_spill] sm:$0xff] }
 0x2a8   : > { %v3215_v56 = vsel %vm922_vm0, %v3212_v24, %v12399_v51  ;;  %v4107_v63 = vpack.c.bf16 %v4094_v18, %v4093_v46  ;;  %v3765_v33 = vmul.f32 %v11992_v11, %v12392_v32  ;;  %v3108_v26 = vadd.f32 %v3088_v48, %v3056_v36 }
 0x2a9   : > { %v3371_v44 = vsel %vm922_vm0, %v3369_v47, %v3370_v23  ;;  %v12401_v2 = vrot.slane %v12400_v45, 1  ;;  %v3528_v24 = vrot.slane %v3458_v49, 1  ;;  %v3055_v5 = vadd.f32 %v3035_v13, %v3003_v22  ;;  %v12403_v47 = vld [vmem:[#allocation50_spill] sm:$0xff] }
 0x2aa   : > { %5464 = vmatprep.mubr.bf16.mxu1 %v4107_v63  ;;  %v3681_v37 = vrot.slane %v3611_v57, 2  ;;  %v3766_v34 = vmul.f32 %v11992_v11, %v12394_v59  ;;  %v3835_v53 = vrot.slane %v3765_v33, 2  ;;  %v3267_v18 = vadd.f32 %v3215_v56, %v3108_v26  ;;  %v12405_v56 = vld [vmem:[#allocation74_spill] sm:$0xff] }
 0x2ab   : > { %v3373_v17 = vsel %vm922_vm0, %v3370_v23, %v12401_v2  ;;  %v3838_v46 = vrot.slane %v12402_v28, 2  ;;  %v3919_v36 = vmul.f32 %v12093_v12, %v12352_v4  ;;  %v3920_v32 = vmul.f32 %v12093_v12, %v12397_v62  ;;  %v12406_v33 = vld [vmem:[#allocation114_spill] sm:$0xff] }
 0x2ac   : > { %v3107_v48 = vadd.f32 %v3087_v42, %v3055_v5  ;;  %v3529_v23 = vsel %vm922_vm0, %v3527_v14, %v3528_v24  ;;  %v12404_v49 = vrot.slane %v12403_v47, 1  ;;  %v3682_v38 = vrot.slane %v3612_v16, 2 }
 0x2ad   : > { %v3425_v59 = vadd.f32 %v3373_v17, %v3267_v18  ;;  %v3836_v51 = vrot.slane %v3766_v34, 2  ;;  %v3921_v57 = vmul.f32 %v12093_v12, %v12405_v56  ;;  %v3989_v63 = vrot.slane %v3919_v36, 2  ;;  %v2341_v17 = vpop.permute.xlu0 %2340 }
 0x2ae   : > { %v3531_v13 = vsel %vm922_vm0, %v3528_v24, %v12404_v49  ;;  %v3266_v22 = vadd.f32 %v3213_v61, %v3107_v48  ;;  %v3683_v4 = vsel %vm1465_vm1, %v3681_v37, %v3682_v38  ;;  %v12407_v62 = vrot.slane %v12406_v33, 2 }
 0x2af   : > { %v3990_v14 = vrot.slane %v3920_v32, 2  ;;  %v3583_v26 = vadd.f32 %v3531_v13, %v3425_v59  ;;  %v3837_v45 = vsel %vm1465_vm1, %v3835_v53, %v3836_v51  ;;  %v3839_v16 = vsel %vm1465_vm1, %v3836_v51, %v3838_v46 }
 0x2b0   : > { %v3685_v42 = vsel %vm1465_vm1, %v3682_v38, %v12407_v62  ;;  %v2218_v2 = vmul.f32 %v12188_v55, %v2183_v9  ;;  %v3424_v24 = vadd.f32 %v3371_v44, %v3266_v22  ;;  %v3992_v5 = vrot.slane %v3921_v57, 2 }
 0x2b1   : > { %v2180_v61 = vadd.f32 %v9461_v20, %v9564_v35  ;;  %v3310_v37 = vmul.f32 %v11918_v6, %v2183_v9  ;;  %v3737_v34 = vadd.f32 %v3685_v42, %v3583_v26  ;;  %v3991_v18 = vsel %vm1465_vm1, %v3989_v63, %v3990_v14 }
 0x2b2   : > { %v2297_v28 = vrot.slane %v2218_v2, 1  ;;  %v9665_v36 = vmul.f32 %v12191_v40, %v2183_v9  ;;  %v3582_v53 = vadd.f32 %v3529_v23, %v3424_v24  ;;  %v9668_v46 = vmul.f32 %v11992_v11, %v2183_v9 }
 0x2b3   : > { %v3387_v32 = vrot.slane %v3310_v37, 1  ;;  %v2376_v55 = vmul.f32 %v11598_v39, %v2341_v17  ;;  %v3891_v44 = vadd.f32 %v3839_v16, %v3737_v34  ;;  %v12408_v48 = vrot.slane %v9418_v19, 1  ;;  %v2962_v37 = vpop.permute.xlu1 %2961 }
 0x2b4   : > { %v3273_v35 = vadd.f32 %v9481_v15, %v9579_v10  ;;  %v9677_v47 = vmul.f32 %v11713_v31, %v2341_v17  ;;  %v3736_v40 = vadd.f32 %v3683_v4, %v3582_v53  ;;  %v3993_v23 = vsel %vm1465_vm1, %v3990_v14, %v3992_v5 }
 0x2b5   : > { %v2298_v20 = vsel %vm922_vm0, %v12408_v48, %v2297_v28  ;;  %v12409_v49 = vrot.slane %v9432_v0, 1  ;;  %v2455_v38 = vrot.slane %v2376_v55, 1  ;;  %v4045_v39 = vadd.f32 %v3993_v23, %v3891_v44  ;;  %v12420_v44 = vld [vmem:[#allocation73_spill] sm:$0xff] }
 0x2b6   : > { %v2338_v9 = vadd.f32 %v2298_v20, %v2180_v61  ;;  %v2763_v59 = vrot.slane %v9665_v36, 2  ;;  %v3468_v51 = vmul.f32 %v12250_v58, %v2341_v17  ;;  %v3890_v56 = vadd.f32 %v3837_v45, %v3736_v40  ;;  %v12422_v20 = vld [vmem:[#allocation159_spill] sm:$0xff] }
 0x2b7   : > { %v3388_v13 = vsel %vm922_vm0, %v12409_v49, %v3387_v32  ;;  %v3853_v15 = vrot.slane %v9668_v46, 2  ;;  %v12410_v31 = vrot.slane %v9556_v29, 1  ;;  %v9690_v57 = vmul.f32 %v12093_v12, %v2341_v17 }
 0x2b8   : > { %v4072_v63 = vadd.f32 %v9438_v8, %v4045_v39  ;;  %v9693_v22 = vadd.f32 %v3388_v13, %v3273_v35  ;;  %v2917_v4 = vrot.slane %v9677_v47, 2  ;;  %v3545_v33 = vrot.slane %v3468_v51, 1  ;;  %v12423_v35 = vld [vmem:[#allocation5_spill] sm:$0xff] }
 0x2b9   : > { %v2456_v10 = vsel %vm922_vm0, %v12410_v31, %v2455_v38  ;;  %v4044_v62 = vadd.f32 %v3991_v18, %v3890_v56  ;;  %v12411_v42 = vrot.slane %v9288_v27, 2  ;;  %v12412_v14 = vrot.slane %v9257_v43, 2  ;;  %v12417_v18 = vld [vmem:[#allocation161_spill] sm:$0xff]  ;;  %v12424_v38 = vld [vmem:[#allocation106_spill] sm:$0xff] }
 0x2ba   : > { %v12413_v45 = vmov %v12408_v48  ;;  %v12414_v16 = vrot.slane %v9096_v3, 1  ;;  %v12415_v17 = vmov %v12410_v31  ;;  %v12416_v24 = vrot.slane %v9317_v52, 1 }
 0x2bb   : > { %v2608_v26 = vsel %vm1465_vm1, %v12412_v14, %v12411_v42  ;;  %v9711_v61 = vadd.f32 %v2456_v10, %v2338_v9  ;;  %v4007_v27 = vrot.slane %v9690_v57, 2  ;;  %v2915_v43 = vrot.slane %v9572_v54, 2  ;;  %v12426_v9 = vld [vmem:[#allocation181_spill] sm:$0xff] }
 0x2bc   : > { %v2296_v2 = vsel %vm922_vm0, %v12414_v16, %v12413_v45  ;;  %v2454_v5 = vsel %vm922_vm0, %v12416_v24, %v12415_v17  ;;  %v4071_v19 = vadd.f32 %v9438_v8, %v4044_v62  ;;  %v4092_v3 = vmax.f32 %v4072_v63, 0.0  ;;  %v12428_v42 = vld [vmem:[#allocation77_spill] sm:$0xff]  ;;  %v12430_v45 = vld [vmem:[#allocation243_spill] sm:$0xff] }
 0x2bd   : > { %v2337_v34 = vadd.f32 %v2296_v2, %v9338_v1  ;;  %v2914_v28 = vrot.slane %v12417_v18, 2  ;;  %v9719_v29 = vmul.f32 %v12286_v30, %v2962_v37  ;;  %v12418_v52 = vrot.slane %v9568_v41, 1  ;;  %v12432_v17 = vld [vmem:[#allocation29_spill] sm:$0xff] }
 0x2be   : > { %v12419_v55 = vrot.slane %v9423_v60, 2  ;;  %v12421_v48 = vrot.slane %v12420_v44, 2  ;;  %v2645_v40 = vadd.f32 %v12423_v35, %v12422_v20  ;;  %v4091_v23 = vmax.f32 %v4071_v19, 0.0  ;;  %v12434_v19 = vld [vmem:[#allocation69_spill] sm:$0xff]  ;;  %v12437_v44 = vld [vmem:[#allocation167_spill] sm:$0xff] }
 0x2bf   : > { %v9724_v53 = vsel %vm922_vm0, %v12418_v52, %v3545_v33  ;;  %v2495_v32 = vadd.f32 %v2454_v5, %v2337_v34  ;;  %v9734_v49 = vmul.f32 %v12047_v50, %v2962_v37  ;;  %v9737_v13 = vmul.f32 %v11667_v7, %v2962_v37  ;;  %v12433_v5 = vld [vmem:[#allocation93_spill] sm:$0xff] }
 0x2c0   : > { %v2762_v1 = vsel %vm1465_vm1, %v12421_v48, %v12419_v55  ;;  %v12425_v39 = vrot.slane %v12424_v38, 2  ;;  %v12427_v51 = vrot.slane %v12426_v9, 2  ;;  %v2916_v10 = vsel %vm1465_vm1, %v2914_v28, %v2915_v43  ;;  %v12435_v28 = vld [vmem:[#allocation28_spill] sm:$0xff] }
 0x2c1   : > { %v2649_v31 = vadd.f32 %v2608_v26, %v2495_v32  ;;  %v3231_v63 = vrot.slane %v9719_v29, 1  ;;  %v4106_v62 = vpack.c.bf16 %v4092_v3, %v4091_v23  ;;  %v12429_v14 = vrot.slane %v12428_v42, 2  ;;  %v12436_v32 = vld [vmem:[#allocation92_spill] sm:$0xff]  ;;  %v12438_v23 = vld [vmem:[#allocation19_spill] sm:$0xff] }
 0x2c2   : > { %v2752_v56 = vsel %vm1465_vm1, %v12427_v51, %v12425_v39  ;;  %v12431_v16 = vrot.slane %v12430_v45, 2  ;;  %v2987_v24 = vmul.f32 %v12047_v50, %v12432_v17  ;;  %v3040_v26 = vmul.f32 %v8627_v21, %v12433_v5  ;;  %v12439_v45 = vld [vmem:[#allocation229_spill] sm:$0xff]  ;;  %v12453_v29 = vld [vmem:[#allocation152_spill] sm:$0xff] }
 0x2c3   : > { %v2799_v33 = vadd.f32 %v2752_v56, %v2645_v40  ;;  %v2803_v37 = vadd.f32 %v2762_v1, %v2649_v31  ;;  %v3092_v18 = vmul.f32 %v8630_v25, %v12434_v19  ;;  %v3147_v3 = vmul.f32 %v12286_v30, %v12432_v17  ;;  %5461 = vmatmul.mubr.bf16.gmra.mrb[8].mxu0 %v4106_v62 }
 0x2c4   : > { %v2906_v2 = vsel %vm1465_vm1, %v12431_v16, %v12429_v14  ;;  %v3060_v52 = vadd.f32 %v3040_v26, %v12435_v28  ;;  %v3148_v55 = vmul.f32 %v12286_v30, %v12436_v32  ;;  %v3305_v48 = vmul.f32 %v11918_v6, %v12437_v44  ;;  %v12441_v28 = vld [vmem:[#allocation60_spill] sm:$0xff] }
 0x2c5   : > { %v2953_v34 = vadd.f32 %v2906_v2, %v2799_v33  ;;  %v3306_v20 = vmul.f32 %v11918_v6, %v12433_v5  ;;  %v3039_v35 = vmul.f32 %v8627_v21, %v12437_v44  ;;  %v3221_v40 = vrot.slane %v3147_v3, 1 }
 0x2c6   : > { %v3463_v38 = vmul.f32 %v12250_v58, %v12438_v23  ;;  %v3112_v39 = vadd.f32 %v3092_v18, %v3060_v52  ;;  %v3222_v9 = vrot.slane %v3148_v55, 1  ;;  %v3379_v51 = vrot.slane %v3305_v48, 1 }
 0x2c7   : > { %v3007_v1 = vadd.f32 %v2987_v24, %v2953_v34  ;;  %v3380_v56 = vrot.slane %v3306_v20, 1  ;;  %v2957_v31 = vadd.f32 %v2916_v10, %v2803_v37  ;;  %v3091_v62 = vmul.f32 %v8630_v25, %v12438_v23  ;;  %v3015_v37 = vpop.permute.xlu1 %3014 }
 0x2c8   : > { %v3464_v42 = vmul.f32 %v12250_v58, %v12434_v19  ;;  %v3223_v14 = vsel %vm922_vm0, %v3221_v40, %v3222_v9  ;;  %v12440_v16 = vrot.slane %v12439_v45, 1  ;;  %v3537_v26 = vrot.slane %v3463_v38, 1 }
 0x2c9   : > { %v3059_v33 = vadd.f32 %v3039_v35, %v3007_v1  ;;  %v3381_v24 = vsel %vm922_vm0, %v3379_v51, %v3380_v56  ;;  %v3617_v10 = vmul.f32 %v11667_v7, %v12432_v17  ;;  %v12442_v52 = vrot.slane %v12441_v28, 1  ;;  %v2967_v35 = vpop.permute.xlu0 %2966  ;;  %v12445_v51 = vld [vmem:[#allocation127_spill] sm:$0xff] }
 0x2ca   : > { %v3225_v2 = vsel %vm922_vm0, %v3222_v9, %v12440_v16  ;;  %v3538_v3 = vrot.slane %v3464_v42, 1  ;;  %v3618_v48 = vmul.f32 %v11667_v7, %v12436_v32  ;;  %v3771_v20 = vmul.f32 %v11992_v11, %v12437_v44 }
 0x2cb   : > { %v3111_v34 = vadd.f32 %v3091_v62, %v3059_v33  ;;  %v3271_v18 = vadd.f32 %v3225_v2, %v3112_v39  ;;  %v3383_v55 = vsel %vm922_vm0, %v3380_v56, %v12442_v52  ;;  %v3772_v1 = vmul.f32 %v11992_v11, %v12433_v5  ;;  %v12443_v39 = vld [vmem:[#allocation53_spill] sm:$0xff] }
 0x2cc   : > { %v12444_v9 = vrot.slane %v12443_v39, 1  ;;  %v3848_v33 = vrot.slane %v12445_v51, 2  ;;  %v3691_v62 = vrot.slane %v3617_v10, 2  ;;  %v3692_v56 = vrot.slane %v3618_v48, 2  ;;  %v12448_v48 = vld [vmem:[#allocation139_spill] sm:$0xff] }
 0x2cd   : > { %v3270_v40 = vadd.f32 %v3223_v14, %v3111_v34  ;;  %v3429_v38 = vadd.f32 %v3383_v55, %v3271_v18  ;;  %v3845_v42 = vrot.slane %v3771_v20, 2  ;;  %v3846_v45 = vrot.slane %v3772_v1, 2  ;;  %v12446_v34 = vld [vmem:[#allocation233_spill] sm:$0xff]  ;;  %v3019_v20 = vpop.permute.xlu1 %3018  ;;  %v3120_v39 = vpop.permute.xlu0 %3119 }
 0x2ce   : > { %v3541_v17 = vsel %vm922_vm0, %v3538_v3, %v12444_v9  ;;  %v3925_v44 = vmul.f32 %v12093_v12, %v12438_v23  ;;  %v3926_v5 = vmul.f32 %v12093_v12, %v12434_v19  ;;  %v3539_v14 = vsel %vm922_vm0, %v3537_v26, %v3538_v3  ;;  %v12449_v26 = vld [vmem:[#allocation122_spill] sm:$0xff] }
 0x2cf   : > { %v3428_v32 = vadd.f32 %v3381_v24, %v3270_v40  ;;  %v3587_v16 = vadd.f32 %v3541_v17, %v3429_v38  ;;  %v3693_v2 = vsel %vm1465_vm1, %v3691_v62, %v3692_v56  ;;  %v12447_v18 = vrot.slane %v12446_v34, 2 }
 0x2d0   : > { %v3847_v10 = vsel %vm1465_vm1, %v3845_v42, %v3846_v45  ;;  %v3849_v24 = vsel %vm1465_vm1, %v3846_v45, %v3848_v33  ;;  %v3927_v23 = vmul.f32 %v12093_v12, %v12448_v48  ;;  %v3999_v1 = vrot.slane %v3925_v44, 2 }
 0x2d1   : > { %v3695_v28 = vsel %vm1465_vm1, %v3692_v56, %v12447_v18  ;;  %v3586_v52 = vadd.f32 %v3539_v14, %v3428_v32  ;;  %v4000_v19 = vrot.slane %v3926_v5, 2  ;;  %v2650_v3 = vadd.f32 %v12449_v26, %v9711_v61  ;;  %v3067_v5 = vpop.permute.xlu1 %3066  ;;  %v3071_v34 = vpop.permute.xlu0 %3070 }
 0x2d2   : > { %v3741_v55 = vadd.f32 %v3695_v28, %v3587_v16  ;;  %v12450_v40 = vrot.slane %v9423_v60, 2  ;;  %v4002_v51 = vrot.slane %v3927_v23, 2  ;;  %v2918_v33 = vsel %vm1465_vm1, %v2915_v43, %v2917_v4 }
 0x2d3   : > { %v3740_v9 = vadd.f32 %v3693_v2, %v3586_v52  ;;  %v2992_v56 = vmul.f32 %v12047_v50, %v2967_v35  ;;  %v3154_v61 = vmul.f32 %v12286_v30, %v2967_v35  ;;  %v3624_v36 = vmul.f32 %v11667_v7, %v2967_v35 }
 0x2d4   : > { %v2764_v38 = vsel %vm1465_vm1, %v12450_v40, %v2763_v59  ;;  %v3895_v17 = vadd.f32 %v3849_v24, %v3741_v55  ;;  %v3701_v60 = vrot.slane %v9737_v13, 2  ;;  %v4003_v42 = vsel %vm1465_vm1, %v4000_v19, %v4002_v51 }
 0x2d5   : > { %v2804_v62 = vadd.f32 %v2764_v38, %v2650_v3  ;;  %v3894_v59 = vadd.f32 %v3847_v10, %v3740_v9  ;;  %v3311_v45 = vmul.f32 %v11918_v6, %v3015_v37  ;;  %v3011_v47 = vadd.f32 %v9734_v49, %v2957_v31 }
 0x2d6   : > { %v4001_v54 = vsel %vm1465_vm1, %v3999_v1, %v4000_v19  ;;  %v4049_v32 = vadd.f32 %v4003_v42, %v3895_v17  ;;  %v3232_v16 = vrot.slane %v3154_v61, 1  ;;  %v3702_v50 = vrot.slane %v3624_v36, 2 }
 0x2d7   : > { %v2958_v4 = vadd.f32 %v2918_v33, %v2804_v62  ;;  %v4048_v43 = vadd.f32 %v4001_v54, %v3894_v59  ;;  %v3043_v44 = vmul.f32 %v8627_v21, %v3015_v37  ;;  %v3777_v14 = vmul.f32 %v11992_v11, %v3015_v37  ;;  %v12451_v54 = vld [vmem:[#allocation160_spill] sm:$0xff] }
 0x2d8   : > { %v4076_v35 = vadd.f32 %v9438_v8, %v4049_v32  ;;  %v3155_v2 = vmul.f32 %v12286_v30, %v3120_v39  ;;  %v3389_v31 = vrot.slane %v3311_v45, 1  ;;  %v3625_v18 = vmul.f32 %v11667_v7, %v3120_v39  ;;  %v3278_v39 = vpop.permute.xlu1 %3277 }
 0x2d9   : > { %v3012_v13 = vadd.f32 %v2992_v56, %v2958_v4  ;;  %v4075_v49 = vadd.f32 %v9438_v8, %v4048_v43  ;;  %v3044_v28 = vmul.f32 %v8627_v21, %v3019_v20  ;;  %v3312_v55 = vmul.f32 %v11918_v6, %v3019_v20 }
 0x2da   : > { %v4096_v10 = vmax.f32 %v4076_v35, 0.0  ;;  %v3234_v52 = vrot.slane %v3155_v2, 1  ;;  %v9838_v24 = vmul.f32 %v11992_v11, %v3019_v20  ;;  %v3704_v23 = vrot.slane %v3625_v18, 2  ;;  %v12456_v35 = vld [vmem:[#allocation174_spill] sm:$0xff] }
 0x2db   : > { %v4095_v48 = vmax.f32 %v4075_v49, 0.0  ;;  %v3064_v37 = vadd.f32 %v3044_v28, %v3012_v13  ;;  %v3096_v30 = vmul.f32 %v8630_v25, %v3071_v34  ;;  %v3855_v1 = vrot.slane %v3777_v14, 2  ;;  %v12458_v14 = vld [vmem:[#allocation107_spill] sm:$0xff] }
 0x2dc   : > { %v3390_v19 = vrot.slane %v3312_v55, 1  ;;  %v3856_v26 = vrot.slane %v9838_v24, 2  ;;  %v9843_v7 = vmul.f32 %v12250_v58, %v3071_v34  ;;  %v3703_v3 = vsel %vm1465_vm1, %v3701_v60, %v3702_v50 }
 0x2dd   : > { %v4108_v21 = vpack.c.bf16 %v4096_v10, %v4095_v48  ;;  %v3063_v40 = vadd.f32 %v3043_v44, %v3011_v47  ;;  %v3116_v38 = vadd.f32 %v3096_v30, %v3064_v37  ;;  %v3235_v20 = vsel %vm922_vm0, %v3232_v16, %v3234_v52  ;;  %v12462_v52 = vld [vmem:[#allocation4_spill] sm:$0xff]  ;;  %v12464_v48 = vld [vmem:[#allocation105_spill] sm:$0xff]  ;;  %v3436_v30 = vpop.permute.xlu1 %3435 }
 0x2de   : > { %v3705_v9 = vsel %vm1465_vm1, %v3702_v50, %v3704_v23  ;;  %v9849_v17 = vmul.f32 %v12093_v12, %v3071_v34  ;;  %v3095_v51 = vmul.f32 %v8630_v25, %v3067_v5  ;;  %v3391_v33 = vsel %vm922_vm0, %v3389_v31, %v3390_v19  ;;  %v12460_v34 = vld [vmem:[#allocation79_spill] sm:$0xff] }
 0x2df   : > { %5465 = vmatmul.mubr.bf16.vlgmr.msra.gmra.mrb[0].mxu1 %v4108_v21  ;;  %v3548_v62 = vrot.slane %v9843_v7, 1  ;;  %v3233_v56 = vsel %vm922_vm0, %v3231_v63, %v3232_v16  ;;  %v3469_v61 = vmul.f32 %v12250_v58, %v3067_v5  ;;  %v3857_v36 = vsel %vm1465_vm1, %v3855_v1, %v3856_v26  ;;  %v12467_v21 = vld [vmem:[#allocation104_spill] sm:$0xff] }
 0x2e0   : > { %v3115_v60 = vadd.f32 %v3095_v51, %v3063_v40  ;;  %v3931_v59 = vmul.f32 %v12093_v12, %v3067_v5  ;;  %v3313_v25 = vmul.f32 %v11918_v6, %v3278_v39  ;;  %v3275_v42 = vadd.f32 %v3235_v20, %v3116_v38  ;;  %v12471_v51 = vld [vmem:[#allocation125_spill] sm:$0xff] }
 0x2e1   : > { %v3547_v45 = vrot.slane %v3469_v61, 1  ;;  %v3779_v47 = vmul.f32 %v11992_v11, %v3278_v39  ;;  %v12452_v32 = vrot.slane %v12451_v54, 1  ;;  %v12454_v4 = vrot.slane %v12453_v29, 1  ;;  %v12469_v39 = vld [vmem:[#allocation32_spill] sm:$0xff] }
 0x2e2   : > { %v4010_v43 = vrot.slane %v9849_v17, 2  ;;  %v3274_v16 = vadd.f32 %v3233_v56, %v3115_v60  ;;  %v3392_v50 = vrot.slane %v3313_v25, 1  ;;  %v12455_v44 = vrot.slane %v9432_v0, 1  ;;  %v12472_v25 = vld [vmem:[#allocation218_spill] sm:$0xff] }
 0x2e3   : > { %v3228_v63 = vsel %vm922_vm0, %v12454_v4, %v12452_v32  ;;  %v12457_v5 = vrot.slane %v12456_v35, 1  ;;  %v3549_v13 = vsel %vm922_vm0, %v3547_v45, %v3548_v62  ;;  %v12459_v2 = vrot.slane %v9568_v41, 1 }
 0x2e4   : > { %v3272_v11 = vadd.f32 %v3228_v63, %v12458_v14  ;;  %v12461_v49 = vrot.slane %v12460_v34, 1  ;;  %v3589_v18 = vadd.f32 %v9724_v53, %v9693_v22  ;;  %v3432_v28 = vadd.f32 %v3391_v33, %v3274_v16 }
 0x2e5   : > { %v3386_v6 = vsel %vm922_vm0, %v12457_v5, %v12455_v44  ;;  %v4009_v10 = vrot.slane %v3931_v59, 2  ;;  %v3393_v0 = vsel %vm922_vm0, %v3390_v19, %v3392_v50  ;;  %v12463_v55 = vrot.slane %v12462_v52, 2  ;;  %v12470_v19 = vld [vmem:[#allocation78_spill] sm:$0xff] }
 0x2e6   : > { %v3544_v31 = vsel %vm922_vm0, %v12461_v49, %v12459_v2  ;;  %v12465_v23 = vrot.slane %v12464_v48, 2  ;;  %v3858_v1 = vrot.slane %v3779_v47, 2  ;;  %v3430_v41 = vadd.f32 %v3386_v6, %v3272_v11 }
 0x2e7   : > { %v12468_v40 = vrot.slane %v12467_v21, 2  ;;  %v3590_v53 = vadd.f32 %v3549_v13, %v3432_v28  ;;  %v3851_v20 = vrot.slane %v12469_v39, 2  ;;  %v3928_v17 = vmul.f32 %v12093_v12, %v12470_v19 }
 0x2e8   : > { %v3700_v37 = vsel %vm1465_vm1, %v12465_v23, %v12463_v55  ;;  %v12466_v7 = vmov %v12465_v23  ;;  %v3929_v33 = vmul.f32 %v12093_v12, %v12471_v51  ;;  %v3433_v56 = vadd.f32 %v3393_v0, %v3275_v42 }
 0x2e9   : > { %v3698_v38 = vsel %vm1465_vm1, %v12468_v40, %v12466_v7  ;;  %v3743_v22 = vadd.f32 %v3700_v37, %v3589_v18  ;;  %v3588_v61 = vadd.f32 %v3544_v31, %v3430_v41  ;;  %v3471_v60 = vmul.f32 %v12250_v58, %v3436_v30 }
 0x2ea   : > { %v3933_v59 = vmul.f32 %v12093_v12, %v3436_v30  ;;  %v3850_v45 = vrot.slane %v12472_v25, 2  ;;  %v3854_v47 = vsel %vm1465_vm1, %v3851_v20, %v3853_v15  ;;  %v4004_v54 = vrot.slane %v3928_v17, 2 }
 0x2eb   : > { %v4005_v32 = vrot.slane %v3929_v33, 2  ;;  %v3742_v29 = vadd.f32 %v3698_v38, %v3588_v61  ;;  %v3897_v4 = vadd.f32 %v3854_v47, %v3743_v22  ;;  %v3550_v63 = vrot.slane %v3471_v60, 1 }
 0x2ec   : > { %v4011_v16 = vsel %vm1465_vm1, %v4009_v10, %v4010_v43  ;;  %v3852_v42 = vsel %vm1465_vm1, %v3850_v45, %v3851_v20  ;;  %v3744_v58 = vadd.f32 %v3703_v3, %v3590_v53  ;;  %v4012_v35 = vrot.slane %v3933_v59, 2 }
 0x2ed   : > { %v4006_v50 = vsel %vm1465_vm1, %v4004_v54, %v4005_v32  ;;  %v4008_v12 = vsel %vm1465_vm1, %v4005_v32, %v4007_v27  ;;  %v3896_v44 = vadd.f32 %v3852_v42, %v3742_v29  ;;  %v3551_v15 = vsel %vm922_vm0, %v3548_v62, %v3550_v63 }
 0x2ee   : > { %v4051_v46 = vadd.f32 %v4008_v12, %v3897_v4  ;;  %v3591_v5 = vadd.f32 %v3551_v15, %v3433_v56  ;;  %v3898_v6 = vadd.f32 %v3857_v36, %v3744_v58  ;;  %v3859_v13 = vsel %vm1465_vm1, %v3856_v26, %v3858_v1 }
 0x2ef   : > { %v4050_v14 = vadd.f32 %v4006_v50, %v3896_v44  ;;  %v4013_v34 = vsel %vm1465_vm1, %v4010_v43, %v4012_v35  ;;  %v4293_v10 = vstv %s4289_s15  ;;  %v5454_v43 = vpop.f32.mrb[0].mxu0  ;;  %s5395_s15 = sshll.u32 %s12555_s25, 5 }
 0x2f0   : > { %v4078_v11 = vadd.f32 %v9438_v8, %v4051_v46  ;;  %v3745_v2 = vadd.f32 %v3705_v9, %v3591_v5  ;;  %v4052_v57 = vadd.f32 %v4011_v16, %v3898_v6  ;;  %v4323_v0 = vrot.slane %v5454_v43, 7  ;;  %v4209_v52 = vpop.f32.mrb[1].mxu0 }
 0x2f1   : > { %v4077_v27 = vadd.f32 %v9438_v8, %v4050_v14  ;;  %v9925_v55 = vmul.f32 %v4293_v10, %v4209_v52  ;;  %v5455_v48 = vpop.f32.mrb[2].mxu0 }
 0x2f2   : > { %v4098_v3 = vmax.f32 %v4078_v11, 0.0  ;;  %v3899_v49 = vadd.f32 %v3859_v13, %v3745_v2  ;;  %v4079_v18 = vadd.f32 %v9438_v8, %v4052_v57  ;;  %v9928_v23 = vsel %vm4319_vm2, 0.0, %v4323_v0 }
 0x2f3   : > { %v4097_v62 = vmax.f32 %v4077_v27, 0.0  ;;  %v4324_v37 = vrot.slane %v5455_v48, 7  ;;  %4639 = vrot.lane.b32.xlu0 %v9928_v23, %s5628_s24  ;;  %v4320_v41 = vrot.slane %v9925_v55, 7  ;;  %v4435_v14 = vrot.slane %v9928_v23, 1 }
 0x2f4   : > { %v4053_v31 = vadd.f32 %v4013_v34, %v3899_v49  ;;  %v4099_v9 = vmax.f32 %v4079_v18, 0.0 }
 0x2f5   : > { %v4109_v24 = vpack.c.bf16 %v4098_v3, %v4097_v62  ;;  %v9935_v1 = vsel %vm4319_vm2, %v4323_v0, %v4324_v37  ;;  %v4389_v6 = vsel %vm4319_vm2, %v4324_v37, 0.0 }
 0x2f6   : > { %v4080_v26 = vadd.f32 %v9438_v8, %v4053_v31  ;;  %v4212_v8 = vpop.f32.mrb[3].mxu0  ;;  %4641 = vrot.lane.b32.xlu1 %v9935_v1, %s5628_s24  ;;  %v4436_v13 = vrot.slane %v9935_v1, 1  ;;  %v4438_v11 = vrot.slane %v4389_v6, 1  ;;  %v4540_v62 = vrot.slane %v9935_v1, 2 }
 0x2f7   : > { %5468 = vmatprep.mubr.bf16.mxu1 %v4109_v24  ;;  %v9930_v30 = vmul.f32 %v4293_v10, %v4212_v8  ;;  %v4542_v18 = vrot.slane %v4389_v6, 2  ;;  %v4539_v24 = vrot.slane %v9928_v23, 2 }
 0x2f8   : > { %v4100_v36 = vmax.f32 %v4080_v26, 0.0  ;;  %v4437_v57 = vsel %vm922_vm0, %v4435_v14, %v4436_v13  ;;  %v4439_v34 = vsel %vm922_vm0, %v4436_v13, %v4438_v11 }
 0x2f9   : > { %v4321_v7 = vrot.slane %v9930_v30, 7  ;;  %v4543_v43 = vsel %vm1465_vm1, %v4540_v62, %v4542_v18 }
 0x2fa   : > { %v4110_v28 = vpack.c.bf16 %v4100_v36, %v4099_v9  ;;  %v4296_v9 = vstv %s4292_s20  ;;  %v4541_v36 = vsel %vm1465_vm1, %v4539_v24, %v4540_v62 }
 0x2fb   : > { %v9946_v21 = vsel %vm4319_vm2, %v4320_v41, %v4321_v7 }
 0x2fc   : > { %5469 = vmatmul.mubr.bf16.gmra.mrb[4].mxu1 %v4110_v28  ;;  %12473 = vst [vmem:[#allocation153_spill] sm:$0xff] %v9946_v21  ;;  %v4535_v55 = vrot.slane %v9946_v21, 2 }
 0x321   : > { %v9948_v40 = vpop.f32.mrb[4].mxu0 }
 0x322   : > { %v9950_v38 = vpop.f32.mrb[5].mxu0  ;;  %v4329_v53 = vrot.slane %v9948_v40, 7 }
 0x323   : > { %v9952_v22 = vpop.f32.mrb[6].mxu0  ;;  %v4326_v19 = vrot.slane %v9950_v38, 7 }
 0x324   : > { %v4330_v39 = vrot.slane %v9952_v22, 7  ;;  %v9956_v20 = vpop.f32.mrb[7].mxu0 }
 0x325   : > { %v4327_v17 = vrot.slane %v9956_v20, 7 }
 0x326   : > { %v9965_v51 = vsel %vm4319_vm2, %v4329_v53, %v4330_v39  ;;  %v4391_v40 = vsel %vm4319_vm2, %v4330_v39, 0.0 }
 0x327   : > { %v9972_v33 = vsel %vm4319_vm2, %v4326_v19, %v4327_v17  ;;  %v4550_v39 = vrot.slane %v9965_v51, 2 }
 0x396   : > { %v9974_v56 = vpop.f32.mrb[8].mxu0 }
 0x397   : > { %v9976_v61 = vpop.f32.mrb[9].mxu0  ;;  %v4335_v59 = vrot.slane %v9974_v56, 7 }
 0x398   : > { %v9978_v60 = vpop.f32.mrb[10].mxu0  ;;  %v4332_v47 = vrot.slane %v9976_v61, 7 }
 0x399   : > { %v4336_v25 = vrot.slane %v9978_v60, 7  ;;  %v9982_v45 = vpop.f32.mrb[11].mxu0 }
 0x39a   : > { %v11329_v54 = vrot.slane %v9982_v45, 7  ;;  %v10356_v56 = vsel %vm4319_vm2, 0.0, %v4332_v47 }
 0x39b   : > { %v9991_v32 = vsel %vm4319_vm2, %v4335_v59, %v4336_v25 }
 0x39c   : > { %v9998_v29 = vsel %vm4319_vm2, %v4332_v47, %v11329_v54 }
 0x3b2   : > { %v5466_v4 = vpop.f32.mrb[0].mxu1 }
 0x3b3   : > { %v4341_v63 = vrot.slane %v5466_v4, 7  ;;  %v4257_v16 = vpop.f32.mrb[1].mxu1 }
 0x3b4   : > { %v5467_v42 = vpop.f32.mrb[2].mxu1  ;;  %v4338_v44 = vrot.slane %v4257_v16, 7 }
 0x3b5   : > { %v10001_v50 = vsel %vm4319_vm2, 0.0, %v4341_v63  ;;  %v4342_v12 = vrot.slane %v5467_v42, 7  ;;  %v10003_v58 = vpop.f32.mrb[3].mxu1 }
 0x3b6   : > { %v4339_v46 = vrot.slane %v10003_v58, 7  ;;  %4663 = vrot.lane.b32.xlu0 %v10001_v50, %s5628_s24  ;;  %v10023_v5 = vsel %vm4319_vm2, 0.0, %v4338_v44  ;;  %v4465_v49 = vrot.slane %v10001_v50, 1  ;;  %v4569_v48 = vrot.slane %v10001_v50, 2 }
 0x3b7   : > { %v10009_v15 = vsel %vm4319_vm2, %v4341_v63, %v4342_v12  ;;  %v4395_v2 = vsel %vm4319_vm2, %v4342_v12, 0.0 }
 0x3b8   : > { %v10014_v35 = vsel %vm4319_vm2, %v4338_v44, %v4339_v46  ;;  %4665 = vrot.lane.b32.xlu1 %v10009_v15, %s5628_s24  ;;  %v4466_v27 = vrot.slane %v10009_v15, 1  ;;  %v4468_v3 = vrot.slane %v4395_v2, 1  ;;  %v4570_v28 = vrot.slane %v10009_v15, 2 }
 0x3b9   : > { %v4572_v52 = vrot.slane %v4395_v2, 2  ;;  %v4565_v58 = vrot.slane %v10014_v35, 2 }
 0x3ba   : > { %4863 = vrot.lane.b32.xlu0 %v10001_v50, %s5629_s16  ;;  %v10052_v31 = vsel %vm922_vm0, %v4465_v49, %v4466_v27  ;;  %v10058_v26 = vsel %vm922_vm0, %v4466_v27, %v4468_v3  ;;  %v10073_v42 = vsel %vm1465_vm1, %v4569_v48, %v4570_v28  ;;  %v4461_v48 = vrot.slane %v10014_v35, 1 }
 0x3bb   : > { %v10082_v13 = vsel %vm1465_vm1, %v4570_v28, %v4572_v52 }
 0x3bc   : > { %4865 = vrot.lane.b32.xlu1 %v10009_v15, %s5629_s16 }
 0x3be   : > { %4659 = vrot.lane.b32.xlu0 %v10023_v5, %s5628_s24 }
 0x3c0   : > { %4661 = vrot.lane.b32.xlu1 %v10014_v35, %s5628_s24 }
 0x3c2   : > { %4859 = vrot.lane.b32.xlu0 %v10023_v5, %s5629_s16 }
 0x3c4   : > { %4861 = vrot.lane.b32.xlu1 %v10014_v35, %s5629_s16 }
 0x3c6   : > { %4474 = vrot.lane.b32.xlu0 %v4437_v57, %s5630_s19 }
 0x3c8   : > { %4476 = vrot.lane.b32.xlu1 %v4439_v34, %s5630_s19 }
 0x3ca   : > { %4498 = vrot.lane.b32.xlu0 %v10052_v31, %s5630_s19 }
 0x3cc   : > { %4500 = vrot.lane.b32.xlu1 %v10058_v26, %s5630_s19 }
 0x3ce   : > { %4578 = vrot.lane.b32.xlu0 %v4541_v36, %s5631_s21 }
 0x3cf   : > { %v5470_v10 = vpop.f32.mrb[4].mxu1 }
 0x3d0   : > { %v4273_v0 = vpop.f32.mrb[5].mxu1  ;;  %v10067_v37 = vmul.f32 %v5470_v10, %v4296_v9  ;;  %4580 = vrot.lane.b32.xlu1 %v4543_v43, %s5631_s21 }
 0x3d1   : > { %v4344_v8 = vrot.slane %v4273_v0, 7  ;;  %v5471_v4 = vpop.f32.mrb[6].mxu1 }
 0x3d2   : > { %v10070_v63 = vmul.f32 %v5471_v4, %v4296_v9  ;;  %v4276_v16 = vpop.f32.mrb[7].mxu1  ;;  %4602 = vrot.lane.b32.xlu0 %v10073_v42, %s5631_s21  ;;  %v4347_v14 = vrot.slane %v10067_v37, 7  ;;  %v4552_v37 = vrot.slane %v4391_v40, 2 }
 0x3d3   : > { %v10076_v12 = vsel %vm4319_vm2, 0.0, %v4344_v8  ;;  %v4345_v44 = vrot.slane %v4276_v16, 7 }
 0x3d4   : > { %v11328_v6 = vrot.slane %v10070_v63, 7  ;;  %4604 = vrot.lane.b32.xlu1 %v10082_v13, %s5631_s21  ;;  %v4704_v27 = vrot.slane %v10076_v12, 1  ;;  %v4773_v18 = vrot.slane %v10076_v12, 2  ;;  %v10221_v38 = vsel %vm4319_vm2, 0.0, %v4347_v14 }
 0x3d5   : > { %v4396_v11 = vsel %vm4319_vm2, %v4345_v44, 0.0  ;;  %v10087_v2 = vsel %vm4319_vm2, %v4344_v8, %v4345_v44  ;;  %v4460_v8 = vrot.slane %v10023_v5, 1 }
 0x3d6   : > { %v4707_v3 = vrot.slane %v4396_v11, 1  ;;  %v4776_v49 = vrot.slane %v4396_v11, 2  ;;  %v4705_v62 = vrot.slane %v10087_v2, 1  ;;  %v4774_v24 = vrot.slane %v10087_v2, 2  ;;  %4709 = vrot.lane.b32.xlu0 %v4437_v57, %s5632_s22 }
 0x3d7   : > { %v10100_v9 = vsel %vm4319_vm2, %v4347_v14, %v11328_v6  ;;  %v4394_v57 = vsel %vm4319_vm2, %v4339_v46, 0.0  ;;  %v10132_v4 = vsel %vm922_vm0, %v4460_v8, %v4461_v48  ;;  %v10158_v11 = vsel %vm4319_vm2, 0.0, %v4320_v41 }
 0x3d8   : > { %v10104_v28 = vsel %vm922_vm0, %v4704_v27, %v4705_v62  ;;  %v10107_v10 = vsel %vm922_vm0, %v4705_v62, %v4707_v3  ;;  %v10110_v0 = vsel %vm1465_vm1, %v4773_v18, %v4774_v24  ;;  %v10113_v52 = vsel %vm1465_vm1, %v4774_v24, %v4776_v49  ;;  %4711 = vrot.lane.b32.xlu1 %v4439_v34, %s5632_s22 }
 0x3d9   : > { %v4463_v34 = vrot.slane %v4394_v57, 1  ;;  %v4567_v46 = vrot.slane %v4394_v57, 2  ;;  %12475 = vst [vmem:[#allocation151_spill] sm:$0xff] %v10158_v11  ;;  %v4388_v27 = vsel %vm4319_vm2, %v4321_v7, 0.0  ;;  %v4431_v3 = vrot.slane %v9946_v21, 1 }
 0x3da   : > { %4733 = vrot.lane.b32.xlu0 %v10052_v31, %s5632_s22  ;;  %v4430_v49 = vrot.slane %v10158_v11, 1  ;;  %v4433_v62 = vrot.slane %v4388_v27, 1  ;;  %v4534_v41 = vrot.slane %v10158_v11, 2  ;;  %v4537_v7 = vrot.slane %v4388_v27, 2 }
 0x3db   : > { %v10149_v44 = vsel %vm1465_vm1, %v4565_v58, %v4567_v46  ;;  %v4390_v46 = vsel %vm4319_vm2, %v4327_v17, 0.0  ;;  %v4441_v27 = vrot.slane %v9972_v33, 1  ;;  %v4545_v17 = vrot.slane %v9972_v33, 2 }
 0x3dc   : > { %4735 = vrot.lane.b32.xlu1 %v10058_v26, %s5632_s22  ;;  %v4432_v30 = vsel %vm922_vm0, %v4430_v49, %v4431_v3  ;;  %v4434_v18 = vsel %vm922_vm0, %v4431_v3, %v4433_v62  ;;  %v4536_v24 = vsel %vm1465_vm1, %v4534_v41, %v4535_v55  ;;  %v4538_v57 = vsel %vm1465_vm1, %v4535_v55, %v4537_v7  ;;  %v10261_v3 = vpop.permute.xlu1 %4641 }
 0x3dd   : > { %12477 = vst [vmem:[#allocation6_spill] sm:$0xff] %v10261_v3  ;;  %v4443_v49 = vrot.slane %v4390_v46, 1  ;;  %v4547_v41 = vrot.slane %v4390_v46, 2  ;;  %v4450_v3 = vrot.slane %v10356_v56, 1 }
 0x3de   : > { %4778 = vrot.lane.b32.xlu0 %v4541_v36, %s5633_s23  ;;  %v10138_v36 = vsel %vm922_vm0, %v4461_v48, %v4463_v34  ;;  %v10184_v48 = vsel %vm4319_vm2, 0.0, %v4329_v53  ;;  %v10197_v34 = vsel %vm4319_vm2, 0.0, %v4326_v19  ;;  %v4446_v53 = vrot.slane %v9965_v51, 1 }
 0x3df   : > { %v4448_v19 = vrot.slane %v4391_v40, 1  ;;  %v4440_v62 = vrot.slane %v10197_v34, 1  ;;  %v10279_v7 = vsel %vm922_vm0, %v4441_v27, %v4443_v49 }
 0x3e0   : > { %4780 = vrot.lane.b32.xlu1 %v4543_v43, %s5633_s23  ;;  %v4564_v43 = vrot.slane %v10023_v5, 2 }
 0x3e1   : > { %v10236_v14 = vsel %vm922_vm0, %v4446_v53, %v4448_v19  ;;  %v10271_v20 = vsel %vm922_vm0, %v4440_v62, %v4441_v27 }
 0x3e2   : > { %4802 = vrot.lane.b32.xlu0 %v10073_v42, %s5633_s23  ;;  %v10144_v16 = vsel %vm1465_vm1, %v4564_v43, %v4565_v58  ;;  %v10247_v58 = vsel %vm1465_vm1, %v4550_v39, %v4552_v37  ;;  %v10256_v43 = vpop.permute.xlu0 %4639 }
 0x3e3   : > { %12476 = vst [vmem:[#allocation45_spill] sm:$0xff] %v10256_v43 }
 0x3e4   : > { %4804 = vrot.lane.b32.xlu1 %v10082_v13, %s5633_s23 }
 0x3e6   : > { %4494 = vrot.lane.b32.xlu0 %v10132_v4, %s5630_s19 }
 0x3e8   : > { %4496 = vrot.lane.b32.xlu1 %v10138_v36, %s5630_s19 }
 0x3ea   : > { %4598 = vrot.lane.b32.xlu0 %v10144_v16, %s5631_s21 }
 0x3ec   : > { %4600 = vrot.lane.b32.xlu1 %v10149_v44, %s5631_s21 }
 0x3ee   : > { %4729 = vrot.lane.b32.xlu0 %v10132_v4, %s5632_s22 }
 0x3f0   : > { %4731 = vrot.lane.b32.xlu1 %v10138_v36, %s5632_s22 }
 0x3f2   : > { %4798 = vrot.lane.b32.xlu0 %v10144_v16, %s5633_s23 }
 0x3f4   : > { %4800 = vrot.lane.b32.xlu1 %v10149_v44, %s5633_s23 }
 0x3f6   : > { %4470 = vrot.lane.b32.xlu0 %v4432_v30, %s5630_s19 }
 0x3f8   : > { %4472 = vrot.lane.b32.xlu1 %v4434_v18, %s5630_s19  ;;  %v4544_v18 = vrot.slane %v10197_v34, 2 }
 0x3fa   : > { %4574 = vrot.lane.b32.xlu0 %v4536_v24, %s5631_s21 }
 0x3fc   : > { %4576 = vrot.lane.b32.xlu1 %v4538_v57, %s5631_s21  ;;  %v10287_v57 = vsel %vm1465_vm1, %v4544_v18, %v4545_v17 }
 0x3fe   : > { %4647 = vrot.lane.b32.xlu0 %v10184_v48, %s5628_s24 }
 0x400   : > { %4649 = vrot.lane.b32.xlu1 %v9965_v51, %s5628_s24 }
 0x402   : > { %4847 = vrot.lane.b32.xlu0 %v10184_v48, %s5629_s16 }
 0x404   : > { %4849 = vrot.lane.b32.xlu1 %v9965_v51, %s5629_s16 }
 0x406   : > { %4643 = vrot.lane.b32.xlu0 %v10197_v34, %s5628_s24 }
 0x408   : > { %4645 = vrot.lane.b32.xlu1 %v9972_v33, %s5628_s24 }
 0x40a   : > { %4667 = vrot.lane.b32.xlu0 %v10076_v12, %s5628_s24 }
 0x40c   : > { %4669 = vrot.lane.b32.xlu1 %v10087_v2, %s5628_s24 }
 0x40e   : > { %4843 = vrot.lane.b32.xlu0 %v10197_v34, %s5629_s16 }
 0x410   : > { %4845 = vrot.lane.b32.xlu1 %v9972_v33, %s5629_s16 }
 0x412   : > { %4867 = vrot.lane.b32.xlu0 %v10076_v12, %s5629_s16  ;;  %v4445_v12 = vrot.slane %v10184_v48, 1 }
 0x414   : > { %4869 = vrot.lane.b32.xlu1 %v10087_v2, %s5629_s16  ;;  %v10230_v22 = vsel %vm922_vm0, %v4445_v12, %v4446_v53  ;;  %v4549_v2 = vrot.slane %v10184_v48, 2  ;;  %v10294_v53 = vsel %vm1465_vm1, %v4545_v17, %v4547_v41  ;;  %v10335_v17 = vsel %vm4319_vm2, 0.0, %v4335_v59 }
 0x416   : > { %4871 = vrot.lane.b32.xlu0 %v10221_v38, %s5629_s16  ;;  %v10242_v8 = vsel %vm1465_vm1, %v4549_v2, %v4550_v39 }
 0x418   : > { %4873 = vrot.lane.b32.xlu1 %v10100_v9, %s5629_s16 }
 0x41a   : > { %4482 = vrot.lane.b32.xlu0 %v10230_v22, %s5630_s19 }
 0x41c   : > { %4484 = vrot.lane.b32.xlu1 %v10236_v14, %s5630_s19 }
 0x41e   : > { %4586 = vrot.lane.b32.xlu0 %v10242_v8, %s5631_s21 }
 0x420   : > { %4588 = vrot.lane.b32.xlu1 %v10247_v58, %s5631_s21 }
 0x422   : > { %4717 = vrot.lane.b32.xlu0 %v10230_v22, %s5632_s22 }
 0x424   : > { %4719 = vrot.lane.b32.xlu1 %v10236_v14, %s5632_s22 }
 0x426   : > { %4786 = vrot.lane.b32.xlu0 %v10242_v8, %s5633_s23 }
 0x428   : > { %v10266_v55 = vpop.permute.xlu0 %4663  ;;  %4788 = vrot.lane.b32.xlu1 %v10247_v58, %s5633_s23 }
 0x429   : > { %12478 = vst [vmem:[#allocation7_spill] sm:$0xff] %v10266_v55 }
 0x42a   : > { %v10274_v30 = vpop.permute.xlu1 %4665  ;;  %4478 = vrot.lane.b32.xlu0 %v10271_v20, %s5630_s19 }
 0x42b   : > { %12479 = vst [vmem:[#allocation206_spill] sm:$0xff] %v10274_v30 }
 0x42c   : > { %v10282_v24 = vpop.permute.xlu0 %4863  ;;  %4480 = vrot.lane.b32.xlu1 %v10279_v7, %s5630_s19 }
 0x42d   : > { %12480 = vst [vmem:[#allocation22_spill] sm:$0xff] %v10282_v24  ;;  %v4455_v24 = vrot.slane %v10335_v17, 1 }
 0x42e   : > { %v10289_v40 = vpop.permute.xlu1 %4865  ;;  %4582 = vrot.lane.b32.xlu0 %v10287_v57, %s5631_s21 }
 0x42f   : > { %12481 = vst [vmem:[#allocation113_spill] sm:$0xff] %v10289_v40  ;;  %v4456_v40 = vrot.slane %v9991_v32, 1 }
 0x430   : > { %v10296_v19 = vpop.permute.xlu0 %4659  ;;  %4584 = vrot.lane.b32.xlu1 %v10294_v53, %s5631_s21 }
 0x431   : > { %12482 = vst [vmem:[#allocation23_spill] sm:$0xff] %v10296_v19  ;;  %v10380_v60 = vsel %vm922_vm0, %v4455_v24, %v4456_v40 }
 0x432   : > { %v10300_v12 = vpop.permute.xlu1 %4661  ;;  %4713 = vrot.lane.b32.xlu0 %v10271_v20, %s5632_s22 }
 0x433   : > { %12483 = vst [vmem:[#allocation155_spill] sm:$0xff] %v10300_v12 }
 0x434   : > { %v10304_v39 = vpop.permute.xlu0 %4859  ;;  %4715 = vrot.lane.b32.xlu1 %v10279_v7, %s5632_s22 }
 0x435   : > { %12484 = vst [vmem:[#allocation236_spill] sm:$0xff] %v10304_v39 }
 0x436   : > { %v10308_v37 = vpop.permute.xlu1 %4861  ;;  %4737 = vrot.lane.b32.xlu0 %v10104_v28, %s5632_s22 }
 0x437   : > { %12485 = vst [vmem:[#allocation30_spill] sm:$0xff] %v10308_v37  ;;  %v4393_v37 = vsel %vm4319_vm2, %v4336_v25, 0.0  ;;  %v4560_v25 = vrot.slane %v9991_v32, 2 }
 0x438   : > { %v10312_v2 = vpop.permute.xlu0 %4474  ;;  %4739 = vrot.lane.b32.xlu1 %v10107_v10, %s5632_s22  ;;  %v4458_v47 = vrot.slane %v4393_v37, 1 }
 0x43a   : > { %v10316_v46 = vpop.permute.xlu1 %4476  ;;  %4782 = vrot.lane.b32.xlu0 %v10287_v57, %s5633_s23 }
 0x43c   : > { %v10320_v27 = vpop.permute.xlu0 %4498  ;;  %4784 = vrot.lane.b32.xlu1 %v10294_v53, %s5633_s23 }
 0x43e   : > { %v10324_v49 = vpop.permute.xlu1 %4500  ;;  %4806 = vrot.lane.b32.xlu0 %v10110_v0, %s5633_s23 }
 0x440   : > { %v10328_v62 = vpop.permute.xlu0 %4578  ;;  %4808 = vrot.lane.b32.xlu1 %v10113_v52, %s5633_s23 }
 0x442   : > { %v10337_v41 = vpop.permute.xlu1 %4580  ;;  %4655 = vrot.lane.b32.xlu0 %v10335_v17, %s5628_s24 }
 0x444   : > { %v10341_v18 = vpop.permute.xlu0 %4602  ;;  %4657 = vrot.lane.b32.xlu1 %v9991_v32, %s5628_s24 }
 0x446   : > { %v10345_v6 = vpop.permute.xlu1 %4604  ;;  %4855 = vrot.lane.b32.xlu0 %v10335_v17, %s5629_s16 }
 0x448   : > { %v10349_v54 = vpop.permute.xlu0 %4709  ;;  %4857 = vrot.lane.b32.xlu1 %v9991_v32, %s5629_s16 }
 0x449   : > { %12486 = vst [vmem:[#allocation186_spill] sm:$0xff] %v10349_v54  ;;  %v4559_v54 = vrot.slane %v10335_v17, 2 }
 0x44a   : > { %v10358_v59 = vpop.permute.xlu1 %4711  ;;  %4651 = vrot.lane.b32.xlu0 %v10356_v56, %s5628_s24 }
 0x44b   : > { %12487 = vst [vmem:[#allocation169_spill] sm:$0xff] %v10358_v59  ;;  %v4562_v59 = vrot.slane %v4393_v37, 2 }
 0x44c   : > { %v10365_v39 = vpop.permute.xlu0 %4733  ;;  %4653 = vrot.lane.b32.xlu1 %v9998_v29, %s5628_s24  ;;  %s346_s24 = sadd.s32 %s5395_s15, %s5394_s13 }
 0x44d   : > { %12488 = vst [vmem:[#allocation226_spill] sm:$0xff] %v10365_v39 }
 0x44e   : > { %v10370_v61 = vpop.permute.xlu1 %4735  ;;  %4851 = vrot.lane.b32.xlu0 %v10356_v56, %s5629_s16 }
 0x44f   : > { %12489 = vst [vmem:[#allocation49_spill] sm:$0xff] %v10370_v61  ;;  %v4459_v61 = vsel %vm922_vm0, %v4456_v40, %v4458_v47 }
 0x450   : > { %v10375_v12 = vpop.permute.xlu0 %4778  ;;  %4853 = vrot.lane.b32.xlu1 %v9998_v29, %s5629_s16  ;;  %s5396_s16 = sshll.u32 %s346_s24, 3 }
 0x451   : > { %12490 = vst [vmem:[#allocation231_spill] sm:$0xff] %v10375_v12  ;;  %v10393_v12 = vsel %vm1465_vm1, %v4559_v54, %v4560_v25  ;;  %v12494_v54 = vrot.slane %v9982_v45, 7  ;;  %s10815_s20 = scalar_lea.vmem %s10940_s0, %s5396_s16 }
 0x452   : > { %v10383_v19 = vpop.permute.xlu1 %4780  ;;  %4490 = vrot.lane.b32.xlu0 %v10380_v60, %s5630_s19 }
 0x453   : > { %12491 = vst [vmem:[#allocation75_spill] sm:$0xff] %v10383_v19  ;;  %v10400_v19 = vsel %vm1465_vm1, %v4560_v25, %v4562_v59  ;;  %v4392_v47 = vsel %vm4319_vm2, %v12494_v54, 0.0  ;;  %v4451_v59 = vrot.slane %v9998_v29, 1  ;;  %v4555_v54 = vrot.slane %v9998_v29, 2 }
 0x454   : > { %v10389_v39 = vpop.permute.xlu0 %4802  ;;  %4492 = vrot.lane.b32.xlu1 %v4459_v61, %s5630_s19  ;;  %v4557_v55 = vrot.slane %v4392_v47, 2 }
 0x455   : > { %12492 = vst [vmem:[#allocation215_spill] sm:$0xff] %v10389_v39  ;;  %v4453_v39 = vrot.slane %v4392_v47, 1  ;;  %v4452_v45 = vsel %vm922_vm0, %v4450_v3, %v4451_v59 }
 0x456   : > { %v10395_v24 = vpop.permute.xlu1 %4804  ;;  %4594 = vrot.lane.b32.xlu0 %v10393_v12, %s5631_s21  ;;  %v10444_v3 = vsel %vm1465_vm1, %v4555_v54, %v4557_v55 }
 0x457   : > { %12493 = vst [vmem:[#allocation95_spill] sm:$0xff] %v10395_v24  ;;  %v4454_v21 = vsel %vm922_vm0, %v4451_v59, %v4453_v39 }
 0x458   : > { %v10402_v37 = vpop.permute.xlu0 %4494  ;;  %4596 = vrot.lane.b32.xlu1 %v10400_v19, %s5631_s21 }
 0x45a   : > { %v10406_v40 = vpop.permute.xlu1 %4496  ;;  %4725 = vrot.lane.b32.xlu0 %v10380_v60, %s5632_s22 }
 0x45c   : > { %v10413_v24 = vpop.permute.xlu0 %4598  ;;  %4727 = vrot.lane.b32.xlu1 %v4459_v61, %s5632_s22 }
 0x45d   : > { %12495 = vst [vmem:[#allocation31_spill] sm:$0xff] %v10413_v24 }
 0x45e   : > { %v10417_v25 = vpop.permute.xlu1 %4600  ;;  %4794 = vrot.lane.b32.xlu0 %v10393_v12, %s5633_s23 }
 0x45f   : > { %12496 = vst [vmem:[#allocation211_spill] sm:$0xff] %v10417_v25  ;;  %v4554_v25 = vrot.slane %v10356_v56, 2 }
 0x460   : > { %v10422_v43 = vpop.permute.xlu0 %4729  ;;  %4796 = vrot.lane.b32.xlu1 %v10400_v19, %s5633_s23 }
 0x461   : > { %12497 = vst [vmem:[#allocation9_spill] sm:$0xff] %v10422_v43  ;;  %v10437_v43 = vsel %vm1465_vm1, %v4554_v25, %v4555_v54 }
 0x462   : > { %v10428_v30 = vpop.permute.xlu1 %4731  ;;  %4486 = vrot.lane.b32.xlu0 %v4452_v45, %s5630_s19 }
 0x463   : > { %12498 = vst [vmem:[#allocation216_spill] sm:$0xff] %v10428_v30 }
 0x464   : > { %v10433_v11 = vpop.permute.xlu0 %4798  ;;  %4488 = vrot.lane.b32.xlu1 %v4454_v21, %s5630_s19 }
 0x465   : > { %12499 = vst [vmem:[#allocation133_spill] sm:$0xff] %v10433_v11 }
 0x466   : > { %v10439_v24 = vpop.permute.xlu1 %4800  ;;  %4590 = vrot.lane.b32.xlu0 %v10437_v43, %s5631_s21 }
 0x467   : > { %12500 = vst [vmem:[#allocation214_spill] sm:$0xff] %v10439_v24 }
 0x468   : > { %4592 = vrot.lane.b32.xlu1 %v10444_v3, %s5631_s21  ;;  %v10448_v39 = vpop.permute.xlu0 %4470 }
 0x46a   : > { %v10450_v47 = vpop.permute.xlu1 %4472  ;;  %4721 = vrot.lane.b32.xlu0 %v4452_v45, %s5632_s22 }
 0x46c   : > { %4723 = vrot.lane.b32.xlu1 %v4454_v21, %s5632_s22  ;;  %v10454_v59 = vpop.permute.xlu0 %4574 }
 0x46d   : > { %12501 = vst [vmem:[#allocation189_spill] sm:$0xff] %v10454_v59 }
 0x46e   : > { %v10456_v25 = vpop.permute.xlu1 %4576  ;;  %4790 = vrot.lane.b32.xlu0 %v10437_v43, %s5633_s23 }
 0x46f   : > { %12502 = vst [vmem:[#allocation182_spill] sm:$0xff] %v10456_v25 }
 0x470   : > { %4792 = vrot.lane.b32.xlu1 %v10444_v3, %s5633_s23  ;;  %v10462_v55 = vpop.permute.xlu0 %4647  ;;  %s362_s23 = scalar_lea.vmem %s10942_s2, %s5398_s17 }
 0x472   : > { %v10464_v54 = vpop.permute.xlu1 %4649  ;;  %4913 = vrot.lane.b32.xlu0 %v10271_v20, %s5634_s8 }
 0x474   : > { %4915 = vrot.lane.b32.xlu1 %v10279_v7, %s5634_s8  ;;  %v10470_v24 = vpop.permute.xlu0 %4847 }
 0x475   : > { %12503 = vst [vmem:[#allocation217_spill] sm:$0xff] %v10470_v24  ;;  %v4908_v24 = vrot.slane %v10221_v38, 1 }
 0x476   : > { %v10472_v11 = vpop.permute.xlu1 %4849  ;;  %4917 = vrot.lane.b32.xlu0 %v10230_v22, %s5634_s8 }
 0x477   : > { %12504 = vst [vmem:[#allocation220_spill] sm:$0xff] %v10472_v11 }
 0x478   : > { %4919 = vrot.lane.b32.xlu1 %v10236_v14, %s5634_s8  ;;  %v10478_v30 = vpop.permute.xlu0 %4643 }
 0x47a   : > { %v10480_v25 = vpop.permute.xlu1 %4645  ;;  %4921 = vrot.lane.b32.xlu0 %v4452_v45, %s5634_s8 }
 0x47c   : > { %4923 = vrot.lane.b32.xlu1 %v4454_v21, %s5634_s8  ;;  %v10484_v20 = vpop.permute.xlu0 %4667 }
 0x47e   : > { %v10486_v7 = vpop.permute.xlu1 %4669  ;;  %4925 = vrot.lane.b32.xlu0 %v10380_v60, %s5634_s8  ;;  %v12509_v60 = vrot.slane %v10070_v63, 7 }
 0x480   : > { %4927 = vrot.lane.b32.xlu1 %v4459_v61, %s5634_s8  ;;  %v10491_v22 = vpop.permute.xlu0 %4843  ;;  %v10508_v61 = vsel %vm4319_vm2, %v12509_v60, 0.0 }
 0x481   : > { %12505 = vst [vmem:[#allocation241_spill] sm:$0xff] %v10491_v22 }
 0x482   : > { %v10493_v14 = vpop.permute.xlu1 %4845  ;;  %4929 = vrot.lane.b32.xlu0 %v10132_v4, %s5634_s8  ;;  %v4909_v4 = vrot.slane %v10100_v9, 1 }
 0x483   : > { %12506 = vst [vmem:[#allocation221_spill] sm:$0xff] %v10493_v14 }
 0x484   : > { %4931 = vrot.lane.b32.xlu1 %v10138_v36, %s5634_s8  ;;  %v10499_v21 = vpop.permute.xlu0 %4867  ;;  %v4910_v60 = vsel %vm922_vm0, %v4908_v24, %v4909_v4 }
 0x485   : > { %12507 = vst [vmem:[#allocation26_spill] sm:$0xff] %v10499_v21 }
 0x486   : > { %v10501_v45 = vpop.permute.xlu1 %4869  ;;  %4933 = vrot.lane.b32.xlu0 %v10052_v31, %s5634_s8  ;;  %v4911_v31 = vrot.slane %v10508_v61, 1 }
 0x487   : > { %12508 = vst [vmem:[#allocation58_spill] sm:$0xff] %v10501_v45 }
 0x488   : > { %4935 = vrot.lane.b32.xlu1 %v10058_v26, %s5634_s8  ;;  %v10512_v11 = vpop.permute.xlu0 %4871  ;;  %v4912_v45 = vsel %vm922_vm0, %v4909_v4, %v4911_v31 }
 0x48a   : > { %v10515_v36 = vpop.permute.xlu1 %4873  ;;  %4937 = vrot.lane.b32.xlu0 %v10104_v28, %s5634_s8 }
 0x48c   : > { %4939 = vrot.lane.b32.xlu1 %v10107_v10, %s5634_s8  ;;  %v4483_v63 = vpop.permute.xlu0 %4482 }
 0x48d   : > { %v4524_v14 = vadd.f32 %v4483_v63, %v10184_v48 }
 0x48e   : > { %v4485_v26 = vpop.permute.xlu1 %4484  ;;  %4941 = vrot.lane.b32.xlu0 %v4910_v60, %s5634_s8 }
 0x48f   : > { %v4525_v22 = vadd.f32 %v4485_v26, %v9965_v51 }
 0x490   : > { %4943 = vrot.lane.b32.xlu1 %v4912_v45, %s5634_s8  ;;  %v4587_v28 = vpop.permute.xlu0 %4586  ;;  %s10844_s8 = scalar_lea.vmem %s10947_s7, %s5396_s16 }
 0x491   : > { %v10529_v21 = vadd.f32 %v4587_v28, %v4524_v14 }
 0x492   : > { %v4589_v59 = vpop.permute.xlu1 %4588  ;;  %4982 = vrot.lane.b32.xlu0 %v10287_v57, %s5635_s9 }
 0x493   : > { %v10533_v10 = vadd.f32 %v4589_v59, %v4525_v22 }
 0x494   : > { %4984 = vrot.lane.b32.xlu1 %v10294_v53, %s5635_s9  ;;  %v4718_v48 = vpop.permute.xlu0 %4717 }
 0x496   : > { %v4720_v24 = vpop.permute.xlu1 %4719  ;;  %4986 = vrot.lane.b32.xlu0 %v10242_v8, %s5635_s9 }
 0x498   : > { %4988 = vrot.lane.b32.xlu1 %v10247_v58, %s5635_s9  ;;  %v4787_v51 = vpop.permute.xlu0 %4786 }
 0x49a   : > { %v4789_v14 = vpop.permute.xlu1 %4788  ;;  %4990 = vrot.lane.b32.xlu0 %v10437_v43, %s5635_s9 }
 0x49c   : > { %4992 = vrot.lane.b32.xlu1 %v10444_v3, %s5635_s9  ;;  %v4479_v57 = vpop.permute.xlu0 %4478 }
 0x49d   : > { %v4522_v53 = vadd.f32 %v4479_v57, %v10197_v34  ;;  %v4520_v34 = vadd.f32 %v10312_v2, %v9928_v23  ;;  %v4532_v2 = vadd.f32 %v10320_v27, %v10001_v50 }
 0x49e   : > { %v4481_v59 = vpop.permute.xlu1 %4480  ;;  %4994 = vrot.lane.b32.xlu0 %v10393_v12, %s5635_s9 }
 0x49f   : > { %v4523_v58 = vadd.f32 %v4481_v59, %v9972_v33  ;;  %v4521_v33 = vadd.f32 %v10316_v46, %v9935_v1  ;;  %v4977_v1 = vrot.slane %v10221_v38, 2  ;;  %v4980_v46 = vrot.slane %v10508_v61, 2 }
 0x4a0   : > { %4996 = vrot.lane.b32.xlu1 %v10400_v19, %s5635_s9  ;;  %v4583_v8 = vpop.permute.xlu0 %4582 }
 0x4a1   : > { %v4626_v22 = vadd.f32 %v4583_v8, %v4522_v53 }
 0x4a2   : > { %v4585_v45 = vpop.permute.xlu1 %4584  ;;  %4998 = vrot.lane.b32.xlu0 %v10144_v16, %s5635_s9  ;;  %v4624_v16 = vadd.f32 %v10328_v62, %v4520_v34 }
 0x4a3   : > { %v4691_v43 = vadd.f32 %v10462_v55, %v4626_v22  ;;  %v4627_v3 = vadd.f32 %v4585_v45, %v4523_v58 }
 0x4a4   : > { %5000 = vrot.lane.b32.xlu1 %v10149_v44, %s5635_s9  ;;  %v4714_v12 = vpop.permute.xlu0 %4713  ;;  %v4978_v44 = vrot.slane %v10100_v9, 2  ;;  %v4636_v9 = vadd.f32 %v10341_v18, %v4532_v2 }
 0x4a5   : > { %v4692_v19 = vadd.f32 %v10464_v54, %v4627_v3  ;;  %v4761_v4 = vadd.f32 %v4718_v48, %v4691_v43  ;;  %v4625_v54 = vadd.f32 %v10337_v41, %v4521_v33 }
 0x4a6   : > { %v4716_v31 = vpop.permute.xlu1 %4715  ;;  %5002 = vrot.lane.b32.xlu0 %v10073_v42, %s5635_s9  ;;  %v4689_v42 = vadd.f32 %v10478_v30, %v4624_v16  ;;  %v4979_v38 = vsel %vm1465_vm1, %v4977_v1, %v4978_v44  ;;  %v4701_v61 = vadd.f32 %v10484_v20, %v4636_v9 }
 0x4a7   : > { %v4830_v55 = vadd.f32 %v4787_v51, %v4761_v4  ;;  %v4762_v63 = vadd.f32 %v4720_v24, %v4692_v19  ;;  %v4690_v50 = vadd.f32 %v10480_v25, %v4625_v54 }
 0x4a8   : > { %5004 = vrot.lane.b32.xlu1 %v10082_v13, %s5635_s9  ;;  %v4738_v23 = vpop.permute.xlu0 %4737  ;;  %v4533_v13 = vadd.f32 %v10324_v49, %v10009_v15  ;;  %v4759_v27 = vadd.f32 %v4714_v12, %v4689_v42 }
 0x4a9   : > { %v4831_v60 = vadd.f32 %v4789_v14, %v4762_v63  ;;  %v4760_v26 = vadd.f32 %v4716_v31, %v4690_v50  ;;  %v4771_v49 = vadd.f32 %v4738_v23, %v4701_v61 }
 0x4aa   : > { %v4740_v62 = vpop.permute.xlu1 %4739  ;;  %5006 = vrot.lane.b32.xlu0 %v10110_v0, %s5635_s9  ;;  %v4637_v41 = vadd.f32 %v10345_v6, %v4533_v13 }
 0x4ac   : > { %5008 = vrot.lane.b32.xlu1 %v10113_v52, %s5635_s9  ;;  %v4783_v30 = vpop.permute.xlu0 %4782  ;;  %v4702_v15 = vadd.f32 %v10486_v7, %v4637_v41  ;;  %v4981_v52 = vsel %vm1465_vm1, %v4978_v44, %v4980_v46 }
 0x4ad   : > { %v10584_v0 = vadd.f32 %v4783_v30, %v4759_v27 }
 0x4ae   : > { %v4785_v28 = vpop.permute.xlu1 %4784  ;;  %5010 = vrot.lane.b32.xlu0 %v4979_v38, %s5635_s9  ;;  %v4772_v48 = vadd.f32 %v4740_v62, %v4702_v15 }
 0x4af   : > { %v10588_v18 = vadd.f32 %v4785_v28, %v4760_v26 }
 0x4b0   : > { %5012 = vrot.lane.b32.xlu1 %v4981_v52, %s5635_s9  ;;  %v4807_v25 = vpop.permute.xlu0 %4806 }
 0x4b1   : > { %v4840_v6 = vadd.f32 %v4807_v25, %v4771_v49 }
 0x4b2   : > { %v4809_v24 = vpop.permute.xlu1 %4808 }
 0x4b3   : > { %v4841_v20 = vadd.f32 %v4809_v24, %v4772_v48  ;;  %v10593_v51 = vadd.f32 %v10512_v11, %v4840_v6 }
 0x4b4   : > { %v4656_v14 = vpop.permute.xlu0 %4655 }
 0x4b5   : > { %v10596_v57 = vadd.f32 %v10515_v36, %v4841_v20 }
 0x4b6   : > { %v4658_v7 = vpop.permute.xlu1 %4657 }
 0x4b8   : > { %v4856_v59 = vpop.permute.xlu0 %4855 }
 0x4ba   : > { %v4858_v53 = vpop.permute.xlu1 %4857 }
 0x4bc   : > { %v4652_v8 = vpop.permute.xlu0 %4651 }
 0x4bd   : > { %v4693_v58 = vadd.f32 %v4652_v8, %v10529_v21 }
 0x4be   : > { %v4654_v22 = vpop.permute.xlu1 %4653 }
 0x4bf   : > { %v4694_v45 = vadd.f32 %v4654_v22, %v10533_v10 }
 0x4c0   : > { %v4852_v43 = vpop.permute.xlu0 %4851 }
 0x4c1   : > { %v10600_v3 = vadd.f32 %v4852_v43, %v4830_v55 }
 0x4c2   : > { %v4854_v12 = vpop.permute.xlu1 %4853 }
 0x4c3   : > { %v10602_v34 = vadd.f32 %v4854_v12, %v4831_v60 }
 0x4c4   : > { %v4491_v11 = vpop.permute.xlu0 %4490 }
 0x4c5   : > { %v4528_v36 = vadd.f32 %v4491_v11, %v10335_v17 }
 0x4c6   : > { %v4493_v19 = vpop.permute.xlu1 %4492 }
 0x4c7   : > { %v4529_v31 = vadd.f32 %v4493_v19, %v9991_v32 }
 0x4c8   : > { %v4595_v4 = vpop.permute.xlu0 %4594 }
 0x4c9   : > { %v10606_v33 = vadd.f32 %v4595_v4, %v4528_v36  ;;  %v4530_v4 = vadd.f32 %v10402_v37, %v10023_v5  ;;  %v12516_v37 = vld [vmem:[#allocation182_spill] sm:$0xff] }
 0x4ca   : > { %v4597_v16 = vpop.permute.xlu1 %4596 }
 0x4cb   : > { %v10608_v21 = vadd.f32 %v4597_v16, %v4529_v31  ;;  %v4531_v16 = vadd.f32 %v10406_v40, %v10014_v35  ;;  %v12517_v35 = vld [vmem:[#allocation206_spill] sm:$0xff] }
 0x4cc   : > { %v4726_v63 = vpop.permute.xlu0 %4725 }
 0x4ce   : > { %v4728_v10 = vpop.permute.xlu1 %4727 }
 0x4d0   : > { %v4795_v44 = vpop.permute.xlu0 %4794 }
 0x4d2   : > { %v4797_v55 = vpop.permute.xlu1 %4796 }
 0x4d4   : > { %v4487_v23 = vpop.permute.xlu0 %4486 }
 0x4d5   : > { %v4526_v54 = vadd.f32 %v4487_v23, %v10356_v56 }
 0x4d6   : > { %v4489_v2 = vpop.permute.xlu1 %4488 }
 0x4d7   : > { %v4527_v60 = vadd.f32 %v4489_v2, %v9998_v29  ;;  %v12512_v2 = vld [vmem:[#allocation211_spill] sm:$0xff] }
 0x4d8   : > { %v4591_v42 = vpop.permute.xlu0 %4590 }
 0x4d9   : > { %v4630_v17 = vadd.f32 %v4591_v42, %v4526_v54  ;;  %v4635_v54 = vadd.f32 %v12512_v2, %v4531_v16  ;;  %v12513_v42 = vld [vmem:[#allocation153_spill] sm:$0xff] }
 0x4da   : > { %v4593_v1 = vpop.permute.xlu1 %4592 }
 0x4db   : > { %v4695_v46 = vadd.f32 %v4656_v14, %v4630_v17  ;;  %v4631_v32 = vadd.f32 %v4593_v1, %v4527_v60  ;;  %v4519_v60 = vadd.f32 %v10450_v47, %v12513_v42  ;;  %v12514_v17 = vld [vmem:[#allocation189_spill] sm:$0xff]  ;;  %v4700_v40 = vadd.f32 %v12517_v35, %v4635_v54  ;;  %v12525_v54 = vld [vmem:[#allocation231_spill] sm:$0xff] }
 0x4dc   : > { %v4722_v62 = vpop.permute.xlu0 %4721  ;;  %v12529_v35 = vld [vmem:[#allocation75_spill] sm:$0xff] }
 0x4dd   : > { %v4765_v13 = vadd.f32 %v4726_v63, %v4695_v46  ;;  %v4696_v9 = vadd.f32 %v4658_v7, %v4631_v32  ;;  %v4763_v50 = vadd.f32 %v4722_v62, %v4693_v58  ;;  %v12510_v63 = vld [vmem:[#allocation31_spill] sm:$0xff]  ;;  %v4623_v62 = vadd.f32 %v12516_v37, %v4519_v60  ;;  %v12526_v60 = vld [vmem:[#allocation26_spill] sm:$0xff]  ;;  %v12528_v37 = vld [vmem:[#allocation241_spill] sm:$0xff] }
 0x4de   : > { %v4724_v27 = vpop.permute.xlu1 %4723  ;;  %v12515_v32 = vld [vmem:[#allocation7_spill] sm:$0xff] }
 0x4df   : > { %v4766_v30 = vadd.f32 %v4728_v10, %v4696_v9  ;;  %v4764_v38 = vadd.f32 %v4724_v27, %v4694_v45  ;;  %v10612_v41 = vadd.f32 %v4795_v44, %v4765_v13  ;;  %v4634_v10 = vadd.f32 %v12510_v63, %v4530_v4  ;;  %v12511_v44 = vld [vmem:[#allocation151_spill] sm:$0xff]  ;;  %v12518_v9 = vld [vmem:[#allocation45_spill] sm:$0xff]  ;;  %v12519_v27 = vld [vmem:[#allocation6_spill] sm:$0xff] }
 0x4e0   : > { %v4791_v61 = vpop.permute.xlu0 %4790  ;;  %v12523_v63 = vld [vmem:[#allocation169_spill] sm:$0xff] }
 0x4e1   : > { %v4832_v26 = vadd.f32 %v4791_v61, %v4763_v50  ;;  %v10614_v28 = vadd.f32 %v4797_v55, %v4766_v30  ;;  %v4518_v55 = vadd.f32 %v10448_v39, %v12511_v44  ;;  %v4699_v5 = vadd.f32 %v12515_v32, %v4634_v10  ;;  %v12524_v44 = vld [vmem:[#allocation215_spill] sm:$0xff] }
 0x4e2   : > { %v4793_v56 = vpop.permute.xlu1 %4792  ;;  %v4688_v30 = vadd.f32 %v12519_v27, %v4623_v62 }
 0x4e3   : > { %v4833_v15 = vadd.f32 %v4793_v56, %v4764_v38  ;;  %v10616_v29 = vadd.f32 %v4856_v59, %v4832_v26  ;;  %v4622_v1 = vadd.f32 %v12514_v17, %v4518_v55  ;;  %v12520_v38 = vld [vmem:[#allocation226_spill] sm:$0xff] }
 0x4e4   : > { %v4914_v49 = vpop.permute.xlu0 %4913  ;;  %v4769_v61 = vadd.f32 %v12520_v38, %v4699_v5  ;;  %v12521_v26 = vld [vmem:[#allocation186_spill] sm:$0xff]  ;;  %v4758_v10 = vadd.f32 %v12523_v63, %v4688_v30  ;;  %v12531_v30 = vld [vmem:[#allocation221_spill] sm:$0xff] }
 0x4e5   : > { %v10618_v52 = vadd.f32 %v4858_v53, %v4833_v15  ;;  %v4687_v50 = vadd.f32 %v12518_v9, %v4622_v1  ;;  %v12522_v15 = vld [vmem:[#allocation49_spill] sm:$0xff]  ;;  %v12527_v1 = vld [vmem:[#allocation95_spill] sm:$0xff] }
 0x4e6   : > { %v4916_v25 = vpop.permute.xlu1 %4915  ;;  %v4770_v4 = vadd.f32 %v12522_v15, %v4700_v40  ;;  %v4838_v55 = vadd.f32 %v12524_v44, %v4769_v61  ;;  %v4827_v9 = vadd.f32 %v12529_v35, %v4758_v10  ;;  %v12530_v40 = vld [vmem:[#allocation58_spill] sm:$0xff] }
 0x4e7   : > { %v4757_v56 = vadd.f32 %v12521_v26, %v4687_v50 }
 0x4e8   : > { %v10620_v48 = vpop.permute.xlu0 %4917  ;;  %v4903_v17 = vadd.f32 %v12526_v60, %v4838_v55  ;;  %v4839_v32 = vadd.f32 %v12527_v1, %v4770_v4  ;;  %v4892_v26 = vadd.f32 %v12531_v30, %v4827_v9  ;;  %v12533_v4 = vld [vmem:[#allocation217_spill] sm:$0xff] }
 0x4e9   : > { %v4826_v42 = vadd.f32 %v12525_v54, %v4757_v56  ;;  %v12532_v56 = vld [vmem:[#allocation23_spill] sm:$0xff]  ;;  %v4893_v55 = vadd.f32 %v12533_v4, %v10584_v0  ;;  %v10689_v54 = vld [vmem:[%s10946_s6] ss:$0 sm:$0xff] }
 0x4ea   : > { %v10622_v6 = vpop.permute.xlu1 %4919  ;;  %v4904_v50 = vadd.f32 %v12530_v40, %v4839_v32  ;;  %v4697_v44 = vadd.f32 %v12532_v56, %v10606_v33  ;;  %v12535_v33 = vld [vmem:[#allocation155_spill] sm:$0xff] }
 0x4eb   : > { %v4891_v62 = vadd.f32 %v12528_v37, %v4826_v42  ;;  %v4962_v42 = vadd.f32 %v4916_v25, %v4892_v26  ;;  %v4698_v1 = vadd.f32 %v12535_v33, %v10608_v21  ;;  %v4963_v0 = vadd.f32 %v10620_v48, %v4893_v55  ;;  %v12536_v25 = vld [vmem:[#allocation9_spill] sm:$0xff]  ;;  %v12537_v21 = vld [vmem:[#allocation216_spill] sm:$0xff]  ;;  %v12543_v55 = vld [vmem:[#allocation30_spill] sm:$0xff] }
 0x4ec   : > { %v10624_v24 = vpop.permute.xlu0 %4921 }
 0x4ed   : > { %v4961_v61 = vadd.f32 %v4914_v49, %v4891_v62  ;;  %v4768_v48 = vadd.f32 %v12537_v21, %v4698_v1  ;;  %v5069_v1 = vld [vmem:[%s10815_s20] sm:$0xff]  ;;  %v5071_v21 = vld [vmem:[%s10815_s20 + $0x10] sm:$0xff] }
 0x4ee   : > { %v10626_v20 = vpop.permute.xlu1 %4923 }
 0x4f0   : > { %v10628_v14 = vpop.permute.xlu0 %4925 }
 0x4f2   : > { %v10630_v7 = vpop.permute.xlu1 %4927 }
 0x4f4   : > { %v10632_v8 = vpop.permute.xlu0 %4929 }
 0x4f6   : > { %v10634_v59 = vpop.permute.xlu1 %4931 }
 0x4f8   : > { %v10636_v58 = vpop.permute.xlu0 %4933 }
 0x4fa   : > { %v10638_v53 = vpop.permute.xlu1 %4935 }
 0x4fc   : > { %v4938_v22 = vpop.permute.xlu0 %4937 }
 0x4fd   : > { %v4973_v27 = vadd.f32 %v4938_v22, %v4903_v17 }
 0x4fe   : > { %v4940_v45 = vpop.permute.xlu1 %4939 }
 0x4ff   : > { %v4974_v15 = vadd.f32 %v4940_v45, %v4904_v50  ;;  %v12534_v45 = vld [vmem:[#allocation220_spill] sm:$0xff]  ;;  %v12538_v50 = vld [vmem:[#allocation133_spill] sm:$0xff] }
 0x500   : > { %v10640_v43 = vpop.permute.xlu0 %4941  ;;  %v4894_v17 = vadd.f32 %v12534_v45, %v10588_v18 }
 0x502   : > { %v10642_v12 = vpop.permute.xlu1 %4943  ;;  %v4964_v62 = vadd.f32 %v10622_v6, %v4894_v17  ;;  %v4966_v6 = vadd.f32 %v10626_v20, %v10602_v34  ;;  %v4968_v34 = vadd.f32 %v10630_v7, %v10618_v52  ;;  %v12540_v20 = vld [vmem:[#allocation22_spill] sm:$0xff]  ;;  %v12542_v52 = vld [vmem:[#allocation236_spill] sm:$0xff]  ;;  %v5082_v17 = vld [vmem:[%s10815_s20 + $0x68] sm:$0xff] }
 0x503   : > { %v4899_v7 = vadd.f32 %v12542_v52, %v10612_v41 }
 0x504   : > { %v4983_v11 = vpop.permute.xlu0 %4982 }
 0x505   : > { %v5030_v22 = vadd.f32 %v4983_v11, %v4961_v61  ;;  %v4767_v11 = vadd.f32 %v12536_v25, %v4697_v44  ;;  %v5070_v25 = vld [vmem:[%s10815_s20 + $0x8] sm:$0xff] }
 0x506   : > { %v4985_v19 = vpop.permute.xlu1 %4984 }
 0x507   : > { %v5031_v32 = vadd.f32 %v4985_v19, %v4962_v42  ;;  %v10707_v35 = vadd.f32 %v10689_v54, %v5030_v22  ;;  %v4965_v19 = vadd.f32 %v10624_v24, %v10600_v3  ;;  %v4967_v3 = vadd.f32 %v10628_v14, %v10616_v29  ;;  %v12539_v24 = vld [vmem:[#allocation214_spill] sm:$0xff]  ;;  %v12541_v14 = vld [vmem:[#allocation113_spill] sm:$0xff] }
 0x508   : > { %v4987_v36 = vpop.permute.xlu0 %4986 }
 0x509   : > { %v5032_v18 = vadd.f32 %v4987_v36, %v4963_v0  ;;  %v10715_v9 = vadd.f32 %v10689_v54, %v5031_v32  ;;  %v4836_v36 = vadd.f32 %v12538_v50, %v4767_v11  ;;  %v10827_v32 = vld [vmem:[%s362_s23 + $0x1] ss:$0 sm:$0xff] }
 0x50a   : > { %v4989_v31 = vpop.permute.xlu1 %4988 }
 0x50b   : > { %v5033_v40 = vadd.f32 %v4989_v31, %v4964_v62  ;;  %v4837_v31 = vadd.f32 %v12539_v24, %v4768_v48  ;;  %v5073_v24 = vld [vmem:[%s10815_s20 + $0x20] sm:$0xff] }
 0x50c   : > { %v4991_v23 = vpop.permute.xlu0 %4990 }
 0x50d   : > { %v10731_v30 = vadd.f32 %v10689_v54, %v5033_v40 }
 0x50e   : > { %v4993_v46 = vpop.permute.xlu1 %4992 }
 0x50f   : > { %v5035_v26 = vadd.f32 %v4993_v46, %v4966_v6  ;;  %v4902_v46 = vadd.f32 %v12541_v14, %v4837_v31  ;;  %v5072_v6 = vld [vmem:[%s10815_s20 + $0x18] sm:$0xff]  ;;  %v5130_v52 = vadd.f32 1.0, %v10731_v30 }
 0x510   : > { %v10657_v13 = vpop.permute.xlu0 %4994 }
 0x512   : > { %v10661_v39 = vpop.permute.xlu1 %4996 }
 0x513   : > { %v5037_v56 = vadd.f32 %v10661_v39, %v4968_v34  ;;  %v4900_v39 = vadd.f32 %v12543_v55, %v10614_v28  ;;  %v4975_v28 = vadd.f32 %v10640_v43, %v10593_v51 }
 0x514   : > { %v10665_v47 = vpop.permute.xlu0 %4998 }
 0x515   : > { %v4970_v41 = vadd.f32 %v10634_v59, %v4900_v39 }
 0x516   : > { %v10669_v16 = vpop.permute.xlu1 %5000 }
 0x517   : > { %v5039_v22 = vadd.f32 %v10669_v16, %v4970_v41 }
 0x518   : > { %v5003_v2 = vpop.permute.xlu0 %5002 }
 0x519   : > { %v10792_v51 = vadd.f32 %v10689_v54, %v5039_v22 }
 0x51a   : > { %v10676_v5 = vpop.permute.xlu1 %5004 }
 0x51c   : > { %v5007_v38 = vpop.permute.xlu0 %5006 }
 0x51d   : > { %v5042_v63 = vadd.f32 %v5007_v38, %v4973_v27  ;;  %v10723_v27 = vadd.f32 %v10689_v54, %v5032_v18  ;;  %v5034_v38 = vadd.f32 %v4991_v23, %v4965_v19  ;;  %v4901_v23 = vadd.f32 %v12540_v20, %v4836_v36 }
 0x51e   : > { %v5009_v10 = vpop.permute.xlu1 %5008  ;;  %v5127_v36 = vadd.f32 1.0, %v10707_v35 }
 0x51f   : > { %v10692_v60 = vadd.f32 %v10689_v54, %v5042_v63  ;;  %v5043_v49 = vadd.f32 %v5009_v10, %v4974_v15  ;;  %v10739_v61 = vadd.f32 %v10689_v54, %v5034_v38  ;;  %v5036_v15 = vadd.f32 %v10657_v13, %v4967_v3 }
 0x520   : > { %v4971_v29 = vadd.f32 %v10636_v58, %v4901_v23  ;;  %v10747_v63 = vadd.f32 %v10689_v54, %v5035_v26  ;;  %v4972_v13 = vadd.f32 %v10638_v53, %v4902_v46  ;;  %v4969_v58 = vadd.f32 %v10632_v8, %v4899_v7  ;;  %v5011_v8 = vpop.permute.xlu0 %5010  ;;  %v5075_v7 = vld [vmem:[%s10815_s20 + $0x30] sm:$0xff] }
 0x521   : > { %v10700_v37 = vadd.f32 %v10689_v54, %v5043_v49  ;;  %5199 = vrot.lane.b32.xlu0 %v10692_v60, %s5636_s12  ;;  %v10756_v44 = vadd.f32 %v10689_v54, %v5036_v15  ;;  %v10764_v10 = vadd.f32 %v10689_v54, %v5037_v56  ;;  %v5044_v45 = vadd.f32 %v5011_v8, %v4975_v28  ;;  %v5074_v15 = vld [vmem:[%s10815_s20 + $0x28] sm:$0xff] }
 0x522   : > { %v5040_v4 = vadd.f32 %v5003_v2, %v4971_v29  ;;  %v5041_v42 = vadd.f32 %v10676_v5, %v4972_v13  ;;  %v5038_v53 = vadd.f32 %v10665_v47, %v4969_v58  ;;  %v5013_v59 = vpop.permute.xlu1 %5012  ;;  %v4976_v47 = vadd.f32 %v10642_v12, %v10596_v57  ;;  %v5081_v12 = vld [vmem:[%s10815_s20 + $0x60] sm:$0xff] }
 0x523   : > { %5201 = vrot.lane.b32.xlu1 %v10700_v37, %s5636_s12  ;;  %v10797_v16 = vadd.f32 %v10689_v54, %v5044_v45  ;;  %v5139_v11 = vadd.f32 1.0, %v10692_v60  ;;  %v5140_v48 = vadd.f32 1.0, %v10700_v37  ;;  %v5128_v3 = vadd.f32 1.0, %v10715_v9 }
 0x524   : > { %v10772_v2 = vadd.f32 %v10689_v54, %v5040_v4  ;;  %v10780_v5 = vadd.f32 %v10689_v54, %v5041_v42  ;;  %v10787_v49 = vadd.f32 %v10689_v54, %v5038_v53  ;;  %v5045_v43 = vadd.f32 %v5013_v59, %v4976_v47  ;;  %v5076_v42 = vld [vmem:[%s10815_s20 + $0x38] sm:$0xff]  ;;  %v5079_v59 = vld [vmem:[%s10815_s20 + $0x50] sm:$0xff] }
 0x525   : > { %5175 = vrot.lane.b32.xlu0 %v10707_v35, %s5636_s12  ;;  %v5129_v23 = vadd.f32 1.0, %v10723_v27  ;;  %v5131_v39 = vadd.f32 1.0, %v10739_v61  ;;  %v5132_v22 = vadd.f32 1.0, %v10747_v63 }
 0x526   : > { %v10802_v57 = vadd.f32 %v10689_v54, %v5045_v43  ;;  %v10821_v54 = vld [vmem:[%s362_s23] ss:$0 sm:$0xff] }
 0x527   : > { %5177 = vrot.lane.b32.xlu1 %v10715_v9, %s5636_s12  ;;  %v5103_v33 = vsub.f32 %v5081_v12, %v10821_v54  ;;  %v5104_v0 = vsub.f32 %v5082_v17, %v10821_v54  ;;  %v5091_v18 = vsub.f32 %v5069_v1, %v10821_v54  ;;  %v5092_v40 = vsub.f32 %v5070_v25, %v10821_v54 }
 0x528   : > { %v5093_v60 = vsub.f32 %v5071_v21, %v10821_v54  ;;  %v5094_v34 = vsub.f32 %v5072_v6, %v10821_v54  ;;  %v5095_v46 = vsub.f32 %v5073_v24, %v10821_v54  ;;  %v5096_v58 = vsub.f32 %v5074_v15, %v10821_v54  ;;  %v5083_v24 = vld [vmem:[%s10815_s20 + $0x70] sm:$0xff] }
 0x529   : > { %5179 = vrot.lane.b32.xlu0 %v10723_v27, %s5636_s12  ;;  %v5123_v62 = vmul.f32 %v10827_v32, %v5103_v33  ;;  %v5124_v19 = vmul.f32 %v10827_v32, %v5104_v0  ;;  %v5111_v38 = vmul.f32 %v10827_v32, %v5091_v18  ;;  %v5112_v35 = vmul.f32 %v10827_v32, %v5092_v40  ;;  %v5080_v33 = vld [vmem:[%s10815_s20 + $0x58] sm:$0xff]  ;;  %v5077_v18 = vld [vmem:[%s10815_s20 + $0x40] sm:$0xff] }
 0x52a   : > { %v5113_v9 = vmul.f32 %v10827_v32, %v5093_v60  ;;  %v5114_v4 = vmul.f32 %v10827_v32, %v5094_v34  ;;  %v5115_v53 = vmul.f32 %v10827_v32, %v5095_v46  ;;  %v5097_v8 = vsub.f32 %v5075_v7, %v10821_v54 }
 0x52b   : > { %5181 = vrot.lane.b32.xlu1 %v10731_v30, %s5636_s12  ;;  %v5155_v50 = vmul.f32 %v5139_v11, %v5123_v62  ;;  %v5156_v26 = vmul.f32 %v5140_v48, %v5124_v19  ;;  %v5143_v14 = vmul.f32 %v5127_v36, %v5111_v38  ;;  %v5144_v13 = vmul.f32 %v5128_v3, %v5112_v35 }
 0x52c   : > { %v5145_v41 = vmul.f32 %v5129_v23, %v5113_v9  ;;  %v5146_v47 = vmul.f32 %v5130_v52, %v5114_v4  ;;  %v5116_v45 = vmul.f32 %v10827_v32, %v5096_v58  ;;  %v5098_v43 = vsub.f32 %v5076_v42, %v10821_v54  ;;  %v5084_v23 = vld [vmem:[%s10815_s20 + $0x78] sm:$0xff] }
 0x52d   : > { %5183 = vrot.lane.b32.xlu0 %v10739_v61, %s5636_s12  ;;  %v5133_v17 = vadd.f32 1.0, %v10756_v44  ;;  %v5147_v1 = vmul.f32 %v5131_v39, %v5115_v53  ;;  %v5117_v0 = vmul.f32 %v10827_v32, %v5097_v8  ;;  %v5101_v25 = vsub.f32 %v5079_v59, %v10821_v54 }
 0x52e   : > { %v5134_v62 = vadd.f32 1.0, %v10764_v10  ;;  %v5148_v21 = vmul.f32 %v5132_v22, %v5116_v45  ;;  %v5118_v48 = vmul.f32 %v10827_v32, %v5098_v43  ;;  %v5102_v19 = vsub.f32 %v5080_v33, %v10821_v54 }
 0x52f   : > { %5185 = vrot.lane.b32.xlu1 %v10747_v63, %s5636_s12  ;;  %v5137_v6 = vadd.f32 1.0, %v10772_v2  ;;  %v5149_v36 = vmul.f32 %v5133_v17, %v5117_v0  ;;  %v5121_v38 = vmul.f32 %v10827_v32, %v5101_v25  ;;  %v5099_v60 = vsub.f32 %v5077_v18, %v10821_v54 }
 0x530   : > { %v5138_v3 = vadd.f32 1.0, %v10780_v5  ;;  %v5136_v46 = vadd.f32 1.0, %v10792_v51  ;;  %v5106_v7 = vsub.f32 %v5084_v23, %v10821_v54  ;;  %v5141_v58 = vadd.f32 1.0, %v10797_v16 }
 0x531   : > { %5187 = vrot.lane.b32.xlu0 %v10756_v44, %s5636_s12 }
 0x533   : > { %5189 = vrot.lane.b32.xlu1 %v10764_v10, %s5636_s12 }
 0x535   : > { %5195 = vrot.lane.b32.xlu0 %v10772_v2, %s5636_s12  ;;  %v5150_v2 = vmul.f32 %v5134_v62, %v5118_v48 }
 0x537   : > { %5197 = vrot.lane.b32.xlu1 %v10780_v5, %s5636_s12  ;;  %v5119_v5 = vmul.f32 %v10827_v32, %v5099_v60 }
 0x539   : > { %5191 = vrot.lane.b32.xlu0 %v10787_v49, %s5636_s12 }
 0x53b   : > { %5193 = vrot.lane.b32.xlu1 %v10792_v51, %s5636_s12 }
 0x53d   : > { %5203 = vrot.lane.b32.xlu0 %v10797_v16, %s5636_s12 }
 0x53f   : > { %5205 = vrot.lane.b32.xlu1 %v10802_v57, %s5636_s12 }
 0x593   : > { %v5200_v37 = vpop.permute.xlu0 %5199 }
 0x594   : > { %v5235_v31 = vadd.f32 %v5200_v37, %v5155_v50  ;;  %v5078_v50 = vld [vmem:[%s10815_s20 + $0x48] sm:$0xff] }
 0x595   : > { %v5202_v20 = vpop.permute.xlu1 %5201  ;;  %v5100_v35 = vsub.f32 %v5078_v50, %v10821_v54 }
 0x596   : > { %5252 = vst.msk [vmem:[%s10844_s8 + $0x60] sm:$0xff] %vm5239_vm3, %v5235_v31  ;;  %v5236_v29 = vadd.f32 %v5202_v20, %v5156_v26  ;;  %v5122_v26 = vmul.f32 %v10827_v32, %v5102_v19  ;;  %v5135_v20 = vadd.f32 1.0, %v10787_v49 }
 0x597   : > { %v5176_v56 = vpop.permute.xlu0 %5175  ;;  %v5120_v49 = vmul.f32 %v10827_v32, %v5100_v35 }
 0x598   : > { %5253 = vst.msk [vmem:[%s10844_s8 + $0x68] sm:$0xff] %vm5239_vm3, %v5236_v29  ;;  %v5223_v27 = vadd.f32 %v5176_v56, %v5143_v14  ;;  %v5153_v29 = vmul.f32 %v5137_v6, %v5121_v38  ;;  %v5105_v14 = vsub.f32 %v5083_v24, %v10821_v54  ;;  %v5154_v52 = vmul.f32 %v5138_v3, %v5122_v26 }
 0x599   : > { %v5178_v55 = vpop.permute.xlu1 %5177  ;;  %v5151_v4 = vmul.f32 %v5135_v20, %v5119_v5  ;;  %v5152_v42 = vmul.f32 %v5136_v46, %v5120_v49  ;;  %v5126_v54 = vmul.f32 %v10827_v32, %v5106_v7 }
 0x59a   : > { %5240 = vst.msk [vmem:[%s10844_s8] sm:$0xff] %vm5239_vm3, %v5223_v27  ;;  %v5224_v30 = vadd.f32 %v5178_v55, %v5144_v13  ;;  %v5125_v55 = vmul.f32 %v10827_v32, %v5105_v14 }
 0x59b   : > { %v5180_v28 = vpop.permute.xlu0 %5179 }
 0x59c   : > { %5241 = vst.msk [vmem:[%s10844_s8 + $0x8] sm:$0xff] %vm5239_vm3, %v5224_v30  ;;  %v5225_v61 = vadd.f32 %v5180_v28, %v5145_v41  ;;  %v5142_v30 = vadd.f32 1.0, %v10802_v57  ;;  %v5157_v8 = vmul.f32 %v5141_v58, %v5125_v55 }
 0x59d   : > { %v5182_v12 = vpop.permute.xlu1 %5181 }
 0x59e   : > { %5242 = vst.msk [vmem:[%s10844_s8 + $0x10] sm:$0xff] %vm5239_vm3, %v5225_v61  ;;  %v5226_v63 = vadd.f32 %v5182_v12, %v5146_v47  ;;  %v5158_v22 = vmul.f32 %v5142_v30, %v5126_v54 }
 0x59f   : > { %v5184_v11 = vpop.permute.xlu0 %5183 }
 0x5a0   : > { %5243 = vst.msk [vmem:[%s10844_s8 + $0x18] sm:$0xff] %vm5239_vm3, %v5226_v63  ;;  %v5227_v44 = vadd.f32 %v5184_v11, %v5147_v1 }
 0x5a1   : > { %v5186_v40 = vpop.permute.xlu1 %5185 }
 0x5a2   : > { %5244 = vst.msk [vmem:[%s10844_s8 + $0x20] sm:$0xff] %vm5239_vm3, %v5227_v44  ;;  %v5228_v10 = vadd.f32 %v5186_v40, %v5148_v21 }
 0x5a3   : > { %v5188_v37 = vpop.permute.xlu0 %5187 }
 0x5a4   : > { %5245 = vst.msk [vmem:[%s10844_s8 + $0x28] sm:$0xff] %vm5239_vm3, %v5228_v10  ;;  %v5229_v31 = vadd.f32 %v5188_v37, %v5149_v36 }
 0x5a5   : > { %v5190_v34 = vpop.permute.xlu1 %5189 }
 0x5a6   : > { %5246 = vst.msk [vmem:[%s10844_s8 + $0x30] sm:$0xff] %vm5239_vm3, %v5229_v31  ;;  %v5230_v15 = vadd.f32 %v5190_v34, %v5150_v2 }
 0x5a7   : > { %v5196_v9 = vpop.permute.xlu0 %5195 }
 0x5a8   : > { %5247 = vst.msk [vmem:[%s10844_s8 + $0x38] sm:$0xff] %vm5239_vm3, %v5230_v15  ;;  %v5233_v56 = vadd.f32 %v5196_v9, %v5153_v29 }
 0x5a9   : > { %v5198_v27 = vpop.permute.xlu1 %5197 }
 0x5aa   : > { %5250 = vst.msk [vmem:[%s10844_s8 + $0x50] sm:$0xff] %vm5239_vm3, %v5233_v56  ;;  %v5234_v13 = vadd.f32 %v5198_v27, %v5154_v52 }
 0x5ab   : > { %v5192_v51 = vpop.permute.xlu0 %5191 }
 0x5ac   : > { %5251 = vst.msk [vmem:[%s10844_s8 + $0x58] sm:$0xff] %vm5239_vm3, %v5234_v13  ;;  %v5231_v39 = vadd.f32 %v5192_v51, %v5151_v4 }
 0x5ad   : > { %v5194_v41 = vpop.permute.xlu1 %5193 }
 0x5ae   : > { %5248 = vst.msk [vmem:[%s10844_s8 + $0x40] sm:$0xff] %vm5239_vm3, %v5231_v39  ;;  %v5232_v53 = vadd.f32 %v5194_v41, %v5152_v42 }
 0x5af   : > { %v5204_v28 = vpop.permute.xlu0 %5203 }
 0x5b0   : > { %5249 = vst.msk [vmem:[%s10844_s8 + $0x48] sm:$0xff] %vm5239_vm3, %v5232_v53  ;;  %v5237_v16 = vadd.f32 %v5204_v28, %v5157_v8 }
 0x5b1   : > { %v5206_v59 = vpop.permute.xlu1 %5205 }
 0x5b2   : > { %5254 = vst.msk [vmem:[%s10844_s8 + $0x70] sm:$0xff] %vm5239_vm3, %v5237_v16  ;;  %v5238_v61 = vadd.f32 %v5206_v59, %v5158_v22 }
 0x5b4   : > { %5255 = vst.msk [vmem:[%s10844_s8 + $0x78] sm:$0xff] %vm5239_vm3, %v5238_v61 }
 0x5b5 PF: > { %s17_s28 = sadd.s32 1, %s5623_s28   ;;  %s12544_s24 = smov %s5615_s26 }
 0x5b6   : > { %p14_p10 = scmp.ge.s32.totalorder %s17_s28, 6   ;;  %s12545_s25 = smov %s5619_s27 }
 0x5b7   : > { %s12546_s26 = smov %s12549_s29  ;;  %s12547_s27 = smov %s12553_s30 }
 0x5b8   :  { %16 = sbr.rel (!%p14_p10) target bundleno = 3 (0x3), region = 84 }

</bundles_post_ra>
